<compile_context>
chip_gen: v6e
topology: v6e:2x2x1
jax: 0.10.0
libtpu: 0.0.40
codegen_flags: <defaults>
</compile_context>

<pallas_src>
import functools
import math

import jax
import jax.numpy as jnp
from jax.experimental import pallas as pl
from jax.experimental.pallas import tpu as pltpu


# ------------------------------- small helpers ------------------------------ #

def _round_up(x, m):
    return (x + m - 1) // m * m


def _vmem_capacity_bytes():
    """Per-core VMEM capacity; conservative 64 MiB (v7x) fallback."""
    try:
        info = pltpu.get_tpu_info()
        for name in ("vmem_capacity_bytes", "vmem_bytes", "vmem_size_bytes"):
            v = getattr(info, name, None)
            if v:
                return int(v)
    except Exception:
        pass
    return 64 * 1024 * 1024


def _pick_block_m(n_rows, row_bytes, budget):
    """Largest multiple-of-8 divisor of n_rows whose double-buffered x tile fits budget."""
    if n_rows <= 8:
        return n_rows
    cap = 256
    while cap > 8 and 2 * cap * row_bytes > budget:
        cap //= 2
    best = 0
    for c in range(8, min(cap, n_rows) + 1, 8):
        if n_rows % c == 0:
            best = c
    return best if best else n_rows          # fall back to a single full-extent block


# ----------------------------- Pallas kernels ------------------------------ #

def _conv_stack_kernel(p1_ref, w1_ref, w234_ref, bconv_ref, o_ref,
                       act_ref, lhs_ref, *, pack, grid_w, depth, m1, m_outs):
    """Fused conv1..conv4 for one block of `pack` images packed into lanes.

    p1_ref   : (G, M1, K1)            bf16  per-image conv1 patches (K order kh,kw,c)
    w1_ref   : (K1, depth)            bf16  conv1 weight (preprocessing folded in)
    w234_ref : (3, 9*G*depth, G*depth) bf16 block-diagonal lane-packed conv2..4 weights
    bconv_ref: (4, G*depth)           f32   per-lane biases (tiled over images)
    o_ref    : (G, m4, depth)         bf16  per-image conv4 activations (virtual-grid rows)
    act_ref  : VMEM (>=M1, G*depth)   bf16  current activation, images packed in lanes
    lhs_ref  : VMEM (>=m2, 9*G*depth) bf16  K-concatenated tap slabs for the layer dot
    """
    G = pack
    GD = G * depth

    # ---- conv1 (stride 2): per-image patch matmul, results packed into lane groups ----
    for g in range(G):
        a1 = jnp.dot(p1_ref[g], w1_ref[...], preferred_element_type=jnp.float32)
        a1 = jnp.maximum(a1 + bconv_ref[0:1, g * depth:(g + 1) * depth], 0.0)
        act_ref[:m1, g * depth:(g + 1) * depth] = a1.astype(jnp.bfloat16)

    # ---- conv2..4 (stride 1, 3x3): one K=9*G*depth dot per layer ----
    # Valid virtual-grid rows of each layer only ever read valid rows of the previous
    # layer (filler columns are zero-weighted by the fc embedding in the head).
    for layer, m_out in enumerate(m_outs):
        for di in range(3):
            for dj in range(3):
                t = di * 3 + dj
                start = di * grid_w + dj          # static sublane offset of this tap
                lhs_ref[:m_out, t * GD:(t + 1) * GD] = act_ref[start:start + m_out, :]
        acc = jnp.dot(lhs_ref[:m_out, :], w234_ref[layer],
                      preferred_element_type=jnp.float32)
        acc = jnp.maximum(acc + bconv_ref[layer + 1:layer + 2, :], 0.0)
        act_ref[:m_out, :] = acc.astype(jnp.bfloat16)

    # ---- unpack lanes -> per-image (m4, depth) slabs (small, 32-lane masked stores) ----
    m4 = m_outs[-1]
    for g in range(G):
        o_ref[g] = act_ref[:m4, g * depth:(g + 1) * depth]


def _head_kernel(x_ref, w_ref, hp_ref, o_ref):
    """Fused Linear -> LayerNorm(eps=1e-5) -> tanh over a tile of batch rows."""
    h = jnp.dot(x_ref[...], w_ref[...], preferred_element_type=jnp.float32)
    h = h + hp_ref[0:1, :]                                        # fc bias
    mean = jnp.mean(h, axis=-1, keepdims=True)
    var = jnp.mean(jnp.square(h - mean), axis=-1, keepdims=True)  # biased, as torch LN
    hn = (h - mean) * jax.lax.rsqrt(var + 1e-5)
    hn = hn * hp_ref[1:2, :] + hp_ref[2:3, :]                     # gamma, beta
    o_ref[...] = jnp.tanh(hn).astype(o_ref.dtype)


# ----------------------------- kernel wrappers ------------------------------ #

def conv_stack(p1, w1, w234, bconv, *, pack, grid_w, depth, m1, m_outs, vmem_limit):
    n_pad, m1_in, k1 = p1.shape
    assert m1_in == m1 and n_pad % pack == 0
    n_blocks = n_pad // pack
    m4 = m_outs[-1]
    kern = functools.partial(_conv_stack_kernel, pack=pack, grid_w=grid_w,
                             depth=depth, m1=m1, m_outs=tuple(m_outs))
    return pl.pallas_call(
        kern,
        out_shape=jax.ShapeDtypeStruct((n_pad, m4, depth), jnp.bfloat16),
        grid=(n_blocks,),
        in_specs=[
            pl.BlockSpec((pack, m1, k1), lambda b: (b, 0, 0)),    # per-block patches
            pl.BlockSpec(w1.shape, lambda b: (0, 0)),             # resident weights
            pl.BlockSpec(w234.shape, lambda b: (0, 0, 0)),
            pl.BlockSpec(bconv.shape, lambda b: (0, 0)),
        ],
        out_specs=pl.BlockSpec((pack, m4, depth), lambda b: (b, 0, 0)),
        scratch_shapes=[
            pltpu.VMEM((_round_up(m1, 8), pack * depth), jnp.bfloat16),
            pltpu.VMEM((_round_up(m_outs[0], 8), 9 * pack * depth), jnp.bfloat16),
        ],
        compiler_params=pltpu.CompilerParams(
            dimension_semantics=("parallel",),
            vmem_limit_bytes=vmem_limit,
        ),
    )(p1, w1, w234, bconv)


def head_forward(x2d, fc_w, head_params, *, out_dim, vmem_limit):
    n_rows, k = x2d.shape
    budget = max(8 * 1024 * 1024,
                 vmem_limit - fc_w.size * fc_w.dtype.itemsize - (4 << 20))
    bm = _pick_block_m(n_rows, k * x2d.dtype.itemsize, budget)
    grid_m = n_rows // bm
    return pl.pallas_call(
        _head_kernel,
        out_shape=jax.ShapeDtypeStruct((n_rows, out_dim), jnp.float32),
        grid=(grid_m,),
        in_specs=[
            pl.BlockSpec((bm, k), lambda i: (i, 0)),              # M-tiled, pipelined
            pl.BlockSpec(fc_w.shape, lambda i: (0, 0)),           # resident fc weight
            pl.BlockSpec(head_params.shape, lambda i: (0, 0)),
        ],
        out_specs=pl.BlockSpec((bm, out_dim), lambda i: (i, 0)),
        compiler_params=pltpu.CompilerParams(
            dimension_semantics=("parallel",),
            vmem_limit_bytes=vmem_limit,
        ),
    )(x2d, fc_w, head_params)


# ------------------------------- host glue --------------------------------- #

def _conv1_patches_nchw(x, stride):
    """3x3 conv1 patches built directly from NCHW obs (K order = (kh, kw, c)), bf16."""
    n, c, h, w = x.shape
    oh = (h - 3) // stride + 1
    ow = (w - 3) // stride + 1
    taps = []
    for di in range(3):
        for dj in range(3):
            taps.append(x[:, :, di:di + stride * (oh - 1) + 1:stride,
                             dj:dj + stride * (ow - 1) + 1:stride])      # (N, C, oh, ow)
    p = jnp.stack(taps, axis=1)                                          # (N, 9, C, oh, ow)
    p = p.transpose(0, 3, 4, 1, 2).reshape(n, oh * ow, 9 * c)
    return p.astype(jnp.bfloat16), oh, ow


def orthogonal(key, rows, cols, gain=1.0):
    """Mimics torch.nn.init.orthogonal_ on a (rows, cols) weight."""
    a = jax.random.normal(key, (rows, cols), dtype=jnp.float32)
    transposed = rows < cols
    if transposed:
        a = a.T
    q, r = jnp.linalg.qr(a)
    d = jnp.diagonal(r)
    d = jnp.where(d == 0, 1.0, jnp.sign(d))
    q = q * d[None, :]
    if transposed:
        q = q.T
    return gain * q


def init_params(key, in_c, H, W, depth=32, output_size=50, pack=8):
    keys = jax.random.split(key, 5)
    gain = math.sqrt(2.0)                      # nn.init.calculate_gain('relu')
    strides = (2, 1, 1, 1)

    conv_mats, conv_torch = [], []
    c_in, h, w = in_c, H, W
    hs, ws = [], []
    for i, s in enumerate(strides):
        fan_in = c_in * 9
        orth = orthogonal(keys[i], depth, fan_in, gain)   # torch (out_c, in_c*3*3)
        conv_torch.append(orth.reshape(depth, c_in, 3, 3))
        # reorder fan_in from torch (c, kh, kw) to patch order (kh, kw, c)
        wm = orth.reshape(depth, c_in, 3, 3).transpose(2, 3, 1, 0).reshape(fan_in, depth)
        conv_mats.append(wm)
        c_in = depth
        h = (h - 3) // s + 1
        w = (w - 3) // s + 1
        hs.append(h)
        ws.append(w)
    assert hs[-1] >= 1 and ws[-1] >= 1, "input spatial size too small for 4 convs"

    grid_w = ws[0]
    m1 = hs[0] * ws[0]
    m_outs = tuple((hs[i] - 1) * grid_w + ws[i] for i in (1, 2, 3))
    m4 = m_outs[-1]
    h4, w4 = hs[3], ws[3]

    # conv1: fold the DrQ preprocessing (x/255 - 0.5): w' = w/255, b' = -0.5*sum_k w_k
    w1 = conv_mats[0]
    b1_fold = -0.5 * jnp.sum(w1, axis=0)
    w1_fold = (w1 / 255.0).astype(jnp.bfloat16)

    # conv2..4: block-diagonal lane-packed weights; LHS lane order is (tap, image, c_in),
    # activation lane order is (image, c_out)  =>  rows = concat_t kron(I_G, W_t).
    eye_g = jnp.eye(pack, dtype=jnp.float32)
    packed = []
    for l in range(1, 4):
        rows = [jnp.kron(eye_g, conv_mats[l][t * depth:(t + 1) * depth, :])
                for t in range(9)]
        packed.append(jnp.concatenate(rows, axis=0))
    w234 = jnp.stack(packed, axis=0).astype(jnp.bfloat16)        # (3, 9*G*depth, G*depth)

    bconv = jnp.stack(
        [jnp.tile(b1_fold, pack)] + [jnp.zeros((pack * depth,), jnp.float32)] * 3,
        axis=0)                                                  # (4, G*depth)

    # fc weight embedded into the kernel's native (virtual-grid row, channel) layout:
    # torch flattens conv4 output as (C, h4, w4); our rows are r = i*grid_w + j with
    # channels minor and zero weight on filler rows (j >= w4) -> no runtime relayout.
    fc_t = orthogonal(keys[4], output_size, depth * h4 * w4, 1.0)        # (50, C*h4*w4)
    fc_hwc = fc_t.reshape(output_size, depth, h4, w4).transpose(0, 2, 3, 1)
    w_emb = jnp.zeros((h4, grid_w, depth, output_size), jnp.float32)
    w_emb = w_emb.at[:, :w4, :, :].set(jnp.transpose(fc_hwc, (1, 2, 3, 0)))
    fc_w = w_emb.reshape(h4 * grid_w * depth, output_size)[: m4 * depth]

    fc_b = jnp.zeros((output_size,), jnp.float32)
    ln_g = jnp.ones((output_size,), jnp.float32)
    ln_b = jnp.zeros((output_size,), jnp.float32)
    head = jnp.stack([fc_b, ln_g, ln_b], axis=0)                 # (3, 50)

    params = dict(
        input_shape=(in_c, H, W), stride1=strides[0], depth=depth,
        out_dim=output_size, pack=pack, grid_w=grid_w, m1=m1, m_outs=m_outs,
        w1=w1_fold, w234=w234, bconv=bconv.astype(jnp.float32),
        fc_w=fc_w.astype(jnp.bfloat16), head=head,
    )
    ref = dict(
        convs=[(conv_torch[i], jnp.zeros((depth,), jnp.float32)) for i in range(4)],
        strides=strides, fc_w=fc_t, fc_b=fc_b, ln_g=ln_g, ln_b=ln_b,
    )
    return params, ref


def cnn_encoder_forward(obs_nchw, params):
    """obs_nchw: (N, C, H, W) pixel values in [0, 255] (preprocessing folded into conv1)."""
    N, C, H, W = obs_nchw.shape
    assert (C, H, W) == params["input_shape"]
    depth, pack = params["depth"], params["pack"]
    m1, m_outs, grid_w = params["m1"], params["m_outs"], params["grid_w"]
    m4 = m_outs[-1]

    pad = (-N) % pack
    x = obs_nchw.astype(jnp.bfloat16)
    if pad:
        x = jnp.concatenate([x, jnp.zeros((pad, C, H, W), jnp.bfloat16)], axis=0)
    n_pad = N + pad

    p1, oh1, ow1 = _conv1_patches_nchw(x, params["stride1"])
    assert ow1 == grid_w and oh1 * ow1 == m1

    cap = _vmem_capacity_bytes()
    vmem_limit = min(int(cap * 3 // 4), 96 * 1024 * 1024)        # 48 MB on v7x, 96 MB else

    a4 = conv_stack(p1, params["w1"], params["w234"], params["bconv"],
                    pack=pack, grid_w=grid_w, depth=depth, m1=m1,
                    m_outs=m_outs, vmem_limit=vmem_limit)
    x2 = a4.reshape(n_pad, m4 * depth)                           # free contiguous reshape
    out = head_forward(x2, params["fc_w"], params["head"],
                       out_dim=params["out_dim"], vmem_limit=vmem_limit)
    return out[:N]


# ----------------------- pure-JAX reference (torch module) ------------------ #

def reference_forward(obs, ref):
    x = obs.astype(jnp.float32) / 255.0 - 0.5
    for (w, b), s in zip(ref["convs"], ref["strides"]):
        x = jax.lax.conv_general_dilated(
            x, w, window_strides=(s, s), padding="VALID",
            dimension_numbers=("NCHW", "OIHW", "NCHW"))
        x = jnp.maximum(x + b[None, :, None, None], 0.0)
    x = x.reshape(x.shape[0], -1)
    h = x @ ref["fc_w"].T + ref["fc_b"]
    mean = h.mean(axis=-1, keepdims=True)
    var = jnp.mean(jnp.square(h - mean), axis=-1, keepdims=True)
    h = (h - mean) * jax.lax.rsqrt(var + 1e-5)
    h = h * ref["ln_g"] + ref["ln_b"]
    return jnp.tanh(h)


if __name__ == "__main__":
    key = jax.random.PRNGKey(0)
    kp, kx = jax.random.split(key)
    # 24x24 keeps shapes small but exercises the virtual-grid filler-row path (w4 < grid_w).
    N, C, H, W = 2, 4, 24, 24
    obs = jax.random.uniform(kx, (N, C, H, W), jnp.float32, 0.0, 255.0)
    params, ref = init_params(kp, C, H, W, depth=32, output_size=50, pack=8)

    out = cnn_encoder_forward(obs, params)
    out = jax.block_until_ready(out)
    assert out.shape == (N, 50)
    assert bool(jnp.all(jnp.isfinite(out)))

    # correctness vs a pure-JAX f32 reference of the PyTorch module (bf16 matmul operands
    # in the kernel => loose tolerance; any layout/weight-packing bug would be O(1) off)
    ref_out = jax.block_until_ready(reference_forward(obs, ref))
    err = float(jnp.max(jnp.abs(out - ref_out)))
    assert err < 8e-2, f"max abs err vs reference = {err}"

    print("KERNEL_OK")
</pallas_src>

<mosaic_0001>
module attributes {stable_mosaic.version = 11 : i64} {
  func.func @_conv_stack_kernel(%arg0: i32, %arg1: memref<8x121x36xbf16, #tpu.memory_space<vmem>>, %arg2: memref<36x32xbf16, #tpu.memory_space<vmem>>, %arg3: memref<3x2304x256xbf16, #tpu.memory_space<vmem>>, %arg4: memref<4x256xf32, #tpu.memory_space<vmem>>, %arg5: memref<8x49x32xbf16, #tpu.memory_space<vmem>>, %arg6: memref<128x256xbf16, #tpu.memory_space<vmem>>, %arg7: memref<104x2304xbf16, #tpu.memory_space<vmem>>) attributes {dimension_semantics = [#tpu.dimension_semantics<parallel>], iteration_bounds = array<i64: 1>, scalar_prefetch = 0 : i64, scratch_operands = 2 : i64, tpu.core_type = #tpu.core_type<tc>, window_params = [{transform_indices = @transform_0, window_bounds = array<i64: 8, 121, 36>}, {pipeline_mode = #tpu.pipeline_mode<synchronous>, transform_indices = @transform_1, window_bounds = array<i64: 36, 32>}, {pipeline_mode = #tpu.pipeline_mode<synchronous>, transform_indices = @transform_2, window_bounds = array<i64: 3, 2304, 256>}, {pipeline_mode = #tpu.pipeline_mode<synchronous>, transform_indices = @transform_3, window_bounds = array<i64: 4, 256>}, {transform_indices = @transform_4, window_bounds = array<i64: 8, 49, 32>}]} {
    %c0 = arith.constant 0 : index
    %c0_0 = arith.constant 0 : index
    %c0_1 = arith.constant 0 : index
    %0 = vector.load %arg1[%c0, %c0_0, %c0_1] : memref<8x121x36xbf16, #tpu.memory_space<vmem>>, vector<1x121x36xbf16>
    %1 = vector.shape_cast %0 : vector<1x121x36xbf16> to vector<121x36xbf16>
    %c0_2 = arith.constant 0 : index
    %c0_3 = arith.constant 0 : index
    %2 = vector.load %arg2[%c0_2, %c0_3] : memref<36x32xbf16, #tpu.memory_space<vmem>>, vector<36x32xbf16>
    %cst = arith.constant dense<0.000000e+00> : vector<121x32xf32>
    %3 = tpu.matmul %1, %2, %cst {dimension_numbers = #tpu.dot_dimension_numbers<[1], [0], [0], [1], [0, 0, 1, 1], [], []>} : vector<121x36xbf16>, vector<36x32xbf16>, vector<121x32xf32> -> vector<121x32xf32>
    %c0_4 = arith.constant 0 : index
    %c0_5 = arith.constant 0 : index
    %4 = vector.load %arg4[%c0_4, %c0_5] : memref<4x256xf32, #tpu.memory_space<vmem>>, vector<1x32xf32>
    %5 = vector.broadcast %4 : vector<1x32xf32> to vector<121x32xf32>
    %6 = arith.addf %3, %5 : vector<121x32xf32>
    %cst_6 = arith.constant 0.000000e+00 : f32
    %7 = vector.broadcast %cst_6 : f32 to vector<121x32xf32>
    %8 = arith.maximumf %6, %7 : vector<121x32xf32>
    %9 = arith.truncf %8 : vector<121x32xf32> to vector<121x32xbf16>
    %c0_7 = arith.constant 0 : index
    %c0_8 = arith.constant 0 : index
    %10 = vector.load %arg6[%c0_7, %c0_8] : memref<128x256xbf16, #tpu.memory_space<vmem>>, vector<121x32xbf16>
    tpu.vector_store %arg6[%c0_7, %c0_8], %9 {strides = array<i32>} : memref<128x256xbf16, #tpu.memory_space<vmem>>, vector<121x32xbf16>,
    %c1 = arith.constant 1 : index
    %c0_9 = arith.constant 0 : index
    %c0_10 = arith.constant 0 : index
    %11 = vector.load %arg1[%c1, %c0_9, %c0_10] : memref<8x121x36xbf16, #tpu.memory_space<vmem>>, vector<1x121x36xbf16>
    %12 = vector.shape_cast %11 : vector<1x121x36xbf16> to vector<121x36xbf16>
    %c0_11 = arith.constant 0 : index
    %c0_12 = arith.constant 0 : index
    %13 = vector.load %arg2[%c0_11, %c0_12] : memref<36x32xbf16, #tpu.memory_space<vmem>>, vector<36x32xbf16>
    %cst_13 = arith.constant dense<0.000000e+00> : vector<121x32xf32>
    %14 = tpu.matmul %12, %13, %cst_13 {dimension_numbers = #tpu.dot_dimension_numbers<[1], [0], [0], [1], [0, 0, 1, 1], [], []>} : vector<121x36xbf16>, vector<36x32xbf16>, vector<121x32xf32> -> vector<121x32xf32>
    %c0_14 = arith.constant 0 : index
    %c32 = arith.constant 32 : index
    %15 = vector.load %arg4[%c0_14, %c32] : memref<4x256xf32, #tpu.memory_space<vmem>>, vector<1x32xf32>
    %16 = vector.broadcast %15 : vector<1x32xf32> to vector<121x32xf32>
    %17 = arith.addf %14, %16 : vector<121x32xf32>
    %cst_15 = arith.constant 0.000000e+00 : f32
    %18 = vector.broadcast %cst_15 : f32 to vector<121x32xf32>
    %19 = arith.maximumf %17, %18 : vector<121x32xf32>
    %20 = arith.truncf %19 : vector<121x32xf32> to vector<121x32xbf16>
    %c0_16 = arith.constant 0 : index
    %c32_17 = arith.constant 32 : index
    %21 = vector.load %arg6[%c0_16, %c32_17] : memref<128x256xbf16, #tpu.memory_space<vmem>>, vector<121x32xbf16>
    tpu.vector_store %arg6[%c0_16, %c32_17], %20 {strides = array<i32>} : memref<128x256xbf16, #tpu.memory_space<vmem>>, vector<121x32xbf16>,
    %c2 = arith.constant 2 : index
    %c0_18 = arith.constant 0 : index
    %c0_19 = arith.constant 0 : index
    %22 = vector.load %arg1[%c2, %c0_18, %c0_19] : memref<8x121x36xbf16, #tpu.memory_space<vmem>>, vector<1x121x36xbf16>
    %23 = vector.shape_cast %22 : vector<1x121x36xbf16> to vector<121x36xbf16>
    %c0_20 = arith.constant 0 : index
    %c0_21 = arith.constant 0 : index
    %24 = vector.load %arg2[%c0_20, %c0_21] : memref<36x32xbf16, #tpu.memory_space<vmem>>, vector<36x32xbf16>
    %cst_22 = arith.constant dense<0.000000e+00> : vector<121x32xf32>
    %25 = tpu.matmul %23, %24, %cst_22 {dimension_numbers = #tpu.dot_dimension_numbers<[1], [0], [0], [1], [0, 0, 1, 1], [], []>} : vector<121x36xbf16>, vector<36x32xbf16>, vector<121x32xf32> -> vector<121x32xf32>
    %c0_23 = arith.constant 0 : index
    %c64 = arith.constant 64 : index
    %26 = vector.load %arg4[%c0_23, %c64] : memref<4x256xf32, #tpu.memory_space<vmem>>, vector<1x32xf32>
    %27 = vector.broadcast %26 : vector<1x32xf32> to vector<121x32xf32>
    %28 = arith.addf %25, %27 : vector<121x32xf32>
    %cst_24 = arith.constant 0.000000e+00 : f32
    %29 = vector.broadcast %cst_24 : f32 to vector<121x32xf32>
    %30 = arith.maximumf %28, %29 : vector<121x32xf32>
    %31 = arith.truncf %30 : vector<121x32xf32> to vector<121x32xbf16>
    %c0_25 = arith.constant 0 : index
    %c64_26 = arith.constant 64 : index
    %32 = vector.load %arg6[%c0_25, %c64_26] : memref<128x256xbf16, #tpu.memory_space<vmem>>, vector<121x32xbf16>
    tpu.vector_store %arg6[%c0_25, %c64_26], %31 {strides = array<i32>} : memref<128x256xbf16, #tpu.memory_space<vmem>>, vector<121x32xbf16>,
    %c3 = arith.constant 3 : index
    %c0_27 = arith.constant 0 : index
    %c0_28 = arith.constant 0 : index
    %33 = vector.load %arg1[%c3, %c0_27, %c0_28] : memref<8x121x36xbf16, #tpu.memory_space<vmem>>, vector<1x121x36xbf16>
    %34 = vector.shape_cast %33 : vector<1x121x36xbf16> to vector<121x36xbf16>
    %c0_29 = arith.constant 0 : index
    %c0_30 = arith.constant 0 : index
    %35 = vector.load %arg2[%c0_29, %c0_30] : memref<36x32xbf16, #tpu.memory_space<vmem>>, vector<36x32xbf16>
    %cst_31 = arith.constant dense<0.000000e+00> : vector<121x32xf32>
    %36 = tpu.matmul %34, %35, %cst_31 {dimension_numbers = #tpu.dot_dimension_numbers<[1], [0], [0], [1], [0, 0, 1, 1], [], []>} : vector<121x36xbf16>, vector<36x32xbf16>, vector<121x32xf32> -> vector<121x32xf32>
    %c0_32 = arith.constant 0 : index
    %c96 = arith.constant 96 : index
    %37 = vector.load %arg4[%c0_32, %c96] : memref<4x256xf32, #tpu.memory_space<vmem>>, vector<1x32xf32>
    %38 = vector.broadcast %37 : vector<1x32xf32> to vector<121x32xf32>
    %39 = arith.addf %36, %38 : vector<121x32xf32>
    %cst_33 = arith.constant 0.000000e+00 : f32
    %40 = vector.broadcast %cst_33 : f32 to vector<121x32xf32>
    %41 = arith.maximumf %39, %40 : vector<121x32xf32>
    %42 = arith.truncf %41 : vector<121x32xf32> to vector<121x32xbf16>
    %c0_34 = arith.constant 0 : index
    %c96_35 = arith.constant 96 : index
    %43 = vector.load %arg6[%c0_34, %c96_35] : memref<128x256xbf16, #tpu.memory_space<vmem>>, vector<121x32xbf16>
    tpu.vector_store %arg6[%c0_34, %c96_35], %42 {strides = array<i32>} : memref<128x256xbf16, #tpu.memory_space<vmem>>, vector<121x32xbf16>,
    %c4 = arith.constant 4 : index
    %c0_36 = arith.constant 0 : index
    %c0_37 = arith.constant 0 : index
    %44 = vector.load %arg1[%c4, %c0_36, %c0_37] : memref<8x121x36xbf16, #tpu.memory_space<vmem>>, vector<1x121x36xbf16>
    %45 = vector.shape_cast %44 : vector<1x121x36xbf16> to vector<121x36xbf16>
    %c0_38 = arith.constant 0 : index
    %c0_39 = arith.constant 0 : index
    %46 = vector.load %arg2[%c0_38, %c0_39] : memref<36x32xbf16, #tpu.memory_space<vmem>>, vector<36x32xbf16>
    %cst_40 = arith.constant dense<0.000000e+00> : vector<121x32xf32>
    %47 = tpu.matmul %45, %46, %cst_40 {dimension_numbers = #tpu.dot_dimension_numbers<[1], [0], [0], [1], [0, 0, 1, 1], [], []>} : vector<121x36xbf16>, vector<36x32xbf16>, vector<121x32xf32> -> vector<121x32xf32>
    %c0_41 = arith.constant 0 : index
    %c128 = arith.constant 128 : index
    %48 = vector.load %arg4[%c0_41, %c128] : memref<4x256xf32, #tpu.memory_space<vmem>>, vector<1x32xf32>
    %49 = vector.broadcast %48 : vector<1x32xf32> to vector<121x32xf32>
    %50 = arith.addf %47, %49 : vector<121x32xf32>
    %cst_42 = arith.constant 0.000000e+00 : f32
    %51 = vector.broadcast %cst_42 : f32 to vector<121x32xf32>
    %52 = arith.maximumf %50, %51 : vector<121x32xf32>
    %53 = arith.truncf %52 : vector<121x32xf32> to vector<121x32xbf16>
    %c0_43 = arith.constant 0 : index
    %c128_44 = arith.constant 128 : index
    %54 = vector.load %arg6[%c0_43, %c128_44] : memref<128x256xbf16, #tpu.memory_space<vmem>>, vector<121x32xbf16>
    tpu.vector_store %arg6[%c0_43, %c128_44], %53 {strides = array<i32>} : memref<128x256xbf16, #tpu.memory_space<vmem>>, vector<121x32xbf16>,
    %c5 = arith.constant 5 : index
    %c0_45 = arith.constant 0 : index
    %c0_46 = arith.constant 0 : index
    %55 = vector.load %arg1[%c5, %c0_45, %c0_46] : memref<8x121x36xbf16, #tpu.memory_space<vmem>>, vector<1x121x36xbf16>
    %56 = vector.shape_cast %55 : vector<1x121x36xbf16> to vector<121x36xbf16>
    %c0_47 = arith.constant 0 : index
    %c0_48 = arith.constant 0 : index
    %57 = vector.load %arg2[%c0_47, %c0_48] : memref<36x32xbf16, #tpu.memory_space<vmem>>, vector<36x32xbf16>
    %cst_49 = arith.constant dense<0.000000e+00> : vector<121x32xf32>
    %58 = tpu.matmul %56, %57, %cst_49 {dimension_numbers = #tpu.dot_dimension_numbers<[1], [0], [0], [1], [0, 0, 1, 1], [], []>} : vector<121x36xbf16>, vector<36x32xbf16>, vector<121x32xf32> -> vector<121x32xf32>
    %c0_50 = arith.constant 0 : index
    %c160 = arith.constant 160 : index
    %59 = vector.load %arg4[%c0_50, %c160] : memref<4x256xf32, #tpu.memory_space<vmem>>, vector<1x32xf32>
    %60 = vector.broadcast %59 : vector<1x32xf32> to vector<121x32xf32>
    %61 = arith.addf %58, %60 : vector<121x32xf32>
    %cst_51 = arith.constant 0.000000e+00 : f32
    %62 = vector.broadcast %cst_51 : f32 to vector<121x32xf32>
    %63 = arith.maximumf %61, %62 : vector<121x32xf32>
    %64 = arith.truncf %63 : vector<121x32xf32> to vector<121x32xbf16>
    %c0_52 = arith.constant 0 : index
    %c160_53 = arith.constant 160 : index
    %65 = vector.load %arg6[%c0_52, %c160_53] : memref<128x256xbf16, #tpu.memory_space<vmem>>, vector<121x32xbf16>
    tpu.vector_store %arg6[%c0_52, %c160_53], %64 {strides = array<i32>} : memref<128x256xbf16, #tpu.memory_space<vmem>>, vector<121x32xbf16>,
    %c6 = arith.constant 6 : index
    %c0_54 = arith.constant 0 : index
    %c0_55 = arith.constant 0 : index
    %66 = vector.load %arg1[%c6, %c0_54, %c0_55] : memref<8x121x36xbf16, #tpu.memory_space<vmem>>, vector<1x121x36xbf16>
    %67 = vector.shape_cast %66 : vector<1x121x36xbf16> to vector<121x36xbf16>
    %c0_56 = arith.constant 0 : index
    %c0_57 = arith.constant 0 : index
    %68 = vector.load %arg2[%c0_56, %c0_57] : memref<36x32xbf16, #tpu.memory_space<vmem>>, vector<36x32xbf16>
    %cst_58 = arith.constant dense<0.000000e+00> : vector<121x32xf32>
    %69 = tpu.matmul %67, %68, %cst_58 {dimension_numbers = #tpu.dot_dimension_numbers<[1], [0], [0], [1], [0, 0, 1, 1], [], []>} : vector<121x36xbf16>, vector<36x32xbf16>, vector<121x32xf32> -> vector<121x32xf32>
    %c0_59 = arith.constant 0 : index
    %c192 = arith.constant 192 : index
    %70 = vector.load %arg4[%c0_59, %c192] : memref<4x256xf32, #tpu.memory_space<vmem>>, vector<1x32xf32>
    %71 = vector.broadcast %70 : vector<1x32xf32> to vector<121x32xf32>
    %72 = arith.addf %69, %71 : vector<121x32xf32>
    %cst_60 = arith.constant 0.000000e+00 : f32
    %73 = vector.broadcast %cst_60 : f32 to vector<121x32xf32>
    %74 = arith.maximumf %72, %73 : vector<121x32xf32>
    %75 = arith.truncf %74 : vector<121x32xf32> to vector<121x32xbf16>
    %c0_61 = arith.constant 0 : index
    %c192_62 = arith.constant 192 : index
    %76 = vector.load %arg6[%c0_61, %c192_62] : memref<128x256xbf16, #tpu.memory_space<vmem>>, vector<121x32xbf16>
    tpu.vector_store %arg6[%c0_61, %c192_62], %75 {strides = array<i32>} : memref<128x256xbf16, #tpu.memory_space<vmem>>, vector<121x32xbf16>,
    %c7 = arith.constant 7 : index
    %c0_63 = arith.constant 0 : index
    %c0_64 = arith.constant 0 : index
    %77 = vector.load %arg1[%c7, %c0_63, %c0_64] : memref<8x121x36xbf16, #tpu.memory_space<vmem>>, vector<1x121x36xbf16>
    %78 = vector.shape_cast %77 : vector<1x121x36xbf16> to vector<121x36xbf16>
    %c0_65 = arith.constant 0 : index
    %c0_66 = arith.constant 0 : index
    %79 = vector.load %arg2[%c0_65, %c0_66] : memref<36x32xbf16, #tpu.memory_space<vmem>>, vector<36x32xbf16>
    %cst_67 = arith.constant dense<0.000000e+00> : vector<121x32xf32>
    %80 = tpu.matmul %78, %79, %cst_67 {dimension_numbers = #tpu.dot_dimension_numbers<[1], [0], [0], [1], [0, 0, 1, 1], [], []>} : vector<121x36xbf16>, vector<36x32xbf16>, vector<121x32xf32> -> vector<121x32xf32>
    %c0_68 = arith.constant 0 : index
    %c224 = arith.constant 224 : index
    %81 = vector.load %arg4[%c0_68, %c224] : memref<4x256xf32, #tpu.memory_space<vmem>>, vector<1x32xf32>
    %82 = vector.broadcast %81 : vector<1x32xf32> to vector<121x32xf32>
    %83 = arith.addf %80, %82 : vector<121x32xf32>
    %cst_69 = arith.constant 0.000000e+00 : f32
    %84 = vector.broadcast %cst_69 : f32 to vector<121x32xf32>
    %85 = arith.maximumf %83, %84 : vector<121x32xf32>
    %86 = arith.truncf %85 : vector<121x32xf32> to vector<121x32xbf16>
    %c0_70 = arith.constant 0 : index
    %c224_71 = arith.constant 224 : index
    %87 = vector.load %arg6[%c0_70, %c224_71] : memref<128x256xbf16, #tpu.memory_space<vmem>>, vector<121x32xbf16>
    tpu.vector_store %arg6[%c0_70, %c224_71], %86 {strides = array<i32>} : memref<128x256xbf16, #tpu.memory_space<vmem>>, vector<121x32xbf16>,
    %c0_72 = arith.constant 0 : index
    %c0_73 = arith.constant 0 : index
    %88 = vector.load %arg6[%c0_72, %c0_73] : memref<128x256xbf16, #tpu.memory_space<vmem>>, vector<97x256xbf16>
    %c0_74 = arith.constant 0 : index
    %c0_75 = arith.constant 0 : index
    %89 = vector.load %arg7[%c0_74, %c0_75] : memref<104x2304xbf16, #tpu.memory_space<vmem>>, vector<97x256xbf16>
    tpu.vector_store %arg7[%c0_74, %c0_75], %88 {strides = array<i32>} : memref<104x2304xbf16, #tpu.memory_space<vmem>>, vector<97x256xbf16>,
    %c1_76 = arith.constant 1 : index
    %c0_77 = arith.constant 0 : index
    %90 = vector.load %arg6[%c1_76, %c0_77] : memref<128x256xbf16, #tpu.memory_space<vmem>>, vector<97x256xbf16>
    %c0_78 = arith.constant 0 : index
    %c256 = arith.constant 256 : index
    %91 = vector.load %arg7[%c0_78, %c256] : memref<104x2304xbf16, #tpu.memory_space<vmem>>, vector<97x256xbf16>
    tpu.vector_store %arg7[%c0_78, %c256], %90 {strides = array<i32>} : memref<104x2304xbf16, #tpu.memory_space<vmem>>, vector<97x256xbf16>,
    %c2_79 = arith.constant 2 : index
    %c0_80 = arith.constant 0 : index
    %92 = vector.load %arg6[%c2_79, %c0_80] : memref<128x256xbf16, #tpu.memory_space<vmem>>, vector<97x256xbf16>
    %c0_81 = arith.constant 0 : index
    %c512 = arith.constant 512 : index
    %93 = vector.load %arg7[%c0_81, %c512] : memref<104x2304xbf16, #tpu.memory_space<vmem>>, vector<97x256xbf16>
    tpu.vector_store %arg7[%c0_81, %c512], %92 {strides = array<i32>} : memref<104x2304xbf16, #tpu.memory_space<vmem>>, vector<97x256xbf16>,
    %c11 = arith.constant 11 : index
    %c0_82 = arith.constant 0 : index
    %94 = vector.load %arg6[%c11, %c0_82] : memref<128x256xbf16, #tpu.memory_space<vmem>>, vector<97x256xbf16>
    %c0_83 = arith.constant 0 : index
    %c768 = arith.constant 768 : index
    %95 = vector.load %arg7[%c0_83, %c768] : memref<104x2304xbf16, #tpu.memory_space<vmem>>, vector<97x256xbf16>
    tpu.vector_store %arg7[%c0_83, %c768], %94 {strides = array<i32>} : memref<104x2304xbf16, #tpu.memory_space<vmem>>, vector<97x256xbf16>,
    %c12 = arith.constant 12 : index
    %c0_84 = arith.constant 0 : index
    %96 = vector.load %arg6[%c12, %c0_84] : memref<128x256xbf16, #tpu.memory_space<vmem>>, vector<97x256xbf16>
    %c0_85 = arith.constant 0 : index
    %c1024 = arith.constant 1024 : index
    %97 = vector.load %arg7[%c0_85, %c1024] : memref<104x2304xbf16, #tpu.memory_space<vmem>>, vector<97x256xbf16>
    tpu.vector_store %arg7[%c0_85, %c1024], %96 {strides = array<i32>} : memref<104x2304xbf16, #tpu.memory_space<vmem>>, vector<97x256xbf16>,
    %c13 = arith.constant 13 : index
    %c0_86 = arith.constant 0 : index
    %98 = vector.load %arg6[%c13, %c0_86] : memref<128x256xbf16, #tpu.memory_space<vmem>>, vector<97x256xbf16>
    %c0_87 = arith.constant 0 : index
    %c1280 = arith.constant 1280 : index
    %99 = vector.load %arg7[%c0_87, %c1280] : memref<104x2304xbf16, #tpu.memory_space<vmem>>, vector<97x256xbf16>
    tpu.vector_store %arg7[%c0_87, %c1280], %98 {strides = array<i32>} : memref<104x2304xbf16, #tpu.memory_space<vmem>>, vector<97x256xbf16>,
    %c22 = arith.constant 22 : index
    %c0_88 = arith.constant 0 : index
    %100 = vector.load %arg6[%c22, %c0_88] : memref<128x256xbf16, #tpu.memory_space<vmem>>, vector<97x256xbf16>
    %c0_89 = arith.constant 0 : index
    %c1536 = arith.constant 1536 : index
    %101 = vector.load %arg7[%c0_89, %c1536] : memref<104x2304xbf16, #tpu.memory_space<vmem>>, vector<97x256xbf16>
    tpu.vector_store %arg7[%c0_89, %c1536], %100 {strides = array<i32>} : memref<104x2304xbf16, #tpu.memory_space<vmem>>, vector<97x256xbf16>,
    %c23 = arith.constant 23 : index
    %c0_90 = arith.constant 0 : index
    %102 = vector.load %arg6[%c23, %c0_90] : memref<128x256xbf16, #tpu.memory_space<vmem>>, vector<97x256xbf16>
    %c0_91 = arith.constant 0 : index
    %c1792 = arith.constant 1792 : index
    %103 = vector.load %arg7[%c0_91, %c1792] : memref<104x2304xbf16, #tpu.memory_space<vmem>>, vector<97x256xbf16>
    tpu.vector_store %arg7[%c0_91, %c1792], %102 {strides = array<i32>} : memref<104x2304xbf16, #tpu.memory_space<vmem>>, vector<97x256xbf16>,
    %c24 = arith.constant 24 : index
    %c0_92 = arith.constant 0 : index
    %104 = vector.load %arg6[%c24, %c0_92] : memref<128x256xbf16, #tpu.memory_space<vmem>>, vector<97x256xbf16>
    %c0_93 = arith.constant 0 : index
    %c2048 = arith.constant 2048 : index
    %105 = vector.load %arg7[%c0_93, %c2048] : memref<104x2304xbf16, #tpu.memory_space<vmem>>, vector<97x256xbf16>
    tpu.vector_store %arg7[%c0_93, %c2048], %104 {strides = array<i32>} : memref<104x2304xbf16, #tpu.memory_space<vmem>>, vector<97x256xbf16>,
    %c0_94 = arith.constant 0 : index
    %c0_95 = arith.constant 0 : index
    %106 = vector.load %arg7[%c0_94, %c0_95] : memref<104x2304xbf16, #tpu.memory_space<vmem>>, vector<97x2304xbf16>
    %c0_96 = arith.constant 0 : index
    %c0_97 = arith.constant 0 : index
    %c0_98 = arith.constant 0 : index
    %107 = vector.load %arg3[%c0_96, %c0_97, %c0_98] : memref<3x2304x256xbf16, #tpu.memory_space<vmem>>, vector<1x2304x256xbf16>
    %108 = vector.shape_cast %107 : vector<1x2304x256xbf16> to vector<2304x256xbf16>
    %cst_99 = arith.constant dense<0.000000e+00> : vector<97x256xf32>
    %109 = tpu.matmul %106, %108, %cst_99 {dimension_numbers = #tpu.dot_dimension_numbers<[1], [0], [0], [1], [0, 0, 1, 1], [], []>} : vector<97x2304xbf16>, vector<2304x256xbf16>, vector<97x256xf32> -> vector<97x256xf32>
    %c1_100 = arith.constant 1 : index
    %c0_101 = arith.constant 0 : index
    %110 = vector.load %arg4[%c1_100, %c0_101] : memref<4x256xf32, #tpu.memory_space<vmem>>, vector<1x256xf32>
    %111 = vector.broadcast %110 : vector<1x256xf32> to vector<97x256xf32>
    %112 = arith.addf %109, %111 : vector<97x256xf32>
    %cst_102 = arith.constant 0.000000e+00 : f32
    %113 = vector.broadcast %cst_102 : f32 to vector<97x256xf32>
    %114 = arith.maximumf %112, %113 : vector<97x256xf32>
    %115 = arith.truncf %114 : vector<97x256xf32> to vector<97x256xbf16>
    %c0_103 = arith.constant 0 : index
    %c0_104 = arith.constant 0 : index
    %116 = vector.load %arg6[%c0_103, %c0_104] : memref<128x256xbf16, #tpu.memory_space<vmem>>, vector<97x256xbf16>
    tpu.vector_store %arg6[%c0_103, %c0_104], %115 {strides = array<i32>} : memref<128x256xbf16, #tpu.memory_space<vmem>>, vector<97x256xbf16>,
    %c0_105 = arith.constant 0 : index
    %c0_106 = arith.constant 0 : index
    %117 = vector.load %arg6[%c0_105, %c0_106] : memref<128x256xbf16, #tpu.memory_space<vmem>>, vector<73x256xbf16>
    %c0_107 = arith.constant 0 : index
    %c0_108 = arith.constant 0 : index
    %118 = vector.load %arg7[%c0_107, %c0_108] : memref<104x2304xbf16, #tpu.memory_space<vmem>>, vector<73x256xbf16>
    tpu.vector_store %arg7[%c0_107, %c0_108], %117 {strides = array<i32>} : memref<104x2304xbf16, #tpu.memory_space<vmem>>, vector<73x256xbf16>,
    %c1_109 = arith.constant 1 : index
    %c0_110 = arith.constant 0 : index
    %119 = vector.load %arg6[%c1_109, %c0_110] : memref<128x256xbf16, #tpu.memory_space<vmem>>, vector<73x256xbf16>
    %c0_111 = arith.constant 0 : index
    %c256_112 = arith.constant 256 : index
    %120 = vector.load %arg7[%c0_111, %c256_112] : memref<104x2304xbf16, #tpu.memory_space<vmem>>, vector<73x256xbf16>
    tpu.vector_store %arg7[%c0_111, %c256_112], %119 {strides = array<i32>} : memref<104x2304xbf16, #tpu.memory_space<vmem>>, vector<73x256xbf16>,
    %c2_113 = arith.constant 2 : index
    %c0_114 = arith.constant 0 : index
    %121 = vector.load %arg6[%c2_113, %c0_114] : memref<128x256xbf16, #tpu.memory_space<vmem>>, vector<73x256xbf16>
    %c0_115 = arith.constant 0 : index
    %c512_116 = arith.constant 512 : index
    %122 = vector.load %arg7[%c0_115, %c512_116] : memref<104x2304xbf16, #tpu.memory_space<vmem>>, vector<73x256xbf16>
    tpu.vector_store %arg7[%c0_115, %c512_116], %121 {strides = array<i32>} : memref<104x2304xbf16, #tpu.memory_space<vmem>>, vector<73x256xbf16>,
    %c11_117 = arith.constant 11 : index
    %c0_118 = arith.constant 0 : index
    %123 = vector.load %arg6[%c11_117, %c0_118] : memref<128x256xbf16, #tpu.memory_space<vmem>>, vector<73x256xbf16>
    %c0_119 = arith.constant 0 : index
    %c768_120 = arith.constant 768 : index
    %124 = vector.load %arg7[%c0_119, %c768_120] : memref<104x2304xbf16, #tpu.memory_space<vmem>>, vector<73x256xbf16>
    tpu.vector_store %arg7[%c0_119, %c768_120], %123 {strides = array<i32>} : memref<104x2304xbf16, #tpu.memory_space<vmem>>, vector<73x256xbf16>,
    %c12_121 = arith.constant 12 : index
    %c0_122 = arith.constant 0 : index
    %125 = vector.load %arg6[%c12_121, %c0_122] : memref<128x256xbf16, #tpu.memory_space<vmem>>, vector<73x256xbf16>
    %c0_123 = arith.constant 0 : index
    %c1024_124 = arith.constant 1024 : index
    %126 = vector.load %arg7[%c0_123, %c1024_124] : memref<104x2304xbf16, #tpu.memory_space<vmem>>, vector<73x256xbf16>
    tpu.vector_store %arg7[%c0_123, %c1024_124], %125 {strides = array<i32>} : memref<104x2304xbf16, #tpu.memory_space<vmem>>, vector<73x256xbf16>,
    %c13_125 = arith.constant 13 : index
    %c0_126 = arith.constant 0 : index
    %127 = vector.load %arg6[%c13_125, %c0_126] : memref<128x256xbf16, #tpu.memory_space<vmem>>, vector<73x256xbf16>
    %c0_127 = arith.constant 0 : index
    %c1280_128 = arith.constant 1280 : index
    %128 = vector.load %arg7[%c0_127, %c1280_128] : memref<104x2304xbf16, #tpu.memory_space<vmem>>, vector<73x256xbf16>
    tpu.vector_store %arg7[%c0_127, %c1280_128], %127 {strides = array<i32>} : memref<104x2304xbf16, #tpu.memory_space<vmem>>, vector<73x256xbf16>,
    %c22_129 = arith.constant 22 : index
    %c0_130 = arith.constant 0 : index
    %129 = vector.load %arg6[%c22_129, %c0_130] : memref<128x256xbf16, #tpu.memory_space<vmem>>, vector<73x256xbf16>
    %c0_131 = arith.constant 0 : index
    %c1536_132 = arith.constant 1536 : index
    %130 = vector.load %arg7[%c0_131, %c1536_132] : memref<104x2304xbf16, #tpu.memory_space<vmem>>, vector<73x256xbf16>
    tpu.vector_store %arg7[%c0_131, %c1536_132], %129 {strides = array<i32>} : memref<104x2304xbf16, #tpu.memory_space<vmem>>, vector<73x256xbf16>,
    %c23_133 = arith.constant 23 : index
    %c0_134 = arith.constant 0 : index
    %131 = vector.load %arg6[%c23_133, %c0_134] : memref<128x256xbf16, #tpu.memory_space<vmem>>, vector<73x256xbf16>
    %c0_135 = arith.constant 0 : index
    %c1792_136 = arith.constant 1792 : index
    %132 = vector.load %arg7[%c0_135, %c1792_136] : memref<104x2304xbf16, #tpu.memory_space<vmem>>, vector<73x256xbf16>
    tpu.vector_store %arg7[%c0_135, %c1792_136], %131 {strides = array<i32>} : memref<104x2304xbf16, #tpu.memory_space<vmem>>, vector<73x256xbf16>,
    %c24_137 = arith.constant 24 : index
    %c0_138 = arith.constant 0 : index
    %133 = vector.load %arg6[%c24_137, %c0_138] : memref<128x256xbf16, #tpu.memory_space<vmem>>, vector<73x256xbf16>
    %c0_139 = arith.constant 0 : index
    %c2048_140 = arith.constant 2048 : index
    %134 = vector.load %arg7[%c0_139, %c2048_140] : memref<104x2304xbf16, #tpu.memory_space<vmem>>, vector<73x256xbf16>
    tpu.vector_store %arg7[%c0_139, %c2048_140], %133 {strides = array<i32>} : memref<104x2304xbf16, #tpu.memory_space<vmem>>, vector<73x256xbf16>,
    %c0_141 = arith.constant 0 : index
    %c0_142 = arith.constant 0 : index
    %135 = vector.load %arg7[%c0_141, %c0_142] : memref<104x2304xbf16, #tpu.memory_space<vmem>>, vector<73x2304xbf16>
    %c1_143 = arith.constant 1 : index
    %c0_144 = arith.constant 0 : index
    %c0_145 = arith.constant 0 : index
    %136 = vector.load %arg3[%c1_143, %c0_144, %c0_145] : memref<3x2304x256xbf16, #tpu.memory_space<vmem>>, vector<1x2304x256xbf16>
    %137 = vector.shape_cast %136 : vector<1x2304x256xbf16> to vector<2304x256xbf16>
    %cst_146 = arith.constant dense<0.000000e+00> : vector<73x256xf32>
    %138 = tpu.matmul %135, %137, %cst_146 {dimension_numbers = #tpu.dot_dimension_numbers<[1], [0], [0], [1], [0, 0, 1, 1], [], []>} : vector<73x2304xbf16>, vector<2304x256xbf16>, vector<73x256xf32> -> vector<73x256xf32>
    %c2_147 = arith.constant 2 : index
    %c0_148 = arith.constant 0 : index
    %139 = vector.load %arg4[%c2_147, %c0_148] : memref<4x256xf32, #tpu.memory_space<vmem>>, vector<1x256xf32>
    %140 = vector.broadcast %139 : vector<1x256xf32> to vector<73x256xf32>
    %141 = arith.addf %138, %140 : vector<73x256xf32>
    %cst_149 = arith.constant 0.000000e+00 : f32
    %142 = vector.broadcast %cst_149 : f32 to vector<73x256xf32>
    %143 = arith.maximumf %141, %142 : vector<73x256xf32>
    %144 = arith.truncf %143 : vector<73x256xf32> to vector<73x256xbf16>
    %c0_150 = arith.constant 0 : index
    %c0_151 = arith.constant 0 : index
    %145 = vector.load %arg6[%c0_150, %c0_151] : memref<128x256xbf16, #tpu.memory_space<vmem>>, vector<73x256xbf16>
    tpu.vector_store %arg6[%c0_150, %c0_151], %144 {strides = array<i32>} : memref<128x256xbf16, #tpu.memory_space<vmem>>, vector<73x256xbf16>,
    %c0_152 = arith.constant 0 : index
    %c0_153 = arith.constant 0 : index
    %146 = vector.load %arg6[%c0_152, %c0_153] : memref<128x256xbf16, #tpu.memory_space<vmem>>, vector<49x256xbf16>
    %c0_154 = arith.constant 0 : index
    %c0_155 = arith.constant 0 : index
    %147 = vector.load %arg7[%c0_154, %c0_155] : memref<104x2304xbf16, #tpu.memory_space<vmem>>, vector<49x256xbf16>
    tpu.vector_store %arg7[%c0_154, %c0_155], %146 {strides = array<i32>} : memref<104x2304xbf16, #tpu.memory_space<vmem>>, vector<49x256xbf16>,
    %c1_156 = arith.constant 1 : index
    %c0_157 = arith.constant 0 : index
    %148 = vector.load %arg6[%c1_156, %c0_157] : memref<128x256xbf16, #tpu.memory_space<vmem>>, vector<49x256xbf16>
    %c0_158 = arith.constant 0 : index
    %c256_159 = arith.constant 256 : index
    %149 = vector.load %arg7[%c0_158, %c256_159] : memref<104x2304xbf16, #tpu.memory_space<vmem>>, vector<49x256xbf16>
    tpu.vector_store %arg7[%c0_158, %c256_159], %148 {strides = array<i32>} : memref<104x2304xbf16, #tpu.memory_space<vmem>>, vector<49x256xbf16>,
    %c2_160 = arith.constant 2 : index
    %c0_161 = arith.constant 0 : index
    %150 = vector.load %arg6[%c2_160, %c0_161] : memref<128x256xbf16, #tpu.memory_space<vmem>>, vector<49x256xbf16>
    %c0_162 = arith.constant 0 : index
    %c512_163 = arith.constant 512 : index
    %151 = vector.load %arg7[%c0_162, %c512_163] : memref<104x2304xbf16, #tpu.memory_space<vmem>>, vector<49x256xbf16>
    tpu.vector_store %arg7[%c0_162, %c512_163], %150 {strides = array<i32>} : memref<104x2304xbf16, #tpu.memory_space<vmem>>, vector<49x256xbf16>,
    %c11_164 = arith.constant 11 : index
    %c0_165 = arith.constant 0 : index
    %152 = vector.load %arg6[%c11_164, %c0_165] : memref<128x256xbf16, #tpu.memory_space<vmem>>, vector<49x256xbf16>
    %c0_166 = arith.constant 0 : index
    %c768_167 = arith.constant 768 : index
    %153 = vector.load %arg7[%c0_166, %c768_167] : memref<104x2304xbf16, #tpu.memory_space<vmem>>, vector<49x256xbf16>
    tpu.vector_store %arg7[%c0_166, %c768_167], %152 {strides = array<i32>} : memref<104x2304xbf16, #tpu.memory_space<vmem>>, vector<49x256xbf16>,
    %c12_168 = arith.constant 12 : index
    %c0_169 = arith.constant 0 : index
    %154 = vector.load %arg6[%c12_168, %c0_169] : memref<128x256xbf16, #tpu.memory_space<vmem>>, vector<49x256xbf16>
    %c0_170 = arith.constant 0 : index
    %c1024_171 = arith.constant 1024 : index
    %155 = vector.load %arg7[%c0_170, %c1024_171] : memref<104x2304xbf16, #tpu.memory_space<vmem>>, vector<49x256xbf16>
    tpu.vector_store %arg7[%c0_170, %c1024_171], %154 {strides = array<i32>} : memref<104x2304xbf16, #tpu.memory_space<vmem>>, vector<49x256xbf16>,
    %c13_172 = arith.constant 13 : index
    %c0_173 = arith.constant 0 : index
    %156 = vector.load %arg6[%c13_172, %c0_173] : memref<128x256xbf16, #tpu.memory_space<vmem>>, vector<49x256xbf16>
    %c0_174 = arith.constant 0 : index
    %c1280_175 = arith.constant 1280 : index
    %157 = vector.load %arg7[%c0_174, %c1280_175] : memref<104x2304xbf16, #tpu.memory_space<vmem>>, vector<49x256xbf16>
    tpu.vector_store %arg7[%c0_174, %c1280_175], %156 {strides = array<i32>} : memref<104x2304xbf16, #tpu.memory_space<vmem>>, vector<49x256xbf16>,
    %c22_176 = arith.constant 22 : index
    %c0_177 = arith.constant 0 : index
    %158 = vector.load %arg6[%c22_176, %c0_177] : memref<128x256xbf16, #tpu.memory_space<vmem>>, vector<49x256xbf16>
    %c0_178 = arith.constant 0 : index
    %c1536_179 = arith.constant 1536 : index
    %159 = vector.load %arg7[%c0_178, %c1536_179] : memref<104x2304xbf16, #tpu.memory_space<vmem>>, vector<49x256xbf16>
    tpu.vector_store %arg7[%c0_178, %c1536_179], %158 {strides = array<i32>} : memref<104x2304xbf16, #tpu.memory_space<vmem>>, vector<49x256xbf16>,
    %c23_180 = arith.constant 23 : index
    %c0_181 = arith.constant 0 : index
    %160 = vector.load %arg6[%c23_180, %c0_181] : memref<128x256xbf16, #tpu.memory_space<vmem>>, vector<49x256xbf16>
    %c0_182 = arith.constant 0 : index
    %c1792_183 = arith.constant 1792 : index
    %161 = vector.load %arg7[%c0_182, %c1792_183] : memref<104x2304xbf16, #tpu.memory_space<vmem>>, vector<49x256xbf16>
    tpu.vector_store %arg7[%c0_182, %c1792_183], %160 {strides = array<i32>} : memref<104x2304xbf16, #tpu.memory_space<vmem>>, vector<49x256xbf16>,
    %c24_184 = arith.constant 24 : index
    %c0_185 = arith.constant 0 : index
    %162 = vector.load %arg6[%c24_184, %c0_185] : memref<128x256xbf16, #tpu.memory_space<vmem>>, vector<49x256xbf16>
    %c0_186 = arith.constant 0 : index
    %c2048_187 = arith.constant 2048 : index
    %163 = vector.load %arg7[%c0_186, %c2048_187] : memref<104x2304xbf16, #tpu.memory_space<vmem>>, vector<49x256xbf16>
    tpu.vector_store %arg7[%c0_186, %c2048_187], %162 {strides = array<i32>} : memref<104x2304xbf16, #tpu.memory_space<vmem>>, vector<49x256xbf16>,
    %c0_188 = arith.constant 0 : index
    %c0_189 = arith.constant 0 : index
    %164 = vector.load %arg7[%c0_188, %c0_189] : memref<104x2304xbf16, #tpu.memory_space<vmem>>, vector<49x2304xbf16>
    %c2_190 = arith.constant 2 : index
    %c0_191 = arith.constant 0 : index
    %c0_192 = arith.constant 0 : index
    %165 = vector.load %arg3[%c2_190, %c0_191, %c0_192] : memref<3x2304x256xbf16, #tpu.memory_space<vmem>>, vector<1x2304x256xbf16>
    %166 = vector.shape_cast %165 : vector<1x2304x256xbf16> to vector<2304x256xbf16>
    %cst_193 = arith.constant dense<0.000000e+00> : vector<49x256xf32>
    %167 = tpu.matmul %164, %166, %cst_193 {dimension_numbers = #tpu.dot_dimension_numbers<[1], [0], [0], [1], [0, 0, 1, 1], [], []>} : vector<49x2304xbf16>, vector<2304x256xbf16>, vector<49x256xf32> -> vector<49x256xf32>
    %c3_194 = arith.constant 3 : index
    %c0_195 = arith.constant 0 : index
    %168 = vector.load %arg4[%c3_194, %c0_195] : memref<4x256xf32, #tpu.memory_space<vmem>>, vector<1x256xf32>
    %169 = vector.broadcast %168 : vector<1x256xf32> to vector<49x256xf32>
    %170 = arith.addf %167, %169 : vector<49x256xf32>
    %cst_196 = arith.constant 0.000000e+00 : f32
    %171 = vector.broadcast %cst_196 : f32 to vector<49x256xf32>
    %172 = arith.maximumf %170, %171 : vector<49x256xf32>
    %173 = arith.truncf %172 : vector<49x256xf32> to vector<49x256xbf16>
    %c0_197 = arith.constant 0 : index
    %c0_198 = arith.constant 0 : index
    %174 = vector.load %arg6[%c0_197, %c0_198] : memref<128x256xbf16, #tpu.memory_space<vmem>>, vector<49x256xbf16>
    tpu.vector_store %arg6[%c0_197, %c0_198], %173 {strides = array<i32>} : memref<128x256xbf16, #tpu.memory_space<vmem>>, vector<49x256xbf16>,
    %c0_199 = arith.constant 0 : index
    %c0_200 = arith.constant 0 : index
    %175 = vector.load %arg6[%c0_199, %c0_200] : memref<128x256xbf16, #tpu.memory_space<vmem>>, vector<49x32xbf16>
    %c0_201 = arith.constant 0 : index
    %c0_202 = arith.constant 0 : index
    %c0_203 = arith.constant 0 : index
    %176 = vector.load %arg5[%c0_201, %c0_202, %c0_203] : memref<8x49x32xbf16, #tpu.memory_space<vmem>>, vector<1x49x32xbf16>
    %177 = vector.shape_cast %176 : vector<1x49x32xbf16> to vector<49x32xbf16>
    %178 = vector.shape_cast %175 : vector<49x32xbf16> to vector<1x49x32xbf16>
    tpu.vector_store %arg5[%c0_201, %c0_202, %c0_203], %178 {strides = array<i32>} : memref<8x49x32xbf16, #tpu.memory_space<vmem>>, vector<1x49x32xbf16>,
    %c0_204 = arith.constant 0 : index
    %c32_205 = arith.constant 32 : index
    %179 = vector.load %arg6[%c0_204, %c32_205] : memref<128x256xbf16, #tpu.memory_space<vmem>>, vector<49x32xbf16>
    %c1_206 = arith.constant 1 : index
    %c0_207 = arith.constant 0 : index
    %c0_208 = arith.constant 0 : index
    %180 = vector.load %arg5[%c1_206, %c0_207, %c0_208] : memref<8x49x32xbf16, #tpu.memory_space<vmem>>, vector<1x49x32xbf16>
    %181 = vector.shape_cast %180 : vector<1x49x32xbf16> to vector<49x32xbf16>
    %182 = vector.shape_cast %179 : vector<49x32xbf16> to vector<1x49x32xbf16>
    tpu.vector_store %arg5[%c1_206, %c0_207, %c0_208], %182 {strides = array<i32>} : memref<8x49x32xbf16, #tpu.memory_space<vmem>>, vector<1x49x32xbf16>,
    %c0_209 = arith.constant 0 : index
    %c64_210 = arith.constant 64 : index
    %183 = vector.load %arg6[%c0_209, %c64_210] : memref<128x256xbf16, #tpu.memory_space<vmem>>, vector<49x32xbf16>
    %c2_211 = arith.constant 2 : index
    %c0_212 = arith.constant 0 : index
    %c0_213 = arith.constant 0 : index
    %184 = vector.load %arg5[%c2_211, %c0_212, %c0_213] : memref<8x49x32xbf16, #tpu.memory_space<vmem>>, vector<1x49x32xbf16>
    %185 = vector.shape_cast %184 : vector<1x49x32xbf16> to vector<49x32xbf16>
    %186 = vector.shape_cast %183 : vector<49x32xbf16> to vector<1x49x32xbf16>
    tpu.vector_store %arg5[%c2_211, %c0_212, %c0_213], %186 {strides = array<i32>} : memref<8x49x32xbf16, #tpu.memory_space<vmem>>, vector<1x49x32xbf16>,
    %c0_214 = arith.constant 0 : index
    %c96_215 = arith.constant 96 : index
    %187 = vector.load %arg6[%c0_214, %c96_215] : memref<128x256xbf16, #tpu.memory_space<vmem>>, vector<49x32xbf16>
    %c3_216 = arith.constant 3 : index
    %c0_217 = arith.constant 0 : index
    %c0_218 = arith.constant 0 : index
    %188 = vector.load %arg5[%c3_216, %c0_217, %c0_218] : memref<8x49x32xbf16, #tpu.memory_space<vmem>>, vector<1x49x32xbf16>
    %189 = vector.shape_cast %188 : vector<1x49x32xbf16> to vector<49x32xbf16>
    %190 = vector.shape_cast %187 : vector<49x32xbf16> to vector<1x49x32xbf16>
    tpu.vector_store %arg5[%c3_216, %c0_217, %c0_218], %190 {strides = array<i32>} : memref<8x49x32xbf16, #tpu.memory_space<vmem>>, vector<1x49x32xbf16>,
    %c0_219 = arith.constant 0 : index
    %c128_220 = arith.constant 128 : index
    %191 = vector.load %arg6[%c0_219, %c128_220] : memref<128x256xbf16, #tpu.memory_space<vmem>>, vector<49x32xbf16>
    %c4_221 = arith.constant 4 : index
    %c0_222 = arith.constant 0 : index
    %c0_223 = arith.constant 0 : index
    %192 = vector.load %arg5[%c4_221, %c0_222, %c0_223] : memref<8x49x32xbf16, #tpu.memory_space<vmem>>, vector<1x49x32xbf16>
    %193 = vector.shape_cast %192 : vector<1x49x32xbf16> to vector<49x32xbf16>
    %194 = vector.shape_cast %191 : vector<49x32xbf16> to vector<1x49x32xbf16>
    tpu.vector_store %arg5[%c4_221, %c0_222, %c0_223], %194 {strides = array<i32>} : memref<8x49x32xbf16, #tpu.memory_space<vmem>>, vector<1x49x32xbf16>,
    %c0_224 = arith.constant 0 : index
    %c160_225 = arith.constant 160 : index
    %195 = vector.load %arg6[%c0_224, %c160_225] : memref<128x256xbf16, #tpu.memory_space<vmem>>, vector<49x32xbf16>
    %c5_226 = arith.constant 5 : index
    %c0_227 = arith.constant 0 : index
    %c0_228 = arith.constant 0 : index
    %196 = vector.load %arg5[%c5_226, %c0_227, %c0_228] : memref<8x49x32xbf16, #tpu.memory_space<vmem>>, vector<1x49x32xbf16>
    %197 = vector.shape_cast %196 : vector<1x49x32xbf16> to vector<49x32xbf16>
    %198 = vector.shape_cast %195 : vector<49x32xbf16> to vector<1x49x32xbf16>
    tpu.vector_store %arg5[%c5_226, %c0_227, %c0_228], %198 {strides = array<i32>} : memref<8x49x32xbf16, #tpu.memory_space<vmem>>, vector<1x49x32xbf16>,
    %c0_229 = arith.constant 0 : index
    %c192_230 = arith.constant 192 : index
    %199 = vector.load %arg6[%c0_229, %c192_230] : memref<128x256xbf16, #tpu.memory_space<vmem>>, vector<49x32xbf16>
    %c6_231 = arith.constant 6 : index
    %c0_232 = arith.constant 0 : index
    %c0_233 = arith.constant 0 : index
    %200 = vector.load %arg5[%c6_231, %c0_232, %c0_233] : memref<8x49x32xbf16, #tpu.memory_space<vmem>>, vector<1x49x32xbf16>
    %201 = vector.shape_cast %200 : vector<1x49x32xbf16> to vector<49x32xbf16>
    %202 = vector.shape_cast %199 : vector<49x32xbf16> to vector<1x49x32xbf16>
    tpu.vector_store %arg5[%c6_231, %c0_232, %c0_233], %202 {strides = array<i32>} : memref<8x49x32xbf16, #tpu.memory_space<vmem>>, vector<1x49x32xbf16>,
    %c0_234 = arith.constant 0 : index
    %c224_235 = arith.constant 224 : index
    %203 = vector.load %arg6[%c0_234, %c224_235] : memref<128x256xbf16, #tpu.memory_space<vmem>>, vector<49x32xbf16>
    %c7_236 = arith.constant 7 : index
    %c0_237 = arith.constant 0 : index
    %c0_238 = arith.constant 0 : index
    %204 = vector.load %arg5[%c7_236, %c0_237, %c0_238] : memref<8x49x32xbf16, #tpu.memory_space<vmem>>, vector<1x49x32xbf16>
    %205 = vector.shape_cast %204 : vector<1x49x32xbf16> to vector<49x32xbf16>
    %206 = vector.shape_cast %203 : vector<49x32xbf16> to vector<1x49x32xbf16>
    tpu.vector_store %arg5[%c7_236, %c0_237, %c0_238], %206 {strides = array<i32>} : memref<8x49x32xbf16, #tpu.memory_space<vmem>>, vector<1x49x32xbf16>,
    return
  }
  func.func @transform_0(%arg0: i32) -> (i32, i32, i32) {
    %c0_i32 = arith.constant 0 : i32
    %c0_i32_0 = arith.constant 0 : i32
    %c0_i32_1 = arith.constant 0 : i32
    return %arg0, %c0_i32, %c0_i32_0 : i32, i32, i32
  }
  func.func @transform_1(%arg0: i32) -> (i32, i32) {
    %c0_i32 = arith.constant 0 : i32
    %c0_i32_0 = arith.constant 0 : i32
    %c0_i32_1 = arith.constant 0 : i32
    return %c0_i32, %c0_i32_0 : i32, i32
  }
  func.func @transform_2(%arg0: i32) -> (i32, i32, i32) {
    %c0_i32 = arith.constant 0 : i32
    %c0_i32_0 = arith.constant 0 : i32
    %c0_i32_1 = arith.constant 0 : i32
    %c0_i32_2 = arith.constant 0 : i32
    return %c0_i32, %c0_i32_0, %c0_i32_1 : i32, i32, i32
  }
  func.func @transform_3(%arg0: i32) -> (i32, i32) {
    %c0_i32 = arith.constant 0 : i32
    %c0_i32_0 = arith.constant 0 : i32
    %c0_i32_1 = arith.constant 0 : i32
    return %c0_i32, %c0_i32_0 : i32, i32
  }
  func.func @transform_4(%arg0: i32) -> (i32, i32, i32) {
    %c0_i32 = arith.constant 0 : i32
    %c0_i32_0 = arith.constant 0 : i32
    %c0_i32_1 = arith.constant 0 : i32
    return %arg0, %c0_i32, %c0_i32_0 : i32, i32, i32
  }
}

</mosaic_0001>

<bundles_post_ra>
// kernel: tpu_custom_call.1
= control target key start
LH: loop header
LB: loop body
LE: loop exit
PB: predicated region body
PF: predicated region fallthrough
CT: control target
= control target key end

     0   :  { %9 = vsyncpa [#allocation5], 0  ;;  %s23291_s0 = inlined_call_operand.vmem [shape: bf16[8,121,36], index: 0, kind: input, shape index: {}]   ;;  %s23292_s1 = inlined_call_operand.vmem [shape: bf16[36,32], index: 1, kind: input, shape index: {}]   ;;  %s23293_s2 = inlined_call_operand.hbm [shape: bf16[3,2304,256], index: 2, kind: input, shape index: {}]   ;;  %s23294_s3 = inlined_call_operand.hbm [shape: f32[4,256], index: 3, kind: input, shape index: {}]   ;;  %s23295_s4 = inlined_call_operand.vmem [shape: bf16[8,49,32], index: 4, kind: output, shape index: {}]  }
   0x1   :  { %10 = vsyncpa [#allocation7], 0  ;;  %s18408_s15 = smov [#allocation4]  }
   0x2   :  { %s20_s16 = sshll.u32 %s18408_s15, 4  ;;  %s21_s16 = int_to_ptr.vmem [resolvable:$true] %s20_s16 }
   0x3   :  { %s18372_s17 = scalar_lea.vmem %s21_s16, 110592  ;;  %p18377_p1 = scmp.lt.s32.totalorder %s21_s16, %s21_s16 }
   0x4   :  { %p18373_p0 = scmp.ne.s32.totalorder %s21_s16, %s18372_s17  ;;  %p18378_p2 = scmp.lt.s32.totalorder %s18372_s17, %s18372_s17 }
   0x6   :  { %p18379_p3 = por %p18378_p2, %p18377_p1 }
   0x8   :  { %p18380_p4 = pnand %p18379_p3, %p18373_p0 }
   0xa   :  { %18383 = shalt.err (!%p18380_p4)
}
   0xb   :  { %s18409_s18 = smov 128   ;;  %s18410_s19 = smov 8  }
   0xc   :  { %26 = dma.hbm_to_vmem [thread:$0]  %s23293_s2, 110592, %s21_s16, [#allocation5], %s18409_s18, %s18409_s18, %s18410_s19  }
   0xd   :  { %s18411_s22 = smov [#allocation6]  }
   0xe   :  { %s33_s23 = sshll.u32 %s18411_s22, 4  ;;  %s34_s23 = int_to_ptr.vmem [resolvable:$true] %s33_s23 }
   0xf   :  { %s18392_s24 = scalar_lea.vmem %s34_s23, 128  ;;  %p18397_p6 = scmp.lt.s32.totalorder %s34_s23, %s34_s23 }
  0x10   :  { %p18393_p5 = scmp.ne.s32.totalorder %s34_s23, %s18392_s24  ;;  %p18398_p7 = scmp.lt.s32.totalorder %s18392_s24, %s18392_s24 }
  0x12   :  { %p18399_p8 = por %p18398_p7, %p18397_p6 }
  0x14   :  { %p18400_p9 = pnand %p18399_p8, %p18393_p5 }
  0x16   :  { %18403 = shalt.err (!%p18400_p9)
}
  0x17   :  { %36 = dma.hbm_to_vmem [thread:$0]  %s23294_s3, 128, %s34_s23, [#allocation7]  }
  0x18   :  { %18404 = dma.done.wait [#allocation5], 110592  }
  0x19   :  { %18405 = vsyncadd [#allocation5], 4294856704 }
  0x1a   :  { %18406 = dma.done.wait [#allocation7], 128  }
  0x1b   :  { %18407 = vsyncadd [#allocation7], 4294967168  ;;  %vm150_vm0 = vcmask 1041408   ;;  %v16886_v0 = vld [vmem:[%s23292_s1 + $0x10] ss:$0 sps:$4 sm:$0x33]  }
  0x1c   :  { %v16888_v1 = vld [vmem:[%s23292_s1 + $0x8] sm:$0xff]   ;;  %v16887_v2 = vld [vmem:[%s23292_s1 + $0x10] ss:$0 sps:$4 sm:$0x33]   ;;  %16871 = vmatprep.subr.msk.bf16.mxu1 %vm150_vm0, %v16886_v0  ;;  %v152_v4 = vsel %vm150_vm0, %v16886_v0, 0  ;;  %v16890_v5 = vld [vmem:[%s23292_s1] sm:$0xff]  }
  0x1d   :  { %v16889_v3 = vld [vmem:[%s23292_s1 + $0x8] sm:$0xff]   ;;  %16873 = vmatprep.subr.msk.bf16.mxu0 %vm150_vm0, %v16887_v2  ;;  %16696 = vmatpush3.bf16.msra.mxu1 %v152_v4  ;;  %v807_v6 = vsel %vm150_vm0, %v16887_v2, 0  ;;  %v16891_v7 = vld [vmem:[%s23292_s1] sm:$0xff]   ;;  %vm125_vm1 = vcmask 293888   ;;  %v16897_v13 = vld [vmem:[%s23291_s0 + $0x10] sm:$0xff]   ;;  %s18412_s13 = smov 64  }
  0x1e   :  { %16740 = vmatpush3.bf16.msra.mxu0 %v807_v6  ;;  %16697 = vmatprep.subr.bf16.mxu1 %v16888_v1  ;;  %v16892_v8 = vld [vmem:[%s23291_s0] sm:$0xff]   ;;  %v16895_v10 = vld [vmem:[%s23292_s1 + $0x10] ss:$0 sps:$4 sm:$0x33]   ;;  %v16894_v11 = vld [vmem:[%s23291_s0 + $0x8] sm:$0xff]   ;;  %s18413_s16 = smov 96  }
  0x1f   :  { %16741 = vmatprep.subr.bf16.mxu0 %v16889_v3  ;;  %v16893_v9 = vld [vmem:[%s23291_s0 + $0x80] sm:$0xff]   ;;  %16701 = vmatprep.mubr.msk.bf16.mxu1 %vm125_vm1, %v16892_v8  ;;  %v16896_v12 = vld [vmem:[%s23291_s0 + $0x88] sm:$0xff]   ;;  %v464_v14 = vsel %vm150_vm0, %v16895_v10, 0  ;;  %v16898_v15 = vld [vmem:[%s23291_s0 + $0x90] sm:$0xff]   ;;  %s18414_s19 = smov 32   ;;  %vm331_vm2 = vcmask 257024  }
  0x20   :  { %16745 = vmatprep.mubr.msk.bf16.mxu0 %vm125_vm1, %v16893_v9  ;;  %v16901_v16 = vld [vmem:[%s23292_s1 + $0x8] sm:$0xff]   ;;  %v16902_v17 = vld [vmem:[%s23292_s1 + $0x10] ss:$0 sps:$4 sm:$0x33]   ;;  %v16899_v18 = vld [vmem:[%s23291_s0 + $0x18] sm:$0xff]   ;;  %vm347_vm3 = vcmask 253952  }
  0x21   :  { %16698 = vmatpush3.bf16.msra.mxu1 %v16888_v1  ;;  %v16900_v19 = vld [vmem:[%s23291_s0 + $0x98] sm:$0xff]   ;;  %v1489_v20 = vsel %vm150_vm0, %v16902_v17, 0  ;;  %v16903_v21 = vld [vmem:[%s23291_s0 + $0x20] sm:$0xff]   ;;  %v16910_v24 = vld [vmem:[%s23292_s1 + $0x8] sm:$0xff]   ;;  %vm348_vm4 = vsmask.f32 256 }
  0x22   :  { %16742 = vmatpush3.bf16.msra.mxu0 %v16889_v3  ;;  %16699 = vmatprep.subr.bf16.mxu1 %v16890_v5  ;;  %v16904_v22 = vld [vmem:[%s23291_s0 + $0xa0] sm:$0xff]   ;;  %v16905_v25 = vld [vmem:[%s23291_s0 + $0x28] sm:$0xff]   ;;  %v16908_v28 = vld [vmem:[%s23291_s0 + $0x30] sm:$0xff]   ;;  %vm675_vm6 = vcmask 519424   ;;  %vm1018_vm7 = vcmask 781824   ;;  %vm1361_vm8 = vcmask 1044224  }
  0x23   :  { %16743 = vmatprep.subr.bf16.mxu0 %v16891_v7  ;;  %v16907_v23 = vld [vmem:[%s23292_s1] sm:$0xff]   ;;  %v16906_v26 = vld [vmem:[%s23291_s0 + $0xa8] sm:$0xff]   ;;  %v16909_v29 = vld [vmem:[%s23291_s0 + $0xb0] sm:$0xff]   ;;  %vm2753_vm9 = vsmask.f32 3328  ;;  %vm2938_vm15 = vcmask 1042432  }
  0x24   :  { %v16913_v27 = vld [vmem:[%s23292_s1] sm:$0xff]   ;;  %v16917_v30 = vld [vmem:[%s23292_s1 + $0x10] ss:$0 sps:$4 sm:$0x33]   ;;  %v16911_v31 = vld [vmem:[%s23291_s0 + $0x38] sm:$0x1f]  }
  0x25   :  { %16700 = vmatpush3.bf16.msra.mxu1 %v16890_v5  ;;  %v16912_v32 = vld [vmem:[%s23291_s0 + $0xb8] sm:$0x1f]   ;;  %v16914_v33 = vld [vmem:[%s23291_s0 + $0x40] sm:$0xff]   ;;  %v16924_v35 = vld [vmem:[%s23292_s1 + $0x10] ss:$0 sps:$4 sm:$0x33]  }
  0x26   :  { %16744 = vmatpush3.bf16.msra.mxu0 %v16891_v7  ;;  %16872 = vmatprep.subr.msk.bf16.mxu1 %vm150_vm0, %v16895_v10  ;;  %v16915_v34 = vld [vmem:[%s23291_s0 + $0x100] sm:$0xff]   ;;  %v16916_v36 = vld [vmem:[%s23291_s0 + $0x48] sm:$0xff]   ;;  %v16919_v38 = vld [vmem:[%s23291_s0 + $0x50] sm:$0xff]   ;;  %v1150_v39 = vsel %vm150_vm0, %v16917_v30, 0  ;;  %v2137_v42 = vsel %vm150_vm0, %v16924_v35, 0 }
  0x27   :  { %16875 = vmatprep.subr.msk.bf16.mxu0 %vm150_vm0, %v16902_v17  ;;  %v16918_v37 = vld [vmem:[%s23291_s0 + $0x108] sm:$0xff]   ;;  %v16920_v40 = vld [vmem:[%s23291_s0 + $0x110] sm:$0xff]   ;;  %v16921_v44 = vld [vmem:[%s23291_s0 + $0x58] sm:$0xff]   ;;  %vm2754_vm10 = vsmask.f32 7440 }
  0x28   :  { %16702 = vmatmul.mubr.msk.bf16.vlgmr.msra.gmra.mxu1 %vm125_vm1, %v16894_v11  ;;  %v16923_v41 = vld [vmem:[%s23292_s1 + $0x8] sm:$0xff]   ;;  %v16929_v45 = vld [vmem:[%s23292_s1] sm:$0xff]   ;;  %v16922_v46 = vld [vmem:[%s23291_s0 + $0x118] sm:$0xff]   ;;  %vm3288_vm11 = vsmask.f32 1280 }
  0x29   :  { %16746 = vmatmul.mubr.msk.bf16.vlgmr.msra.gmra.mxu0 %vm125_vm1, %v16896_v12  ;;  %16718 = vmatpush3.bf16.msra.mxu1 %v464_v14  ;;  %v16932_v43 = vld [vmem:[%s23292_s1 + $0x8] sm:$0xff]   ;;  %v16925_v47 = vld [vmem:[%s23291_s0 + $0x60] sm:$0xff]   ;;  %v16939_v50 = vld [vmem:[%s23292_s1 + $0x10] ss:$0 sps:$4 sm:$0x33]  }
  0x2a   :  { %16705 = vmatprep.mubr.msk.bf16.mxu1 %vm125_vm1, %v16897_v13  ;;  %16749 = vmatprep.mubr.msk.bf16.mxu0 %vm125_vm1, %v16898_v15  ;;  %v16935_v48 = vld [vmem:[%s23292_s1] sm:$0xff]   ;;  %v16927_v51 = vld [vmem:[%s23291_s0 + $0x68] sm:$0xff]   ;;  %v16930_v53 = vld [vmem:[%s23291_s0 + $0x70] sm:$0xff]   ;;  %v1797_v63 = vsel %vm150_vm0, %v16939_v50, 0  ;;  %vm3289_vm12 = vsmask.f32 5392 }
  0x2b   :  { %16719 = vmatprep.subr.bf16.mxu1 %v16901_v16  ;;  %16784 = vmatpush3.bf16.msra.mxu0 %v1489_v20  ;;  %v16926_v49 = vld [vmem:[%s23291_s0 + $0x120] sm:$0xff]   ;;  %v16928_v52 = vld [vmem:[%s23291_s0 + $0x128] sm:$0xff]   ;;  %v16931_v54 = vld [vmem:[%s23291_s0 + $0x130] sm:$0xff]  }
  0x2c   :  { %16785 = vmatprep.subr.bf16.mxu0 %v16910_v24  ;;  %v18633_v55 = vld [vmem:[#allocation6] ss:$0 sm:$0xff]  ;;  %v16933_v56 = vld [vmem:[%s23291_s0 + $0x78] sm:$0x1f]   ;;  %v16936_v58 = vld [vmem:[%s23291_s0 + $0xc0] sm:$0xff]  }
  0x2d   :  { %16720 = vmatpush3.bf16.msra.mxu1 %v16901_v16  ;;  %779 = vrot.lane.b32.xlu1 %v18633_v55, %s18412_s13  ;;  %v16934_v57 = vld [vmem:[%s23291_s0 + $0x138] sm:$0x1f]   ;;  %v16937_v59 = vld [vmem:[%s23291_s0 + $0x180] sm:$0xff]   ;;  %v16938_v60 = vld [vmem:[%s23291_s0 + $0xc8] sm:$0xff]  }
  0x2e   :  { %16721 = vmatprep.subr.bf16.mxu1 %v16907_v23  ;;  %436 = vrot.lane.b32.xlu0 %v18633_v55, %s18413_s16  ;;  %v16940_v61 = vld [vmem:[%s23291_s0 + $0x188] sm:$0xff]   ;;  %v16941_v62 = vld [vmem:[%s23291_s0 + $0xd0] sm:$0xff]   ;;  %v16943_v2 = vld [vmem:[%s23291_s0 + $0xd8] sm:$0xff]  }
  0x2f   :  { %16786 = vmatpush3.bf16.msra.mxu0 %v16910_v24  ;;  %v16942_v0 = vld [vmem:[%s23291_s0 + $0x190] sm:$0xff]   ;;  %v16945_v1 = vld [vmem:[%s23292_s1 + $0x8] sm:$0xff]   ;;  %v16950_v3 = vld [vmem:[%s23292_s1] sm:$0xff]  }
  0x30   :  { %16706 = vmatmul.mubr.msk.bf16.gmra.mxu1 %vm125_vm1, %v16899_v18  ;;  %16787 = vmatprep.subr.bf16.mxu0 %v16913_v27  ;;  %v16944_v4 = vld [vmem:[%s23291_s0 + $0x198] sm:$0xff]   ;;  %v15056_v5 = vld [vmem:[#allocation6 + $0x4] ss:$0 sm:$0xff]  ;;  %v16946_v6 = vld [vmem:[%s23291_s0 + $0xe0] sm:$0xff]  }
  0x31   :  { %16750 = vmatmul.mubr.msk.bf16.gmra.mxu0 %vm125_vm1, %v16900_v19  ;;  %16709 = vmatprep.mubr.msk.bf16.mxu1 %vm125_vm1, %v16903_v21  ;;  %v16957_v7 = vld [vmem:[%s23292_s1 + $0x10] ss:$0 sps:$4 sm:$0x33]   ;;  %v16947_v8 = vld [vmem:[%s23291_s0 + $0x1a0] sm:$0xff]   ;;  %v16948_v9 = vld [vmem:[%s23291_s0 + $0xe8] sm:$0xff]  }
  0x32   :  { %16753 = vmatprep.mubr.msk.bf16.mxu0 %vm125_vm1, %v16904_v22  ;;  %16722 = vmatpush3.bf16.msra.mxu1 %v16907_v23  ;;  %v16949_v10 = vld [vmem:[%s23291_s0 + $0x1a8] sm:$0xff]   ;;  %v16951_v11 = vld [vmem:[%s23291_s0 + $0xf0] sm:$0xff]   ;;  %v16953_v13 = vld [vmem:[%s23291_s0 + $0xf8] sm:$0x1f]   ;;  %v2477_v19 = vsel %vm150_vm0, %v16957_v7, 0 }
  0x33   :  { %16788 = vmatpush3.bf16.msra.mxu0 %v16913_v27  ;;  %16874 = vmatprep.subr.msk.bf16.mxu1 %vm150_vm0, %v16917_v30  ;;  %v16952_v12 = vld [vmem:[%s23291_s0 + $0x1b0] sm:$0xff]   ;;  %v16954_v14 = vld [vmem:[%s23291_s0 + $0x1b8] sm:$0x1f]   ;;  %v16955_v15 = vld [vmem:[%s23291_s0 + $0x140] sm:$0xff]  }
  0x34   :  { %16877 = vmatprep.subr.msk.bf16.mxu0 %vm150_vm0, %v16924_v35  ;;  %1769 = vrot.lane.b32.xlu0 %v15056_v5, %s18413_s16  ;;  %v16956_v16 = vld [vmem:[%s23291_s0 + $0x148] sm:$0xff]   ;;  %v16958_v17 = vld [vmem:[%s23291_s0 + $0x150] sm:$0xff]   ;;  %v16963_v20 = vld [vmem:[%s23292_s1] sm:$0xff]  }
  0x35   :  { %2109 = vrot.lane.b32.xlu1 %v15056_v5, %s18412_s13  ;;  %v16960_v18 = vld [vmem:[%s23292_s1 + $0x8] sm:$0xff]   ;;  %v16959_v21 = vld [vmem:[%s23291_s0 + $0x158] sm:$0xff]   ;;  %v16961_v22 = vld [vmem:[%s23291_s0 + $0x160] sm:$0xff]  }
  0x36   :  { %v16962_v23 = vld [vmem:[%s23291_s0 + $0x168] sm:$0xff]   ;;  %v16964_v24 = vld [vmem:[%s23291_s0 + $0x170] sm:$0xff]   ;;  %v16970_v30 = vld [vmem:[%s23291_s0 + $0x1e0] sm:$0xff]  }
  0x37   :  { %v16967_v27 = vld [vmem:[%s23291_s0 + $0x1c8] sm:$0xff]   ;;  %vm18850_vm5 = vmand %vm347_vm3, %vm348_vm4  ;;  %vm3020_vm3 = vsmask.f32 2304 }
  0x38   :  { %16710 = vmatmul.mubr.msk.bf16.gmra.mxu1 %vm125_vm1, %v16905_v25  ;;  %1122 = vrot.lane.b32.xlu0 %v18633_v55, %s18414_s19  ;;  %v16965_v25 = vld [vmem:[%s23291_s0 + $0x178] sm:$0x1f]   ;;  %vm19331_vm13 = vmor %vm2753_vm9, %vm2754_vm10  ;;  %vm3021_vm9 = vsmask.f32 6416 }
  0x39   :  { %16754 = vmatmul.mubr.msk.bf16.gmra.mxu0 %vm125_vm1, %v16906_v26  ;;  %16713 = vmatprep.mubr.msk.bf16.mxu1 %vm125_vm1, %v16908_v28  ;;  %v16966_v26 = vld [vmem:[%s23291_s0 + $0x1c0] sm:$0xff]   ;;  %v16968_v28 = vld [vmem:[%s23291_s0 + $0x1d0] sm:$0xff]   ;;  %vm19338_vm14 = vmor %vm3288_vm11, %vm3289_vm12  ;;  %vm2734_vm12 = vsmask.f32 4352 }
  0x3a   :  { %16757 = vmatprep.mubr.msk.bf16.mxu0 %vm125_vm1, %v16909_v29  ;;  %2449 = vrot.lane.b32.xlu1 %v15056_v5, %s18414_s19  ;;  %v16969_v29 = vld [vmem:[%s23291_s0 + $0x1d8] sm:$0xff]   ;;  %vm19574_vm11 = vmor %vm3020_vm3, %vm3021_vm9 }
  0x40   :  { %16714 = vmatmul.mubr.msk.bf16.gmra.mxu1 %vm125_vm1, %v16911_v31  ;;  %v16971_v31 = vld [vmem:[%s23291_s0 + $0x1e8] sm:$0xff]  }
  0x41   :  { %16758 = vmatmul.mubr.msk.bf16.gmra.mxu0 %vm125_vm1, %v16912_v32  ;;  %16723 = vmatprep.mubr.msk.bf16.mxu1 %vm125_vm1, %v16914_v33  ;;  %v16972_v32 = vld [vmem:[%s23291_s0 + $0x1f0] sm:$0xff]   ;;  %v16973_v33 = vld [vmem:[%s23291_s0 + $0x1f8] sm:$0x1f]  }
  0x42   :  { %16789 = vmatprep.mubr.msk.bf16.mxu0 %vm125_vm1, %v16915_v34 }
  0x48   :  { %16724 = vmatmul.mubr.msk.bf16.vlgmr.msra.gmra.mxu1 %vm125_vm1, %v16916_v36 }
  0x49   :  { %16790 = vmatmul.mubr.msk.bf16.vlgmr.msra.gmra.mxu0 %vm125_vm1, %v16918_v37  ;;  %16762 = vmatpush3.bf16.msra.mxu1 %v1150_v39 }
  0x4a   :  { %16727 = vmatprep.mubr.msk.bf16.mxu1 %vm125_vm1, %v16919_v38  ;;  %16793 = vmatprep.mubr.msk.bf16.mxu0 %vm125_vm1, %v16920_v40 }
  0x4b   :  { %16763 = vmatprep.subr.bf16.mxu1 %v16923_v41  ;;  %16828 = vmatpush3.bf16.msra.mxu0 %v2137_v42 }
  0x4c   :  { %16829 = vmatprep.subr.bf16.mxu0 %v16932_v43 }
  0x4d   :  { %16764 = vmatpush3.bf16.msra.mxu1 %v16923_v41 }
  0x4e   :  { %16765 = vmatprep.subr.bf16.mxu1 %v16929_v45 }
  0x4f   :  { %16830 = vmatpush3.bf16.msra.mxu0 %v16932_v43 }
  0x50   :  { %16728 = vmatmul.mubr.msk.bf16.gmra.mxu1 %vm125_vm1, %v16921_v44  ;;  %16831 = vmatprep.subr.bf16.mxu0 %v16935_v48 }
  0x51   :  { %16794 = vmatmul.mubr.msk.bf16.gmra.mxu0 %vm125_vm1, %v16922_v46  ;;  %16731 = vmatprep.mubr.msk.bf16.mxu1 %vm125_vm1, %v16925_v47 }
  0x52   :  { %16797 = vmatprep.mubr.msk.bf16.mxu0 %vm125_vm1, %v16926_v49  ;;  %16766 = vmatpush3.bf16.msra.mxu1 %v16929_v45 }
  0x53   :  { %16832 = vmatpush3.bf16.msra.mxu0 %v16935_v48  ;;  %16876 = vmatprep.subr.msk.bf16.mxu1 %vm150_vm0, %v16939_v50  ;;  %v18807_v48 = vld [vmem:[#allocation6] ss:$0 sm:$0xff] }
  0x58   :  { %16732 = vmatmul.mubr.msk.bf16.gmra.mxu1 %vm125_vm1, %v16927_v51 }
  0x59   :  { %16798 = vmatmul.mubr.msk.bf16.gmra.mxu0 %vm125_vm1, %v16928_v52  ;;  %16735 = vmatprep.mubr.msk.bf16.mxu1 %vm125_vm1, %v16930_v53 }
  0x5a   :  { %16801 = vmatprep.mubr.msk.bf16.mxu0 %vm125_vm1, %v16931_v54 }
  0x60   :  { %16736 = vmatmul.mubr.msk.bf16.gmra.mxu1 %vm125_vm1, %v16933_v56 }
  0x61   :  { %16802 = vmatmul.mubr.msk.bf16.gmra.mxu0 %vm125_vm1, %v16934_v57  ;;  %16767 = vmatprep.mubr.msk.bf16.mxu1 %vm125_vm1, %v16936_v58 }
  0x62   :  { %16833 = vmatprep.mubr.msk.bf16.mxu0 %vm125_vm1, %v16937_v59 }
  0x68   :  { %16768 = vmatmul.mubr.msk.bf16.vlgmr.msra.gmra.mxu1 %vm125_vm1, %v16938_v60 }
  0x69   :  { %16834 = vmatmul.mubr.msk.bf16.vlgmr.msra.gmra.mxu0 %vm125_vm1, %v16940_v61  ;;  %16806 = vmatpush3.bf16.msra.mxu1 %v1797_v63 }
  0x6a   :  { %16771 = vmatprep.mubr.msk.bf16.mxu1 %vm125_vm1, %v16941_v62  ;;  %16837 = vmatprep.mubr.msk.bf16.mxu0 %vm125_vm1, %v16942_v0 }
  0x6b   :  { %16807 = vmatprep.subr.bf16.mxu1 %v16945_v1 }
  0x6d   :  { %16808 = vmatpush3.bf16.msra.mxu1 %v16945_v1 }
  0x6e   :  { %16809 = vmatprep.subr.bf16.mxu1 %v16950_v3 }
  0x70   :  { %16772 = vmatmul.mubr.msk.bf16.gmra.mxu1 %vm125_vm1, %v16943_v2 }
  0x71   :  { %16838 = vmatmul.mubr.msk.bf16.gmra.mxu0 %vm125_vm1, %v16944_v4  ;;  %16775 = vmatprep.mubr.msk.bf16.mxu1 %vm125_vm1, %v16946_v6 }
  0x72   :  { %16841 = vmatprep.mubr.msk.bf16.mxu0 %vm125_vm1, %v16947_v8  ;;  %16810 = vmatpush3.bf16.msra.mxu1 %v16950_v3 }
  0x73   :  { %16878 = vmatprep.subr.msk.bf16.mxu1 %vm150_vm0, %v16957_v7 }
  0x78   :  { %16776 = vmatmul.mubr.msk.bf16.gmra.mxu1 %vm125_vm1, %v16948_v9 }
  0x79   :  { %16842 = vmatmul.mubr.msk.bf16.gmra.mxu0 %vm125_vm1, %v16949_v10  ;;  %16779 = vmatprep.mubr.msk.bf16.mxu1 %vm125_vm1, %v16951_v11 }
  0x7a   :  { %16845 = vmatprep.mubr.msk.bf16.mxu0 %vm125_vm1, %v16952_v12 }
  0x80   :  { %16780 = vmatmul.mubr.msk.bf16.gmra.mxu1 %vm125_vm1, %v16953_v13 }
  0x81   :  { %16846 = vmatmul.mubr.msk.bf16.gmra.mxu0 %vm125_vm1, %v16954_v14  ;;  %16811 = vmatprep.mubr.msk.bf16.mxu1 %vm125_vm1, %v16955_v15 }
  0x88   :  { %16812 = vmatmul.mubr.msk.bf16.vlgmr.msra.gmra.mxu1 %vm125_vm1, %v16956_v16 }
  0x89   :  { %16850 = vmatpush3.bf16.msra.mxu1 %v2477_v19  ;;  %16815 = vmatprep.mubr.msk.bf16.mxu1 %vm125_vm1, %v16958_v17 }
  0x8a   :  { %16851 = vmatprep.subr.bf16.mxu1 %v16960_v18 }
  0x8d   :  { %16852 = vmatpush3.bf16.msra.mxu1 %v16960_v18 }
  0x8e   :  { %16853 = vmatprep.subr.bf16.mxu1 %v16963_v20 }
  0x90   :  { %16816 = vmatmul.mubr.msk.bf16.gmra.mxu1 %vm125_vm1, %v16959_v21 }
  0x91   :  { %16819 = vmatprep.mubr.msk.bf16.mxu1 %vm125_vm1, %v16961_v22  ;;  %16854 = vmatpush3.bf16.msra.mxu1 %v16963_v20 }
  0x98   :  { %16820 = vmatmul.mubr.msk.bf16.gmra.mxu1 %vm125_vm1, %v16962_v23 }
  0x99   :  { %16823 = vmatprep.mubr.msk.bf16.mxu1 %vm125_vm1, %v16964_v24 }
  0x9f   :  { %v18801_v34 = vpop.permute.xlu1 %779 }
  0xa0   :  { %16824 = vmatmul.mubr.msk.bf16.gmra.mxu1 %vm125_vm1, %v16965_v25 }
  0xa1   :  { %16855 = vmatprep.mubr.msk.bf16.mxu1 %vm125_vm1, %v16966_v26 }
  0xa8   :  { %16856 = vmatmul.mubr.msk.bf16.vlgmr.msra.gmra.mxu1 %vm125_vm1, %v16967_v27 }
  0xa9   :  { %16859 = vmatprep.mubr.msk.bf16.mxu1 %vm125_vm1, %v16968_v28 }
  0xb0   :  { %16860 = vmatmul.mubr.msk.bf16.gmra.mxu1 %vm125_vm1, %v16969_v29 }
  0xb1   :  { %16863 = vmatprep.mubr.msk.bf16.mxu1 %vm125_vm1, %v16970_v30 }
  0xb8   :  { %16864 = vmatmul.mubr.msk.bf16.gmra.mxu1 %vm125_vm1, %v16971_v31 }
  0xb9   :  { %16867 = vmatprep.mubr.msk.bf16.mxu1 %vm125_vm1, %v16972_v32 }
  0xc0   :  { %16868 = vmatmul.mubr.msk.bf16.gmra.mxu1 %vm125_vm1, %v16973_v33  ;;  %vm2939_vm1 = vcmask 1046532  }
  0xc1   :  { %vm19517_vm10 = vmor %vm2938_vm15, %vm2939_vm1  ;;  %vm2731_vm15 = vcmask 1040384   ;;  %vm2733_vm1 = vcmask 1044484  }
  0xc2   :  { %vm19693_vm3 = vmand %vm2731_vm15, %vm348_vm4 }
  0xc3   :  { %vm19704_vm9 = vmand %vm2733_vm1, %vm2734_vm12 }
  0xc4   :  { %vm19740_vm12 = vmor %vm19704_vm9, %vm19693_vm3  ;;  %vm1377_vm3 = vcmask 1041152  }
  0xe8   :  { %v16703_v35 = vpop.f32.mrf.mxu1 }
  0xe9   :  { %v197_v36 = vadd.f32 %v16703_v35, %v18633_v55  ;;  %v16747_v37 = vpop.f32.mrf.mxu0 }
  0xea   :  { %v188_v38 = vpop.f32.mrf.mxu1  ;;  %v852_v39 = vadd.f32 %v16747_v37, %v18801_v34 }
  0xeb   :  { %v253_v40 = vmax.f32 %v197_v36, 0.0  ;;  %v189_v41 = vadd.f32 %v18633_v55, %v188_v38  ;;  %v843_v42 = vpop.f32.mrf.mxu0 }
  0xec   :  { %v16704_v43 = vpop.f32.mrf.mxu1  ;;  %v908_v44 = vmax.f32 %v852_v39, 0.0  ;;  %v844_v45 = vadd.f32 %v843_v42, %v18801_v34 }
  0xed   :  { %v16451_v46 = vpack.c.bf16 %v253_v40, %v253_v40  ;;  %v251_v47 = vmax.f32 %v189_v41, 0.0  ;;  %v200_v49 = vadd.f32 %v18807_v48, %v16704_v43  ;;  %v16748_v50 = vpop.f32.mrf.mxu0 }
  0xee   :  { %v191_v51 = vpop.f32.mrf.mxu1  ;;  %v855_v52 = vadd.f32 %v16748_v50, %v18801_v34  ;;  %v16483_v53 = vpack.c.bf16 %v908_v44, %v908_v44  ;;  %v906_v54 = vmax.f32 %v844_v45, 0.0 }
  0xef   :  { %334 = vst.msk [vmem:[#allocation2 + $0x10] sm:$0xf] %vm331_vm2, %v16451_v46  ;;  %v16449_v55 = vpack.c.bf16 %v251_v47, %v251_v47  ;;  %v254_v56 = vmax.f32 %v200_v49, 0.0  ;;  %v192_v57 = vadd.f32 %v18807_v48, %v191_v51  ;;  %v846_v58 = vpop.f32.mrf.mxu0 }
  0xf0   :  { %v16707_v59 = vpop.f32.mrf.mxu1  ;;  %v909_v60 = vmax.f32 %v855_v52, 0.0  ;;  %974 = vrot.lane.b32.xlu0 %v16483_v53, %s18412_s13  ;;  %v847_v61 = vadd.f32 %v846_v58, %v18801_v34  ;;  %v16481_v62 = vpack.c.bf16 %v906_v54, %v906_v54 }
  0xf1   :  { %332 = vst.msk [vmem:[#allocation2] sm:$0xf] %vm331_vm2, %v16449_v55  ;;  %v16452_v63 = vpack.c.bf16 %v254_v56, %v254_v56  ;;  %v252_v0 = vmax.f32 %v192_v57, 0.0  ;;  %v213_v1 = vadd.f32 %v18807_v48, %v16707_v59  ;;  %v16751_v2 = vpop.f32.mrf.mxu0 }
  0xf2   :  { %v204_v3 = vpop.f32.mrf.mxu1  ;;  %v16484_v4 = vpack.c.bf16 %v909_v60, %v909_v60  ;;  %v907_v5 = vmax.f32 %v847_v61, 0.0  ;;  %v868_v6 = vadd.f32 %v16751_v2, %v18801_v34  ;;  %v23389_v60 = vmov 0 }
  0xf3   :  { %335 = vst.msk [vmem:[#allocation2 + $0x18] sm:$0xf] %vm331_vm2, %v16452_v63  ;;  %v16450_v7 = vpack.c.bf16 %v252_v0, %v252_v0  ;;  %v257_v8 = vmax.f32 %v213_v1, 0.0  ;;  %v205_v9 = vadd.f32 %v18807_v48, %v204_v3  ;;  %v859_v10 = vpop.f32.mrf.mxu0  ;;  %v23390_v60 = vsel %vm18850_vm5, 4294967295, %v23389_v60 }
  0xf4   :  { %v860_v11 = vadd.f32 %v859_v10, %v18801_v34  ;;  %v16708_v12 = vpop.f32.mrf.mxu1  ;;  %976 = vrot.lane.b32.xlu1 %v16484_v4, %s18412_s13  ;;  %v16482_v13 = vpack.c.bf16 %v907_v5, %v907_v5  ;;  %970 = vrot.lane.b32.xlu0 %v16481_v62, %s18412_s13  ;;  %v912_v14 = vmax.f32 %v868_v6, 0.0  ;;  %23391 = vst [vmem:[#allocation10_spill] sm:$0xff] %v23390_v60 }
  0xf5   :  { %333 = vst.msk [vmem:[#allocation2 + $0x8] sm:$0xf] %vm331_vm2, %v16450_v7  ;;  %v16455_v15 = vpack.c.bf16 %v257_v8, %v257_v8  ;;  %v255_v16 = vmax.f32 %v205_v9, 0.0  ;;  %v216_v17 = vadd.f32 %v18807_v48, %v16708_v12  ;;  %v16752_v18 = vpop.f32.mrf.mxu0 }
  0xf6   :  { %v910_v19 = vmax.f32 %v860_v11, 0.0  ;;  %v871_v20 = vadd.f32 %v16752_v18, %v18801_v34  ;;  %v207_v21 = vpop.f32.mrf.mxu1  ;;  %v16487_v22 = vpack.c.bf16 %v912_v14, %v912_v14 }
  0xf7   :  { %338 = vst.msk [vmem:[#allocation2 + $0x30] sm:$0xf] %vm331_vm2, %v16455_v15  ;;  %v16453_v23 = vpack.c.bf16 %v255_v16, %v255_v16  ;;  %v258_v24 = vmax.f32 %v216_v17, 0.0  ;;  %v208_v25 = vadd.f32 %v18807_v48, %v207_v21  ;;  %v862_v26 = vpop.f32.mrf.mxu0  ;;  %v18867_v15 = vpop.permute.xlu0 %436 }
  0xf8   :  { %v16485_v27 = vpack.c.bf16 %v910_v19, %v910_v19  ;;  %v913_v28 = vmax.f32 %v871_v20, 0.0  ;;  %v863_v29 = vadd.f32 %v862_v26, %v18801_v34  ;;  %v16711_v30 = vpop.f32.mrf.mxu1  ;;  %972 = vrot.lane.b32.xlu1 %v16482_v13, %s18412_s13  ;;  %982 = vrot.lane.b32.xlu0 %v16487_v22, %s18412_s13  ;;  %v350_v13 = vld [vmem:[#allocation2 + $0x78] sm:$0x1] }
  0xf9   :  { %336 = vst.msk [vmem:[#allocation2 + $0x20] sm:$0xf] %vm331_vm2, %v16453_v23  ;;  %v16456_v31 = vpack.c.bf16 %v258_v24, %v258_v24  ;;  %v256_v32 = vmax.f32 %v208_v25, 0.0  ;;  %v18832_v33 = vpop.f32.mrf.mxu0  ;;  %v229_v35 = vadd.f32 %v18807_v48, %v16711_v30  ;;  %v18876_v25 = vld [vmem:[#allocation6 + $0x4] ss:$0 sm:$0xff] }
  0xfa   :  { %v16488_v36 = vpack.c.bf16 %v913_v28, %v913_v28  ;;  %v911_v37 = vmax.f32 %v863_v29, 0.0  ;;  %v220_v38 = vpop.f32.mrf.mxu1 }
  0xfb   :  { %339 = vst.msk [vmem:[#allocation2 + $0x38] sm:$0xf] %vm331_vm2, %v16456_v31  ;;  %v16454_v39 = vpack.c.bf16 %v256_v32, %v256_v32  ;;  %v261_v40 = vmax.f32 %v229_v35, 0.0  ;;  %v221_v41 = vadd.f32 %v18807_v48, %v220_v38  ;;  %v875_v42 = vpop.f32.mrf.mxu0 }
  0xfc   :  { %v16486_v43 = vpack.c.bf16 %v911_v37, %v911_v37  ;;  %v876_v44 = vadd.f32 %v875_v42, %v18801_v34  ;;  %v16712_v45 = vpop.f32.mrf.mxu1  ;;  %984 = vrot.lane.b32.xlu1 %v16488_v36, %s18412_s13  ;;  %978 = vrot.lane.b32.xlu0 %v16485_v27, %s18412_s13 }
  0xfd   :  { %337 = vst.msk [vmem:[#allocation2 + $0x28] sm:$0xf] %vm331_vm2, %v16454_v39  ;;  %v16459_v46 = vpack.c.bf16 %v261_v40, %v261_v40  ;;  %v259_v47 = vmax.f32 %v221_v41, 0.0  ;;  %v18841_v49 = vpop.f32.mrf.mxu0  ;;  %v232_v50 = vadd.f32 %v18807_v48, %v16712_v45 }
  0xfe   :  { %v914_v51 = vmax.f32 %v876_v44, 0.0  ;;  %v223_v52 = vpop.f32.mrf.mxu1 }
  0xff   :  { %342 = vst.msk [vmem:[#allocation2 + $0x50] sm:$0xf] %vm331_vm2, %v16459_v46  ;;  %v16457_v53 = vpack.c.bf16 %v259_v47, %v259_v47  ;;  %v262_v54 = vmax.f32 %v232_v50, 0.0  ;;  %v224_v55 = vadd.f32 %v18807_v48, %v223_v52  ;;  %v878_v56 = vpop.f32.mrf.mxu0 }
 0x100   :  { %v16489_v57 = vpack.c.bf16 %v914_v51, %v914_v51  ;;  %v879_v58 = vadd.f32 %v878_v56, %v18801_v34  ;;  %v16715_v59 = vpop.f32.mrf.mxu1  ;;  %980 = vrot.lane.b32.xlu1 %v16486_v43, %s18412_s13 }
 0x101   :  { %340 = vst.msk [vmem:[#allocation2 + $0x40] sm:$0xf] %vm331_vm2, %v16457_v53  ;;  %v16460_v61 = vpack.c.bf16 %v262_v54, %v262_v54  ;;  %v260_v62 = vmax.f32 %v224_v55, 0.0  ;;  %v18855_v63 = vpop.f32.mrf.mxu0  ;;  %v245_v0 = vadd.f32 %v18807_v48, %v16715_v59 }
 0x102   :  { %v915_v1 = vmax.f32 %v879_v58, 0.0  ;;  %v236_v2 = vpop.f32.mrf.mxu1  ;;  %986 = vrot.lane.b32.xlu0 %v16489_v57, %s18412_s13 }
 0x103   :  { %343 = vst.msk [vmem:[#allocation2 + $0x58] sm:$0xf] %vm331_vm2, %v16460_v61  ;;  %v16458_v3 = vpack.c.bf16 %v260_v62, %v260_v62  ;;  %v265_v4 = vmax.f32 %v245_v0, 0.0  ;;  %v237_v5 = vadd.f32 %v18807_v48, %v236_v2  ;;  %v18861_v6 = vpop.f32.mrf.mxu0 }
 0x104   :  { %v16490_v7 = vpack.c.bf16 %v915_v1, %v915_v1  ;;  %v16716_v8 = vpop.f32.mrf.mxu1 }
 0x105   :  { %341 = vst.msk [vmem:[#allocation2 + $0x48] sm:$0xf] %vm331_vm2, %v16458_v3  ;;  %v16463_v9 = vpack.c.bf16 %v265_v4, %v265_v4  ;;  %v263_v10 = vmax.f32 %v237_v5, 0.0  ;;  %v18864_v11 = vpop.f32.mrf.mxu0  ;;  %v248_v12 = vadd.f32 %v18807_v48, %v16716_v8 }
 0x106   :  { %v239_v14 = vpop.f32.mrf.mxu1  ;;  %988 = vrot.lane.b32.xlu1 %v16490_v7, %s18412_s13 }
 0x107   :  { %346 = vst.msk [vmem:[#allocation2 + $0x70] sm:$0xf] %vm331_vm2, %v16463_v9  ;;  %v16461_v16 = vpack.c.bf16 %v263_v10, %v263_v10  ;;  %v266_v17 = vmax.f32 %v248_v12, 0.0  ;;  %v240_v18 = vadd.f32 %v18807_v48, %v239_v14  ;;  %v18872_v19 = vpop.f32.mrf.mxu0 }
 0x108   :  { %v16725_v20 = vpop.f32.mrf.mxu1 }
 0x109   :  { %344 = vst.msk [vmem:[#allocation2 + $0x60] sm:$0xf] %vm331_vm2, %v16461_v16  ;;  %v16464_v21 = vpack.c.bf16 %v266_v17, %v266_v17  ;;  %v264_v22 = vmax.f32 %v240_v18, 0.0  ;;  %v16791_v23 = vpop.f32.mrf.mxu0  ;;  %v509_v24 = vadd.f32 %v16725_v20, %v18867_v15 }
 0x10a   :  { %v1534_v26 = vadd.f32 %v18876_v25, %v16791_v23  ;;  %v500_v27 = vpop.f32.mrf.mxu1 }
 0x10b   :  { %v351_v28 = vsel %vm18850_vm5, %v16464_v21, %v350_v13  ;;  %v16462_v29 = vpack.c.bf16 %v264_v22, %v264_v22  ;;  %v565_v48 = vmax.f32 %v509_v24, 0.0  ;;  %v501_v30 = vadd.f32 %v500_v27, %v18867_v15  ;;  %v1525_v31 = vpop.f32.mrf.mxu0 }
 0x10c   :  { %352 = vst [vmem:[#allocation2 + $0x78] sm:$0x1] %v351_v28  ;;  %v1590_v32 = vmax.f32 %v1534_v26, 0.0  ;;  %v1526_v35 = vadd.f32 %v18876_v25, %v1525_v31  ;;  %v16726_v36 = vpop.f32.mrf.mxu1 }
 0x10d   :  { %345 = vst.msk [vmem:[#allocation2 + $0x68] sm:$0xf] %vm331_vm2, %v16462_v29  ;;  %v16467_v37 = vpack.c.bf16 %v565_v48, %v565_v48  ;;  %v563_v38 = vmax.f32 %v501_v30, 0.0  ;;  %v16792_v39 = vpop.f32.mrf.mxu0  ;;  %v512_v40 = vadd.f32 %v16726_v36, %v18867_v15 }
 0x10e   :  { %v16515_v41 = vpack.c.bf16 %v1590_v32, %v1590_v32  ;;  %v1588_v42 = vmax.f32 %v1526_v35, 0.0  ;;  %v1537_v43 = vadd.f32 %v18876_v25, %v16792_v39  ;;  %v503_v44 = vpop.f32.mrf.mxu1 }
 0x10f   :  { %v566_v45 = vmax.f32 %v512_v40, 0.0  ;;  %v504_v46 = vadd.f32 %v503_v44, %v18867_v15  ;;  %v1528_v47 = vpop.f32.mrf.mxu0  ;;  %631 = vrot.lane.b32.xlu0 %v16467_v37, %s18414_s19  ;;  %v16465_v54 = vpack.c.bf16 %v563_v38, %v563_v38 }
 0x110   :  { %1670 = vst.msk [vmem:[#allocation2 + $0x14] sm:$0xf] %vm331_vm2, %v16515_v41  ;;  %v16513_v50 = vpack.c.bf16 %v1588_v42, %v1588_v42  ;;  %v1591_v51 = vmax.f32 %v1537_v43, 0.0  ;;  %v1529_v52 = vadd.f32 %v18876_v25, %v1528_v47  ;;  %v16729_v53 = vpop.f32.mrf.mxu1 }
 0x111   :  { %v16468_v55 = vpack.c.bf16 %v566_v45, %v566_v45  ;;  %v564_v56 = vmax.f32 %v504_v46, 0.0  ;;  %v525_v57 = vadd.f32 %v16729_v53, %v18867_v15  ;;  %v16795_v58 = vpop.f32.mrf.mxu0 }
 0x112   :  { %1668 = vst.msk [vmem:[#allocation2 + $0x4] sm:$0xf] %vm331_vm2, %v16513_v50  ;;  %v16516_v59 = vpack.c.bf16 %v1591_v51, %v1591_v51  ;;  %v1589_v61 = vmax.f32 %v1529_v52, 0.0  ;;  %v1550_v62 = vadd.f32 %v18876_v25, %v16795_v58  ;;  %v516_v0 = vpop.f32.mrf.mxu1 }
 0x113   :  { %v569_v1 = vmax.f32 %v525_v57, 0.0  ;;  %v517_v2 = vadd.f32 %v516_v0, %v18867_v15  ;;  %v1541_v3 = vpop.f32.mrf.mxu0  ;;  %633 = vrot.lane.b32.xlu1 %v16468_v55, %s18414_s19  ;;  %627 = vrot.lane.b32.xlu0 %v16465_v54, %s18414_s19  ;;  %v16466_v9 = vpack.c.bf16 %v564_v56, %v564_v56  ;;  %v18926_v0 = vpop.permute.xlu0 %1769 }
 0x114   :  { %1671 = vst.msk [vmem:[#allocation2 + $0x1c] sm:$0xf] %vm331_vm2, %v16516_v59  ;;  %v16514_v4 = vpack.c.bf16 %v1589_v61, %v1589_v61  ;;  %v1594_v5 = vmax.f32 %v1550_v62, 0.0  ;;  %v1542_v7 = vadd.f32 %v18876_v25, %v1541_v3  ;;  %v16730_v8 = vpop.f32.mrf.mxu1 }
 0x115   :  { %v16471_v10 = vpack.c.bf16 %v569_v1, %v569_v1  ;;  %v567_v12 = vmax.f32 %v517_v2, 0.0  ;;  %v528_v13 = vadd.f32 %v16730_v8, %v18867_v15  ;;  %v16796_v14 = vpop.f32.mrf.mxu0 }
 0x116   :  { %1669 = vst.msk [vmem:[#allocation2 + $0xc] sm:$0xf] %vm331_vm2, %v16514_v4  ;;  %v16519_v16 = vpack.c.bf16 %v1594_v5, %v1594_v5  ;;  %v1592_v17 = vmax.f32 %v1542_v7, 0.0  ;;  %v1553_v18 = vadd.f32 %v18876_v25, %v16796_v14  ;;  %v519_v20 = vpop.f32.mrf.mxu1 }
 0x117   :  { %v570_v21 = vmax.f32 %v528_v13, 0.0  ;;  %v520_v22 = vadd.f32 %v519_v20, %v18867_v15  ;;  %v1544_v23 = vpop.f32.mrf.mxu0  ;;  %629 = vrot.lane.b32.xlu1 %v16466_v9, %s18414_s19  ;;  %639 = vrot.lane.b32.xlu0 %v16471_v10, %s18414_s19  ;;  %v16469_v29 = vpack.c.bf16 %v567_v12, %v567_v12  ;;  %v18941_v20 = vpop.permute.xlu1 %2109 }
 0x118   :  { %1674 = vst.msk [vmem:[#allocation2 + $0x34] sm:$0xf] %vm331_vm2, %v16519_v16  ;;  %v16517_v24 = vpack.c.bf16 %v1592_v17, %v1592_v17  ;;  %v1595_v26 = vmax.f32 %v1553_v18, 0.0  ;;  %v1545_v27 = vadd.f32 %v18876_v25, %v1544_v23  ;;  %v18906_v28 = vpop.f32.mrf.mxu1  ;;  %v18943_v23 = vpop.permute.xlu0 %1122 }
 0x119   :  { %v16472_v48 = vpack.c.bf16 %v570_v21, %v570_v21  ;;  %v568_v30 = vmax.f32 %v520_v22, 0.0  ;;  %v16799_v31 = vpop.f32.mrf.mxu0  ;;  %v1683_v21 = vld [vmem:[#allocation2 + $0x7c] sm:$0x1] }
 0x11a   :  { %1672 = vst.msk [vmem:[#allocation2 + $0x24] sm:$0xf] %vm331_vm2, %v16517_v24  ;;  %v16520_v32 = vpack.c.bf16 %v1595_v26, %v1595_v26  ;;  %v1593_v35 = vmax.f32 %v1545_v27, 0.0  ;;  %v1566_v36 = vadd.f32 %v18876_v25, %v16799_v31  ;;  %v532_v37 = vpop.f32.mrf.mxu1 }
 0x11b   :  { %v533_v38 = vadd.f32 %v532_v37, %v18867_v15  ;;  %v1557_v39 = vpop.f32.mrf.mxu0  ;;  %641 = vrot.lane.b32.xlu1 %v16472_v48, %s18414_s19  ;;  %635 = vrot.lane.b32.xlu0 %v16469_v29, %s18414_s19  ;;  %v16470_v44 = vpack.c.bf16 %v568_v30, %v568_v30 }
 0x11c   :  { %1675 = vst.msk [vmem:[#allocation2 + $0x3c] sm:$0xf] %vm331_vm2, %v16520_v32  ;;  %v16518_v40 = vpack.c.bf16 %v1593_v35, %v1593_v35  ;;  %v1598_v41 = vmax.f32 %v1566_v36, 0.0  ;;  %v1558_v42 = vadd.f32 %v18876_v25, %v1557_v39  ;;  %v18915_v43 = vpop.f32.mrf.mxu1 }
 0x11d   :  { %v571_v45 = vmax.f32 %v533_v38, 0.0  ;;  %v16800_v46 = vpop.f32.mrf.mxu0 }
 0x11e   :  { %1673 = vst.msk [vmem:[#allocation2 + $0x2c] sm:$0xf] %vm331_vm2, %v16518_v40  ;;  %v16523_v47 = vpack.c.bf16 %v1598_v41, %v1598_v41  ;;  %v1596_v50 = vmax.f32 %v1558_v42, 0.0  ;;  %v1569_v51 = vadd.f32 %v18876_v25, %v16800_v46  ;;  %v535_v52 = vpop.f32.mrf.mxu1 }
 0x11f   :  { %v16473_v53 = vpack.c.bf16 %v571_v45, %v571_v45  ;;  %v536_v54 = vadd.f32 %v535_v52, %v18867_v15  ;;  %v1560_v55 = vpop.f32.mrf.mxu0  ;;  %637 = vrot.lane.b32.xlu1 %v16470_v44, %s18414_s19 }
 0x120   :  { %1678 = vst.msk [vmem:[#allocation2 + $0x54] sm:$0xf] %vm331_vm2, %v16523_v47  ;;  %v16521_v56 = vpack.c.bf16 %v1596_v50, %v1596_v50  ;;  %v1599_v57 = vmax.f32 %v1569_v51, 0.0  ;;  %v1561_v58 = vadd.f32 %v18876_v25, %v1560_v55  ;;  %v18923_v59 = vpop.f32.mrf.mxu1 }
 0x121   :  { %v572_v61 = vmax.f32 %v536_v54, 0.0  ;;  %v16803_v62 = vpop.f32.mrf.mxu0  ;;  %643 = vrot.lane.b32.xlu0 %v16473_v53, %s18414_s19 }
 0x122   :  { %1676 = vst.msk [vmem:[#allocation2 + $0x44] sm:$0xf] %vm331_vm2, %v16521_v56  ;;  %v16524_v1 = vpack.c.bf16 %v1599_v57, %v1599_v57  ;;  %v1597_v2 = vmax.f32 %v1561_v58, 0.0  ;;  %v1582_v3 = vadd.f32 %v18876_v25, %v16803_v62  ;;  %v18930_v4 = vpop.f32.mrf.mxu1 }
 0x123   :  { %v16474_v5 = vpack.c.bf16 %v572_v61, %v572_v61  ;;  %v1573_v7 = vpop.f32.mrf.mxu0 }
 0x124   :  { %1679 = vst.msk [vmem:[#allocation2 + $0x5c] sm:$0xf] %vm331_vm2, %v16524_v1  ;;  %v16522_v8 = vpack.c.bf16 %v1597_v2, %v1597_v2  ;;  %v1602_v9 = vmax.f32 %v1582_v3, 0.0  ;;  %v1574_v10 = vadd.f32 %v18876_v25, %v1573_v7  ;;  %v18934_v12 = vpop.f32.mrf.mxu1 }
 0x125   :  { %v16804_v13 = vpop.f32.mrf.mxu0  ;;  %645 = vrot.lane.b32.xlu1 %v16474_v5, %s18414_s19 }
 0x126   :  { %1677 = vst.msk [vmem:[#allocation2 + $0x4c] sm:$0xf] %vm331_vm2, %v16522_v8  ;;  %v16527_v14 = vpack.c.bf16 %v1602_v9, %v1602_v9  ;;  %v1600_v16 = vmax.f32 %v1574_v10, 0.0  ;;  %v1585_v17 = vadd.f32 %v18876_v25, %v16804_v13  ;;  %v18939_v18 = vpop.f32.mrf.mxu1  ;;  %v16976_v8 = vld [vmem:[#allocation4 + $0x74] ss:$8 sps:$4 sm:$0xff]  }
 0x127   :  { %v1576_v22 = vpop.f32.mrf.mxu0  ;;  %v16974_v10 = vld [vmem:[#allocation4 + $0x70] ss:$8 sps:$4 sm:$0xff]   ;;  %6186 = vmatprep.subr.bf16.mxu0 %v16976_v8 }
 0x128   :  { %1682 = vst.msk [vmem:[#allocation2 + $0x74] sm:$0xf] %vm331_vm2, %v16527_v14  ;;  %v16525_v24 = vpack.c.bf16 %v1600_v16, %v1600_v16  ;;  %v1603_v26 = vmax.f32 %v1585_v17, 0.0  ;;  %v1577_v27 = vadd.f32 %v18876_v25, %v1576_v22  ;;  %v16769_v29 = vpop.f32.mrf.mxu1  ;;  %6187 = vmatpush1.bf16.msra.mxu0 %v16974_v10  ;;  %v16992_v8 = vld [vmem:[#allocation4 + $0x30] ss:$8 sps:$4 sm:$0xff]  }
 0x129   :  { %v16835_v48 = vpop.f32.mrf.mxu0  ;;  %v1195_v36 = vadd.f32 %v16769_v29, %v18943_v23 }
 0x12a   :  { %1680 = vst.msk [vmem:[#allocation2 + $0x64] sm:$0xf] %vm331_vm2, %v16525_v24  ;;  %v16528_v30 = vpack.c.bf16 %v1603_v26, %v1603_v26  ;;  %v1601_v31 = vmax.f32 %v1577_v27, 0.0  ;;  %v2182_v32 = vadd.f32 %v16835_v48, %v18941_v20  ;;  %v1186_v35 = vpop.f32.mrf.mxu1  ;;  %v16979_v26 = vld [vmem:[#allocation4 + $0x64] ss:$8 sps:$4 sm:$0xff]  }
 0x12b   :  { %v2173_v37 = vpop.f32.mrf.mxu0  ;;  %v1251_v50 = vmax.f32 %v1195_v36, 0.0  ;;  %v1187_v57 = vadd.f32 %v1186_v35, %v18943_v23  ;;  %v16977_v48 = vld [vmem:[#allocation4 + $0x60] ss:$8 sps:$4 sm:$0xff]   ;;  %6188 = vmatprep.subr.bf16.mxu0 %v16979_v26 }
 0x12c   :  { %v1684_v38 = vsel %vm18850_vm5, %v16528_v30, %v1683_v21  ;;  %v16526_v39 = vpack.c.bf16 %v1601_v31, %v1601_v31  ;;  %v2238_v40 = vmax.f32 %v2182_v32, 0.0  ;;  %v2174_v41 = vadd.f32 %v2173_v37, %v18941_v20  ;;  %v16770_v25 = vpop.f32.mrf.mxu1  ;;  %6189 = vmatpush1.bf16.msra.mxu0 %v16977_v48  ;;  %v16998_v48 = vld [vmem:[#allocation4 + $0x20] ss:$8 sps:$4 sm:$0xff]  }
 0x12d   :  { %1685 = vst [vmem:[#allocation2 + $0x7c] sm:$0x1] %v1684_v38  ;;  %v16836_v42 = vpop.f32.mrf.mxu0  ;;  %v1198_v45 = vadd.f32 %v16770_v25, %v18943_v23  ;;  %v16499_v1 = vpack.c.bf16 %v1251_v50, %v1251_v50  ;;  %v1249_v13 = vmax.f32 %v1187_v57, 0.0  ;;  %v16982_v38 = vld [vmem:[#allocation4 + $0x54] ss:$8 sps:$4 sm:$0xff]  }
 0x12e   :  { %1681 = vst.msk [vmem:[#allocation2 + $0x6c] sm:$0xf] %vm331_vm2, %v16526_v39  ;;  %v16547_v44 = vpack.c.bf16 %v2238_v40, %v2238_v40  ;;  %v2185_v46 = vadd.f32 %v16836_v42, %v18941_v20  ;;  %v1189_v47 = vpop.f32.mrf.mxu1  ;;  %v2236_v52 = vmax.f32 %v2174_v41, 0.0  ;;  %v16980_v40 = vld [vmem:[#allocation4 + $0x50] ss:$8 sps:$4 sm:$0xff]   ;;  %6190 = vmatprep.subr.bf16.mxu0 %v16982_v38 }
 0x12f   :  { %v2176_v51 = vpop.f32.mrf.mxu0  ;;  %v1252_v58 = vmax.f32 %v1198_v45, 0.0  ;;  %v1190_v16 = vadd.f32 %v1189_v47, %v18943_v23  ;;  %v16497_v30 = vpack.c.bf16 %v1249_v13, %v1249_v13  ;;  %v16985_v41 = vld [vmem:[#allocation4 + $0x174] ss:$8 sps:$4 sm:$0xff]   ;;  %v16983_v47 = vld [vmem:[#allocation4 + $0x170] ss:$8 sps:$4 sm:$0xff]  }
 0x130   :  { %v2239_v53 = vmax.f32 %v2185_v46, 0.0  ;;  %v2177_v54 = vadd.f32 %v2176_v51, %v18941_v20  ;;  %2304 = vrot.lane.b32.xlu0 %v16547_v44, %s18412_s13  ;;  %v16773_v55 = vpop.f32.mrf.mxu1  ;;  %v16545_v2 = vpack.c.bf16 %v2236_v52, %v2236_v52  ;;  %6191 = vmatpush1.bf16.msra.mxu0 %v16980_v40  ;;  %v16988_v51 = vld [vmem:[#allocation4 + $0x44] ss:$8 sps:$4 sm:$0xff]   ;;  %v17001_v38 = vld [vmem:[#allocation4 + $0x140] ss:$8 sps:$4 sm:$0xff]  }
 0x131   :  { %v16839_v56 = vpop.f32.mrf.mxu0  ;;  %v16500_v14 = vpack.c.bf16 %v1252_v58, %v1252_v58  ;;  %v1211_v27 = vadd.f32 %v16773_v55, %v18943_v23  ;;  %v1250_v31 = vmax.f32 %v1190_v16, 0.0  ;;  %6287 = vmatprep.subr.bf16.mxu1 %v16985_v41  ;;  %v16986_v55 = vld [vmem:[#allocation4 + $0x40] ss:$8 sps:$4 sm:$0xff]   ;;  %6192 = vmatprep.subr.bf16.mxu0 %v16988_v51 }
 0x132   :  { %v16548_v61 = vpack.c.bf16 %v2239_v53, %v2239_v53  ;;  %v1202_v62 = vpop.f32.mrf.mxu1  ;;  %v2237_v3 = vmax.f32 %v2177_v54, 0.0  ;;  %v2198_v5 = vadd.f32 %v16839_v56, %v18941_v20  ;;  %6288 = vmatpush1.bf16.msra.mxu1 %v16983_v47  ;;  %v16991_v56 = vld [vmem:[#allocation4 + $0x164] ss:$8 sps:$4 sm:$0xff]   ;;  %v17009_v47 = vld [vmem:[#allocation4 + $0x134] ss:$8 sps:$4 sm:$0xff]  }
 0x133   :  { %v2189_v9 = vpop.f32.mrf.mxu0  ;;  %v1255_v39 = vmax.f32 %v1211_v27, 0.0  ;;  %v16498_v25 = vpack.c.bf16 %v1250_v31, %v1250_v31  ;;  %v1203_v53 = vadd.f32 %v1202_v62, %v18943_v23  ;;  %6289 = vmatprep.subr.bf16.mxu1 %v16991_v56  ;;  %v17000_v27 = vld [vmem:[#allocation4 + $0x24] ss:$8 sps:$4 sm:$0xff]  }
 0x134   :  { %2306 = vrot.lane.b32.xlu1 %v16548_v61, %s18412_s13  ;;  %1317 = vrot.lane.b32.xlu0 %v16499_v1, %s18413_s16  ;;  %v16774_v7 = vpop.f32.mrf.mxu1  ;;  %v16546_v21 = vpack.c.bf16 %v2237_v3, %v2237_v3  ;;  %v2242_v22 = vmax.f32 %v2198_v5, 0.0  ;;  %v2190_v42 = vadd.f32 %v2189_v9, %v18941_v20  ;;  %v16989_v3 = vld [vmem:[#allocation4 + $0x160] ss:$8 sps:$4 sm:$0xff]   ;;  %v16994_v5 = vld [vmem:[#allocation4 + $0x34] ss:$8 sps:$4 sm:$0xff]  }
 0x135   :  { %v16840_v29 = vpop.f32.mrf.mxu0  ;;  %v1214_v44 = vadd.f32 %v16774_v7, %v18943_v23  ;;  %v16503_v52 = vpack.c.bf16 %v1255_v39, %v1255_v39  ;;  %6193 = vmatpush1.bf16.msra.mxu0 %v16986_v55  ;;  %v1253_v7 = vmax.f32 %v1203_v53, 0.0  ;;  %v16997_v9 = vld [vmem:[#allocation4 + $0x154] ss:$8 sps:$4 sm:$0xff]  }
 0x136   :  { %v18963_v17 = vpop.f32.mrf.mxu1  ;;  %v2201_v32 = vadd.f32 %v16840_v29, %v18941_v20  ;;  %v16551_v36 = vpack.c.bf16 %v2242_v22, %v2242_v22  ;;  %v2240_v57 = vmax.f32 %v2190_v42, 0.0  ;;  %6290 = vmatpush1.bf16.msra.mxu1 %v16989_v3  ;;  %6194 = vmatprep.subr.bf16.mxu0 %v16994_v5  ;;  %v16995_v22 = vld [vmem:[#allocation4 + $0x150] ss:$8 sps:$4 sm:$0xff]   ;;  %v17010_v3 = vld [vmem:[#allocation4] ss:$8 sps:$4 sm:$0xff]  }
 0x137   :  { %v2192_v54 = vpop.f32.mrf.mxu0  ;;  %v1256_v58 = vmax.f32 %v1214_v44, 0.0  ;;  %6291 = vmatprep.subr.bf16.mxu1 %v16997_v9  ;;  %v16501_v31 = vpack.c.bf16 %v1253_v7, %v1253_v7  ;;  %v17015_v5 = vld [vmem:[#allocation4 + $0x124] ss:$8 sps:$4 sm:$0xff]  }
 0x138   :  { %1319 = vrot.lane.b32.xlu1 %v16500_v14, %s18413_s16  ;;  %2300 = vrot.lane.b32.xlu0 %v16545_v2, %s18412_s13  ;;  %v18967_v24 = vpop.f32.mrf.mxu1  ;;  %v2243_v45 = vmax.f32 %v2201_v32, 0.0  ;;  %v2193_v1 = vadd.f32 %v2192_v54, %v18941_v20  ;;  %v16549_v10 = vpack.c.bf16 %v2240_v57, %v2240_v57  ;;  %v1206_v14 = vadd.f32 %v18963_v17, %v18943_v23  ;;  %v17007_v54 = vld [vmem:[#allocation4 + $0x130] ss:$8 sps:$4 sm:$0xff]  }
 0x139   :  { %v16504_v13 = vpack.c.bf16 %v1256_v58, %v1256_v58  ;;  %6195 = vmatpush1.bf16.msra.mxu0 %v16992_v8  ;;  %v17012_v58 = vld [vmem:[#allocation4 + $0x4] ss:$8 sps:$4 sm:$0xff]  }
 0x13a   :  { %v18971_v35 = vpop.f32.mrf.mxu1  ;;  %v16552_v61 = vpack.c.bf16 %v2243_v45, %v2243_v45  ;;  %v2241_v16 = vmax.f32 %v2193_v1, 0.0  ;;  %6292 = vmatpush1.bf16.msra.mxu1 %v16995_v22  ;;  %v1254_v17 = vmax.f32 %v1206_v14, 0.0  ;;  %6196 = vmatprep.subr.bf16.mxu0 %v17000_v27  ;;  %v17004_v45 = vld [vmem:[#allocation4 + $0x10] ss:$8 sps:$4 sm:$0xff]   ;;  %v17018_v22 = vld [vmem:[#allocation4 + $0xf4] ss:$8 sps:$4 sm:$0xff]  }
 0x13c   :  { %2302 = vrot.lane.b32.xlu1 %v16546_v21, %s18412_s13  ;;  %1313 = vrot.lane.b32.xlu0 %v16497_v30, %s18413_s16  ;;  %v18975_v37 = vpop.f32.mrf.mxu1  ;;  %v17003_v30 = vld [vmem:[#allocation4 + $0x144] ss:$8 sps:$4 sm:$0xff]   ;;  %v16550_v32 = vpack.c.bf16 %v2241_v16, %v2241_v16  ;;  %v16502_v51 = vpack.c.bf16 %v1254_v17, %v1254_v17 }
 0x13d   :  { %6197 = vmatpush1.bf16.msra.mxu0 %v16998_v48  ;;  %6293 = vmatprep.subr.bf16.mxu1 %v17003_v30  ;;  %v17021_v48 = vld [vmem:[#allocation4 + $0x114] ss:$8 sps:$4 sm:$0xff]  }
 0x13e   :  { %v18979_v46 = vpop.f32.mrf.mxu1  ;;  %6294 = vmatpush1.bf16.msra.mxu1 %v17001_v38 }
 0x13f   :  { %6295 = vmatprep.subr.bf16.mxu1 %v17009_v47  ;;  %v17027_v47 = vld [vmem:[#allocation4 + $0x104] ss:$8 sps:$4 sm:$0xff]  }
 0x140   :  { %1315 = vrot.lane.b32.xlu1 %v16498_v25, %s18413_s16  ;;  %2312 = vrot.lane.b32.xlu0 %v16551_v36, %s18412_s13  ;;  %v18983_v50 = vpop.f32.mrf.mxu1  ;;  %v17006_v25 = vld [vmem:[#allocation4 + $0x14] ss:$8 sps:$4 sm:$0xff]  }
 0x141   :  { %6198 = vmatprep.subr.bf16.mxu0 %v17006_v25 }
 0x142   :  { %v18987_v2 = vpop.f32.mrf.mxu1  ;;  %6199 = vmatpush1.bf16.msra.mxu0 %v17004_v45  ;;  %6296 = vmatpush1.bf16.msra.mxu1 %v17007_v54 }
 0x143   :  { %6200 = vmatprep.subr.bf16.mxu0 %v17012_v58  ;;  %6297 = vmatprep.subr.bf16.mxu1 %v17015_v5  ;;  %v17028_v58 = vld [vmem:[#allocation4 + $0xd0] ss:$8 sps:$4 sm:$0xff]  }
 0x144   :  { %2314 = vrot.lane.b32.xlu1 %v16552_v61, %s18412_s13  ;;  %1325 = vrot.lane.b32.xlu0 %v16503_v52, %s18413_s16  ;;  %v18991_v62 = vpop.f32.mrf.mxu1 }
 0x146   :  { %v18995_v21 = vpop.f32.mrf.mxu1  ;;  %6201 = vmatpush1.bf16.msra.mxu0 %v17010_v3 }
 0x147   :  { %6202 = vmatprep.subr.bf16.mxu0 %v17018_v22 }
 0x148   :  { %1327 = vrot.lane.b32.xlu1 %v16504_v13, %s18413_s16  ;;  %2308 = vrot.lane.b32.xlu0 %v16549_v10, %s18412_s13  ;;  %v16813_v26 = vpop.f32.mrf.mxu1  ;;  %v17013_v10 = vld [vmem:[#allocation4 + $0x120] ss:$8 sps:$4 sm:$0xff]  }
 0x149   :  { %v1842_v29 = vadd.f32 %v16813_v26, %v18926_v0  ;;  %6298 = vmatpush1.bf16.msra.mxu1 %v17013_v10 }
 0x14a   :  { %v1833_v36 = vpop.f32.mrf.mxu1  ;;  %6299 = vmatprep.subr.bf16.mxu1 %v17021_v48  ;;  %v17034_v48 = vld [vmem:[#allocation4 + $0xc0] ss:$8 sps:$4 sm:$0xff]  }
 0x14b   :  { %v1898_v39 = vmax.f32 %v1842_v29, 0.0  ;;  %v1834_v40 = vadd.f32 %v1833_v36, %v18926_v0  ;;  %v17016_v29 = vld [vmem:[#allocation4 + $0xf0] ss:$8 sps:$4 sm:$0xff]  }
 0x14c   :  { %2310 = vrot.lane.b32.xlu1 %v16550_v32, %s18412_s13  ;;  %1321 = vrot.lane.b32.xlu0 %v16501_v31, %s18413_s16  ;;  %v16814_v41 = vpop.f32.mrf.mxu1  ;;  %v17019_v32 = vld [vmem:[#allocation4 + $0x110] ss:$8 sps:$4 sm:$0xff]  }
 0x14d   :  { %v16531_v42 = vpack.c.bf16 %v1898_v39, %v1898_v39  ;;  %v1845_v44 = vadd.f32 %v16814_v41, %v18926_v0  ;;  %v1896_v52 = vmax.f32 %v1834_v40, 0.0  ;;  %6203 = vmatpush2.bf16.msra.mxu0 %v17016_v29  ;;  %v17022_v40 = vld [vmem:[#allocation4 + $0xe0] ss:$8 sps:$4 sm:$0xff]   ;;  %v17024_v41 = vld [vmem:[#allocation4 + $0xe4] ss:$8 sps:$4 sm:$0xff]   ;;  %6300 = vmatpush1.bf16.msra.mxu1 %v17019_v32 }
 0x14e   :  { %v1836_v53 = vpop.f32.mrf.mxu1  ;;  %6204 = vmatprep.subr.bf16.mxu0 %v17024_v41  ;;  %6301 = vmatprep.subr.bf16.mxu1 %v17027_v47  ;;  %v17037_v32 = vld [vmem:[#allocation4 + $0x1e0] ss:$8 sps:$4 sm:$0xff]  }
 0x14f   :  { %v1899_v55 = vmax.f32 %v1845_v44, 0.0  ;;  %v1837_v56 = vadd.f32 %v1836_v53, %v18926_v0  ;;  %v16529_v7 = vpack.c.bf16 %v1896_v52, %v1896_v52  ;;  %v17025_v52 = vld [vmem:[#allocation4 + $0x100] ss:$8 sps:$4 sm:$0xff]  }
 0x150   :  { %1323 = vrot.lane.b32.xlu1 %v16502_v51, %s18413_s16  ;;  %1964 = vrot.lane.b32.xlu0 %v16531_v42, %s18414_s19  ;;  %v16817_v57 = vpop.f32.mrf.mxu1 }
 0x151   :  { %v16532_v61 = vpack.c.bf16 %v1899_v55, %v1899_v55  ;;  %v1858_v1 = vadd.f32 %v16817_v57, %v18926_v0  ;;  %v1897_v8 = vmax.f32 %v1837_v56, 0.0  ;;  %6205 = vmatpush2.bf16.msra.mxu0 %v17022_v40  ;;  %v17030_v55 = vld [vmem:[#allocation4 + $0xd4] ss:$8 sps:$4 sm:$0xff]   ;;  %6302 = vmatpush1.bf16.msra.mxu1 %v17025_v52 }
 0x152   :  { %v1849_v9 = vpop.f32.mrf.mxu1  ;;  %6206 = vmatprep.subr.bf16.mxu0 %v17030_v55  ;;  %v17045_v52 = vld [vmem:[#allocation4 + $0x1d4] ss:$8 sps:$4 sm:$0xff]  }
 0x153   :  { %v1902_v13 = vmax.f32 %v1858_v1, 0.0  ;;  %v1850_v14 = vadd.f32 %v1849_v9, %v18926_v0  ;;  %v16530_v30 = vpack.c.bf16 %v1897_v8, %v1897_v8  ;;  %v17033_v9 = vld [vmem:[#allocation4 + $0x1f4] ss:$8 sps:$4 sm:$0xff]  }
 0x154   :  { %1966 = vrot.lane.b32.xlu1 %v16532_v61, %s18414_s19  ;;  %1960 = vrot.lane.b32.xlu0 %v16529_v7, %s18414_s19  ;;  %v16818_v16 = vpop.f32.mrf.mxu1  ;;  %v19027_v7 = vpop.f32.mrf.mxu0 }
 0x155   :  { %v16535_v26 = vpack.c.bf16 %v1902_v13, %v1902_v13  ;;  %v1861_v27 = vadd.f32 %v16818_v16, %v18926_v0  ;;  %v1900_v31 = vmax.f32 %v1850_v14, 0.0  ;;  %6207 = vmatpush2.bf16.msra.mxu0 %v17028_v58  ;;  %v17031_v13 = vld [vmem:[#allocation4 + $0x1f0] ss:$8 sps:$4 sm:$0xff]   ;;  %6303 = vmatprep.subr.bf16.mxu1 %v17033_v9  ;;  %v19034_v16 = vpop.permute.xlu1 %2449  ;;  %v17048_v9 = vld [vmem:[#allocation4 + $0xa4] ss:$8 sps:$4 sm:$0xff]  }
 0x156   :  { %v1852_v17 = vpop.f32.mrf.mxu1  ;;  %6304 = vmatpush2.bf16.msra.mxu1 %v17031_v13 }
 0x157   :  { %v1903_v36 = vmax.f32 %v1861_v27, 0.0  ;;  %v1853_v38 = vadd.f32 %v1852_v17, %v18926_v0  ;;  %v16533_v42 = vpack.c.bf16 %v1900_v31, %v1900_v31  ;;  %v2205_v27 = vpop.f32.mrf.mxu0  ;;  %v17039_v31 = vld [vmem:[#allocation4 + $0x1e4] ss:$8 sps:$4 sm:$0xff]  }
 0x158   :  { %1962 = vrot.lane.b32.xlu1 %v16530_v30, %s18414_s19  ;;  %1972 = vrot.lane.b32.xlu0 %v16535_v26, %s18414_s19  ;;  %v19015_v39 = vpop.f32.mrf.mxu1  ;;  %v17036_v26 = vld [vmem:[#allocation4 + $0xc4] ss:$8 sps:$4 sm:$0xff]  }
 0x159   :  { %v16536_v25 = vpack.c.bf16 %v1903_v36, %v1903_v36  ;;  %v1901_v44 = vmax.f32 %v1853_v38, 0.0  ;;  %6208 = vmatprep.subr.bf16.mxu0 %v17036_v26  ;;  %v19041_v36 = vpop.f32.mrf.mxu0  ;;  %6305 = vmatprep.subr.bf16.mxu1 %v17039_v31  ;;  %v17046_v26 = vld [vmem:[#allocation4 + $0xa0] ss:$8 sps:$4 sm:$0xff]  }
 0x15a   :  { %v1865_v45 = vpop.f32.mrf.mxu1  ;;  %6209 = vmatpush2.bf16.msra.mxu0 %v17034_v48  ;;  %6306 = vmatpush2.bf16.msra.mxu1 %v17037_v32 }
 0x15b   :  { %v1866_v51 = vadd.f32 %v1865_v45, %v18926_v0  ;;  %v16534_v56 = vpack.c.bf16 %v1901_v44, %v1901_v44  ;;  %v17042_v44 = vld [vmem:[#allocation4 + $0xb4] ss:$8 sps:$4 sm:$0xff]   ;;  %v2206_v45 = vadd.f32 %v2205_v27, %v18941_v20  ;;  %v2208_v58 = vpop.f32.mrf.mxu0  ;;  %6307 = vmatprep.subr.bf16.mxu1 %v17045_v52  ;;  %v17051_v27 = vld [vmem:[#allocation4 + $0x1c4] ss:$8 sps:$4 sm:$0xff]   ;;  %v1222_v52 = vadd.f32 %v18979_v46, %v18943_v23 }
 0x15c   :  { %1974 = vrot.lane.b32.xlu1 %v16536_v25, %s18414_s19  ;;  %1968 = vrot.lane.b32.xlu0 %v16533_v42, %s18414_s19  ;;  %v19020_v53 = vpop.f32.mrf.mxu1  ;;  %v2209_v48 = vadd.f32 %v2208_v58, %v18941_v20  ;;  %v544_v46 = vadd.f32 %v18915_v43, %v18867_v15 }
 0x15d   :  { %v1904_v54 = vmax.f32 %v1866_v51, 0.0  ;;  %v17040_v51 = vld [vmem:[#allocation4 + $0xb0] ss:$8 sps:$4 sm:$0xff]   ;;  %6210 = vmatprep.subr.bf16.mxu0 %v17042_v44  ;;  %v2244_v13 = vmax.f32 %v2206_v45, 0.0 }
 0x15e   :  { %v1868_v57 = vpop.f32.mrf.mxu1  ;;  %6211 = vmatpush2.bf16.msra.mxu0 %v17040_v51  ;;  %v17052_v45 = vld [vmem:[#allocation4 + $0x90] ss:$8 sps:$4 sm:$0xff]   ;;  %v574_v43 = vmax.f32 %v544_v46, 0.0 }
 0x15f   :  { %v16537_v61 = vpack.c.bf16 %v1904_v54, %v1904_v54  ;;  %v1869_v1 = vadd.f32 %v1868_v57, %v18926_v0  ;;  %v17043_v57 = vld [vmem:[#allocation4 + $0x1d0] ss:$8 sps:$4 sm:$0xff]   ;;  %6212 = vmatprep.subr.bf16.mxu0 %v17048_v9  ;;  %v16553_v51 = vpack.c.bf16 %v2244_v13, %v2244_v13  ;;  %v17063_v9 = vld [vmem:[#allocation4 + $0x1a4] ss:$8 sps:$4 sm:$0xff]   ;;  %v1258_v13 = vmax.f32 %v1222_v52, 0.0 }
 0x160   :  { %1970 = vrot.lane.b32.xlu1 %v16534_v56, %s18414_s19  ;;  %v19024_v3 = vpop.f32.mrf.mxu1  ;;  %6308 = vmatpush2.bf16.msra.mxu1 %v17043_v57  ;;  %v17067_v46 = vld [vmem:[#allocation4 + $0x190] ss:$8 sps:$4 sm:$0xff]  }
 0x161   :  { %v1905_v5 = vmax.f32 %v1869_v1, 0.0  ;;  %1976 = vrot.lane.b32.xlu0 %v16537_v61, %s18414_s19  ;;  %6309 = vmatprep.subr.bf16.mxu1 %v17051_v27  ;;  %v1874_v27 = vadd.f32 %v19015_v39, %v18926_v0 }
 0x162   :  { %v19029_v8 = vpop.f32.mrf.mxu1  ;;  %v19036_v22 = vpop.permute.xlu0 %974  ;;  %6213 = vmatpush2.bf16.msra.mxu0 %v17046_v26 }
 0x163   :  { %v16538_v10 = vpack.c.bf16 %v1905_v5, %v1905_v5 }
 0x164   :  { %v19031_v14 = vpop.f32.mrf.mxu1 }
 0x165   :  { %1978 = vrot.lane.b32.xlu1 %v16538_v10, %s18414_s19  ;;  %v1219_v10 = vadd.f32 %v18971_v35, %v18943_v23  ;;  %v17054_v35 = vld [vmem:[#allocation4 + $0x94] ss:$8 sps:$4 sm:$0xff]  }
 0x166   :  { %v19038_v29 = vpop.f32.mrf.mxu1  ;;  %v19043_v41 = vpop.permute.xlu1 %976  ;;  %6214 = vmatprep.subr.bf16.mxu0 %v17054_v35  ;;  %v16506_v35 = vpack.c.bf16 %v1258_v13, %v1258_v13 }
 0x167   :  { %v19046_v42 = vpop.permute.xlu0 %970  ;;  %v1257_v44 = vmax.f32 %v1219_v10, 0.0  ;;  %6215 = vmatpush2.bf16.msra.mxu0 %v17052_v45 }
 0x168   :  { %v16857_v30 = vpop.f32.mrf.mxu1 }
 0x169   :  { %v2522_v17 = vadd.f32 %v16857_v30, %v19034_v16  ;;  %v16505_v10 = vpack.c.bf16 %v1257_v44, %v1257_v44 }
 0x16a   :  { %v2513_v38 = vpop.f32.mrf.mxu1 }
 0x16b   :  { %v2578_v40 = vmax.f32 %v2522_v17, 0.0  ;;  %v2514_v25 = vadd.f32 %v2513_v38, %v19034_v16  ;;  %v19055_v17 = vpop.permute.xlu1 %972  ;;  %v19057_v38 = vpop.permute.xlu0 %982 }
 0x16c   :  { %v16858_v47 = vpop.f32.mrf.mxu1 }
 0x16d   :  { %v16563_v54 = vpack.c.bf16 %v2578_v40, %v2578_v40  ;;  %v2576_v55 = vmax.f32 %v2514_v25, 0.0  ;;  %v2525_v56 = vadd.f32 %v16858_v47, %v19034_v16  ;;  %v17049_v40 = vld [vmem:[#allocation4 + $0x1c0] ss:$8 sps:$4 sm:$0xff]   ;;  %v541_v25 = vadd.f32 %v18906_v28, %v18867_v15  ;;  %v17057_v47 = vld [vmem:[#allocation4 + $0x1b4] ss:$8 sps:$4 sm:$0xff]  }
 0x16e   :  { %v2516_v61 = vpop.f32.mrf.mxu1  ;;  %6310 = vmatpush2.bf16.msra.mxu1 %v17049_v40  ;;  %v17060_v28 = vld [vmem:[#allocation4 + $0x84] ss:$8 sps:$4 sm:$0xff]  }
 0x16f   :  { %v2579_v1 = vmax.f32 %v2525_v56, 0.0  ;;  %v2517_v5 = vadd.f32 %v2516_v61, %v19034_v16  ;;  %2644 = vrot.lane.b32.xlu0 %v16563_v54, %s18413_s16  ;;  %v16561_v30 = vpack.c.bf16 %v2576_v55, %v2576_v55  ;;  %v2245_v54 = vmax.f32 %v2209_v48, 0.0  ;;  %v17055_v56 = vld [vmem:[#allocation4 + $0x1b0] ss:$8 sps:$4 sm:$0xff]   ;;  %6311 = vmatprep.subr.bf16.mxu1 %v17057_v47  ;;  %v19065_v58 = vpop.permute.xlu1 %984  ;;  %v19067_v61 = vpop.permute.xlu0 %978  ;;  %v17061_v48 = vld [vmem:[#allocation4 + $0x1a0] ss:$8 sps:$4 sm:$0xff]  }
 0x170   :  { %v16861_v57 = vpop.f32.mrf.mxu1  ;;  %6216 = vmatprep.subr.bf16.mxu0 %v17060_v28  ;;  %v16476_v47 = vpack.c.bf16 %v574_v43, %v574_v43  ;;  %v17069_v28 = vld [vmem:[#allocation4 + $0x194] ss:$8 sps:$4 sm:$0xff]  }
 0x171   :  { %v16564_v31 = vpack.c.bf16 %v2579_v1, %v2579_v1  ;;  %v2577_v32 = vmax.f32 %v2517_v5, 0.0  ;;  %v573_v1 = vmax.f32 %v541_v25, 0.0  ;;  %v17058_v5 = vld [vmem:[#allocation4 + $0x80] ss:$8 sps:$4 sm:$0xff]   ;;  %v16554_v26 = vpack.c.bf16 %v2245_v54, %v2245_v54 }
 0x172   :  { %6312 = vmatpush2.bf16.msra.mxu1 %v17055_v56  ;;  %6217 = vmatpush2.bf16.msra.mxu0 %v17058_v5  ;;  %v1906_v25 = vmax.f32 %v1874_v27, 0.0  ;;  %v2538_v39 = vadd.f32 %v16861_v57, %v19034_v16  ;;  %v884_v5 = vadd.f32 %v18832_v33, %v18801_v34 }
 0x173   :  { %2646 = vrot.lane.b32.xlu1 %v16564_v31, %s18413_s16  ;;  %2640 = vrot.lane.b32.xlu0 %v16561_v30, %s18413_s16  ;;  %v16562_v55 = vpack.c.bf16 %v2577_v32, %v2577_v32  ;;  %v2529_v30 = vpop.f32.mrf.mxu1  ;;  %v1877_v32 = vadd.f32 %v19020_v53, %v18926_v0  ;;  %v16475_v40 = vpack.c.bf16 %v573_v1, %v573_v1  ;;  %v19082_v44 = vpop.permute.xlu1 %980 }
 0x174   :  { %6313 = vmatprep.subr.bf16.mxu1 %v17063_v9  ;;  %v19077_v31 = vpop.permute.xlu0 %986  ;;  %v16539_v52 = vpack.c.bf16 %v1906_v25, %v1906_v25  ;;  %v2582_v54 = vmax.f32 %v2538_v39, 0.0  ;;  %v2530_v53 = vadd.f32 %v2529_v30, %v19034_v16  ;;  %v916_v33 = vmax.f32 %v884_v5, 0.0 }
 0x175   :  { %v16862_v45 = vpop.f32.mrf.mxu1  ;;  %v2214_v25 = vadd.f32 %v19027_v7, %v18941_v20  ;;  %v1227_v7 = vadd.f32 %v18967_v24, %v18943_v23 }
 0x176   :  { %6314 = vmatpush2.bf16.msra.mxu1 %v17061_v48  ;;  %v16567_v13 = vpack.c.bf16 %v2582_v54, %v2582_v54 }
 0x177   :  { %2642 = vrot.lane.b32.xlu1 %v16562_v55, %s18413_s16  ;;  %2316 = vrot.lane.b32.xlu0 %v16553_v51, %s18412_s13  ;;  %v1907_v51 = vmax.f32 %v1877_v32, 0.0  ;;  %v2541_v55 = vadd.f32 %v16862_v45, %v19034_v16  ;;  %v2532_v1 = vpop.f32.mrf.mxu1  ;;  %v17075_v32 = vld [vmem:[#allocation4 + $0x184] ss:$8 sps:$4 sm:$0xff]   ;;  %v1259_v24 = vmax.f32 %v1227_v7, 0.0  ;;  %v1235_v7 = vadd.f32 %v18987_v2, %v18943_v23 }
 0x178   :  { %v19088_v56 = vpop.permute.xlu1 %988  ;;  %6315 = vmatprep.subr.bf16.mxu1 %v17069_v28  ;;  %v2533_v48 = vadd.f32 %v2532_v1, %v19034_v16 }
 0x179   :  { %v16540_v9 = vpack.c.bf16 %v1907_v51, %v1907_v51  ;;  %v2583_v27 = vmax.f32 %v2541_v55, 0.0  ;;  %v2217_v55 = vadd.f32 %v19041_v36, %v18941_v20  ;;  %v1230_v36 = vadd.f32 %v18975_v37, %v18943_v23 }
 0x17a   :  { %6316 = vmatpush2.bf16.msra.mxu1 %v17067_v46 }
 0x17b   :  { %2318 = vrot.lane.b32.xlu1 %v16554_v26, %s18412_s13  ;;  %1329 = vrot.lane.b32.xlu0 %v16505_v10, %s18413_s16  ;;  %v17066_v10 = vld [vmem:[#allocation4 + $0x274] ss:$8 sps:$4 sm:$0xff]   ;;  %v2580_v26 = vmax.f32 %v2530_v53, 0.0  ;;  %v16568_v45 = vpack.c.bf16 %v2583_v27, %v2583_v27  ;;  %v2246_v53 = vmax.f32 %v2214_v25, 0.0  ;;  %v2247_v5 = vmax.f32 %v2217_v55, 0.0 }
 0x17c   :  { %6388 = vmatprep.subr.bf16.mxu0 %v17066_v10  ;;  %6317 = vmatprep.subr.bf16.mxu1 %v17075_v32 }
 0x17d   :  { %v16565_v39 = vpack.c.bf16 %v2580_v26, %v2580_v26  ;;  %v1260_v26 = vmax.f32 %v1230_v36, 0.0  ;;  %v16556_v37 = vpack.c.bf16 %v2247_v5, %v2247_v5 }
 0x17f   :  { %1331 = vrot.lane.b32.xlu1 %v16506_v35, %s18413_s16  ;;  %647 = vrot.lane.b32.xlu0 %v16475_v40, %s18414_s19  ;;  %v16865_v40 = vpop.f32.mrf.mxu1  ;;  %v887_v35 = vadd.f32 %v18841_v49, %v18801_v34  ;;  %v16491_v49 = vpack.c.bf16 %v916_v33, %v916_v33  ;;  %v16508_v32 = vpack.c.bf16 %v1260_v26, %v1260_v26 }
 0x180   :  { %v2554_v27 = vadd.f32 %v16865_v40, %v19034_v16 }
 0x181   :  { %v632_v57 = vpop.permute.xlu0 %631  ;;  %v2545_v54 = vpop.f32.mrf.mxu1 }
 0x182   :  { %678 = vst.msk [vmem:[#allocation2 + $0x10] sm:$0xf] %vm675_vm6, %v632_v57 }
 0x183   :  { %649 = vrot.lane.b32.xlu1 %v16476_v47, %s18414_s19  ;;  %1980 = vrot.lane.b32.xlu0 %v16539_v52, %s18414_s19  ;;  %1021 = vst.msk [vmem:[#allocation2 + $0x10] sm:$0xf] %vm1018_vm7, %v19036_v22  ;;  %v17073_v22 = vld [vmem:[#allocation4 + $0x180] ss:$8 sps:$4 sm:$0xff]   ;;  %v2581_v47 = vmax.f32 %v2533_v48, 0.0  ;;  %v16866_v46 = vpop.f32.mrf.mxu1 }
 0x184   :  { %6318 = vmatpush2.bf16.msra.mxu1 %v17073_v22  ;;  %v2586_v22 = vmax.f32 %v2554_v27, 0.0  ;;  %v2557_v40 = vadd.f32 %v16866_v46, %v19034_v16 }
 0x185   :  { %v634_v30 = vpop.permute.xlu1 %633  ;;  %v628_v43 = vpop.permute.xlu0 %627  ;;  %v16566_v57 = vpack.c.bf16 %v2581_v47, %v2581_v47 }
 0x186   :  { %679 = vst.msk [vmem:[#allocation2 + $0x18] sm:$0xf] %vm675_vm6, %v634_v30  ;;  %676 = vst.msk [vmem:[#allocation2] sm:$0xf] %vm675_vm6, %v628_v43  ;;  %v2587_v47 = vmax.f32 %v2557_v40, 0.0  ;;  %v557_v40 = vadd.f32 %v18923_v59, %v18867_v15 }
 0x187   :  { %1982 = vrot.lane.b32.xlu1 %v16540_v9, %s18414_s19  ;;  %2652 = vrot.lane.b32.xlu0 %v16567_v13, %s18413_s16  ;;  %1019 = vst.msk [vmem:[#allocation2] sm:$0xf] %vm1018_vm7, %v19046_v42  ;;  %1022 = vst.msk [vmem:[#allocation2 + $0x18] sm:$0xf] %vm1018_vm7, %v19043_v41  ;;  %v17081_v41 = vld [vmem:[#allocation4 + $0x374] ss:$8 sps:$4 sm:$0xff]   ;;  %v2546_v9 = vadd.f32 %v2545_v54, %v19034_v16  ;;  %v2548_v13 = vpop.f32.mrf.mxu1 }
 0x188   :  { %v917_v42 = vmax.f32 %v887_v35, 0.0  ;;  %6489 = vmatprep.subr.bf16.mxu1 %v17081_v41  ;;  %v2549_v30 = vadd.f32 %v2548_v13, %v19034_v16  ;;  %v1885_v13 = vadd.f32 %v19038_v29, %v18926_v0 }
 0x189   :  { %v630_v51 = vpop.permute.xlu1 %629  ;;  %v640_v52 = vpop.permute.xlu0 %639  ;;  %v2584_v48 = vmax.f32 %v2546_v9, 0.0 }
 0x18a   :  { %677 = vst.msk [vmem:[#allocation2 + $0x8] sm:$0xf] %vm675_vm6, %v630_v51  ;;  %682 = vst.msk [vmem:[#allocation2 + $0x30] sm:$0xf] %vm675_vm6, %v640_v52  ;;  %v2585_v35 = vmax.f32 %v2549_v30, 0.0  ;;  %v19159_v54 = vpop.f32.mrf.mxu1  ;;  %v1909_v29 = vmax.f32 %v1885_v13, 0.0 }
 0x18b   :  { %2654 = vrot.lane.b32.xlu1 %v16568_v45, %s18413_s16  ;;  %2648 = vrot.lane.b32.xlu0 %v16565_v39, %s18413_s16  ;;  %1020 = vst.msk [vmem:[#allocation2 + $0x8] sm:$0xf] %vm1018_vm7, %v19055_v17  ;;  %1025 = vst.msk [vmem:[#allocation2 + $0x30] sm:$0xf] %vm1018_vm7, %v19057_v38  ;;  %v16492_v17 = vpack.c.bf16 %v917_v42, %v917_v42  ;;  %v16555_v38 = vpack.c.bf16 %v2246_v53, %v2246_v53 }
 0x18c   :  { %v16569_v33 = vpack.c.bf16 %v2584_v48, %v2584_v48  ;;  %v1882_v39 = vadd.f32 %v19029_v8, %v18926_v0  ;;  %v16571_v45 = vpack.c.bf16 %v2586_v22, %v2586_v22  ;;  %v16570_v51 = vpack.c.bf16 %v2585_v35, %v2585_v35  ;;  %v2561_v8 = vpop.f32.mrf.mxu1 }
 0x18d   :  { %v642_v28 = vpop.permute.xlu1 %641  ;;  %v636_v1 = vpop.permute.xlu0 %635  ;;  %v16572_v42 = vpack.c.bf16 %v2587_v47, %v2587_v47  ;;  %v1238_v48 = vadd.f32 %v18995_v21, %v18943_v23  ;;  %v900_v47 = vadd.f32 %v18855_v63, %v18801_v34  ;;  %v1243_v63 = vadd.f32 %v18983_v50, %v18943_v23 }
 0x18e   :  { %683 = vst.msk [vmem:[#allocation2 + $0x38] sm:$0xf] %vm675_vm6, %v642_v28  ;;  %680 = vst.msk [vmem:[#allocation2 + $0x20] sm:$0xf] %vm675_vm6, %v636_v1  ;;  %v1908_v41 = vmax.f32 %v1882_v39, 0.0  ;;  %v1261_v28 = vmax.f32 %v1235_v7, 0.0 }
 0x18f   :  { %2650 = vrot.lane.b32.xlu1 %v16566_v57, %s18413_s16  ;;  %990 = vrot.lane.b32.xlu0 %v16491_v49, %s18412_s13  ;;  %1023 = vst.msk [vmem:[#allocation2 + $0x20] sm:$0xf] %vm1018_vm7, %v19067_v61  ;;  %1026 = vst.msk [vmem:[#allocation2 + $0x38] sm:$0xf] %vm1018_vm7, %v19065_v58  ;;  %v16507_v58 = vpack.c.bf16 %v1259_v24, %v1259_v24  ;;  %v552_v57 = vadd.f32 %v18939_v18, %v18867_v15  ;;  %v1262_v35 = vmax.f32 %v1238_v48, 0.0 }
 0x190   :  { %v16541_v2 = vpack.c.bf16 %v1908_v41, %v1908_v41  ;;  %v2562_v24 = vadd.f32 %v2561_v8, %v19034_v16  ;;  %v895_v18 = vadd.f32 %v18872_v19, %v18801_v34  ;;  %v16509_v5 = vpack.c.bf16 %v1261_v28, %v1261_v28 }
 0x191   :  { %v638_v10 = vpop.permute.xlu1 %637  ;;  %v920_v41 = vmax.f32 %v900_v47, 0.0 }
 0x192   :  { %681 = vst.msk [vmem:[#allocation2 + $0x28] sm:$0xf] %vm675_vm6, %v638_v10  ;;  %v919_v19 = vmax.f32 %v895_v18, 0.0 }
 0x193   :  { %992 = vrot.lane.b32.xlu1 %v16492_v17, %s18412_s13  ;;  %2320 = vrot.lane.b32.xlu0 %v16555_v38, %s18412_s13  ;;  %v644_v61 = vpop.permute.xlu0 %643  ;;  %1024 = vst.msk [vmem:[#allocation2 + $0x28] sm:$0xf] %vm1018_vm7, %v19082_v44  ;;  %v549_v44 = vadd.f32 %v18930_v4, %v18867_v15  ;;  %v892_v4 = vadd.f32 %v18861_v6, %v18801_v34  ;;  %v576_v38 = vmax.f32 %v552_v57, 0.0 }
 0x194   :  { %684 = vst.msk [vmem:[#allocation2 + $0x40] sm:$0xf] %vm675_vm6, %v644_v61  ;;  %v2588_v61 = vmax.f32 %v2562_v24, 0.0  ;;  %v1263_v24 = vmax.f32 %v1243_v63, 0.0 }
 0x195   :  { %1027 = vst.msk [vmem:[#allocation2 + $0x40] sm:$0xf] %vm1018_vm7, %v19077_v31  ;;  %v19151_v31 = vpop.f32.mrf.mxu0  ;;  %v575_v25 = vmax.f32 %v549_v44, 0.0  ;;  %v16478_v27 = vpack.c.bf16 %v576_v38, %v576_v38 }
 0x196   :  { %v2230_v8 = vadd.f32 %v19151_v31, %v18941_v20  ;;  %v2570_v31 = vadd.f32 %v19159_v54, %v19034_v16 }
 0x197   :  { %2322 = vrot.lane.b32.xlu1 %v16556_v37, %s18412_s13  ;;  %v646_v43 = vpop.permute.xlu1 %645  ;;  %1333 = vrot.lane.b32.xlu0 %v16507_v58, %s18413_s16  ;;  %v2221_v52 = vpop.f32.mrf.mxu0  ;;  %v16477_v49 = vpack.c.bf16 %v575_v25, %v575_v25 }
 0x198   :  { %685 = vst.msk [vmem:[#allocation2 + $0x48] sm:$0xf] %vm675_vm6, %v646_v43  ;;  %v2222_v6 = vadd.f32 %v2221_v52, %v18941_v20  ;;  %v19184_v58 = vpop.f32.mrf.mxu1  ;;  %v16573_v43 = vpack.c.bf16 %v2588_v61, %v2588_v61  ;;  %v16510_v52 = vpack.c.bf16 %v1262_v35, %v1262_v35  ;;  %v2250_v50 = vmax.f32 %v2230_v8, 0.0 }
 0x199   :  { %1028 = vst.msk [vmem:[#allocation2 + $0x48] sm:$0xf] %vm1018_vm7, %v19088_v56  ;;  %v918_v56 = vmax.f32 %v892_v4, 0.0  ;;  %v19172_v46 = vpop.f32.mrf.mxu0  ;;  %v16542_v4 = vpack.c.bf16 %v1909_v29, %v1909_v29  ;;  %v2590_v13 = vmax.f32 %v2570_v31, 0.0 }
 0x19a   :  { %v2248_v1 = vmax.f32 %v2222_v6, 0.0  ;;  %v2564_v44 = vpop.f32.mrf.mxu1 }
 0x19b   :  { %1335 = vrot.lane.b32.xlu1 %v16508_v32, %s18413_s16  ;;  %2656 = vrot.lane.b32.xlu0 %v16569_v33, %s18413_s16  ;;  %v16493_v55 = vpack.c.bf16 %v918_v56, %v918_v56  ;;  %v2224_v10 = vpop.f32.mrf.mxu0  ;;  %v16494_v33 = vpack.c.bf16 %v919_v19, %v919_v19  ;;  %v2565_v25 = vadd.f32 %v2564_v44, %v19034_v16 }
 0x19c   :  { %v16557_v9 = vpack.c.bf16 %v2248_v1, %v2248_v1  ;;  %v2225_v30 = vadd.f32 %v2224_v10, %v18941_v20  ;;  %v1890_v56 = vadd.f32 %v19024_v3, %v18926_v0  ;;  %v16495_v1 = vpack.c.bf16 %v920_v41, %v920_v41 }
 0x19d   :  { %v16511_v10 = vpack.c.bf16 %v1263_v24, %v1263_v24 }
 0x19e   :  { %v2249_v21 = vmax.f32 %v2225_v30, 0.0 }
 0x19f   :  { %2658 = vrot.lane.b32.xlu1 %v16570_v51, %s18413_s16  ;;  %2660 = vrot.lane.b32.xlu0 %v16571_v45, %s18413_s16  ;;  %v577_v51 = vmax.f32 %v557_v40, 0.0 }
 0x1a0   :  { %v16558_v59 = vpack.c.bf16 %v2249_v21, %v2249_v21 }
 0x1a2   :  { %v19166_v53 = vpop.permute.xlu0 %2304 }
 0x1a3   :  { %2662 = vrot.lane.b32.xlu1 %v16572_v42, %s18413_s16  ;;  %651 = vrot.lane.b32.xlu0 %v16477_v49, %s18414_s19  ;;  %v2589_v49 = vmax.f32 %v2565_v25, 0.0  ;;  %v16479_v42 = vpack.c.bf16 %v577_v51, %v577_v51 }
 0x1a5   :  { %v16574_v3 = vpack.c.bf16 %v2589_v49, %v2589_v49 }
 0x1a6   :  { %v19175_v36 = vpop.permute.xlu1 %2306  ;;  %v1318_v17 = vpop.permute.xlu0 %1317 }
 0x1a7   :  { %1364 = vst.msk [vmem:[#allocation2 + $0x10] sm:$0xf] %vm1361_vm8, %v1318_v17  ;;  %1984 = vrot.lane.b32.xlu1 %v16541_v2, %s18414_s19  ;;  %994 = vrot.lane.b32.xlu0 %v16493_v55, %s18412_s13  ;;  %v1910_v55 = vmax.f32 %v1890_v56, 0.0  ;;  %v560_v2 = vadd.f32 %v18934_v12, %v18867_v15  ;;  %v16559_v15 = vpack.c.bf16 %v2250_v50, %v2250_v50 }
 0x1a8   :  { %v1893_v12 = vadd.f32 %v19031_v14, %v18926_v0  ;;  %v16575_v14 = vpack.c.bf16 %v2590_v13, %v2590_v13 }
 0x1a9   :  { %v16543_v17 = vpack.c.bf16 %v1910_v55, %v1910_v55 }
 0x1aa   :  { %v1320_v26 = vpop.permute.xlu1 %1319  ;;  %v19186_v37 = vpop.permute.xlu0 %2300  ;;  %v1911_v0 = vmax.f32 %v1893_v12, 0.0 }
 0x1ab   :  { %1365 = vst.msk [vmem:[#allocation2 + $0x18] sm:$0xf] %vm1361_vm8, %v1320_v26  ;;  %2324 = vrot.lane.b32.xlu1 %v16557_v9, %s18412_s13  ;;  %1337 = vrot.lane.b32.xlu0 %v16509_v5, %s18413_s16  ;;  %v903_v5 = vadd.f32 %v18864_v11, %v18801_v34  ;;  %v578_v9 = vmax.f32 %v560_v2, 0.0  ;;  %v1246_v34 = vadd.f32 %v18991_v62, %v18943_v23 }
 0x1ac   :  { %v2233_v11 = vadd.f32 %v19172_v46, %v18941_v20  ;;  %v16544_v62 = vpack.c.bf16 %v1911_v0, %v1911_v0  ;;  %v17072_v0 = vld [vmem:[#allocation4 + $0x264] ss:$8 sps:$4 sm:$0xff]  }
 0x1ad   :  { %v921_v26 = vmax.f32 %v903_v5, 0.0  ;;  %v16480_v19 = vpack.c.bf16 %v578_v9, %v578_v9  ;;  %v1264_v20 = vmax.f32 %v1246_v34, 0.0 }
 0x1ae   :  { %v19194_v32 = vpop.permute.xlu1 %2302  ;;  %v1314_v22 = vpop.permute.xlu0 %1313  ;;  %v2251_v23 = vmax.f32 %v2233_v11, 0.0  ;;  %v17064_v11 = vld [vmem:[#allocation4 + $0x270] ss:$8 sps:$4 sm:$0xff]  }
 0x1af   :  { %1362 = vst.msk [vmem:[#allocation2] sm:$0xf] %vm1361_vm8, %v1314_v22  ;;  %2664 = vrot.lane.b32.xlu1 %v16573_v43, %s18413_s16  ;;  %653 = vrot.lane.b32.xlu0 %v16478_v27, %s18414_s19  ;;  %v16496_v30 = vpack.c.bf16 %v921_v26, %v921_v26 }
 0x1b2   :  { %v1316_v39 = vpop.permute.xlu1 %1315  ;;  %v19202_v45 = vpop.permute.xlu0 %2312 }
 0x1b3   :  { %1363 = vst.msk [vmem:[#allocation2 + $0x8] sm:$0xf] %vm1361_vm8, %v1316_v39  ;;  %1986 = vrot.lane.b32.xlu1 %v16542_v4, %s18414_s19  ;;  %996 = vrot.lane.b32.xlu0 %v16494_v33, %s18412_s13 }
 0x1b6   :  { %v19211_v7 = vpop.permute.xlu1 %2314  ;;  %v1326_v6 = vpop.permute.xlu0 %1325 }
 0x1b7   :  { %1368 = vst.msk [vmem:[#allocation2 + $0x30] sm:$0xf] %vm1361_vm8, %v1326_v6  ;;  %2326 = vrot.lane.b32.xlu1 %v16558_v59, %s18412_s13  ;;  %1339 = vrot.lane.b32.xlu0 %v16510_v52, %s18413_s16 }
 0x1ba   :  { %v1328_v57 = vpop.permute.xlu1 %1327  ;;  %v19220_v28 = vpop.permute.xlu0 %2308 }
 0x1bb   :  { %1369 = vst.msk [vmem:[#allocation2 + $0x38] sm:$0xf] %vm1361_vm8, %v1328_v57  ;;  %2666 = vrot.lane.b32.xlu1 %v16574_v3, %s18413_s16  ;;  %655 = vrot.lane.b32.xlu0 %v16479_v42, %s18414_s19 }
 0x1be   :  { %v2311_v18 = vpop.permute.xlu1 %2310  ;;  %v1322_v38 = vpop.permute.xlu0 %1321 }
 0x1bf   :  { %1366 = vst.msk [vmem:[#allocation2 + $0x20] sm:$0xf] %vm1361_vm8, %v1322_v38  ;;  %1988 = vrot.lane.b32.xlu1 %v16543_v17, %s18414_s19  ;;  %998 = vrot.lane.b32.xlu0 %v16495_v1, %s18412_s13 }
 0x1c2   :  { %v1324_v61 = vpop.permute.xlu1 %1323  ;;  %v1965_v54 = vpop.permute.xlu0 %1964 }
 0x1c3   :  { %1367 = vst.msk [vmem:[#allocation2 + $0x28] sm:$0xf] %vm1361_vm8, %v1324_v61  ;;  %2328 = vrot.lane.b32.xlu1 %v16559_v15, %s18412_s13  ;;  %1341 = vrot.lane.b32.xlu0 %v16511_v10, %s18413_s16 }
 0x1c4   :  { %2010 = vst.msk [vmem:[#allocation2 + $0x14] sm:$0xf] %vm675_vm6, %v1965_v54 }
 0x1c5   :  { %2350 = vst.msk [vmem:[#allocation2 + $0x14] sm:$0xf] %vm1018_vm7, %v19166_v53  ;;  %v2573_v53 = vadd.f32 %v19184_v58, %v19034_v16 }
 0x1c6   :  { %v1967_v27 = vpop.permute.xlu1 %1966  ;;  %v1961_v48 = vpop.permute.xlu0 %1960 }
 0x1c7   :  { %2011 = vst.msk [vmem:[#allocation2 + $0x1c] sm:$0xf] %vm675_vm6, %v1967_v27  ;;  %2008 = vst.msk [vmem:[#allocation2 + $0x4] sm:$0xf] %vm675_vm6, %v1961_v48  ;;  %2668 = vrot.lane.b32.xlu1 %v16575_v14, %s18413_s16  ;;  %657 = vrot.lane.b32.xlu0 %v16480_v19, %s18414_s19  ;;  %v2591_v43 = vmax.f32 %v2573_v53, 0.0 }
 0x1c8   :  { %2351 = vst.msk [vmem:[#allocation2 + $0x1c] sm:$0xf] %vm1018_vm7, %v19175_v36  ;;  %2348 = vst.msk [vmem:[#allocation2 + $0x4] sm:$0xf] %vm1018_vm7, %v19186_v37  ;;  %v16512_v36 = vpack.c.bf16 %v1264_v20, %v1264_v20  ;;  %v16560_v37 = vpack.c.bf16 %v2251_v23, %v2251_v23  ;;  %v23394_v23 = vmov 0 }
 0x1c9   :  { %v16576_v44 = vpack.c.bf16 %v2591_v43, %v2591_v43  ;;  %v23395_v23 = vsel %vm19331_vm13, 4294967295, %v23394_v23 }
 0x1ca   :  { %v1963_v46 = vpop.permute.xlu1 %1962  ;;  %v1973_v29 = vpop.permute.xlu0 %1972  ;;  %23396 = vst [vmem:[#allocation13_spill] sm:$0xff] %v23395_v23 }
 0x1cb   :  { %2009 = vst.msk [vmem:[#allocation2 + $0xc] sm:$0xf] %vm675_vm6, %v1963_v46  ;;  %2014 = vst.msk [vmem:[#allocation2 + $0x34] sm:$0xf] %vm675_vm6, %v1973_v29  ;;  %1990 = vrot.lane.b32.xlu1 %v16544_v62, %s18414_s19  ;;  %1000 = vrot.lane.b32.xlu0 %v16496_v30, %s18412_s13  ;;  %v23397_v62 = vmov 0 }
 0x1cc   :  { %2349 = vst.msk [vmem:[#allocation2 + $0xc] sm:$0xf] %vm1018_vm7, %v19194_v32  ;;  %2354 = vst.msk [vmem:[#allocation2 + $0x34] sm:$0xf] %vm1018_vm7, %v19202_v45  ;;  %v23398_v62 = vsel %vm19338_vm14, 4294967295, %v23397_v62 }
 0x1cd   :  { %23399 = vst [vmem:[#allocation14_spill] sm:$0xff] %v23398_v62  ;;  %v17070_v46 = vld [vmem:[#allocation4 + $0x260] ss:$8 sps:$4 sm:$0xff]  }
 0x1ce   :  { %v1975_v16 = vpop.permute.xlu1 %1974  ;;  %v1969_v58 = vpop.permute.xlu0 %1968 }
 0x1cf   :  { %2015 = vst.msk [vmem:[#allocation2 + $0x3c] sm:$0xf] %vm675_vm6, %v1975_v16  ;;  %2012 = vst.msk [vmem:[#allocation2 + $0x24] sm:$0xf] %vm675_vm6, %v1969_v58  ;;  %2330 = vrot.lane.b32.xlu1 %v16560_v37, %s18412_s13  ;;  %1343 = vrot.lane.b32.xlu0 %v16512_v36, %s18413_s16  ;;  %v17078_v16 = vld [vmem:[#allocation4 + $0x254] ss:$8 sps:$4 sm:$0xff]  }
 0x1d0   :  { %2355 = vst.msk [vmem:[#allocation2 + $0x3c] sm:$0xf] %vm1018_vm7, %v19211_v7  ;;  %2352 = vst.msk [vmem:[#allocation2 + $0x24] sm:$0xf] %vm1018_vm7, %v19220_v28  ;;  %v17079_v58 = vld [vmem:[#allocation4 + $0x370] ss:$8 sps:$4 sm:$0xff]  }
 0x1d2   :  { %v1971_v32 = vpop.permute.xlu1 %1970 }
 0x1d3   :  { %2013 = vst.msk [vmem:[#allocation2 + $0x2c] sm:$0xf] %vm675_vm6, %v1971_v32  ;;  %2670 = vrot.lane.b32.xlu1 %v16576_v44, %s18413_s16  ;;  %v1977_v22 = vpop.permute.xlu0 %1976 }
 0x1d4   :  { %2353 = vst.msk [vmem:[#allocation2 + $0x2c] sm:$0xf] %vm1018_vm7, %v2311_v18 }
 0x1d5   :  { %2016 = vst.msk [vmem:[#allocation2 + $0x44] sm:$0xf] %vm675_vm6, %v1977_v22 }
 0x1d7   :  { %v1979_v33 = vpop.permute.xlu1 %1978 }
 0x1d8   :  { %2017 = vst.msk [vmem:[#allocation2 + $0x4c] sm:$0xf] %vm675_vm6, %v1979_v33  ;;  %v17090_v33 = vld [vmem:[#allocation4 + $0x364] ss:$8 sps:$4 sm:$0xff]  }
 0x1e1   :  { %v2645_v40 = vpop.permute.xlu0 %2644 }
 0x1e2   :  { %2690 = vst.msk [vmem:[#allocation2 + $0x14] sm:$0xf] %vm1361_vm8, %v2645_v40 }
 0x1e5   :  { %v2647_v35 = vpop.permute.xlu1 %2646  ;;  %v2641_v21 = vpop.permute.xlu0 %2640 }
 0x1e6   :  { %2691 = vst.msk [vmem:[#allocation2 + $0x1c] sm:$0xf] %vm1361_vm8, %v2647_v35  ;;  %2688 = vst.msk [vmem:[#allocation2 + $0x4] sm:$0xf] %vm1361_vm8, %v2641_v21 }
 0x1e9   :  { %v19280_v4 = vld [vmem:[#allocation2 + $0x10] sm:$0xff]  ;;  %v2643_v25 = vpop.permute.xlu1 %2642  ;;  %v2317_v39 = vpop.permute.xlu0 %2316 }
 0x1ea   :  { %v19283_v45 = vshll.u32 %v19280_v4, 16  ;;  %v19286_v47 = vshrl.u32 %v19280_v4, 16  ;;  %2689 = vst.msk [vmem:[#allocation2 + $0xc] sm:$0xf] %vm1361_vm8, %v2643_v25  ;;  %v17076_v25 = vld [vmem:[#allocation4 + $0x250] ss:$8 sps:$4 sm:$0xff]  }
 0x1eb   :  { %2356 = vst.msk [vmem:[#allocation2 + $0x44] sm:$0xf] %vm1018_vm7, %v2317_v39 }
 0x1ec   :  { %v3303_v51 = vrot.slane %v19286_v47, 6  ;;  %v3306_v52 = vrot.slane %v19283_v45, 7  ;;  %v2778_v14 = vrot.slane %v19283_v45, 5 }
 0x1ed   :  { %v19292_v59 = vld [vmem:[#allocation2 + $0x18] sm:$0xff]  ;;  %v2319_v56 = vpop.permute.xlu1 %2318  ;;  %v1330_v49 = vpop.permute.xlu0 %1329  ;;  %v2706_v42 = vld [vmem:[#allocation2] sm:$0xff] }
 0x1ee   :  { %v19295_v7 = vshll.u32 %v19292_v59, 16  ;;  %v19298_v6 = vshrl.u32 %v19292_v59, 16  ;;  %3710 = vst [vmem:[#allocation3 + $0x268] sm:$0xff] %v19292_v59  ;;  %2357 = vst.msk [vmem:[#allocation2 + $0x4c] sm:$0xf] %vm1018_vm7, %v2319_v56  ;;  %v19303_v41 = vor.u32 %v3306_v52, %v3303_v51  ;;  %v2757_v28 = vshrl.u32 %v2706_v42, 16 }
 0x1ef   :  { %1370 = vst.msk [vmem:[#allocation2 + $0x40] sm:$0xf] %vm1361_vm8, %v1330_v49  ;;  %v2760_v24 = vshll.u32 %v2706_v42, 16  ;;  %v15220_v20 = vcombine.high %v19280_v4, %v19292_v59  ;;  %v15219_v39 = vcombine.low %v19280_v4, %v19292_v59  ;;  %v17084_v51 = vld [vmem:[#allocation4 + $0x244] ss:$8 sps:$4 sm:$0xff]  }
 0x1f0   :  { %v3313_v55 = vrot.slane %v19298_v6, 6  ;;  %v3316_v3 = vrot.slane %v19295_v7, 7  ;;  %v3564_v57 = vrot.slane %v19298_v6, 7  ;;  %v2759_v18 = vrot.slane %v2757_v28, 4  ;;  %v17088_v52 = vld [vmem:[#allocation4 + $0x360] ss:$8 sps:$4 sm:$0xff]  }
 0x1f1   :  { %v1332_v63 = vpop.permute.xlu1 %1331  ;;  %v648_v8 = vpop.permute.xlu0 %647  ;;  %v19310_v1 = vld [vmem:[#allocation2 + $0x8] sm:$0xff]  ;;  %v2762_v38 = vrot.slane %v2760_v24, 5  ;;  %v3309_v53 = vrot.slane %v19303_v41, 4 }
 0x1f2   :  { %1371 = vst.msk [vmem:[#allocation2 + $0x48] sm:$0xf] %vm1361_vm8, %v1332_v63  ;;  %v19312_v2 = vor.u32 %v3316_v3, %v3313_v55  ;;  %v19317_v50 = vor.u32 %v3564_v57, %v19295_v7  ;;  %v2766_v5 = vshll.u32 %v19310_v1, 16  ;;  %v2770_v9 = vshrl.u32 %v19310_v1, 16  ;;  %v17096_v3 = vld [vmem:[#allocation4 + $0x354] ss:$8 sps:$4 sm:$0xff]  }
 0x1f3   :  { %686 = vst.msk [vmem:[#allocation2 + $0x50] sm:$0xf] %vm675_vm6, %v648_v8  ;;  %v2763_v10 = vor.u32 %v2762_v38, %v2759_v18  ;;  %v15201_v54 = vcombine.low %v2706_v42, %v19310_v1  ;;  %v15202_v34 = vcombine.high %v2706_v42, %v19310_v1  ;;  %v17082_v18 = vld [vmem:[#allocation4 + $0x240] ss:$8 sps:$4 sm:$0xff]  }
 0x1f4   :  { %23392 = vst [vmem:[#allocation11_spill] sm:$0xff] %v19312_v2  ;;  %23393 = vst [vmem:[#allocation12_spill] sm:$0xff] %v19317_v50  ;;  %v2768_v15 = vrot.slane %v2766_v5, 5  ;;  %v2772_v12 = vrot.slane %v2770_v9, 4  ;;  %v19354_v40 = vsel %vm19338_vm14, %v3309_v53, %v19312_v2  ;;  %v17087_v5 = vld [vmem:[#allocation4 + $0x234] ss:$8 sps:$4 sm:$0xff]  }
 0x1f5   :  { %v650_v17 = vpop.permute.xlu1 %649  ;;  %v1981_v31 = vpop.permute.xlu0 %1980  ;;  %v2764_v26 = vrot.slane %v2763_v10, 4  ;;  %6218 = vmatprep.mubr.bf16.mxu0 %v15202_v34  ;;  %v17094_v9 = vld [vmem:[#allocation4 + $0x350] ss:$8 sps:$4 sm:$0xff]   ;;  %v17151_v50 = vld [vmem:[#allocation4 + $0x3c4] ss:$8 sps:$4 sm:$0xff]  }
 0x1f6   :  { %687 = vst.msk [vmem:[#allocation2 + $0x58] sm:$0xf] %vm675_vm6, %v650_v17  ;;  %2018 = vst.msk [vmem:[#allocation2 + $0x54] sm:$0xf] %vm675_vm6, %v1981_v31  ;;  %v2773_v19 = vor.u32 %v2772_v12, %v2768_v15  ;;  %6219 = vmatmul.mubr.bf16.vlgmr.msra.gmra.mxu0 %v15201_v54 }
 0x1f7   :  { %6228 = vmatprep.mubr.bf16.mxu0 %v15220_v20  ;;  %6389 = vmatpush1.bf16.msra.mxu0 %v17064_v11  ;;  %v2769_v29 = vsel %vm19331_vm13, %v2764_v26, %v2768_v15 }
 0x1f8   :  { %v2774_v27 = vrot.slane %v2773_v19, 4  ;;  %6390 = vmatprep.subr.bf16.mxu0 %v17072_v0  ;;  %v17085_v19 = vld [vmem:[#allocation4 + $0x230] ss:$8 sps:$4 sm:$0xff]   ;;  %v17093_v0 = vld [vmem:[#allocation4 + $0x224] ss:$8 sps:$4 sm:$0xff]  }
 0x1f9   :  { %v1983_v13 = vpop.permute.xlu1 %1982  ;;  %v2653_v61 = vpop.permute.xlu0 %2652 }
 0x1fa   :  { %2019 = vst.msk [vmem:[#allocation2 + $0x5c] sm:$0xf] %vm675_vm6, %v1983_v13  ;;  %v2779_v36 = vsel %vm19331_vm13, %v2774_v27, %v2778_v14  ;;  %v17102_v13 = vld [vmem:[#allocation4 + $0x344] ss:$8 sps:$4 sm:$0xff]   ;;  %v17100_v27 = vld [vmem:[#allocation4 + $0x340] ss:$8 sps:$4 sm:$0xff]  }
 0x1fb   :  { %2694 = vst.msk [vmem:[#allocation2 + $0x34] sm:$0xf] %vm1361_vm8, %v2653_v61  ;;  %v15203_v37 = vcombine.low %v2769_v29, %v2779_v36  ;;  %v15204_v43 = vcombine.high %v2769_v29, %v2779_v36  ;;  %6391 = vmatpush1.bf16.msra.mxu0 %v17070_v46  ;;  %v17108_v29 = vld [vmem:[#allocation4 + $0x334] ss:$8 sps:$4 sm:$0xff]   ;;  %v17091_v36 = vld [vmem:[#allocation4 + $0x220] ss:$8 sps:$4 sm:$0xff]  }
 0x1fc   :  { %6392 = vmatprep.subr.bf16.mxu0 %v17078_v16  ;;  %v17114_v16 = vld [vmem:[#allocation4 + $0x324] ss:$8 sps:$4 sm:$0xff]  }
 0x1fd   :  { %v2655_v48 = vpop.permute.xlu1 %2654  ;;  %v2649_v30 = vpop.permute.xlu0 %2648  ;;  %6319 = vmatprep.mubr.bf16.mxu1 %v15204_v43  ;;  %v17106_v43 = vld [vmem:[#allocation4 + $0x330] ss:$8 sps:$4 sm:$0xff]  }
 0x1fe   :  { %2695 = vst.msk [vmem:[#allocation2 + $0x3c] sm:$0xf] %vm1361_vm8, %v2655_v48  ;;  %2692 = vst.msk [vmem:[#allocation2 + $0x24] sm:$0xf] %vm1361_vm8, %v2649_v30  ;;  %6320 = vmatmul.mubr.bf16.vlgmr.msra.gmra.mxu1 %v15203_v37  ;;  %6229 = vmatmul.mubr.bf16.gmra.mxu0 %v15219_v39  ;;  %v3007_v48 = vld [vmem:[#allocation2 + $0x8] sm:$0xee] }
 0x1ff   :  { %6490 = vmatpush1.bf16.msra.mxu1 %v17079_v58  ;;  %6393 = vmatpush1.bf16.msra.mxu0 %v17076_v25  ;;  %v17099_v37 = vld [vmem:[#allocation4 + $0x214] ss:$8 sps:$4 sm:$0xff]   ;;  %v3024_v58 = vshrl.u32 %v3007_v48, 16  ;;  %v2782_v39 = vrot.slane %v19286_v47, 4 }
 0x200   :  { %6491 = vmatprep.subr.bf16.mxu1 %v17090_v33  ;;  %6394 = vmatprep.subr.bf16.mxu0 %v17084_v51  ;;  %v3035_v51 = vrot.slane %v19286_v47, 5  ;;  %v17097_v47 = vld [vmem:[#allocation4 + $0x210] ss:$8 sps:$4 sm:$0xff]  }
 0x201   :  { %v2651_v32 = vpop.permute.xlu1 %2650  ;;  %v991_v22 = vpop.permute.xlu0 %990 }
 0x202   :  { %v19349_v44 = vld [vmem:[#allocation2 + $0x30] sm:$0xff]  ;;  %2693 = vst.msk [vmem:[#allocation2 + $0x2c] sm:$0xf] %vm1361_vm8, %v2651_v32  ;;  %v3027_v32 = vshll.u32 %v3007_v48, 16 }
 0x203   :  { %v19357_v35 = vshll.u32 %v19349_v44, 16  ;;  %v19360_v21 = vshrl.u32 %v19349_v44, 16  ;;  %3713 = vst [vmem:[#allocation3 + $0x130] sm:$0xff] %v19349_v44  ;;  %1029 = vst.msk [vmem:[#allocation2 + $0x50] sm:$0xf] %vm1018_vm7, %v991_v22  ;;  %6492 = vmatpush1.bf16.msra.mxu1 %v17088_v52  ;;  %6395 = vmatpush1.bf16.msra.mxu0 %v17082_v18  ;;  %v3038_v52 = vrot.slane %v19283_v45, 6 }
 0x204   :  { %6493 = vmatprep.subr.bf16.mxu1 %v17096_v3  ;;  %6396 = vmatprep.subr.bf16.mxu0 %v17087_v5  ;;  %v3275_v22 = vld [vmem:[#allocation2 + $0x8] sm:$0xcc]  ;;  %v23299_v3 = vrot.slane %v19295_v7, 5  ;;  %v2792_v18 = vrot.slane %v19298_v6, 4  ;;  %v23302_v45 = vrot.slane %v19292_v59, 5 }
 0x205   :  { %v3343_v56 = vrot.slane %v19360_v21, 6  ;;  %v3346_v49 = vrot.slane %v19357_v35, 7  ;;  %v19369_v42 = vld [vmem:[#allocation2 + $0x38] sm:$0xff]  ;;  %v19371_v63 = vld [vmem:[#allocation2 + $0x20] sm:$0xff]  ;;  %v993_v8 = vpop.permute.xlu1 %992  ;;  %v2321_v55 = vpop.permute.xlu0 %2320  ;;  %v23298_v28 = vrot.slane %v19360_v21, 7 }
 0x206   :  { %23400 = vst [vmem:[#allocation15_spill] sm:$0xff] %v19369_v42  ;;  %3714 = vst [vmem:[#allocation3 + $0xd0] sm:$0xff] %v19369_v42  ;;  %v19381_v17 = vshll.u32 %v19369_v42, 16  ;;  %v19384_v31 = vshrl.u32 %v19369_v42, 16  ;;  %v19400_v34 = vshll.u32 %v19371_v63, 16  ;;  %v19403_v11 = vshrl.u32 %v19371_v63, 16 }
 0x207   :  { %3711 = vst [vmem:[#allocation3 + $0x370] sm:$0xff] %v19371_v63  ;;  %1030 = vst.msk [vmem:[#allocation2 + $0x58] sm:$0xf] %vm1018_vm7, %v993_v8  ;;  %v19378_v24 = vor.u32 %v3346_v49, %v3343_v56  ;;  %v19389_v38 = vor.u32 %v23298_v28, %v19357_v35  ;;  %6494 = vmatpush1.bf16.msra.mxu1 %v17094_v9  ;;  %6397 = vmatpush1.bf16.msra.mxu0 %v17085_v19  ;;  %v19419_v56 = vld [vmem:[#allocation2 + $0x10] sm:$0x88] }
 0x208   :  { %2358 = vst.msk [vmem:[#allocation2 + $0x54] sm:$0xf] %vm1018_vm7, %v2321_v55  ;;  %v3353_v61 = vrot.slane %v19384_v31, 6  ;;  %v3356_v54 = vrot.slane %v19381_v17, 7  ;;  %v23297_v26 = vrot.slane %v19384_v31, 7  ;;  %6495 = vmatprep.subr.bf16.mxu1 %v17102_v13  ;;  %v3323_v33 = vrot.slane %v19403_v11, 6  ;;  %6398 = vmatprep.subr.bf16.mxu0 %v17093_v0 }
 0x209   :  { %23401 = vst [vmem:[#allocation16_spill] sm:$0xff] %v19389_v38  ;;  %v19391_v10 = vld [vmem:[#allocation2 + $0x28] sm:$0xff]  ;;  %v2323_v15 = vpop.permute.xlu1 %2322  ;;  %v1334_v12 = vpop.permute.xlu0 %1333  ;;  %v3326_v25 = vrot.slane %v19400_v34, 7  ;;  %v23296_v49 = vrot.slane %v19403_v11, 7  ;;  %v3295_v13 = vshll.u32 %v3275_v22, 16  ;;  %v3557_v19 = vshrl.u32 %v19419_v56, 16 }
 0x20a   :  { %3712 = vst [vmem:[#allocation3 + $0x1d0] sm:$0xff] %v19391_v10  ;;  %2359 = vst.msk [vmem:[#allocation2 + $0x5c] sm:$0xf] %vm1018_vm7, %v2323_v15  ;;  %v19405_v30 = vor.u32 %v3356_v54, %v3353_v61  ;;  %v19410_v20 = vor.u32 %v23297_v26, %v19381_v17  ;;  %v19427_v9 = vshll.u32 %v19391_v10, 16  ;;  %v23301_v15 = vrot.slane %v19280_v4, 5 }
 0x20b   :  { %1372 = vst.msk [vmem:[#allocation2 + $0x50] sm:$0xf] %vm1361_vm8, %v1334_v12  ;;  %6496 = vmatpush1.bf16.msra.mxu1 %v17100_v27  ;;  %v19424_v5 = vor.u32 %v3326_v25, %v3323_v33  ;;  %v3292_v12 = vshrl.u32 %v3275_v22, 16  ;;  %v19435_v61 = vor.u32 %v23296_v49, %v19400_v34  ;;  %6399 = vmatpush1.bf16.msra.mxu0 %v17091_v36  ;;  %v17105_v54 = vld [vmem:[#allocation4 + $0x204] ss:$8 sps:$4 sm:$0xff]   ;;  %v19438_v0 = vrot.slane %v3024_v58, 5 }
 0x20c   :  { %23402 = vst [vmem:[#allocation17_spill] sm:$0xff] %v19410_v20  ;;  %6497 = vmatprep.subr.bf16.mxu1 %v17108_v29  ;;  %v19440_v27 = vrot.slane %v3027_v32, 6  ;;  %v19443_v48 = vshrl.u32 %v19391_v10, 16  ;;  %6400 = vmatprep.subr.bf16.mxu0 %v17099_v37  ;;  %v3045_v29 = vrot.slane %v19298_v6, 5  ;;  %v3048_v36 = vrot.slane %v19295_v7, 6 }
 0x20d   :  { %v1336_v53 = vpop.permute.xlu1 %1335  ;;  %v2657_v46 = vpop.permute.xlu0 %2656  ;;  %23403 = vst [vmem:[#allocation18_spill] sm:$0xff] %v19435_v61  ;;  %v3336_v58 = vrot.slane %v19427_v9, 7  ;;  %v17120_v25 = vld [vmem:[#allocation4 + $0x314] ss:$8 sps:$4 sm:$0xff]   ;;  %v19454_v37 = vor.u32 %v3038_v52, %v3035_v51  ;;  %v19466_v56 = vrot.slane %v3292_v12, 6  ;;  %v19468_v51 = vrot.slane %v3295_v13, 7 }
 0x20e   :  { %1373 = vst.msk [vmem:[#allocation2 + $0x58] sm:$0xf] %vm1361_vm8, %v1336_v53  ;;  %2696 = vst.msk [vmem:[#allocation2 + $0x44] sm:$0xf] %vm1361_vm8, %v2657_v46  ;;  %v17112_v53 = vld [vmem:[#allocation4 + $0x320] ss:$8 sps:$4 sm:$0xff]   ;;  %v19447_v46 = vor.u32 %v2782_v39, %v2778_v14  ;;  %v3030_v13 = vor.u32 %v19440_v27, %v19438_v0 }
 0x20f   :  { %6498 = vmatpush1.bf16.msra.mxu1 %v17106_v43  ;;  %v19458_v43 = vor.u32 %v2792_v18, %v23299_v3  ;;  %v3333_v14 = vrot.slane %v19443_v48, 6  ;;  %v17103_v39 = vld [vmem:[#allocation4 + $0x200] ss:$8 sps:$4 sm:$0xff]   ;;  %v23300_v52 = vrot.slane %v19443_v48, 7  ;;  %6401 = vmatpush1.bf16.msra.mxu0 %v17097_v47  ;;  %v17118_v12 = vld [vmem:[#allocation4 + $0x310] ss:$8 sps:$4 sm:$0xff]  }
 0x210   :  { %6499 = vmatprep.subr.bf16.mxu1 %v17114_v16  ;;  %v23303_v16 = vrot.slane %v19310_v1, 5  ;;  %6402 = vmatprep.subr.bf16.mxu0 %v17105_v54  ;;  %v17109_v3 = vld [vmem:[#allocation4 + $0x2f0] ss:$8 sps:$4 sm:$0xff]   ;;  %v17126_v54 = vld [vmem:[#allocation4 + $0x304] ss:$8 sps:$4 sm:$0xff]   ;;  %v2948_v0 = vrot.slane %v23301_v15, 4 }
 0x211   :  { %v2659_v8 = vpop.permute.xlu1 %2658  ;;  %v2661_v55 = vpop.permute.xlu0 %2660  ;;  %v19473_v18 = vor.u32 %v3336_v58, %v3333_v14  ;;  %v19488_v47 = vor.u32 %v23300_v52, %v19427_v9  ;;  %v17124_v27 = vld [vmem:[#allocation4 + $0x300] ss:$8 sps:$4 sm:$0xff]   ;;  %v23415_v6 = vrot.slane %v19295_v7, 5  ;;  %v23431_v61 = vrot.slane %v19381_v17, 5 }
 0x212   :  { %2697 = vst.msk [vmem:[#allocation2 + $0x4c] sm:$0xf] %vm1361_vm8, %v2659_v8  ;;  %2698 = vst.msk [vmem:[#allocation2 + $0x54] sm:$0xf] %vm1361_vm8, %v2661_v55  ;;  %v17111_v8 = vld [vmem:[#allocation4 + $0x2f4] ss:$8 sps:$4 sm:$0xff]  }
 0x213   :  { %v19471_v55 = vld [vmem:[#allocation2] sm:$0xee]  ;;  %6500 = vmatpush1.bf16.msra.mxu1 %v17112_v53  ;;  %23406 = vst [vmem:[#allocation21_spill] sm:$0xff] %v19488_v47  ;;  %v2784_v53 = vrot.slane %v19447_v46, 4  ;;  %v2945_v52 = vrot.slane %v23303_v16, 4  ;;  %6403 = vmatpush1.bf16.msra.mxu0 %v17103_v39  ;;  %v23411_v46 = vmov 0 }
 0x214   :  { %6501 = vmatprep.subr.bf16.mxu1 %v17120_v25  ;;  %v19508_v25 = vrot.slane %v23302_v45, 4  ;;  %6404 = vmatprep.subr.bf16.mxu0 %v17111_v8  ;;  %v23412_v46 = vsel %vm19517_vm10, 4294967295, %v23411_v46  ;;  %v3031_v45 = vrot.slane %v3030_v13, 4  ;;  %v19526_v16 = vrot.slane %v3564_v57, 4 }
 0x215   :  { %v19452_v22 = vld [vmem:[#allocation2 + $0x40] sm:$0xff]  ;;  %v2663_v32 = vpop.permute.xlu1 %2662  ;;  %v652_v33 = vpop.permute.xlu0 %651  ;;  %23413 = vst [vmem:[#allocation26_spill] sm:$0xff] %v23412_v46  ;;  %v19545_v57 = vsel %vm19331_vm13, %v2784_v53, %v23415_v6  ;;  %v23418_v53 = vrot.slane %v19280_v4, 5  ;;  %v2822_v4 = vrot.slane %v19360_v21, 4 }
 0x216   :  { %23404 = vst [vmem:[#allocation19_spill] sm:$0xff] %v19452_v22  ;;  %3715 = vst [vmem:[#allocation3 + $0x190] sm:$0xff] %v19452_v22  ;;  %v19476_v49 = vshll.u32 %v19452_v22, 16 }
 0x217   :  { %2699 = vst.msk [vmem:[#allocation2 + $0x5c] sm:$0xf] %vm1361_vm8, %v2663_v32  ;;  %v19479_v32 = vshrl.u32 %v19452_v22, 16  ;;  %23410 = vst [vmem:[#allocation25_spill] sm:$0xff] %v19508_v25  ;;  %6502 = vmatpush1.bf16.msra.mxu1 %v17118_v12  ;;  %6405 = vmatpush2.bf16.msra.mxu0 %v17109_v3 }
 0x218   :  { %688 = vst.msk [vmem:[#allocation2 + $0x60] sm:$0xf] %vm675_vm6, %v652_v33  ;;  %v19483_v33 = vor.u32 %v3048_v36, %v3045_v29  ;;  %v19498_v29 = vrot.slane %v3557_v19, 11  ;;  %v17117_v36 = vld [vmem:[#allocation4 + $0x2e4] ss:$8 sps:$4 sm:$0xff]   ;;  %v15197_v19 = vrot.slane %v19471_v55, 9  ;;  %v3298_v55 = vor.u32 %v19468_v51, %v19466_v56  ;;  %6503 = vmatprep.subr.bf16.mxu1 %v17126_v54 }
 0x219   :  { %v19490_v58 = vld [vmem:[#allocation2 + $0x48] sm:$0xff]  ;;  %v19492_v14 = vld [vmem:[#allocation2 + $0x50] sm:$0xff]  ;;  %v1985_v26 = vpop.permute.xlu1 %1984  ;;  %v995_v28 = vpop.permute.xlu0 %994  ;;  %v3363_v15 = vrot.slane %v19479_v32, 6  ;;  %23414 = vst [vmem:[#allocation27_spill] sm:$0xff] %v19526_v16  ;;  %v23306_v8 = vrot.slane %v19479_v32, 7  ;;  %6406 = vmatprep.subr.bf16.mxu0 %v17117_v36 }
 0x21a   :  { %23405 = vst [vmem:[#allocation20_spill] sm:$0xff] %v19483_v33  ;;  %23407 = vst [vmem:[#allocation22_spill] sm:$0xff] %v19490_v58  ;;  %v19530_v12 = vshll.u32 %v19490_v58, 16  ;;  %v19538_v56 = vshrl.u32 %v19490_v58, 16  ;;  %v17115_v51 = vld [vmem:[#allocation4 + $0x2e0] ss:$8 sps:$4 sm:$0xff]  }
 0x21b   :  { %23408 = vst [vmem:[#allocation23_spill] sm:$0xff] %v19492_v14  ;;  %23409 = vst [vmem:[#allocation24_spill] sm:$0xff] %v19498_v29  ;;  %v17123_v54 = vld [vmem:[#allocation4 + $0x2d4] ss:$8 sps:$4 sm:$0xff]   ;;  %6504 = vmatpush1.bf16.msra.mxu1 %v17124_v27  ;;  %v17138_v36 = vld [vmem:[#allocation4 + $0x3e4] ss:$8 sps:$4 sm:$0xff]   ;;  %6407 = vmatpush2.bf16.msra.mxu0 %v17115_v51 }
 0x21c   :  { %2728 = vst [vmem:[#allocation3 + $0x250] sm:$0xff] %v19490_v58  ;;  %3716 = vst [vmem:[#allocation3 + $0x2e8] sm:$0xff] %v19490_v58  ;;  %6408 = vmatprep.subr.bf16.mxu0 %v17123_v54  ;;  %v17136_v51 = vld [vmem:[#allocation4 + $0x3e0] ss:$8 sps:$4 sm:$0xff]   ;;  %v17142_v16 = vld [vmem:[#allocation4 + $0x3d0] ss:$8 sps:$4 sm:$0xff]  }
 0x21d   :  { %3717 = vst [vmem:[#allocation3 + $0x330] sm:$0xff] %v19492_v14  ;;  %2020 = vst.msk [vmem:[#allocation2 + $0x64] sm:$0xf] %vm675_vm6, %v1985_v26  ;;  %v3366_v26 = vrot.slane %v19476_v49, 7  ;;  %v2325_v20 = vpop.permute.xlu1 %2324  ;;  %v1338_v38 = vpop.permute.xlu0 %1337  ;;  %v19647_v29 = vshll.u32 %v19492_v14, 16 }
 0x21e   :  { %1031 = vst.msk [vmem:[#allocation2 + $0x60] sm:$0xf] %vm1018_vm7, %v995_v28  ;;  %v17132_v28 = vld [vmem:[#allocation4 + $0x3f4] ss:$8 sps:$4 sm:$0xff]   ;;  %2360 = vst.msk [vmem:[#allocation2 + $0x64] sm:$0xf] %vm1018_vm7, %v2325_v20  ;;  %v19564_v20 = vsel %vm19517_vm10, %v2945_v52, %v23418_v53 }
 0x21f   :  { %v19532_v60 = vld [vmem:[#allocation2 + $0x58] sm:$0xff]  ;;  %v19535_v47 = vor.u32 %v3366_v26, %v3363_v15  ;;  %1374 = vst.msk [vmem:[#allocation2 + $0x60] sm:$0xf] %vm1361_vm8, %v1338_v38  ;;  %v19552_v15 = vor.u32 %v23306_v8, %v19476_v49  ;;  %v23417_v26 = vrot.slane %v19310_v1, 5  ;;  %v23419_v38 = vrot.slane %v19292_v59, 5  ;;  %6505 = vmatprep.subr.bf16.mxu1 %v17132_v28 }
 0x220   :  { %3718 = vst [vmem:[#allocation3 + $0x1a0] sm:$0xff] %v19532_v60  ;;  %v23421_v1 = vmov 0  ;;  %v17130_v52 = vld [vmem:[#allocation4 + $0x3f0] ss:$8 sps:$4 sm:$0xff]   ;;  %v19583_v59 = vsel %vm19574_vm11, %v3031_v45, %v19454_v37  ;;  %v3373_v53 = vrot.slane %v19538_v56, 6  ;;  %v23425_v8 = vrot.slane %v19454_v37, 4 }
 0x221   :  { %23416 = vst [vmem:[#allocation28_spill] sm:$0xff] %v19552_v15  ;;  %v19558_v7 = vsel %vm19517_vm10, %v15197_v19, %v23417_v26  ;;  %v19570_v6 = vsel %vm19517_vm10, %v2948_v0, %v23419_v38  ;;  %v23422_v1 = vsel %vm19574_vm11, 4294967295, %v23421_v1  ;;  %23424 = vst [vmem:[#allocation31_spill] sm:$0xff] %v19583_v59  ;;  %v3299_v0 = vrot.slane %v3298_v55, 4  ;;  %v2665_v39 = vpop.permute.xlu1 %2664  ;;  %v654_v13 = vpop.permute.xlu0 %653  ;;  %6506 = vmatpush2.bf16.msra.mxu1 %v17130_v52  ;;  %v17127_v52 = vld [vmem:[#allocation4 + $0x2c0] ss:$8 sps:$4 sm:$0xff]  }
 0x222   :  { %23420 = vst [vmem:[#allocation29_spill] sm:$0xff] %v19570_v6  ;;  %23423 = vst [vmem:[#allocation30_spill] sm:$0xff] %v23422_v1  ;;  %v3075_v19 = vrot.slane %v19360_v21, 5  ;;  %v3078_v26 = vrot.slane %v19357_v35, 6  ;;  %v3376_v38 = vrot.slane %v19530_v12, 7  ;;  %v19601_v28 = vsel %vm19574_vm11, %v23425_v8, %v19483_v33  ;;  %6507 = vmatprep.subr.bf16.mxu1 %v17138_v36 }
 0x223   :  { %2700 = vst.msk [vmem:[#allocation2 + $0x64] sm:$0xf] %vm1361_vm8, %v2665_v39  ;;  %23426 = vst [vmem:[#allocation32_spill] sm:$0xff] %v19601_v28  ;;  %v17121_v39 = vld [vmem:[#allocation4 + $0x2d0] ss:$8 sps:$4 sm:$0xff]   ;;  %v2832_v8 = vrot.slane %v19384_v31, 4 }
 0x224   :  { %689 = vst.msk [vmem:[#allocation2 + $0x68] sm:$0xf] %vm675_vm6, %v654_v13  ;;  %v19604_v27 = vor.u32 %v3376_v38, %v3373_v53  ;;  %v17129_v13 = vld [vmem:[#allocation4 + $0x2c4] ss:$8 sps:$4 sm:$0xff]   ;;  %v23427_v15 = vrot.slane %v19538_v56, 7  ;;  %v19620_v53 = vsel %vm19338_vm14, %v3299_v0, %v19303_v41  ;;  %v23429_v38 = vrot.slane %v19357_v35, 5  ;;  %6409 = vmatpush2.bf16.msra.mxu0 %v17121_v39 }
 0x225   :  { %v19626_v55 = vor.u32 %v3078_v26, %v3075_v19  ;;  %v19630_v33 = vshrl.u32 %v19492_v14, 16  ;;  %v997_v54 = vpop.permute.xlu0 %996  ;;  %v2802_v41 = vrot.slane %v19403_v11, 4  ;;  %v17135_v19 = vld [vmem:[#allocation4 + $0x2b4] ss:$8 sps:$4 sm:$0xff]   ;;  %v3085_v26 = vrot.slane %v19384_v31, 5  ;;  %6410 = vmatprep.subr.bf16.mxu0 %v17129_v13  ;;  %6508 = vmatpush2.bf16.msra.mxu1 %v17136_v51 }
 0x226   :  { %v19615_v3 = vor.u32 %v23427_v15, %v19530_v12  ;;  %v19624_v45 = vor.u32 %v2822_v4, %v23429_v38  ;;  %v1987_v15 = vpop.permute.xlu1 %1986  ;;  %v2812_v4 = vrot.slane %v19443_v48, 4  ;;  %1032 = vst.msk [vmem:[#allocation2 + $0x68] sm:$0xf] %vm1018_vm7, %v997_v54  ;;  %v3088_v38 = vrot.slane %v19381_v17, 6  ;;  %v17495_v1 = vld [vmem:[#allocation4 + $0xaf4] ss:$8 sps:$4 sm:$0xff]  }
 0x227   :  { %23430 = vst [vmem:[#allocation34_spill] sm:$0xff] %v19626_v55  ;;  %2021 = vst.msk [vmem:[#allocation2 + $0x6c] sm:$0xf] %vm675_vm6, %v1987_v15  ;;  %v3055_v36 = vrot.slane %v19403_v11, 5  ;;  %v3058_v37 = vrot.slane %v19400_v34, 6  ;;  %v19644_v0 = vor.u32 %v2832_v8, %v23431_v61  ;;  %v15238_v54 = vcombine.high %v19371_v63, %v19391_v10 }
 0x228   :  { %23428 = vst [vmem:[#allocation33_spill] sm:$0xff] %v19615_v3  ;;  %v17144_v3 = vld [vmem:[#allocation4 + $0x3d4] ss:$8 sps:$4 sm:$0xff]   ;;  %v23432_v39 = vrot.slane %v19349_v44, 5  ;;  %v23434_v8 = vrot.slane %v19360_v21, 7  ;;  %v23436_v13 = vrot.slane %v19400_v34, 5  ;;  %6411 = vmatpush2.bf16.msra.mxu0 %v17127_v52 }
 0x229   :  { %v1340_v62 = vpop.permute.xlu0 %1339  ;;  %6509 = vmatprep.subr.bf16.mxu1 %v17144_v3  ;;  %v23437_v28 = vrot.slane %v19427_v9, 5  ;;  %6238 = vmatprep.mubr.bf16.mxu0 %v15238_v54  ;;  %v19678_v21 = vshrl.u32 %v19532_v60, 16  ;;  %v17133_v3 = vld [vmem:[#allocation4 + $0x2b0] ss:$8 sps:$4 sm:$0xff]   ;;  %v17141_v54 = vld [vmem:[#allocation4 + $0x2a4] ss:$8 sps:$4 sm:$0xff]  }
 0x22a   :  { %v19655_v59 = vrot.slane %v23432_v39, 4  ;;  %v19660_v6 = vrot.slane %v23434_v8, 4  ;;  %v19662_v25 = vld [vmem:[#allocation2 + $0x60] sm:$0xff]  ;;  %v2327_v15 = vpop.permute.xlu1 %2326  ;;  %v19666_v51 = vor.u32 %v2802_v41, %v23436_v13  ;;  %v23438_v39 = vrot.slane %v19630_v33, 7  ;;  %1375 = vst.msk [vmem:[#allocation2 + $0x68] sm:$0xf] %vm1361_vm8, %v1340_v62  ;;  %6412 = vmatprep.subr.bf16.mxu0 %v17135_v19  ;;  %6510 = vmatpush2.bf16.msra.mxu1 %v17142_v16 }
 0x22b   :  { %v19670_v2 = vor.u32 %v2812_v4, %v23437_v28  ;;  %3719 = vst [vmem:[#allocation3 + $0x2b8] sm:$0xff] %v19662_v25  ;;  %2361 = vst.msk [vmem:[#allocation2 + $0x6c] sm:$0xf] %vm1018_vm7, %v2327_v15  ;;  %v23440_v28 = vrot.slane %v19369_v42, 5  ;;  %v19689_v13 = vor.u32 %v3058_v37, %v3055_v36  ;;  %v19698_v15 = vor.u32 %v3088_v38, %v3085_v26  ;;  %v17149_v37 = vld [vmem:[#allocation4 + $0x3c0] ss:$8 sps:$4 sm:$0xff]  }
 0x22c   :  { %23433 = vst [vmem:[#allocation35_spill] sm:$0xff] %v19655_v59  ;;  %23435 = vst [vmem:[#allocation36_spill] sm:$0xff] %v19660_v6  ;;  %v19675_v61 = vor.u32 %v23438_v39, %v19647_v29  ;;  %v3065_v41 = vrot.slane %v19443_v48, 5  ;;  %v23448_v8 = vrot.slane %v19384_v31, 7  ;;  %v2842_v38 = vrot.slane %v19479_v32, 4  ;;  %6511 = vmatprep.subr.bf16.mxu1 %v17151_v50  ;;  %6413 = vmatpush2.bf16.msra.mxu0 %v17133_v3 }
 0x22d   :  { %v19686_v4 = vrot.slane %v23440_v28, 4  ;;  %23442 = vst [vmem:[#allocation39_spill] sm:$0xff] %v19689_v13  ;;  %23445 = vst [vmem:[#allocation40_spill] sm:$0xff] %v19698_v15  ;;  %v3068_v28 = vrot.slane %v19427_v9, 6  ;;  %v656_v19 = vpop.permute.xlu0 %655  ;;  %v17158_v16 = vld [vmem:[#allocation4 + $0x3b4] ss:$8 sps:$4 sm:$0xff]   ;;  %6414 = vmatprep.subr.bf16.mxu0 %v17141_v54 }
 0x22e   :  { %23439 = vst [vmem:[#allocation37_spill] sm:$0xff] %v19675_v61  ;;  %v19711_v62 = vrot.slane %v23448_v8, 4  ;;  %v2667_v61 = vpop.permute.xlu1 %2666  ;;  %v2804_v6 = vrot.slane %v19666_v51, 4  ;;  %v2814_v15 = vrot.slane %v19670_v2, 4  ;;  %v19718_v55 = vshll.u32 %v19532_v60, 16  ;;  %6512 = vmatpush2.bf16.msra.mxu1 %v17149_v37 }
 0x22f   :  { %23441 = vst [vmem:[#allocation38_spill] sm:$0xff] %v19686_v4  ;;  %2701 = vst.msk [vmem:[#allocation2 + $0x6c] sm:$0xf] %vm1361_vm8, %v2667_v61  ;;  %v23450_v31 = vrot.slane %v19371_v63, 5  ;;  %v15237_v51 = vcombine.low %v19371_v63, %v19391_v10  ;;  %v23452_v2 = vrot.slane %v19400_v34, 5  ;;  %v23453_v26 = vrot.slane %v19458_v43, 4  ;;  %6513 = vmatprep.subr.bf16.mxu1 %v17158_v16 }
 0x230   :  { %23449 = vst [vmem:[#allocation41_spill] sm:$0xff] %v19711_v62  ;;  %690 = vst.msk [vmem:[#allocation2 + $0x70] sm:$0xf] %vm675_vm6, %v656_v19  ;;  %v2737_v62 = vld [vmem:[#allocation3 + $0xa8] sm:$0x11]  ;;  %v23454_v61 = vmov 0 }
 0x231   :  { %v19725_v8 = vrot.slane %v23450_v31, 4  ;;  %v2799_v36 = vsel %vm19331_vm13, %v23453_v26, %v23452_v2  ;;  %v23455_v61 = vsel %vm19740_vm12, 4294967295, %v23454_v61  ;;  %v19745_v31 = vor.u32 %v3068_v28, %v3065_v41  ;;  %v2718_v3 = vld [vmem:[#allocation2 + $0x60] sm:$0x11]  ;;  %v17139_v2 = vld [vmem:[#allocation4 + $0x2a0] ss:$8 sps:$4 sm:$0xff]   ;;  %6239 = vmatmul.mubr.bf16.gmra.mxu0 %v15237_v51  ;;  %v999_v4 = vpop.permute.xlu0 %998 }
 0x232   :  { %23456 = vst [vmem:[#allocation43_spill] sm:$0xff] %v23455_v61  ;;  %v3095_v34 = vrot.slane %v19479_v32, 5  ;;  %v23458_v43 = vrot.slane %v19678_v21, 7  ;;  %v23460_v39 = vrot.slane %v19476_v49, 5  ;;  %v3098_v50 = vrot.slane %v19476_v49, 6  ;;  %v1989_v19 = vpop.permute.xlu1 %1988  ;;  %6415 = vmatpush2.bf16.msra.mxu0 %v17139_v2 }
 0x233   :  { %23451 = vst [vmem:[#allocation42_spill] sm:$0xff] %v19725_v8  ;;  %23457 = vst [vmem:[#allocation44_spill] sm:$0xff] %v19745_v31  ;;  %v15222_v41 = vcombine.high %v19545_v57, %v2799_v36  ;;  %v15256_v28 = vcombine.high %v19349_v44, %v19369_v42  ;;  %v15221_v37 = vcombine.low %v19545_v57, %v2799_v36  ;;  %v23319_v16 = vrot.slane %v19530_v12, 5 }
 0x234   :  { %v19751_v26 = vor.u32 %v23458_v43, %v19718_v55  ;;  %v19755_v52 = vor.u32 %v2842_v38, %v23460_v39  ;;  %v17148_v43 = vld [vmem:[#allocation4 + $0x294] ss:$8 sps:$4 sm:$0xff]   ;;  %v23463_v38 = vrot.slane %v19427_v9, 5  ;;  %v23464_v39 = vrot.slane %v19357_v35, 5  ;;  %2022 = vst.msk [vmem:[#allocation2 + $0x74] sm:$0xf] %vm675_vm6, %v1989_v19 }
 0x235   :  { %1033 = vst.msk [vmem:[#allocation2 + $0x70] sm:$0xf] %vm1018_vm7, %v999_v4  ;;  %v2852_v57 = vrot.slane %v19538_v56, 4  ;;  %6329 = vmatprep.mubr.bf16.mxu1 %v15222_v41  ;;  %6248 = vmatprep.mubr.bf16.mxu0 %v15256_v28  ;;  %v2738_v35 = vsel %vm19740_vm12, %v2718_v3, %v2737_v62  ;;  %v23465_v36 = vrot.slane %v19391_v10, 5  ;;  %v23466_v4 = vrot.slane %v19443_v48, 7 }
 0x236   :  { %23459 = vst [vmem:[#allocation45_spill] sm:$0xff] %v19751_v26  ;;  %v23461_v26 = vrot.slane %v19403_v11, 7  ;;  %v19770_v51 = vsel %vm19331_vm13, %v2804_v6, %v23463_v38  ;;  %v19776_v59 = vsel %vm19331_vm13, %v2814_v15, %v23464_v39  ;;  %v17156_v11 = vld [vmem:[#allocation4 + $0x3b0] ss:$8 sps:$4 sm:$0xff]   ;;  %v17162_v6 = vld [vmem:[#allocation4 + $0x3a4] ss:$8 sps:$4 sm:$0xff]   ;;  %6330 = vmatmul.mubr.bf16.gmra.mxu1 %v15221_v37  ;;  %v19799_v39 = vor.u32 %v3098_v50, %v3095_v34  ;;  %v2329_v48 = vpop.permute.xlu1 %2328 }
 0x237   :  { %v15240_v9 = vcombine.high %v19770_v51, %v19776_v59  ;;  %v19789_v19 = vrot.slane %v23465_v36, 4  ;;  %2739 = vst [vmem:[#allocation3 + $0xa8] sm:$0x11] %v2738_v35  ;;  %v17146_v28 = vld [vmem:[#allocation4 + $0x290] ss:$8 sps:$4 sm:$0xff]   ;;  %vm691_vm6 = vcmask 516352   ;;  %6416 = vmatprep.subr.bf16.mxu0 %v17148_v43  ;;  %v15274_v3 = vcombine.high %v19452_v22, %v19490_v58  ;;  %6514 = vmatpush2.bf16.msra.mxu1 %v17156_v11 }
 0x238   :  { %v19763_v54 = vrot.slane %v23461_v26, 4  ;;  %v19793_v26 = vrot.slane %v23466_v4, 4  ;;  %23468 = vst [vmem:[#allocation48_spill] sm:$0xff] %v19799_v39  ;;  %v19801_v36 = vld [vmem:[#allocation2 + $0x68] sm:$0xff]  ;;  %v1342_v4 = vpop.permute.xlu0 %1341  ;;  %v23469_v37 = vrot.slane %v19479_v32, 7  ;;  %v23320_v35 = vrot.slane %v19490_v58, 5  ;;  %6515 = vmatprep.subr.bf16.mxu1 %v17162_v6  ;;  %6417 = vmatpush2.bf16.msra.mxu0 %v17146_v28 }
 0x239   :  { %6339 = vmatprep.mubr.bf16.mxu1 %v15240_v9  ;;  %v17155_v41 = vld [vmem:[#allocation4 + $0x284] ss:$8 sps:$4 sm:$0xff]   ;;  %v23322_v62 = vrot.slane %v19490_v58, 6  ;;  %3720 = vst [vmem:[#allocation3 + $0x348] sm:$0xff] %v19801_v36  ;;  %2362 = vst.msk [vmem:[#allocation2 + $0x74] sm:$0xf] %vm1018_vm7, %v2329_v48  ;;  %v19816_v32 = vor.u32 %v2852_v57, %v23319_v16  ;;  %v15255_v9 = vcombine.low %v19349_v44, %v19369_v42 }
 0x23a   :  { %23462 = vst [vmem:[#allocation46_spill] sm:$0xff] %v19763_v54  ;;  %23467 = vst [vmem:[#allocation47_spill] sm:$0xff] %v19793_v26  ;;  %v19805_v2 = vrot.slane %v23469_v37, 4  ;;  %v17160_v50 = vld [vmem:[#allocation4 + $0x3a0] ss:$8 sps:$4 sm:$0xff]   ;;  %v23323_v34 = vrot.slane %v19647_v29, 5  ;;  %v15239_v48 = vcombine.low %v19770_v51, %v19776_v59  ;;  %6418 = vmatprep.subr.bf16.mxu0 %v17155_v41 }
 0x23b   :  { %1376 = vst.msk [vmem:[#allocation2 + $0x70] sm:$0xf] %vm1361_vm8, %v1342_v4  ;;  %v2862_v43 = vrot.slane %v19630_v33, 4  ;;  %v17168_v37 = vld [vmem:[#allocation4 + $0x394] ss:$8 sps:$4 sm:$0xff]   ;;  %v23471_v4 = vrot.slane %v19381_v17, 5  ;;  %6249 = vmatmul.mubr.bf16.gmra.mxu0 %v15255_v9  ;;  %6516 = vmatpush2.bf16.msra.mxu1 %v17160_v50 }
 0x23c   :  { %23470 = vst [vmem:[#allocation49_spill] sm:$0xff] %v19805_v2  ;;  %v19825_v11 = vld [vmem:[#allocation2 + $0x60] sm:$0x11]  ;;  %v23472_v57 = vrot.slane %v19624_v45, 4  ;;  %v23473_v16 = vrot.slane %v19476_v49, 5  ;;  %v23474_v6 = vrot.slane %v19644_v0, 4  ;;  %6258 = vmatprep.mubr.bf16.mxu0 %v15274_v3  ;;  %6517 = vmatprep.subr.bf16.mxu1 %v17168_v37 }
 0x23d   :  { %v17153_v59 = vld [vmem:[#allocation4 + $0x280] ss:$8 sps:$4 sm:$0xff]   ;;  %v3105_v51 = vrot.slane %v19538_v56, 5  ;;  %v2872_v45 = vrot.slane %v19678_v21, 4  ;;  %v17165_v49 = vld [vmem:[#allocation4 + $0x474] ss:$8 sps:$4 sm:$0xff]  }
 0x23e   :  { %v19833_v38 = vsel %vm19331_vm13, %v23472_v57, %v23471_v4  ;;  %v19841_v15 = vsel %vm19331_vm13, %v23474_v6, %v23473_v16  ;;  %v2669_v57 = vpop.permute.xlu1 %2668  ;;  %v19850_v0 = vrot.slane %v23320_v35, 4  ;;  %v3108_v16 = vrot.slane %v19530_v12, 6  ;;  %v17166_v9 = vld [vmem:[#allocation4 + $0x390] ss:$8 sps:$4 sm:$0xff]   ;;  %v17175_v28 = vld [vmem:[#allocation4 + $0x384] ss:$8 sps:$4 sm:$0xff]   ;;  %6340 = vmatmul.mubr.bf16.gmra.mxu1 %v15239_v48  ;;  %6419 = vmatpush2.bf16.msra.mxu0 %v17153_v59 }
 0x23f   :  { %v15258_v4 = vcombine.high %v19833_v38, %v19841_v15  ;;  %2702 = vst.msk [vmem:[#allocation2 + $0x74] sm:$0xf] %vm1361_vm8, %v2669_v57  ;;  %v2854_v17 = vrot.slane %v19816_v32, 4  ;;  %v19859_v41 = vrot.slane %v23322_v62, 4  ;;  %v2863_v35 = vor.u32 %v2862_v43, %v23323_v34  ;;  %6590 = vmatprep.subr.bf16.mxu0 %v17165_v49  ;;  %6518 = vmatpush2.bf16.msra.mxu1 %v17166_v9  ;;  %v3019_v42 = vld [vmem:[#allocation2 + $0x68] sm:$0x33]  ;;  %vm19893_vm8 = vmand %vm691_vm6, %vm348_vm4 }
 0x240   :  { %v2876_v39 = vshll.u32 %v19825_v11, 16  ;;  %v23475_v3 = vrot.slane %v19538_v56, 7  ;;  %v3118_v50 = vrot.slane %v19647_v29, 6  ;;  %v3386_v32 = vrot.slane %v19647_v29, 7  ;;  %v17173_v56 = vld [vmem:[#allocation4 + $0x380] ss:$8 sps:$4 sm:$0xff]   ;;  %6519 = vmatprep.subr.bf16.mxu1 %v17175_v28 }
 0x241   :  { %v3115_v62 = vrot.slane %v19630_v33, 5  ;;  %v3383_v43 = vrot.slane %v19630_v33, 6  ;;  %v23477_v34 = vrot.slane %v19718_v55, 5  ;;  %v15273_v6 = vcombine.low %v19452_v22, %v19490_v58  ;;  %6349 = vmatprep.mubr.bf16.mxu1 %v15258_v4  ;;  %v2909_v28 = vld [vmem:[#allocation3 + $0x118] sm:$0x11] }
 0x242   :  { %v19867_v57 = vrot.slane %v23475_v3, 4  ;;  %vm1034_vm7 = vcmask 778752   ;;  %v23478_v3 = vrot.slane %v19492_v14, 5  ;;  %v23479_v48 = vrot.slane %v19492_v14, 6 }
 0x243   :  { %v2873_v37 = vor.u32 %v2872_v45, %v23477_v34  ;;  %v15292_v34 = vcombine.high %v19492_v14, %v19532_v60  ;;  %v17184_v45 = vld [vmem:[#allocation4 + $0x574] ss:$8 sps:$4 sm:$0xff]   ;;  %v19888_v58 = vor.u32 %v3108_v16, %v3105_v51  ;;  %v2864_v4 = vrot.slane %v2863_v35, 4  ;;  %6259 = vmatmul.mubr.bf16.gmra.mxu0 %v15273_v6  ;;  %6520 = vmatpush2.bf16.msra.mxu1 %v17173_v56  ;;  %vm19977_vm9 = vmand %vm1034_vm7, %vm348_vm4 }
 0x244   :  { %23476 = vst [vmem:[#allocation50_spill] sm:$0xff] %v19867_v57  ;;  %v19879_v57 = vrot.slane %v23478_v3, 4  ;;  %v19883_v59 = vrot.slane %v23479_v48, 4  ;;  %v2878_v49 = vrot.slane %v2876_v39, 5  ;;  %v2880_v22 = vshrl.u32 %v19825_v11, 16  ;;  %v658_v48 = vpop.permute.xlu0 %657  ;;  %6691 = vmatprep.subr.bf16.mxu1 %v17184_v45 }
 0x245   :  { %23480 = vst [vmem:[#allocation51_spill] sm:$0xff] %v19888_v58  ;;  %v3125_v2 = vrot.slane %v19678_v21, 5  ;;  %v15257_v9 = vcombine.low %v19833_v38, %v19841_v15  ;;  %v23483_v51 = vrot.slane %v19530_v12, 5  ;;  %v23484_v39 = vrot.slane %v19755_v52, 4  ;;  %v1991_v58 = vpop.permute.xlu1 %1990  ;;  %v693_v15 = vld [vmem:[#allocation2 + $0x78] sm:$0x1]  ;;  %6268 = vmatprep.mubr.bf16.mxu0 %v15292_v34 }
 0x246   :  { %v23485_v11 = vrot.slane %v19647_v29, 5  ;;  %v2874_v26 = vrot.slane %v2873_v37, 4  ;;  %v19915_v54 = vshrl.u32 %v19662_v25, 16  ;;  %v19918_v12 = vshll.u32 %v19662_v25, 16  ;;  %v19923_v29 = vld [vmem:[#allocation2 + $0x70] sm:$0xff] }
 0x247   :  { %v19906_v35 = vsel %vm19331_vm13, %v23484_v39, %v23483_v51  ;;  %v3128_v38 = vrot.slane %v19718_v55, 6  ;;  %v3146_v37 = vshll.u32 %v3019_v42, 16  ;;  %3721 = vst [vmem:[#allocation3 + $0x150] sm:$0xff] %v19923_v29  ;;  %v694_v51 = vsel %vm19893_vm8, %v658_v48, %v693_v15  ;;  %v2023_v39 = vld [vmem:[#allocation2 + $0x7c] sm:$0x1]  ;;  %6350 = vmatmul.mubr.bf16.gmra.mxu1 %v15257_v9 }
 0x248   :  { %v19912_v16 = vsel %vm19331_vm13, %v2854_v17, %v23485_v11  ;;  %v3143_v17 = vshrl.u32 %v3019_v42, 16  ;;  %v19929_v6 = vld [vmem:[#allocation2 + $0x60] sm:$0x33]  ;;  %v19931_v11 = vld [vmem:[#allocation3 + $0xa8] sm:$0x11]  ;;  %v23486_v13 = vrot.slane %v19718_v55, 5  ;;  %v19941_v42 = vsel %vm19331_vm13, %v2874_v26, %v2878_v49 }
 0x249   :  { %2906 = vst [vmem:[#allocation3 + $0x180] sm:$0xff] %v19912_v16  ;;  %v15276_v52 = vcombine.high %v19906_v35, %v19912_v16  ;;  %695 = vst [vmem:[#allocation2 + $0x78] sm:$0x1] %v694_v51  ;;  %v2910_v34 = vsel %vm19740_vm12, %v2880_v22, %v2909_v28  ;;  %v2024_v56 = vsel %vm19893_vm8, %v1991_v58, %v2023_v39  ;;  %v23488_v51 = vrot.slane %v19492_v14, 7  ;;  %v2331_v23 = vpop.permute.xlu1 %2330 }
 0x24a   :  { %v19937_v31 = vsel %vm19331_vm13, %v2864_v4, %v23486_v13  ;;  %v19947_v48 = vor.u32 %v3118_v50, %v3115_v62  ;;  %v19949_v15 = vor.u32 %v3386_v32, %v3383_v43  ;;  %v23490_v13 = vrot.slane %v19630_v33, 7  ;;  %2911 = vst [vmem:[#allocation3 + $0x118] sm:$0x11] %v2910_v34  ;;  %2025 = vst [vmem:[#allocation2 + $0x7c] sm:$0x1] %v2024_v56 }
 0x24b   :  { %v19953_v8 = vrot.slane %v23488_v51, 4  ;;  %v2973_v22 = vrot.slane %v19532_v60, 5  ;;  %v23334_v58 = vrot.slane %v19532_v60, 6  ;;  %v3135_v26 = vrot.slane %v19915_v54, 5  ;;  %6359 = vmatprep.mubr.bf16.mxu1 %v15276_v52  ;;  %v1001_v51 = vpop.permute.xlu0 %1000  ;;  %vm20058_vm8 = vmand %vm1377_vm3, %vm348_vm4 }
 0x24c   :  { %23487 = vst [vmem:[#allocation52_spill] sm:$0xff] %v19947_v48  ;;  %v19957_v4 = vrot.slane %v23490_v13, 4  ;;  %v3138_v62 = vrot.slane %v19918_v12, 6  ;;  %v3393_v50 = vrot.slane %v19678_v21, 6  ;;  %v3396_v32 = vrot.slane %v19718_v55, 7 }
 0x24d   :  { %23489 = vst [vmem:[#allocation53_spill] sm:$0xff] %v19953_v8  ;;  %v2976_v33 = vrot.slane %v19929_v6, 5  ;;  %v15310_v43 = vcombine.high %v19931_v11, %v19931_v11  ;;  %v3129_v45 = vor.u32 %v3128_v38, %v3125_v2  ;;  %v3145_v49 = vrot.slane %v3143_v17, 5 }
 0x24e   :  { %23491 = vst [vmem:[#allocation54_spill] sm:$0xff] %v19957_v4  ;;  %v3148_v3 = vrot.slane %v3146_v37, 6  ;;  %v15291_v9 = vcombine.low %v19492_v14, %v19532_v60  ;;  %v3121_v28 = vrot.slane %v19947_v48, 4  ;;  %v15275_v55 = vcombine.low %v19906_v35, %v19912_v16 }
 0x24f   :  { %v2975_v2 = vrot.slane %v2973_v22, 4  ;;  %v19983_v38 = vrot.slane %v23334_v58, 4  ;;  %v3139_v17 = vor.u32 %v3138_v62, %v3135_v26  ;;  %v15294_v37 = vcombine.high %v19937_v31, %v19941_v42 }
 0x250   :  { %6269 = vmatmul.mubr.bf16.gmra.mxu0 %v15291_v9  ;;  %vm3207_vm6 = vcmask 1045508   ;;  %v2978_v34 = vrot.slane %v2976_v33, 4  ;;  %v3403_v35 = vrot.slane %v19915_v54, 6  ;;  %v3406_v16 = vrot.slane %v19918_v12, 7  ;;  %v1036_v56 = vld [vmem:[#allocation2 + $0x78] sm:$0x1]  ;;  %6360 = vmatmul.mubr.bf16.gmra.mxu1 %v15275_v55 }
 0x251   :  { %6278 = vmatprep.mubr.bf16.mxu0 %v15310_v43  ;;  %v23494_v13 = vrot.slane %v19492_v14, 5  ;;  %v3131_v26 = vrot.slane %v3129_v45, 4  ;;  %v19996_v62 = vor.u32 %v3396_v32, %v3393_v50  ;;  %v3149_v9 = vor.u32 %v3148_v3, %v3145_v49  ;;  %v2363_v39 = vld [vmem:[#allocation2 + $0x7c] sm:$0x1]  ;;  %v3004_v43 = vld [vmem:[#allocation3 + $0x248] sm:$0x11]  ;;  %6369 = vmatprep.mubr.bf16.mxu1 %v15294_v37  ;;  %vm20107_vm3 = vmor %vm150_vm0, %vm3207_vm6 }
 0x252   :  { %v1037_v58 = vsel %vm19977_vm9, %v1001_v51, %v1036_v56  ;;  %v23495_v48 = vrot.slane %v19532_v60, 7  ;;  %v3241_v8 = vrot.slane %v19662_v25, 6  ;;  %v2364_v50 = vsel %vm19977_vm9, %v2331_v23, %v2363_v39  ;;  %v3177_v55 = vld [vmem:[#allocation3 + $0x360] sm:$0x11]  ;;  %v20022_v39 = vld [vmem:[#allocation3 + $0x118] sm:$0x11] }
 0x253   :  { %v19994_v52 = vsel %vm19517_vm10, %v19850_v0, %v23494_v13  ;;  %v3151_v0 = vrot.slane %v3145_v49, 4  ;;  %v3287_v13 = vld [vmem:[#allocation2 + $0x68] sm:$0x77]  ;;  %1038 = vst [vmem:[#allocation2 + $0x78] sm:$0x1] %v1037_v58  ;;  %v3141_v32 = vrot.slane %v3139_v17, 4  ;;  %v15309_v3 = vcombine.low %v19931_v11, %v19931_v11 }
 0x254   :  { %3001 = vst [vmem:[#allocation3 + $0x320] sm:$0xff] %v19994_v52  ;;  %v20003_v4 = vrot.slane %v23495_v48, 4  ;;  %2365 = vst [vmem:[#allocation2 + $0x7c] sm:$0x1] %v2364_v50  ;;  %v20013_v48 = vsel %vm19517_vm10, %v19879_v57, %v2973_v22  ;;  %v20017_v49 = vsel %vm19517_vm10, %v2975_v2, %v2976_v33  ;;  %v20019_v58 = vor.u32 %v3406_v16, %v3403_v35  ;;  %v20030_v57 = vld [vmem:[#allocation2 + $0x68] sm:$0x77] }
 0x255   :  { %v23338_v23 = vrot.slane %v19662_v25, 7  ;;  %v20026_v11 = vsel %vm19574_vm11, %v3121_v28, %v3129_v45  ;;  %v3005_v6 = vsel %vm19740_vm12, %v2978_v34, %v3004_v43  ;;  %v3411_v22 = vshrl.u32 %v3287_v13, 16  ;;  %v23544_v50 = vld [vmem:[#allocation47_spill] sm:$0xff] }
 0x256   :  { %v3414_v37 = vshll.u32 %v3287_v13, 16  ;;  %3174 = vst [vmem:[#allocation3 + $0x50] sm:$0xff] %v20026_v11  ;;  %3006 = vst [vmem:[#allocation3 + $0x248] sm:$0x11] %v3005_v6  ;;  %v20035_v33 = vsel %vm19574_vm11, %v3131_v26, %v3139_v17  ;;  %v20039_v2 = vsel %vm19574_vm11, %v3141_v32, %v3149_v9  ;;  %vm3554_vm7 = vsmask.f32 4368 }
 0x257   :  { %v3399_v45 = vrot.slane %v19996_v62, 4  ;;  %v15293_v28 = vcombine.low %v19937_v31, %v19941_v42  ;;  %v3178_v34 = vsel %vm19740_vm12, %v3151_v0, %v3177_v55  ;;  %v23496_v16 = vrot.slane %v19678_v21, 7  ;;  %v23500_v0 = vld [vmem:[#allocation11_spill] sm:$0xff]  ;;  %v2671_v42 = vpop.permute.xlu1 %2670  ;;  %vm20197_vm0 = vmor %vm348_vm4, %vm3554_vm7 }
 0x258   :  { %v3243_v56 = vrot.slane %v3241_v8, 4  ;;  %6279 = vmatmul.mubr.bf16.gmra.mxu0 %v15309_v3  ;;  %v15312_v51 = vcombine.high %v20022_v39, %v20022_v39  ;;  %3179 = vst [vmem:[#allocation3 + $0x360] sm:$0x11] %v3178_v34  ;;  %v20066_v21 = vrot.slane %v23338_v23, 4  ;;  %v23341_v26 = vrot.slane %v19915_v54, 7  ;;  %vm20361_vm4 = vmor %vm2731_vm15, %vm2733_vm1 }
 0x259   :  { %v20050_v17 = vrot.slane %v23496_v16, 4  ;;  %v3244_v9 = vrot.slane %v20030_v57, 6  ;;  %v23499_v43 = vcombine.high %v19558_v7, %v19564_v20  ;;  %v23501_v13 = vrot.slane %v23500_v0, 4  ;;  %v1344_v16 = vpop.permute.xlu0 %1343  ;;  %6370 = vmatmul.mubr.bf16.gmra.mxu1 %v15293_v28 }
 0x25a   :  { %v3409_v3 = vrot.slane %v20019_v58, 4  ;;  %v20081_v55 = vrot.slane %v3411_v22, 6  ;;  %v20083_v6 = vrot.slane %v3414_v37, 7  ;;  %v1379_v34 = vld [vmem:[#allocation2 + $0x78] sm:$0x1]  ;;  %v23503_v57 = vrot.slane %v19424_v5, 4  ;;  %6379 = vmatprep.mubr.bf16.mxu1 %v15312_v51 }
 0x25b   :  { %6420 = vmatprep.mubr.bf16.mxu0 %v23499_v43  ;;  %v20078_v32 = vsel %vm19338_vm14, %v23501_v13, %v19424_v5  ;;  %v23504_v0 = vrot.slane %v19371_v63, 5  ;;  %v23505_v13 = vld [vmem:[#allocation25_spill] sm:$0xff]  ;;  %v1380_v22 = vsel %vm20058_vm8, %v1344_v16, %v1379_v34  ;;  %v2703_v37 = vld [vmem:[#allocation2 + $0x7c] sm:$0x1]  ;;  %v23506_v63 = vmov 0 }
 0x25c   :  { %v20090_v43 = vsel %vm19338_vm14, %v23503_v57, %v19473_v18  ;;  %v23507_v63 = vsel %vm20107_vm3, 4294967295, %v23506_v63  ;;  %v3652_v28 = vshrl.u32 %v19801_v36, 16  ;;  %1381 = vst [vmem:[#allocation2 + $0x78] sm:$0x1] %v1380_v22  ;;  %v2704_v34 = vsel %vm20058_vm8, %v2671_v42, %v2703_v37  ;;  %v17163_v51 = vld [vmem:[#allocation4 + $0x470] ss:$8 sps:$4 sm:$0xff]  }
 0x25d   :  { %v20097_v35 = vsel %vm19517_vm10, %v23505_v13, %v23504_v0  ;;  %23508 = vst [vmem:[#allocation11_spill] sm:$0xff] %v23507_v63  ;;  %v23509_v16 = vrot.slane %v19473_v18, 4  ;;  %v23510_v13 = vrot.slane %v19378_v24, 4  ;;  %v3246_v5 = vrot.slane %v3244_v9, 4  ;;  %2705 = vst [vmem:[#allocation2 + $0x7c] sm:$0x1] %v2704_v34 }
 0x25e   :  { %v23511_v42 = vrot.slane %v19492_v14, 6  ;;  %v23512_v22 = vrot.slane %v19532_v60, 6  ;;  %v3417_v37 = vor.u32 %v20083_v6, %v20081_v55  ;;  %v23513_v34 = vld [vmem:[#allocation29_spill] sm:$0xff]  ;;  %v23514_v31 = vrot.slane %v19405_v30, 4 }
 0x25f   :  { %v20119_v0 = vsel %vm19338_vm14, %v23509_v16, %v19378_v24  ;;  %v20126_v57 = vsel %vm19338_vm14, %v23510_v13, %v19405_v30  ;;  %v15224_v16 = vcombine.high %v23513_v34, %v20097_v35  ;;  %v17171_v13 = vld [vmem:[#allocation4 + $0x464] ss:$8 sps:$4 sm:$0xff]   ;;  %v23515_v6 = vrot.slane %v19535_v47, 4 }
 0x260   :  { %v20135_v18 = vsel %vm20107_vm3, %v19859_v41, %v23511_v42  ;;  %v20142_v24 = vsel %vm20107_vm3, %v19883_v59, %v23512_v22  ;;  %v20158_v59 = vsel %vm19338_vm14, %v23514_v31, %v19535_v47  ;;  %v20174_v30 = vsel %vm20107_vm3, %v19983_v38, %v3241_v8  ;;  %v3272_v42 = vld [vmem:[#allocation3 + $0xb8] sm:$0x11]  ;;  %v17169_v38 = vld [vmem:[#allocation4 + $0x460] ss:$8 sps:$4 sm:$0xff]  }
 0x261   :  { %3269 = vst [vmem:[#allocation3 + $0x300] sm:$0xff] %v20142_v24  ;;  %v20165_v22 = vsel %vm19338_vm14, %v23515_v6, %v19604_v27  ;;  %v3419_v31 = vrot.slane %v20081_v55, 4  ;;  %v23516_v47 = vcombine.low %v19558_v7, %v19564_v20  ;;  %v15311_v6 = vcombine.low %v20022_v39, %v20022_v39  ;;  %v23541_v7 = vld [vmem:[#allocation46_spill] sm:$0xff] }
 0x262   :  { %v20186_v23 = vsel %vm20107_vm3, %v3243_v56, %v3244_v9  ;;  %v3661_v8 = vshrl.u32 %v19923_v29, 16  ;;  %v23517_v39 = vmov 0  ;;  %v17178_v56 = vld [vmem:[#allocation4 + $0x454] ss:$8 sps:$4 sm:$0xff]   ;;  %v23520_v9 = vrot.slane %v19604_v27, 4 }
 0x263   :  { %6421 = vmatmul.mubr.bf16.vlgmr.msra.gmra.mxu0 %v23516_v47  ;;  %v23518_v39 = vsel %vm20197_vm0, 4294967295, %v23517_v39  ;;  %v3273_v55 = vsel %vm19740_vm12, %v3246_v5, %v3272_v42  ;;  %v20222_v27 = vsel %vm19338_vm14, %v3399_v45, %v20019_v58  ;;  %6380 = vmatmul.mubr.bf16.gmra.mxu1 %v15311_v6  ;;  %v20236_v45 = vrot.slane %v3652_v28, 7  ;;  %v23525_v42 = vld [vmem:[#allocation31_spill] sm:$0xff]  ;;  %v23529_v5 = vld [vmem:[#allocation12_spill] sm:$0xff] }
 0x264   :  { %6591 = vmatpush1.bf16.msra.mxu0 %v17163_v51  ;;  %6430 = vmatprep.mubr.bf16.mxu0 %v15224_v16  ;;  %23519 = vst [vmem:[#allocation25_spill] sm:$0xff] %v23518_v39  ;;  %v20206_v51 = vsel %vm19338_vm14, %v23520_v9, %v19949_v15  ;;  %v23521_v16 = vrot.slane %v19949_v15, 4  ;;  %23523 = vst [vmem:[#allocation55_spill] sm:$0xff] %v20222_v27  ;;  %v23528_v20 = vrot.slane %v19349_v44, 5  ;;  %v17176_v28 = vld [vmem:[#allocation4 + $0x450] ss:$8 sps:$4 sm:$0xff]  }
 0x265   :  { %6592 = vmatprep.subr.bf16.mxu0 %v17171_v13  ;;  %v3445_v13 = vld [vmem:[#allocation3 + $0x310] sm:$0x11]  ;;  %3274 = vst [vmem:[#allocation3 + $0xb8] sm:$0x11] %v3273_v55  ;;  %v23530_v44 = vld [vmem:[#allocation24_spill] sm:$0xff]  ;;  %v23546_v14 = vrot.slane %v19801_v36, 7 }
 0x266   :  { %v20213_v47 = vsel %vm19338_vm14, %v23521_v16, %v19996_v62  ;;  %v20234_v62 = vsel %vm19338_vm14, %v3409_v3, %v3417_v37  ;;  %v23526_v16 = vld [vmem:[#allocation32_spill] sm:$0xff]  ;;  %v20246_v55 = vsel %vm19517_vm10, %v19789_v19, %v23528_v20  ;;  %v20252_v37 = vrot.slane %v3661_v8, 7  ;;  %v23532_v19 = vld [vmem:[#allocation18_spill] sm:$0xff]  ;;  %v23533_v20 = vld [vmem:[#allocation27_spill] sm:$0xff] }
 0x267   :  { %23522 = vst [vmem:[#allocation29_spill] sm:$0xff] %v20213_v47  ;;  %3442 = vst [vmem:[#allocation3 + $0x228] sm:$0xff] %v20213_v47  ;;  %v23527_v6 = vcombine.high %v23525_v42, %v23526_v16  ;;  %v20260_v15 = vsel %vm20197_vm0, %v23530_v44, %v23529_v5  ;;  %v20266_v58 = vsel %vm20197_vm0, %v23533_v20, %v23532_v19  ;;  %v23536_v3 = vld [vmem:[#allocation42_spill] sm:$0xff]  ;;  %v3664_v19 = vshll.u32 %v19923_v29, 16  ;;  %v17182_v5 = vld [vmem:[#allocation4 + $0x570] ss:$8 sps:$4 sm:$0xff]  }
 0x268   :  { %23524 = vst [vmem:[#allocation56_spill] sm:$0xff] %v20234_v62  ;;  %6593 = vmatpush1.bf16.msra.mxu0 %v17169_v38  ;;  %23531 = vst [vmem:[#allocation31_spill] sm:$0xff] %v20260_v15  ;;  %v15223_v8 = vcombine.low %v23513_v34, %v20097_v35  ;;  %v23535_v38 = vrot.slane %v19391_v10, 5  ;;  %v23537_v35 = vld [vmem:[#allocation44_spill] sm:$0xff]  ;;  %v23538_v34 = vld [vmem:[#allocation39_spill] sm:$0xff] }
 0x269   :  { %6521 = vmatprep.mubr.bf16.mxu1 %v23527_v6  ;;  %v3446_v6 = vsel %vm19740_vm12, %v3419_v31, %v3445_v13  ;;  %23534 = vst [vmem:[#allocation32_spill] sm:$0xff] %v20266_v58  ;;  %6594 = vmatprep.subr.bf16.mxu0 %v17178_v56  ;;  %v17181_v13 = vld [vmem:[#allocation4 + $0x444] ss:$8 sps:$4 sm:$0xff]   ;;  %v3655_v56 = vshll.u32 %v19801_v36, 16  ;;  %v23539_v20 = vrot.slane %v23538_v34, 4  ;;  %v23543_v9 = vld [vmem:[#allocation16_spill] sm:$0xff] }
 0x26a   :  { %v20275_v31 = vsel %vm19517_vm10, %v23536_v3, %v23535_v38  ;;  %3447 = vst [vmem:[#allocation3 + $0x310] sm:$0x11] %v3446_v6  ;;  %v20295_v6 = vor.u32 %v23341_v26, %v19918_v12  ;;  %v3510_v38 = vrot.slane %v19923_v29, 7  ;;  %v23540_v44 = vld [vmem:[#allocation21_spill] sm:$0xff]  ;;  %v3509_v12 = vrot.slane %v23546_v14, 4  ;;  %v23555_v62 = vld [vmem:[#allocation38_spill] sm:$0xff] }
 0x26b   :  { %v15242_v10 = vcombine.high %v20275_v31, %v20246_v55  ;;  %v20290_v3 = vsel %vm19574_vm11, %v23539_v20, %v23537_v35  ;;  %6431 = vmatmul.mubr.bf16.gmra.mxu0 %v15223_v8  ;;  %v20302_v41 = vsel %vm20197_vm0, %v23541_v7, %v23540_v44  ;;  %v20308_v20 = vsel %vm20197_vm0, %v23544_v50, %v23543_v9  ;;  %v17179_v8 = vld [vmem:[#allocation4 + $0x440] ss:$8 sps:$4 sm:$0xff]   ;;  %v23547_v7 = vld [vmem:[#allocation20_spill] sm:$0xff]  ;;  %v17190_v50 = vld [vmem:[#allocation4 + $0x564] ss:$8 sps:$4 sm:$0xff]  }
 0x26c   :  { %23542 = vst [vmem:[#allocation12_spill] sm:$0xff] %v20302_v41  ;;  %23545 = vst [vmem:[#allocation24_spill] sm:$0xff] %v20308_v20  ;;  %v20313_v26 = vor.u32 %v3655_v56, %v20236_v45  ;;  %v20316_v29 = vor.u32 %v3664_v19, %v20252_v37  ;;  %6595 = vmatpush1.bf16.msra.mxu0 %v17176_v28  ;;  %v23548_v44 = vrot.slane %v23547_v7, 4  ;;  %v17187_v9 = vld [vmem:[#allocation4 + $0x434] ss:$8 sps:$4 sm:$0xff]   ;;  %v23567_v20 = vld [vmem:[#allocation41_spill] sm:$0xff] }
 0x26d   :  { %6440 = vmatprep.mubr.bf16.mxu0 %v15242_v10  ;;  %6596 = vmatprep.subr.bf16.mxu0 %v17181_v13  ;;  %v15241_v56 = vcombine.low %v20275_v31, %v20246_v55  ;;  %v23549_v19 = vld [vmem:[#allocation15_spill] sm:$0xff]  ;;  %v23552_v13 = vcombine.low %v23525_v42, %v23526_v16  ;;  %v23558_v16 = vmov 0  ;;  %v23569_v41 = vrot.slane %v19532_v60, 7  ;;  %v23570_v27 = vld [vmem:[#allocation53_spill] sm:$0xff]  ;;  %v3694_v47 = vld [vmem:[#allocation3 + $0x210] sm:$0x11] }
 0x26e   :  { %v20323_v58 = vsel %vm19574_vm11, %v23548_v44, %v23538_v34  ;;  %v23550_v28 = vrot.slane %v23549_v19, 5  ;;  %v23551_v10 = vld [vmem:[#allocation35_spill] sm:$0xff]  ;;  %v23556_v19 = vld [vmem:[#allocation34_spill] sm:$0xff]  ;;  %v23559_v16 = vsel %vm20361_vm4, 4294967295, %v23558_v16  ;;  %v23566_v34 = vld [vmem:[#allocation28_spill] sm:$0xff] }
 0x26f   :  { %v15226_v14 = vcombine.high %v20323_v58, %v20290_v3  ;;  %6522 = vmatmul.mubr.bf16.vlgmr.msra.gmra.mxu1 %v23552_v13  ;;  %v23553_v7 = vld [vmem:[#allocation19_spill] sm:$0xff]  ;;  %v15225_v31 = vcombine.low %v20323_v58, %v20290_v3  ;;  %23560 = vst [vmem:[#allocation18_spill] sm:$0xff] %v23559_v16  ;;  %v17188_v58 = vld [vmem:[#allocation4 + $0x560] ss:$8 sps:$4 sm:$0xff]   ;;  %v23561_v3 = vld [vmem:[#allocation40_spill] sm:$0xff] }
 0x270   :  { %v20334_v15 = vsel %vm19517_vm10, %v23551_v10, %v23550_v28  ;;  %v23554_v44 = vrot.slane %v23553_v7, 5  ;;  %v23557_v28 = vrot.slane %v23537_v35, 4  ;;  %6692 = vmatpush1.bf16.msra.mxu1 %v17182_v5  ;;  %v23562_v35 = vrot.slane %v23556_v19, 4  ;;  %6597 = vmatpush1.bf16.msra.mxu0 %v17179_v8  ;;  %v17193_v8 = vld [vmem:[#allocation4 + $0x424] ss:$8 sps:$4 sm:$0xff]  }
 0x271   :  { %6531 = vmatprep.mubr.bf16.mxu1 %v15226_v14  ;;  %v20382_v5 = vsel %vm20197_vm0, %v23567_v20, %v23566_v34  ;;  %v3668_v14 = vrot.slane %v20252_v37, 4  ;;  %6693 = vmatprep.subr.bf16.mxu1 %v17190_v50  ;;  %v17196_v50 = vld [vmem:[#allocation4 + $0x554] ss:$8 sps:$4 sm:$0xff]   ;;  %v23574_v34 = vld [vmem:[#allocation37_spill] sm:$0xff] }
 0x272   :  { %v20346_v55 = vsel %vm19517_vm10, %v23555_v62, %v23554_v44  ;;  %v20355_v10 = vsel %vm19574_vm11, %v23557_v28, %v23556_v19  ;;  %v3512_v62 = vrot.slane %v3510_v38, 4  ;;  %v20370_v13 = vsel %vm19574_vm11, %v23562_v35, %v23561_v3  ;;  %v23563_v44 = vld [vmem:[#allocation17_spill] sm:$0xff]  ;;  %v23564_v28 = vld [vmem:[#allocation36_spill] sm:$0xff]  ;;  %23568 = vst [vmem:[#allocation42_spill] sm:$0xff] %v20382_v5  ;;  %6598 = vmatprep.subr.bf16.mxu0 %v17187_v9 }
 0x273   :  { %v20376_v42 = vsel %vm20197_vm0, %v23564_v28, %v23563_v44  ;;  %v17185_v19 = vld [vmem:[#allocation4 + $0x430] ss:$8 sps:$4 sm:$0xff]   ;;  %v20392_v44 = vsel %vm20361_vm4, %v23570_v27, %v23569_v41  ;;  %v23571_v28 = vrot.slane %v19662_v25, 7  ;;  %v15260_v37 = vcombine.high %v20334_v15, %v20346_v55  ;;  %v23572_v27 = vld [vmem:[#allocation33_spill] sm:$0xff]  ;;  %6441 = vmatmul.mubr.bf16.gmra.mxu0 %v15241_v56 }
 0x274   :  { %23565 = vst [vmem:[#allocation27_spill] sm:$0xff] %v20376_v42  ;;  %v15244_v60 = vcombine.high %v20355_v10, %v20370_v13  ;;  %v23576_v41 = vrot.slane %v19801_v36, 7  ;;  %v3538_v5 = vld [vmem:[#allocation3 + $0x128] sm:$0x11]  ;;  %6694 = vmatpush1.bf16.msra.mxu1 %v17188_v58  ;;  %v17194_v42 = vld [vmem:[#allocation4 + $0x550] ss:$8 sps:$4 sm:$0xff]   ;;  %6599 = vmatpush1.bf16.msra.mxu0 %v17185_v19 }
 0x275   :  { %v20399_v20 = vsel %vm20361_vm4, %v20003_v4, %v23571_v28  ;;  %v23573_v4 = vld [vmem:[#allocation49_spill] sm:$0xff]  ;;  %v23575_v28 = vld [vmem:[#allocation50_spill] sm:$0xff]  ;;  %6450 = vmatprep.mubr.bf16.mxu0 %v15260_v37  ;;  %6600 = vmatprep.subr.bf16.mxu0 %v17193_v8  ;;  %v3539_v19 = vsel %vm19740_vm12, %v3512_v62, %v3538_v5 }
 0x276   :  { %3535 = vst [vmem:[#allocation3 + $0x1a8] sm:$0xff] %v20399_v20  ;;  %v20414_v9 = vsel %vm20197_vm0, %v23573_v4, %v23572_v27  ;;  %v20420_v35 = vsel %vm20197_vm0, %v23575_v28, %v23574_v34  ;;  %v20429_v25 = vsel %vm20361_vm4, %v20066_v21, %v23576_v41  ;;  %v23577_v27 = vrot.slane %v19915_v54, 7  ;;  %v17191_v54 = vld [vmem:[#allocation4 + $0x420] ss:$8 sps:$4 sm:$0xff]   ;;  %v17202_v41 = vld [vmem:[#allocation4 + $0x544] ss:$8 sps:$4 sm:$0xff]   ;;  %6695 = vmatprep.subr.bf16.mxu1 %v17196_v50 }
 0x277   :  { %v20437_v28 = vsel %vm20361_vm4, %v3509_v12, %v3510_v38  ;;  %v15269_v36 = vcombine.low %v20414_v9, %v20420_v35  ;;  %v3659_v21 = vrot.slane %v20236_v45, 4  ;;  %v23579_v34 = vld [vmem:[#allocation54_spill] sm:$0xff]  ;;  %v17199_v12 = vld [vmem:[#allocation4 + $0x414] ss:$8 sps:$4 sm:$0xff]   ;;  %v20456_v45 = vsel %vm20197_vm0, %v20050_v17, %v20295_v6  ;;  %6532 = vmatmul.mubr.bf16.gmra.mxu1 %v15225_v31  ;;  %3540 = vst [vmem:[#allocation3 + $0x128] sm:$0x11] %v3539_v19 }
 0x278   :  { %v3650_v4 = vrot.slane %v23577_v27, 4  ;;  %v15303_v56 = vcombine.low %v20429_v25, %v20437_v28  ;;  %v15304_v58 = vcombine.high %v20429_v25, %v20437_v28  ;;  %v23578_v27 = vld [vmem:[#allocation45_spill] sm:$0xff]  ;;  %3691 = vst [vmem:[#allocation3 + $0x70] sm:$0xff] %v20456_v45  ;;  %v3695_v6 = vsel %vm19740_vm12, %v3668_v14, %v3694_v47  ;;  %6696 = vmatpush1.bf16.msra.mxu1 %v17194_v42  ;;  %v17197_v19 = vld [vmem:[#allocation4 + $0x410] ss:$8 sps:$4 sm:$0xff]  }
 0x279   :  { %v20450_v38 = vsel %vm20197_vm0, %v23579_v34, %v23578_v27  ;;  %v20473_v17 = vsel %vm20197_vm0, %v3659_v21, %v20316_v29  ;;  %v3722_v62 = vld [vmem:[#allocation3 + $0x28] sm:$0x11]  ;;  %v23580_v31 = vrot.slane %v23553_v7, 5  ;;  %6541 = vmatprep.mubr.bf16.mxu1 %v15244_v60  ;;  %3696 = vst [vmem:[#allocation3 + $0x210] sm:$0x11] %v3695_v6  ;;  %v23581_v29 = vld [vmem:[#allocation48_spill] sm:$0xff]  ;;  %6601 = vmatpush1.bf16.msra.mxu0 %v17191_v54 }
 0x27a   :  { %v20463_v37 = vsel %vm20197_vm0, %v3650_v4, %v20313_v26  ;;  %v15288_v8 = vcombine.high %v20450_v38, %v20456_v45  ;;  %v15287_v50 = vcombine.low %v20450_v38, %v20456_v45  ;;  %v3709_v26 = vld [vmem:[#allocation2 + $0x78] sm:$0x11]  ;;  %v17200_v4 = vld [vmem:[#allocation4 + $0x540] ss:$8 sps:$4 sm:$0xff]   ;;  %v3101_v21 = vrot.slane %v23581_v29, 4  ;;  %6697 = vmatprep.subr.bf16.mxu1 %v17202_v41  ;;  %6602 = vmatprep.subr.bf16.mxu0 %v17199_v12 }
 0x27b   :  { %v2966_v5 = vrot.slane %v23580_v31, 4  ;;  %v15259_v47 = vcombine.low %v20334_v15, %v20346_v55  ;;  %v23582_v7 = vld [vmem:[#allocation22_spill] sm:$0xff]  ;;  %v17208_v31 = vld [vmem:[#allocation4 + $0x534] ss:$8 sps:$4 sm:$0xff]   ;;  %v3723_v34 = vsel %vm19740_vm12, %v3709_v26, %v3722_v62  ;;  %v3091_v6 = vrot.slane %v23561_v3, 4 }
 0x27c   :  { %v23583_v42 = vrot.slane %v23582_v7, 5  ;;  %v17205_v60 = vld [vmem:[#allocation4 + $0x404] ss:$8 sps:$4 sm:$0xff]   ;;  %v23584_v27 = vld [vmem:[#allocation51_spill] sm:$0xff]  ;;  %3724 = vst [vmem:[#allocation3 + $0x28] sm:$0x11] %v3723_v34  ;;  %6698 = vmatpush1.bf16.msra.mxu1 %v17200_v4  ;;  %v15243_v12 = vcombine.low %v20355_v10, %v20370_v13  ;;  %v23625_v28 = vcombine.high %v20463_v37, %v20473_v17 }
 0x27d   :  { %v3110_v41 = vsel %vm19574_vm11, %v3101_v21, %v23584_v27  ;;  %6451 = vmatmul.mubr.bf16.gmra.mxu0 %v15259_v47  ;;  %v17206_v15 = vld [vmem:[#allocation4 + $0x530] ss:$8 sps:$4 sm:$0xff]   ;;  %v17203_v55 = vld [vmem:[#allocation4 + $0x400] ss:$8 sps:$4 sm:$0xff]   ;;  %v3100_v3 = vsel %vm19574_vm11, %v3091_v6, %v23581_v29  ;;  %v17214_v26 = vld [vmem:[#allocation4 + $0x524] ss:$8 sps:$4 sm:$0xff]   ;;  %6699 = vmatprep.subr.bf16.mxu1 %v17208_v31  ;;  %v15296_v29 = vcombine.high %v20013_v48, %v20017_v49 }
 0x27e   :  { %v2968_v14 = vsel %vm19517_vm10, %v2966_v5, %v23583_v42  ;;  %6603 = vmatpush1.bf16.msra.mxu0 %v17197_v19  ;;  %v15262_v62 = vcombine.high %v3100_v3, %v3110_v41  ;;  %v17211_v5 = vld [vmem:[#allocation4 + $0x4f4] ss:$8 sps:$4 sm:$0xff]   ;;  %v17212_v4 = vld [vmem:[#allocation4 + $0x520] ss:$8 sps:$4 sm:$0xff]   ;;  %v3111_v34 = vrot.slane %v23584_v27, 4 }
 0x27f   :  { %v15278_v54 = vcombine.high %v2968_v14, %v19994_v52  ;;  %6604 = vmatprep.subr.bf16.mxu0 %v17205_v60  ;;  %6542 = vmatmul.mubr.bf16.gmra.mxu1 %v15243_v12  ;;  %v17209_v21 = vld [vmem:[#allocation4 + $0x4f0] ss:$8 sps:$4 sm:$0xff]   ;;  %v15277_v10 = vcombine.low %v2968_v14, %v19994_v52  ;;  %v17217_v13 = vld [vmem:[#allocation4 + $0x4e4] ss:$8 sps:$4 sm:$0xff]   ;;  %v17220_v19 = vld [vmem:[#allocation4 + $0x514] ss:$8 sps:$4 sm:$0xff]   ;;  %v15261_v60 = vcombine.low %v3100_v3, %v3110_v41 }
 0x280   :  { %6700 = vmatpush1.bf16.msra.mxu1 %v17206_v15  ;;  %6551 = vmatprep.mubr.bf16.mxu1 %v15262_v62  ;;  %v17218_v47 = vld [vmem:[#allocation4 + $0x510] ss:$8 sps:$4 sm:$0xff]   ;;  %v17215_v42 = vld [vmem:[#allocation4 + $0x4e0] ss:$8 sps:$4 sm:$0xff]   ;;  %v17226_v6 = vld [vmem:[#allocation4 + $0x504] ss:$8 sps:$4 sm:$0xff]   ;;  %v15295_v41 = vcombine.low %v20013_v48, %v20017_v49  ;;  %v15298_v48 = vcombine.high %v20035_v33, %v20039_v2 }
 0x281   :  { %6460 = vmatprep.mubr.bf16.mxu0 %v15278_v54  ;;  %6701 = vmatprep.subr.bf16.mxu1 %v17214_v26  ;;  %v23585_v31 = vld [vmem:[#allocation52_spill] sm:$0xff]  ;;  %v17224_v54 = vld [vmem:[#allocation4 + $0x500] ss:$8 sps:$4 sm:$0xff]   ;;  %v17230_v3 = vld [vmem:[#allocation4 + $0x4c4] ss:$8 sps:$4 sm:$0xff]  }
 0x282   :  { %6605 = vmatpush1.bf16.msra.mxu0 %v17203_v55  ;;  %v3120_v27 = vsel %vm19574_vm11, %v3111_v34, %v23585_v31  ;;  %v17223_v14 = vld [vmem:[#allocation4 + $0x4d4] ss:$8 sps:$4 sm:$0xff]   ;;  %v3835_v15 = vld [vmem:[#allocation3 + $0x248] sm:$0x11]  ;;  %v3180_v55 = vld [vmem:[#allocation2 + $0x8] sm:$0xcc] }
 0x283   :  { %6606 = vmatprep.subr.bf16.mxu0 %v17211_v5  ;;  %v15280_v52 = vcombine.high %v3120_v27, %v20026_v11  ;;  %v17221_v12 = vld [vmem:[#allocation4 + $0x4d0] ss:$8 sps:$4 sm:$0xff]   ;;  %v17233_v26 = vld [vmem:[#allocation4 + $0x5f4] ss:$8 sps:$4 sm:$0xff]   ;;  %v15314_v62 = vcombine.high %v3835_v15, %v3835_v15  ;;  %v18334_v5 = vld [vmem:[#allocation2 + $0x10] sm:$0xff]  ;;  %v15198_v34 = vrot.slane %v3180_v55, 10 }
 0x284   :  { %6702 = vmatpush1.bf16.msra.mxu1 %v17212_v4  ;;  %v3211_v4 = vrot.slane %v18334_v5, 6  ;;  %v17236_v49 = vld [vmem:[#allocation4 + $0x4b4] ss:$8 sps:$4 sm:$0xff]   ;;  %v17252_v5 = vld [vmem:[#allocation4 + $0x5c0] ss:$8 sps:$4 sm:$0xff]  }
 0x285   :  { %6461 = vmatmul.mubr.bf16.gmra.mxu0 %v15277_v10  ;;  %6703 = vmatprep.subr.bf16.mxu1 %v17220_v19  ;;  %v17228_v10 = vld [vmem:[#allocation4 + $0x4c0] ss:$8 sps:$4 sm:$0xff]   ;;  %v17239_v19 = vld [vmem:[#allocation4 + $0x5e4] ss:$8 sps:$4 sm:$0xff]   ;;  %v3836_v55 = vld [vmem:[#allocation3 + $0x360] sm:$0x11] }
 0x286   :  { %6607 = vmatpush2.bf16.msra.mxu0 %v17209_v21  ;;  %6470 = vmatprep.mubr.bf16.mxu0 %v15296_v29  ;;  %v17231_v21 = vld [vmem:[#allocation4 + $0x5f0] ss:$8 sps:$4 sm:$0xff]   ;;  %v20513_v29 = vld [vmem:[#allocation3 + $0x268] sm:$0xff]  ;;  %v20520_v31 = vsel %vm20107_vm3, %v15198_v34, %v3211_v4  ;;  %v17260_v34 = vld [vmem:[#allocation4 + $0x5b4] ss:$8 sps:$4 sm:$0xff]  }
 0x287   :  { %6608 = vmatprep.subr.bf16.mxu0 %v17217_v13  ;;  %6552 = vmatmul.mubr.bf16.gmra.mxu1 %v15261_v60  ;;  %v15279_v13 = vcombine.low %v3120_v27, %v20026_v11  ;;  %v17237_v60 = vld [vmem:[#allocation4 + $0x5e0] ss:$8 sps:$4 sm:$0xff]   ;;  %v17234_v11 = vld [vmem:[#allocation4 + $0x4b0] ss:$8 sps:$4 sm:$0xff]   ;;  %v15313_v27 = vcombine.low %v3835_v15, %v3835_v15  ;;  %v15316_v15 = vcombine.high %v3836_v55, %v3836_v55  ;;  %v17416_v38 = vld [vmem:[#allocation4 + $0x8a4] ss:$8 sps:$4 sm:$0xff]  }
 0x288   :  { %6704 = vmatpush1.bf16.msra.mxu1 %v17218_v47  ;;  %6561 = vmatprep.mubr.bf16.mxu1 %v15280_v52  ;;  %v3214_v47 = vrot.slane %v20513_v29, 6  ;;  %v17243_v52 = vld [vmem:[#allocation4 + $0x4a4] ss:$8 sps:$4 sm:$0xff]  }
 0x289   :  { %6705 = vmatprep.subr.bf16.mxu1 %v17226_v6 }
 0x28a   :  { %6609 = vmatpush2.bf16.msra.mxu0 %v17215_v42  ;;  %v3213_v42 = vrot.slane %v3211_v4, 4  ;;  %v17249_v4 = vld [vmem:[#allocation4 + $0x490] ss:$8 sps:$4 sm:$0xff]  }
 0x28b   :  { %6610 = vmatprep.subr.bf16.mxu0 %v17223_v14  ;;  %v17246_v14 = vld [vmem:[#allocation4 + $0x5d4] ss:$8 sps:$4 sm:$0xff]  }
 0x28c   :  { %6706 = vmatpush1.bf16.msra.mxu1 %v17224_v54  ;;  %v3215_v6 = vsel %vm20107_vm3, %v3213_v42, %v3214_v47  ;;  %v17263_v42 = vld [vmem:[#allocation4 + $0x5a4] ss:$8 sps:$4 sm:$0xff]  }
 0x28d   :  { %6471 = vmatmul.mubr.bf16.gmra.mxu0 %v15295_v41  ;;  %6707 = vmatprep.subr.bf16.mxu1 %v17233_v26  ;;  %v15210_v54 = vcombine.high %v20520_v31, %v3215_v6  ;;  %v15297_v41 = vcombine.low %v20035_v33, %v20039_v2  ;;  %v17254_v26 = vld [vmem:[#allocation4 + $0x5c4] ss:$8 sps:$4 sm:$0xff]  }
 0x28e   :  { %6611 = vmatpush2.bf16.msra.mxu0 %v17221_v12  ;;  %6480 = vmatprep.mubr.bf16.mxu0 %v15314_v62  ;;  %v17244_v12 = vld [vmem:[#allocation4 + $0x5d0] ss:$8 sps:$4 sm:$0xff]   ;;  %v17251_v62 = vld [vmem:[#allocation4 + $0x494] ss:$8 sps:$4 sm:$0xff]   ;;  %v17257_v2 = vld [vmem:[#allocation4 + $0x484] ss:$8 sps:$4 sm:$0xff]  }
 0x28f   :  { %6612 = vmatprep.subr.bf16.mxu0 %v17230_v3  ;;  %6562 = vmatmul.mubr.bf16.gmra.mxu1 %v15279_v13  ;;  %v17241_v3 = vld [vmem:[#allocation4 + $0x4a0] ss:$8 sps:$4 sm:$0xff]  }
 0x290   :  { %6708 = vmatpush2.bf16.msra.mxu1 %v17231_v21  ;;  %6571 = vmatprep.mubr.bf16.mxu1 %v15298_v48  ;;  %v20527_v21 = vld [vmem:[#allocation3 + $0x370] sm:$0xff]  ;;  %v15315_v48 = vcombine.low %v3836_v55, %v3836_v55  ;;  %v17264_v55 = vld [vmem:[#allocation4 + $0x670] ss:$8 sps:$4 sm:$0xff]  }
 0x291   :  { %6709 = vmatprep.subr.bf16.mxu1 %v17239_v19  ;;  %v3217_v33 = vrot.slane %v20527_v21, 6  ;;  %v17258_v19 = vld [vmem:[#allocation4 + $0x5b0] ss:$8 sps:$4 sm:$0xff]  }
 0x292   :  { %6613 = vmatpush2.bf16.msra.mxu0 %v17228_v10  ;;  %v20530_v10 = vld [vmem:[#allocation3 + $0x1d0] sm:$0xff] }
 0x293   :  { %6614 = vmatprep.subr.bf16.mxu0 %v17236_v49  ;;  %v3220_v13 = vrot.slane %v20530_v10, 6  ;;  %v17255_v49 = vld [vmem:[#allocation4 + $0x480] ss:$8 sps:$4 sm:$0xff]  }
 0x294   :  { %6710 = vmatpush2.bf16.msra.mxu1 %v17237_v60  ;;  %v3219_v60 = vrot.slane %v3217_v33, 4 }
 0x295   :  { %6481 = vmatmul.mubr.bf16.gmra.mxu0 %v15313_v27  ;;  %6711 = vmatprep.subr.bf16.mxu1 %v17246_v14  ;;  %v3216_v27 = vrot.slane %v3214_v47, 4  ;;  %v17261_v14 = vld [vmem:[#allocation4 + $0x5a0] ss:$8 sps:$4 sm:$0xff]   ;;  %v17272_v47 = vld [vmem:[#allocation4 + $0x664] ss:$8 sps:$4 sm:$0xff]  }
 0x296   :  { %6615 = vmatpush2.bf16.msra.mxu0 %v17234_v11  ;;  %6622 = vmatprep.mubr.bf16.mxu0 %v15210_v54  ;;  %v17266_v11 = vld [vmem:[#allocation4 + $0x674] ss:$8 sps:$4 sm:$0xff]   ;;  %v3221_v54 = vsel %vm20107_vm3, %v3219_v60, %v3220_v13 }
 0x297   :  { %6616 = vmatprep.subr.bf16.mxu0 %v17243_v52  ;;  %6572 = vmatmul.mubr.bf16.gmra.mxu1 %v15297_v41  ;;  %v23586_v52 = vcombine.high %v19620_v53, %v19354_v40  ;;  %v3218_v41 = vsel %vm20107_vm3, %v3216_v27, %v3217_v33  ;;  %v17278_v33 = vld [vmem:[#allocation4 + $0x654] ss:$8 sps:$4 sm:$0xff]  }
 0x298   :  { %6712 = vmatpush2.bf16.msra.mxu1 %v17244_v12  ;;  %6581 = vmatprep.mubr.bf16.mxu1 %v15316_v15  ;;  %v15209_v12 = vcombine.low %v20520_v31, %v3215_v6  ;;  %v20541_v15 = vld [vmem:[#allocation3 + $0x130] sm:$0xff] }
 0x299   :  { %6713 = vmatprep.subr.bf16.mxu1 %v17254_v26  ;;  %v15228_v26 = vcombine.high %v3218_v41, %v3221_v54  ;;  %v20544_v31 = vld [vmem:[#allocation3 + $0xd0] sm:$0xff] }
 0x29a   :  { %6617 = vmatpush2.bf16.msra.mxu0 %v17241_v3  ;;  %v17269_v3 = vld [vmem:[#allocation4 + $0x594] ss:$8 sps:$4 sm:$0xff]   ;;  %v3226_v6 = vrot.slane %v20544_v31, 6 }
 0x29b   :  { %6618 = vmatprep.subr.bf16.mxu0 %v17251_v62  ;;  %v3223_v62 = vrot.slane %v20541_v15, 6 }
 0x29c   :  { %6714 = vmatpush2.bf16.msra.mxu1 %v17252_v5  ;;  %v3222_v5 = vrot.slane %v3220_v13, 4 }
 0x29d   :  { %6715 = vmatprep.subr.bf16.mxu1 %v17260_v34  ;;  %v17270_v34 = vld [vmem:[#allocation4 + $0x660] ss:$8 sps:$4 sm:$0xff]  }
 0x29e   :  { %6619 = vmatpush2.bf16.msra.mxu0 %v17249_v4  ;;  %v17267_v4 = vld [vmem:[#allocation4 + $0x590] ss:$8 sps:$4 sm:$0xff]   ;;  %v3224_v13 = vsel %vm20107_vm3, %v3222_v5, %v3223_v62  ;;  %v23588_v5 = vcombine.high %v20078_v32, %v20090_v43 }
 0x29f   :  { %6620 = vmatprep.subr.bf16.mxu0 %v17257_v2  ;;  %6582 = vmatmul.mubr.bf16.gmra.mxu1 %v15315_v48  ;;  %v17275_v2 = vld [vmem:[#allocation4 + $0x584] ss:$8 sps:$4 sm:$0xff]   ;;  %v17273_v48 = vld [vmem:[#allocation4 + $0x580] ss:$8 sps:$4 sm:$0xff]  }
 0x2a0   :  { %6716 = vmatpush2.bf16.msra.mxu1 %v17258_v19  ;;  %6723 = vmatprep.mubr.bf16.mxu1 %v23586_v52  ;;  %v3225_v19 = vrot.slane %v3223_v62, 4  ;;  %v17281_v52 = vld [vmem:[#allocation4 + $0x644] ss:$8 sps:$4 sm:$0xff]   ;;  %v17287_v62 = vld [vmem:[#allocation4 + $0x634] ss:$8 sps:$4 sm:$0xff]  }
 0x2a1   :  { %6717 = vmatprep.subr.bf16.mxu1 %v17263_v42  ;;  %v20549_v42 = vld [vmem:[#allocation3 + $0x190] sm:$0xff] }
 0x2a2   :  { %6621 = vmatpush2.bf16.msra.mxu0 %v17255_v49  ;;  %v17276_v49 = vld [vmem:[#allocation4 + $0x650] ss:$8 sps:$4 sm:$0xff]   ;;  %v3229_v60 = vrot.slane %v20549_v42, 6  ;;  %v3227_v27 = vsel %vm20107_vm3, %v3225_v19, %v3226_v6 }
 0x2a3   :  { %6792 = vmatprep.subr.bf16.mxu0 %v17266_v11  ;;  %v15227_v11 = vcombine.low %v3218_v41, %v3221_v54  ;;  %v23587_v54 = vcombine.low %v19620_v53, %v19354_v40  ;;  %v3228_v41 = vrot.slane %v3226_v6, 4  ;;  %v15245_v19 = vcombine.low %v3224_v13, %v3227_v27  ;;  %v17293_v53 = vld [vmem:[#allocation4 + $0x624] ss:$8 sps:$4 sm:$0xff]   ;;  %v17296_v6 = vld [vmem:[#allocation4 + $0x754] ss:$8 sps:$4 sm:$0xff]  }
 0x2a4   :  { %6718 = vmatpush2.bf16.msra.mxu1 %v17261_v14  ;;  %v17284_v14 = vld [vmem:[#allocation4 + $0x774] ss:$8 sps:$4 sm:$0xff]  }
 0x2a5   :  { %6623 = vmatmul.mubr.bf16.vlgmr.msra.gmra.mxu0 %v15209_v12  ;;  %6719 = vmatprep.subr.bf16.mxu1 %v17269_v3  ;;  %v17282_v12 = vld [vmem:[#allocation4 + $0x770] ss:$8 sps:$4 sm:$0xff]   ;;  %v17279_v3 = vld [vmem:[#allocation4 + $0x640] ss:$8 sps:$4 sm:$0xff]   ;;  %v3230_v40 = vsel %vm20107_vm3, %v3228_v41, %v3229_v60  ;;  %v23593_v41 = vcombine.low %v20119_v0, %v20126_v57 }
 0x2a6   :  { %6632 = vmatprep.mubr.bf16.mxu0 %v15228_v26  ;;  %6793 = vmatpush1.bf16.msra.mxu0 %v17264_v55  ;;  %v15246_v55 = vcombine.high %v3224_v13, %v3227_v27  ;;  %v3231_v26 = vrot.slane %v3229_v60, 4  ;;  %v23590_v13 = vcombine.low %v20078_v32, %v20090_v43  ;;  %v23591_v60 = vcombine.high %v20119_v0, %v20126_v57  ;;  %v17300_v27 = vld [vmem:[#allocation4 + $0x740] ss:$8 sps:$4 sm:$0xff]   ;;  %v17318_v57 = vld [vmem:[#allocation4 + $0x710] ss:$8 sps:$4 sm:$0xff]  }
 0x2a7   :  { %6794 = vmatprep.subr.bf16.mxu0 %v17272_v47  ;;  %v17290_v47 = vld [vmem:[#allocation4 + $0x764] ss:$8 sps:$4 sm:$0xff]   ;;  %v23592_v32 = vcombine.high %v20135_v18, %v20142_v24  ;;  %v17303_v43 = vld [vmem:[#allocation4 + $0x600] ss:$8 sps:$4 sm:$0xff]   ;;  %v23596_v0 = vcombine.high %v20174_v30, %v20186_v23 }
 0x2a8   :  { %6720 = vmatpush2.bf16.msra.mxu1 %v17267_v4  ;;  %v17288_v4 = vld [vmem:[#allocation4 + $0x760] ss:$8 sps:$4 sm:$0xff]  }
 0x2a9   :  { %6721 = vmatprep.subr.bf16.mxu1 %v17275_v2 }
 0x2aa   :  { %6795 = vmatpush1.bf16.msra.mxu0 %v17270_v34  ;;  %v23589_v34 = vrot.slane %v23582_v7, 6  ;;  %v17291_v7 = vld [vmem:[#allocation4 + $0x620] ss:$8 sps:$4 sm:$0xff]  }
 0x2ab   :  { %6796 = vmatprep.subr.bf16.mxu0 %v17278_v33  ;;  %v17285_v33 = vld [vmem:[#allocation4 + $0x630] ss:$8 sps:$4 sm:$0xff]  }
 0x2ac   :  { %6722 = vmatpush2.bf16.msra.mxu1 %v17273_v48  ;;  %v3233_v2 = vsel %vm20107_vm3, %v3231_v26, %v23589_v34  ;;  %v17314_v26 = vld [vmem:[#allocation4 + $0x724] ss:$8 sps:$4 sm:$0xff]   ;;  %v17309_v34 = vld [vmem:[#allocation4 + $0x6f0] ss:$8 sps:$4 sm:$0xff]  }
 0x2ad   :  { %6633 = vmatmul.mubr.bf16.gmra.mxu0 %v15227_v11  ;;  %6893 = vmatprep.subr.bf16.mxu1 %v17284_v14  ;;  %v15264_v48 = vcombine.high %v3230_v40, %v3233_v2  ;;  %v17302_v11 = vld [vmem:[#allocation4 + $0x744] ss:$8 sps:$4 sm:$0xff]   ;;  %v17297_v14 = vld [vmem:[#allocation4 + $0x610] ss:$8 sps:$4 sm:$0xff]  }
 0x2ae   :  { %6642 = vmatprep.mubr.bf16.mxu0 %v15246_v55  ;;  %6797 = vmatpush1.bf16.msra.mxu0 %v17276_v49  ;;  %v17294_v49 = vld [vmem:[#allocation4 + $0x750] ss:$8 sps:$4 sm:$0xff]   ;;  %v15263_v55 = vcombine.low %v3230_v40, %v3233_v2  ;;  %v23595_v40 = vcombine.low %v20135_v18, %v20142_v24  ;;  %v23600_v24 = vld [vmem:[#allocation29_spill] sm:$0xff] }
 0x2af   :  { %6798 = vmatprep.subr.bf16.mxu0 %v17281_v52  ;;  %6724 = vmatmul.mubr.bf16.vlgmr.msra.gmra.mxu1 %v23587_v54  ;;  %v17299_v52 = vld [vmem:[#allocation4 + $0x614] ss:$8 sps:$4 sm:$0xff]  }
 0x2b0   :  { %6733 = vmatprep.mubr.bf16.mxu1 %v23588_v5  ;;  %6894 = vmatpush1.bf16.msra.mxu1 %v17282_v12  ;;  %v17305_v12 = vld [vmem:[#allocation4 + $0x604] ss:$8 sps:$4 sm:$0xff]   ;;  %v17311_v54 = vld [vmem:[#allocation4 + $0x6f4] ss:$8 sps:$4 sm:$0xff]   ;;  %v23594_v5 = vcombine.high %v20158_v59, %v20165_v22 }
 0x2b1   :  { %6895 = vmatprep.subr.bf16.mxu1 %v17290_v47  ;;  %v17306_v47 = vld [vmem:[#allocation4 + $0x730] ss:$8 sps:$4 sm:$0xff]  }
 0x2b2   :  { %6799 = vmatpush1.bf16.msra.mxu0 %v17279_v3  ;;  %v17308_v3 = vld [vmem:[#allocation4 + $0x734] ss:$8 sps:$4 sm:$0xff]  }
 0x2b3   :  { %6800 = vmatprep.subr.bf16.mxu0 %v17287_v62  ;;  %v4133_v62 = vlaneseq }
 0x2b4   :  { %6896 = vmatpush1.bf16.msra.mxu1 %v17288_v4  ;;  %v17312_v4 = vld [vmem:[#allocation4 + $0x720] ss:$8 sps:$4 sm:$0xff]  }
 0x2b5   :  { %6643 = vmatmul.mubr.bf16.gmra.mxu0 %v15245_v19  ;;  %6897 = vmatprep.subr.bf16.mxu1 %v17296_v6  ;;  %v4134_v2 = vshrl.u32 %v4133_v62, 7  ;;  %v17320_v19 = vld [vmem:[#allocation4 + $0x714] ss:$8 sps:$4 sm:$0xff]   ;;  %v17326_v6 = vld [vmem:[#allocation4 + $0x704] ss:$8 sps:$4 sm:$0xff]  }
 0x2b6   :  { %6652 = vmatprep.mubr.bf16.mxu0 %v15264_v48  ;;  %6801 = vmatpush1.bf16.msra.mxu0 %v17285_v33  ;;  %v17317_v33 = vld [vmem:[#allocation4 + $0x6e4] ss:$8 sps:$4 sm:$0xff]   ;;  %v17332_v62 = vld [vmem:[#allocation4 + $0x7f0] ss:$8 sps:$4 sm:$0xff]  }
 0x2b7   :  { %6802 = vmatprep.subr.bf16.mxu0 %v17293_v53  ;;  %6734 = vmatmul.mubr.bf16.gmra.mxu1 %v23590_v13  ;;  %v17315_v53 = vld [vmem:[#allocation4 + $0x6e0] ss:$8 sps:$4 sm:$0xff]   ;;  %v20587_v48 = vsub.s32 0, %v4134_v2  ;;  %v20592_v18 = vsub.s32 1, %v4134_v2 }
 0x2b8   :  { %6743 = vmatprep.mubr.bf16.mxu1 %v23591_v60  ;;  %6898 = vmatpush1.bf16.msra.mxu1 %v17294_v49  ;;  %v17323_v49 = vld [vmem:[#allocation4 + $0x6d4] ss:$8 sps:$4 sm:$0xff]   ;;  %v17324_v13 = vld [vmem:[#allocation4 + $0x700] ss:$8 sps:$4 sm:$0xff]  }
 0x2b9   :  { %6899 = vmatprep.subr.bf16.mxu1 %v17302_v11  ;;  %23597 = vst [vmem:[#allocation44_spill] sm:$0xff] %v20587_v48  ;;  %v23598_v11 = vcombine.low %v20158_v59, %v20165_v22  ;;  %23599 = vst [vmem:[#allocation39_spill] sm:$0xff] %v20592_v18  ;;  %v3837_v60 = vld [vmem:[#allocation3 + $0xb8] sm:$0x11]  ;;  %v17331_v59 = vld [vmem:[#allocation4 + $0x6c4] ss:$8 sps:$4 sm:$0xff]  }
 0x2ba   :  { %6803 = vmatpush1.bf16.msra.mxu0 %v17291_v7  ;;  %v4131_v7 = vld [vmem:[#allocation6 + $0x1] ss:$4 sm:$0x3]  ;;  %v17334_v22 = vld [vmem:[#allocation4 + $0x7f4] ss:$8 sps:$4 sm:$0xff]  }
 0x2bb   :  { %6804 = vmatprep.subr.bf16.mxu0 %v17299_v52  ;;  %v23601_v52 = vcombine.high %v20206_v51, %v23600_v24 }
 0x2bc   :  { %6900 = vmatpush1.bf16.msra.mxu1 %v17300_v27  ;;  %v17321_v27 = vld [vmem:[#allocation4 + $0x6d0] ss:$8 sps:$4 sm:$0xff]  }
 0x2bd   :  { %6653 = vmatmul.mubr.bf16.gmra.mxu0 %v15263_v55  ;;  %6901 = vmatprep.subr.bf16.mxu1 %v17308_v3  ;;  %v6220_v55 = vpop.f32.mrf.mxu0  ;;  %v15318_v3 = vcombine.high %v3837_v60, %v3837_v60 }
 0x2be   :  { %6662 = vmatprep.mubr.bf16.mxu0 %v23592_v32  ;;  %6805 = vmatpush1.bf16.msra.mxu0 %v17297_v14  ;;  %v20598_v14 = vrot.slane %v4131_v7, %v20587_v48  ;;  %v17450_v48 = vld [vmem:[#allocation4 + $0x944] ss:$8 sps:$4 sm:$0xff]  }
 0x2bf   :  { %6806 = vmatprep.subr.bf16.mxu0 %v17305_v12  ;;  %6744 = vmatmul.mubr.bf16.gmra.mxu1 %v23593_v41  ;;  %v3477_v12 = vrot.slane %v20513_v29, 7  ;;  %v6222_v32 = vpop.f32.mrf.mxu0  ;;  %v17329_v29 = vld [vmem:[#allocation4 + $0x6c0] ss:$8 sps:$4 sm:$0xff]   ;;  %v17340_v41 = vld [vmem:[#allocation4 + $0x7e4] ss:$8 sps:$4 sm:$0xff]  }
 0x2c0   :  { %6753 = vmatprep.mubr.bf16.mxu1 %v23594_v5  ;;  %6902 = vmatpush1.bf16.msra.mxu1 %v17306_v47  ;;  %v20602_v47 = vrot.slane %v4131_v7, %v20592_v18  ;;  %v6221_v5 = vadd.f32 %v6220_v55, %v20598_v14  ;;  %v17346_v55 = vld [vmem:[#allocation4 + $0x7d4] ss:$8 sps:$4 sm:$0xff]  }
 0x2c1   :  { %6903 = vmatprep.subr.bf16.mxu1 %v17314_v26  ;;  %v23602_v26 = vcombine.low %v20174_v30, %v20186_v23  ;;  %v6224_v2 = vpop.f32.mrf.mxu0 }
 0x2c2   :  { %6807 = vmatpush1.bf16.msra.mxu0 %v17303_v43  ;;  %v3480_v43 = vrot.slane %v20527_v21, 7  ;;  %v6223_v23 = vadd.f32 %v6222_v32, %v20602_v47 }
 0x2c3   :  { %6808 = vmatprep.subr.bf16.mxu0 %v17311_v54  ;;  %v3448_v54 = vld [vmem:[#allocation2 + $0x10] sm:$0x88] }
 0x2c4   :  { %6904 = vmatpush1.bf16.msra.mxu1 %v17312_v4  ;;  %v3479_v4 = vrot.slane %v3477_v12, 4 }
 0x2c5   :  { %6663 = vmatmul.mubr.bf16.gmra.mxu0 %v23595_v40  ;;  %6905 = vmatprep.subr.bf16.mxu1 %v17320_v19  ;;  %v23603_v19 = vcombine.low %v20206_v51, %v23600_v24  ;;  %v15199_v40 = vrot.slane %v3448_v54, 11  ;;  %v17335_v51 = vld [vmem:[#allocation4 + $0x6b0] ss:$8 sps:$4 sm:$0xff]   ;;  %v17354_v54 = vld [vmem:[#allocation4 + $0x7c4] ss:$8 sps:$4 sm:$0xff]  }
 0x2c6   :  { %6672 = vmatprep.mubr.bf16.mxu0 %v23596_v0  ;;  %6809 = vmatpush2.bf16.msra.mxu0 %v17309_v34  ;;  %v17337_v34 = vld [vmem:[#allocation4 + $0x6b4] ss:$8 sps:$4 sm:$0xff]  }
 0x2c7   :  { %6810 = vmatprep.subr.bf16.mxu0 %v17317_v33  ;;  %6754 = vmatmul.mubr.bf16.gmra.mxu1 %v23598_v11  ;;  %v6321_v33 = vpop.f32.mrf.mxu1  ;;  %v23605_v0 = vld [vmem:[#allocation56_spill] sm:$0xff]  ;;  %v6225_v11 = vadd.f32 %v6224_v2, %v20598_v14  ;;  %v17357_v2 = vld [vmem:[#allocation4 + $0x684] ss:$8 sps:$4 sm:$0xff]  }
 0x2c8   :  { %6763 = vmatprep.mubr.bf16.mxu1 %v23601_v52  ;;  %6906 = vmatpush1.bf16.msra.mxu1 %v17318_v57  ;;  %v20613_v30 = vadd.f32 %v6321_v33, %v6221_v5  ;;  %v23604_v57 = vld [vmem:[#allocation55_spill] sm:$0xff]  ;;  %v15317_v52 = vcombine.low %v3837_v60, %v3837_v60  ;;  %v17352_v5 = vld [vmem:[#allocation4 + $0x7c0] ss:$8 sps:$4 sm:$0xff]  }
 0x2c9   :  { %6907 = vmatprep.subr.bf16.mxu1 %v17326_v6  ;;  %v17338_v6 = vld [vmem:[#allocation4 + $0x7e0] ss:$8 sps:$4 sm:$0xff]   ;;  %v6323_v7 = vpop.f32.mrf.mxu1 }
 0x2ca   :  { %6811 = vmatpush2.bf16.msra.mxu0 %v17315_v53  ;;  %v23606_v53 = vcombine.high %v23604_v57, %v23605_v0  ;;  %v20625_v24 = vadd.f32 %v6323_v7, %v6223_v23  ;;  %v23609_v7 = vld [vmem:[#allocation32_spill] sm:$0xff] }
 0x2cb   :  { %6812 = vmatprep.subr.bf16.mxu0 %v17323_v49  ;;  %v20622_v49 = vsel %vm20361_vm4, %v3479_v4, %v3480_v43  ;;  %v17349_v4 = vld [vmem:[#allocation4 + $0x690] ss:$8 sps:$4 sm:$0xff]  }
 0x2cc   :  { %6908 = vmatpush1.bf16.msra.mxu1 %v17324_v13  ;;  %v3478_v13 = vsel %vm20361_vm4, %v15199_v40, %v3477_v12  ;;  %v23607_v12 = vcombine.low %v23604_v57, %v23605_v0  ;;  %v17355_v40 = vld [vmem:[#allocation4 + $0x680] ss:$8 sps:$4 sm:$0xff]   ;;  %v17363_v57 = vld [vmem:[#allocation4 + $0x7a4] ss:$8 sps:$4 sm:$0xff]   ;;  %v3486_v0 = vrot.slane %v20541_v15, 7  ;;  %v3489_v15 = vrot.slane %v20544_v31, 7 }
 0x2cd   :  { %6673 = vmatmul.mubr.bf16.gmra.mxu0 %v23602_v26  ;;  %6909 = vmatprep.subr.bf16.mxu1 %v17334_v22  ;;  %v15214_v22 = vcombine.high %v3478_v13, %v20622_v49  ;;  %v17344_v26 = vld [vmem:[#allocation4 + $0x7d0] ss:$8 sps:$4 sm:$0xff]   ;;  %v17378_v31 = vld [vmem:[#allocation4 + $0x854] ss:$8 sps:$4 sm:$0xff]  }
 0x2ce   :  { %6682 = vmatprep.mubr.bf16.mxu0 %v15318_v3  ;;  %6813 = vmatpush2.bf16.msra.mxu0 %v17321_v27  ;;  %v17343_v27 = vld [vmem:[#allocation4 + $0x6a4] ss:$8 sps:$4 sm:$0xff]  }
 0x2cf   :  { %6814 = vmatprep.subr.bf16.mxu0 %v17331_v59  ;;  %6764 = vmatmul.mubr.bf16.gmra.mxu1 %v23603_v19  ;;  %v6325_v59 = vpop.f32.mrf.mxu1  ;;  %v3838_v3 = vld [vmem:[#allocation3 + $0x310] sm:$0x11]  ;;  %v17358_v19 = vld [vmem:[#allocation4 + $0x7b0] ss:$8 sps:$4 sm:$0xff]  }
 0x2d0   :  { %6773 = vmatprep.mubr.bf16.mxu1 %v23606_v53  ;;  %6910 = vmatpush2.bf16.msra.mxu1 %v17332_v62  ;;  %v20630_v32 = vadd.f32 %v6325_v59, %v6225_v11  ;;  %v17341_v62 = vld [vmem:[#allocation4 + $0x6a0] ss:$8 sps:$4 sm:$0xff]   ;;  %v15320_v60 = vcombine.high %v3838_v3, %v3838_v3  ;;  %v15319_v23 = vcombine.low %v3838_v3, %v3838_v3  ;;  %v3482_v53 = vrot.slane %v3480_v43, 4  ;;  %v17369_v43 = vld [vmem:[#allocation4 + $0x794] ss:$8 sps:$4 sm:$0xff]  }
 0x2d1   :  { %6911 = vmatprep.subr.bf16.mxu1 %v17340_v41  ;;  %v3483_v41 = vrot.slane %v20530_v10, 7  ;;  %v17366_v10 = vld [vmem:[#allocation4 + $0x874] ss:$8 sps:$4 sm:$0xff]   ;;  %v17361_v11 = vld [vmem:[#allocation4 + $0x7a0] ss:$8 sps:$4 sm:$0xff]   ;;  %v3492_v3 = vrot.slane %v20549_v42, 7 }
 0x2d2   :  { %6815 = vmatpush2.bf16.msra.mxu0 %v17329_v29  ;;  %v17351_v29 = vld [vmem:[#allocation4 + $0x694] ss:$8 sps:$4 sm:$0xff]   ;;  %v17372_v59 = vld [vmem:[#allocation4 + $0x864] ss:$8 sps:$4 sm:$0xff]   ;;  %v17376_v42 = vld [vmem:[#allocation4 + $0x850] ss:$8 sps:$4 sm:$0xff]  }
 0x2d3   :  { %6816 = vmatprep.subr.bf16.mxu0 %v17337_v34  ;;  %v17360_v34 = vld [vmem:[#allocation4 + $0x7b4] ss:$8 sps:$4 sm:$0xff]   ;;  %v3485_v33 = vrot.slane %v3483_v41, 4  ;;  %v3484_v21 = vsel %vm20361_vm4, %v3482_v53, %v3483_v41 }
 0x2d4   :  { %6912 = vmatpush2.bf16.msra.mxu1 %v17338_v6  ;;  %v23608_v6 = vld [vmem:[#allocation31_spill] sm:$0xff]  ;;  %v23612_v53 = vld [vmem:[#allocation12_spill] sm:$0xff] }
 0x2d5   :  { %6683 = vmatmul.mubr.bf16.gmra.mxu0 %v15317_v52  ;;  %6913 = vmatprep.subr.bf16.mxu1 %v17346_v55  ;;  %v3487_v52 = vsel %vm20361_vm4, %v3485_v33, %v3486_v0  ;;  %v15213_v55 = vcombine.low %v3478_v13, %v20622_v49  ;;  %v3488_v49 = vrot.slane %v3486_v0, 4  ;;  %v18341_v13 = vld [vmem:[#allocation3 + $0x250] sm:$0xff]  ;;  %v23611_v0 = vcombine.low %v23608_v6, %v23609_v7 }
 0x2d6   :  { %6817 = vmatpush2.bf16.msra.mxu0 %v17335_v51  ;;  %6824 = vmatprep.mubr.bf16.mxu0 %v15214_v22  ;;  %v23610_v51 = vcombine.high %v23608_v6, %v23609_v7  ;;  %v15232_v22 = vcombine.high %v3484_v21, %v3487_v52  ;;  %v17387_v6 = vld [vmem:[#allocation4 + $0x824] ss:$8 sps:$4 sm:$0xff]  }
 0x2d7   :  { %6818 = vmatprep.subr.bf16.mxu0 %v17343_v27  ;;  %6774 = vmatmul.mubr.bf16.gmra.mxu1 %v23607_v12  ;;  %v17364_v27 = vld [vmem:[#allocation4 + $0x870] ss:$8 sps:$4 sm:$0xff]   ;;  %v17373_v12 = vld [vmem:[#allocation4 + $0x780] ss:$8 sps:$4 sm:$0xff]  }
 0x2d8   :  { %6783 = vmatprep.mubr.bf16.mxu1 %v15320_v60  ;;  %6914 = vmatpush2.bf16.msra.mxu1 %v17344_v26  ;;  %v17367_v26 = vld [vmem:[#allocation4 + $0x790] ss:$8 sps:$4 sm:$0xff]   ;;  %v3491_v60 = vrot.slane %v3489_v15, 4 }
 0x2d9   :  { %6915 = vmatprep.subr.bf16.mxu1 %v17354_v54  ;;  %v17375_v54 = vld [vmem:[#allocation4 + $0x784] ss:$8 sps:$4 sm:$0xff]  }
 0x2da   :  { %6819 = vmatpush2.bf16.msra.mxu0 %v17341_v62  ;;  %v17370_v62 = vld [vmem:[#allocation4 + $0x860] ss:$8 sps:$4 sm:$0xff]   ;;  %v3493_v41 = vsel %vm20361_vm4, %v3491_v60, %v3492_v3 }
 0x2db   :  { %6820 = vmatprep.subr.bf16.mxu0 %v17351_v29  ;;  %v3495_v29 = vrot.slane %v18341_v13, 7  ;;  %v23619_v60 = vld [vmem:[#allocation42_spill] sm:$0xff] }
 0x2dc   :  { %6916 = vmatpush2.bf16.msra.mxu1 %v17352_v5  ;;  %v20651_v5 = vpop.f32.mrf.mxu0 }
 0x2dd   :  { %6917 = vmatprep.subr.bf16.mxu1 %v17360_v34  ;;  %v3490_v34 = vsel %vm20361_vm4, %v3488_v49, %v3489_v15  ;;  %v17388_v49 = vld [vmem:[#allocation4 + $0x810] ss:$8 sps:$4 sm:$0xff]  }
 0x2de   :  { %6821 = vmatpush2.bf16.msra.mxu0 %v17349_v4  ;;  %v15231_v4 = vcombine.low %v3484_v21, %v3487_v52  ;;  %v15250_v33 = vcombine.high %v3490_v34, %v3493_v41  ;;  %v23615_v52 = vld [vmem:[#allocation23_spill] sm:$0xff] }
 0x2df   :  { %6822 = vmatprep.subr.bf16.mxu0 %v17357_v2  ;;  %6784 = vmatmul.mubr.bf16.gmra.mxu1 %v15319_v23  ;;  %v17381_v2 = vld [vmem:[#allocation4 + $0x844] ss:$8 sps:$4 sm:$0xff]   ;;  %v17379_v23 = vld [vmem:[#allocation4 + $0x840] ss:$8 sps:$4 sm:$0xff]  }
 0x2e0   :  { %6918 = vmatpush2.bf16.msra.mxu1 %v17358_v19  ;;  %6925 = vmatprep.mubr.bf16.mxu1 %v23610_v51  ;;  %v3497_v19 = vrot.slane %v3495_v29, 4  ;;  %v23613_v51 = vld [vmem:[#allocation24_spill] sm:$0xff] }
 0x2e1   :  { %6919 = vmatprep.subr.bf16.mxu1 %v17363_v57  ;;  %v17384_v57 = vld [vmem:[#allocation4 + $0x834] ss:$8 sps:$4 sm:$0xff]  }
 0x2e2   :  { %6823 = vmatpush2.bf16.msra.mxu0 %v17355_v40  ;;  %v6230_v40 = vpop.f32.mrf.mxu0 }
 0x2e3   :  { %6994 = vmatprep.subr.bf16.mxu0 %v17366_v10  ;;  %v3494_v10 = vrot.slane %v3492_v3, 4 }
 0x2e4   :  { %6920 = vmatpush2.bf16.msra.mxu1 %v17361_v11  ;;  %v23614_v11 = vcombine.high %v23612_v53, %v23613_v51  ;;  %v6232_v21 = vpop.f32.mrf.mxu0 }
 0x2e5   :  { %6825 = vmatmul.mubr.bf16.vlgmr.msra.gmra.mxu0 %v15213_v55  ;;  %6921 = vmatprep.subr.bf16.mxu1 %v17369_v43  ;;  %v17382_v55 = vld [vmem:[#allocation4 + $0x830] ss:$8 sps:$4 sm:$0xff]   ;;  %v15249_v43 = vcombine.low %v3490_v34, %v3493_v41  ;;  %v17391_v34 = vld [vmem:[#allocation4 + $0x800] ss:$8 sps:$4 sm:$0xff]  }
 0x2e6   :  { %6834 = vmatprep.mubr.bf16.mxu0 %v15232_v22  ;;  %6995 = vmatpush1.bf16.msra.mxu0 %v17364_v27  ;;  %v23616_v27 = vrot.slane %v23615_v52, 7  ;;  %v17385_v22 = vld [vmem:[#allocation4 + $0x820] ss:$8 sps:$4 sm:$0xff]   ;;  %v6234_v3 = vpop.f32.mrf.mxu0 }
 0x2e7   :  { %6996 = vmatprep.subr.bf16.mxu0 %v17372_v59  ;;  %v3496_v59 = vsel %vm20361_vm4, %v3494_v10, %v3495_v29  ;;  %v6235_v52 = vadd.f32 %v6234_v3, %v20598_v14 }
 0x2e8   :  { %6922 = vmatpush2.bf16.msra.mxu1 %v17367_v26  ;;  %v3499_v15 = vsel %vm20361_vm4, %v3497_v19, %v23616_v27  ;;  %v17390_v26 = vld [vmem:[#allocation4 + $0x814] ss:$8 sps:$4 sm:$0xff]   ;;  %v20673_v13 = vpop.f32.mrf.mxu0 }
 0x2e9   :  { %6923 = vmatprep.subr.bf16.mxu1 %v17375_v54  ;;  %v15268_v7 = vcombine.high %v3496_v59, %v3499_v15  ;;  %v23618_v54 = vld [vmem:[#allocation27_spill] sm:$0xff]  ;;  %v15267_v29 = vcombine.low %v3496_v59, %v3499_v15 }
 0x2ea   :  { %6997 = vmatpush1.bf16.msra.mxu0 %v17370_v62  ;;  %v23617_v62 = vcombine.low %v23612_v53, %v23613_v51  ;;  %v17396_v19 = vld [vmem:[#allocation4 + $0x8f4] ss:$8 sps:$4 sm:$0xff]   ;;  %v23623_v51 = vcombine.high %v20414_v9, %v20420_v35  ;;  %v17407_v35 = vld [vmem:[#allocation4 + $0x8c4] ss:$8 sps:$4 sm:$0xff]  }
 0x2eb   :  { %6998 = vmatprep.subr.bf16.mxu0 %v17378_v31  ;;  %v23620_v31 = vcombine.high %v23618_v54, %v23619_v60 }
 0x2ec   :  { %6924 = vmatpush2.bf16.msra.mxu1 %v17373_v12  ;;  %v17393_v12 = vld [vmem:[#allocation4 + $0x804] ss:$8 sps:$4 sm:$0xff]  }
 0x2ed   :  { %6835 = vmatmul.mubr.bf16.gmra.mxu0 %v15231_v4  ;;  %v23621_v4 = vcombine.high %v20392_v44, %v20399_v20 }
 0x2ee   :  { %6844 = vmatprep.mubr.bf16.mxu0 %v15250_v33  ;;  %6999 = vmatpush1.bf16.msra.mxu0 %v17376_v42  ;;  %v20675_v42 = vpop.f32.mrf.mxu1 }
 0x2ef   :  { %7000 = vmatprep.subr.bf16.mxu0 %v17381_v2  ;;  %6926 = vmatmul.mubr.bf16.vlgmr.msra.gmra.mxu1 %v23611_v0  ;;  %v6231_v2 = vadd.f32 %v6230_v40, %v20598_v14  ;;  %v6233_v0 = vadd.f32 %v6232_v21, %v20602_v47  ;;  %v17394_v40 = vld [vmem:[#allocation4 + $0x8f0] ss:$8 sps:$4 sm:$0xff]  }
 0x2f0   :  { %6935 = vmatprep.mubr.bf16.mxu1 %v23614_v11 }
 0x2f1   :  { %v6240_v41 = vpop.f32.mrf.mxu0 }
 0x2f2   :  { %7001 = vmatpush1.bf16.msra.mxu0 %v17379_v23  ;;  %v6241_v3 = vadd.f32 %v6240_v41, %v20598_v14 }
 0x2f3   :  { %7002 = vmatprep.subr.bf16.mxu0 %v17384_v57  ;;  %v6242_v33 = vpop.f32.mrf.mxu0  ;;  %v23622_v57 = vcombine.low %v23618_v54, %v23619_v60 }
 0x2f5   :  { %6845 = vmatmul.mubr.bf16.gmra.mxu0 %v15249_v43  ;;  %v6244_v53 = vpop.f32.mrf.mxu0 }
 0x2f6   :  { %6854 = vmatprep.mubr.bf16.mxu0 %v15268_v7  ;;  %7003 = vmatpush1.bf16.msra.mxu0 %v17382_v55  ;;  %v6331_v23 = vpop.f32.mrf.mxu1  ;;  %v17399_v55 = vld [vmem:[#allocation4 + $0x8e4] ss:$8 sps:$4 sm:$0xff]  }
 0x2f7   :  { %7004 = vmatprep.subr.bf16.mxu0 %v17387_v6  ;;  %6936 = vmatmul.mubr.bf16.gmra.mxu1 %v23617_v62  ;;  %v20685_v10 = vadd.f32 %v6331_v23, %v6231_v2  ;;  %v20693_v15 = vpop.f32.mrf.mxu0  ;;  %v23624_v6 = vcombine.low %v20392_v44, %v20399_v20  ;;  %v17402_v62 = vld [vmem:[#allocation4 + $0x8d4] ss:$8 sps:$4 sm:$0xff]   ;;  %v6243_v44 = vadd.f32 %v6242_v33, %v20602_v47  ;;  %v17405_v2 = vld [vmem:[#allocation4 + $0x8c0] ss:$8 sps:$4 sm:$0xff]  }
 0x2f8   :  { %6945 = vmatprep.mubr.bf16.mxu1 %v23620_v31  ;;  %v6333_v11 = vpop.f32.mrf.mxu1  ;;  %v17410_v23 = vld [vmem:[#allocation4 + $0x8b4] ss:$8 sps:$4 sm:$0xff]  }
 0x2f9   :  { %v20691_v27 = vadd.f32 %v6333_v11, %v6233_v0 }
 0x2fa   :  { %7005 = vmatpush1.bf16.msra.mxu0 %v17385_v22  ;;  %v6335_v43 = vpop.f32.mrf.mxu1  ;;  %v17397_v22 = vld [vmem:[#allocation4 + $0x8e0] ss:$8 sps:$4 sm:$0xff]  }
 0x2fb   :  { %7006 = vmatprep.subr.bf16.mxu0 %v17390_v26  ;;  %v20695_v21 = vadd.f32 %v6335_v43, %v6235_v52  ;;  %v6250_v59 = vpop.f32.mrf.mxu0  ;;  %v3840_v43 = vld [vmem:[#allocation3 + $0x210] sm:$0x11] }
 0x2fc   :  { %v20700_v7 = vpop.f32.mrf.mxu1  ;;  %v6251_v33 = vadd.f32 %v6250_v59, %v20598_v14 }
 0x2fd   :  { %6855 = vmatmul.mubr.bf16.gmra.mxu0 %v15267_v29  ;;  %v6252_v26 = vpop.f32.mrf.mxu0  ;;  %v6245_v29 = vadd.f32 %v6244_v53, %v20598_v14 }
 0x2fe   :  { %6864 = vmatprep.mubr.bf16.mxu0 %v23621_v4  ;;  %7007 = vmatpush1.bf16.msra.mxu0 %v17388_v49  ;;  %v6341_v54 = vpop.f32.mrf.mxu1  ;;  %v17400_v49 = vld [vmem:[#allocation4 + $0x8d0] ss:$8 sps:$4 sm:$0xff]   ;;  %v6253_v0 = vadd.f32 %v6252_v26, %v20602_v47 }
 0x2ff   :  { %7008 = vmatprep.subr.bf16.mxu0 %v17393_v12  ;;  %6946 = vmatmul.mubr.bf16.gmra.mxu1 %v23622_v57  ;;  %v20710_v20 = vadd.f32 %v6341_v54, %v6241_v3  ;;  %v6254_v60 = vpop.f32.mrf.mxu0  ;;  %v17414_v3 = vld [vmem:[#allocation4 + $0x8a0] ss:$8 sps:$4 sm:$0xff]   ;;  %v15324_v54 = vcombine.high %v3840_v43, %v3840_v43 }
 0x300   :  { %6955 = vmatprep.mubr.bf16.mxu1 %v23623_v51  ;;  %v6343_v31 = vpop.f32.mrf.mxu1  ;;  %v17408_v51 = vld [vmem:[#allocation4 + $0x8b0] ss:$8 sps:$4 sm:$0xff]   ;;  %v6255_v11 = vadd.f32 %v6254_v60, %v20598_v14 }
 0x301   :  { %v20716_v12 = vadd.f32 %v6343_v31, %v6243_v44  ;;  %v20718_v41 = vpop.f32.mrf.mxu0  ;;  %v17421_v44 = vld [vmem:[#allocation4 + $0x894] ss:$8 sps:$4 sm:$0xff]  }
 0x302   :  { %7009 = vmatpush1.bf16.msra.mxu0 %v17391_v34  ;;  %v6345_v9 = vpop.f32.mrf.mxu1 }
 0x303   :  { %7010 = vmatprep.subr.bf16.mxu0 %v17396_v19  ;;  %v20720_v4 = vadd.f32 %v6345_v9, %v6245_v29  ;;  %v6260_v34 = vpop.f32.mrf.mxu0  ;;  %v17419_v9 = vld [vmem:[#allocation4 + $0x890] ss:$8 sps:$4 sm:$0xff]  }
 0x304   :  { %v6261_v26 = vadd.f32 %v6260_v34, %v20598_v14 }
 0x305   :  { %6865 = vmatmul.mubr.bf16.gmra.mxu0 %v23624_v6  ;;  %v6262_v19 = vpop.f32.mrf.mxu0 }
 0x306   :  { %6874 = vmatprep.mubr.bf16.mxu0 %v15304_v58  ;;  %7011 = vmatpush2.bf16.msra.mxu0 %v17394_v40  ;;  %v3839_v58 = vld [vmem:[#allocation3 + $0x128] sm:$0x11]  ;;  %v6263_v31 = vadd.f32 %v6262_v19, %v20602_v47  ;;  %v15323_v19 = vcombine.low %v3840_v43, %v3840_v43 }
 0x307   :  { %7012 = vmatprep.subr.bf16.mxu0 %v17399_v55  ;;  %6956 = vmatmul.mubr.bf16.gmra.mxu1 %v15269_v36  ;;  %v15322_v36 = vcombine.high %v3839_v58, %v3839_v58  ;;  %v6264_v25 = vpop.f32.mrf.mxu0  ;;  %v15321_v40 = vcombine.low %v3839_v58, %v3839_v58  ;;  %v23626_v58 = vcombine.low %v20463_v37, %v20473_v17 }
 0x308   :  { %6965 = vmatprep.mubr.bf16.mxu1 %v15288_v8  ;;  %v20725_v8 = vpop.f32.mrf.mxu1 }
 0x309   :  { %v20740_v55 = vpop.f32.mrf.mxu0 }
 0x30a   :  { %7013 = vmatpush2.bf16.msra.mxu0 %v17397_v22  ;;  %v6351_v57 = vpop.f32.mrf.mxu1 }
 0x30b   :  { %7014 = vmatprep.subr.bf16.mxu0 %v17402_v62  ;;  %v20732_v53 = vadd.f32 %v6351_v57, %v6251_v33  ;;  %v17424_v33 = vld [vmem:[#allocation4 + $0x884] ss:$8 sps:$4 sm:$0xff]  }
 0x30d   :  { %6875 = vmatmul.mubr.bf16.gmra.mxu0 %v15303_v56  ;;  %v6353_v56 = vpop.f32.mrf.mxu1 }
 0x30e   :  { %6884 = vmatprep.mubr.bf16.mxu0 %v15322_v36  ;;  %7015 = vmatpush2.bf16.msra.mxu0 %v17400_v49  ;;  %v20738_v52 = vadd.f32 %v6353_v56, %v6253_v0  ;;  %v6265_v36 = vadd.f32 %v6264_v25, %v20598_v14  ;;  %v17422_v0 = vld [vmem:[#allocation4 + $0x880] ss:$8 sps:$4 sm:$0xff]  }
 0x30f   :  { %7016 = vmatprep.subr.bf16.mxu0 %v17407_v35  ;;  %6966 = vmatmul.mubr.bf16.gmra.mxu1 %v15287_v50  ;;  %v6355_v45 = vpop.f32.mrf.mxu1  ;;  %v17413_v50 = vld [vmem:[#allocation3 + $0x26c] ss:$264 sps:$4 sm:$0xff]  }
 0x310   :  { %6975 = vmatprep.mubr.bf16.mxu1 %v23625_v28  ;;  %v20742_v59 = vadd.f32 %v6355_v45, %v6255_v11  ;;  %v6270_v6 = vpop.f32.mrf.mxu0 }
 0x311   :  { %v20744_v22 = vpop.f32.mrf.mxu1  ;;  %v6271_v28 = vadd.f32 %v6270_v6, %v20598_v14 }
 0x312   :  { %7017 = vmatpush2.bf16.msra.mxu0 %v17405_v2  ;;  %v6272_v62 = vpop.f32.mrf.mxu0 }
 0x313   :  { %7018 = vmatprep.subr.bf16.mxu0 %v17410_v23  ;;  %v6361_v60 = vpop.f32.mrf.mxu1 }
 0x314   :  { %v20751_v49 = vadd.f32 %v6361_v60, %v6261_v26  ;;  %v6274_v29 = vpop.f32.mrf.mxu0 }
 0x315   :  { %6885 = vmatmul.mubr.bf16.gmra.mxu0 %v15321_v40  ;;  %v6363_v35 = vpop.f32.mrf.mxu1  ;;  %v6275_v43 = vadd.f32 %v6274_v29, %v20598_v14 }
 0x316   :  { %7019 = vmatpush2.bf16.msra.mxu0 %v17408_v51  ;;  %7026 = vmatprep.mubr.bf16.mxu0 %v17413_v50  ;;  %v20754_v34 = vadd.f32 %v6363_v35, %v6263_v31  ;;  %v20756_v2 = vpop.f32.mrf.mxu0  ;;  %v6273_v51 = vadd.f32 %v6272_v62, %v20602_v47  ;;  %v17411_v50 = vld [vmem:[#allocation3 + $0x268] ss:$264 sps:$4 sm:$0xff]  }
 0x317   :  { %7020 = vmatprep.subr.bf16.mxu0 %v17416_v38  ;;  %6976 = vmatmul.mubr.bf16.gmra.mxu1 %v23626_v58  ;;  %v6365_v23 = vpop.f32.mrf.mxu1  ;;  %v3751_v38 = vld [vmem:[#allocation3 + $0x1d0] sm:$0xff] }
 0x318   :  { %6985 = vmatprep.mubr.bf16.mxu1 %v15324_v54  ;;  %v20758_v37 = vadd.f32 %v6365_v23, %v6265_v36  ;;  %v6280_v17 = vpop.f32.mrf.mxu0  ;;  %v3760_v54 = vld [vmem:[#allocation3 + $0x130] sm:$0xff] }
 0x319   :  { %v20760_v57 = vpop.f32.mrf.mxu1  ;;  %v6281_v35 = vadd.f32 %v6280_v17, %v20598_v14 }
 0x31a   :  { %7021 = vmatpush2.bf16.msra.mxu0 %v17414_v3  ;;  %v6282_v56 = vpop.f32.mrf.mxu0 }
 0x31b   :  { %7022 = vmatprep.subr.bf16.mxu0 %v17421_v44  ;;  %v6371_v25 = vpop.f32.mrf.mxu1  ;;  %v15236_v44 = vcombine.high %v3751_v38, %v3760_v54 }
 0x31c   :  { %v6284_v11 = vpop.f32.mrf.mxu0  ;;  %v20764_v40 = vadd.f32 %v6371_v25, %v6271_v28 }
 0x31d   :  { %v6373_v45 = vpop.f32.mrf.mxu1  ;;  %v15235_v11 = vcombine.low %v3751_v38, %v3760_v54 }
 0x31e   :  { %7023 = vmatpush2.bf16.msra.mxu0 %v17419_v9  ;;  %v6285_v3 = vpop.f32.mrf.mxu0  ;;  %v20767_v26 = vadd.f32 %v6373_v45, %v6273_v51  ;;  %v3769_v45 = vld [vmem:[#allocation3 + $0xd0] sm:$0xff] }
 0x31f   :  { %7024 = vmatprep.subr.bf16.mxu0 %v17424_v33  ;;  %6986 = vmatmul.mubr.bf16.gmra.mxu1 %v15323_v19  ;;  %v6375_v6 = vpop.f32.mrf.mxu1  ;;  %v6283_v33 = vadd.f32 %v6282_v56, %v20602_v47 }
 0x320   :  { %v20769_v60 = vadd.f32 %v6375_v6, %v6275_v43 }
 0x321   :  { %v20772_v31 = vpop.f32.mrf.mxu1 }
 0x322   :  { %7025 = vmatpush2.bf16.msra.mxu0 %v17422_v0  ;;  %v3778_v0 = vld [vmem:[#allocation3 + $0x190] sm:$0xff] }
 0x323   :  { %v6422_v58 = vpop.f32.mrf.mxu0  ;;  %v6381_v36 = vpop.f32.mrf.mxu1  ;;  %v15254_v17 = vcombine.high %v3769_v45, %v3778_v0 }
 0x324   :  { %v6423_v62 = vadd.f32 %v6422_v58, %v20613_v30  ;;  %v20777_v23 = vadd.f32 %v6381_v36, %v6281_v35 }
 0x325   :  { %7027 = vmatmul.mubr.bf16.vlgmr.msra.gmra.mxu0 %v17411_v50  ;;  %v6424_v9 = vpop.f32.mrf.mxu0  ;;  %v6383_v25 = vpop.f32.mrf.mxu1 }
 0x326   :  { %7036 = vmatprep.mubr.bf16.mxu0 %v15236_v44  ;;  %v6425_v29 = vadd.f32 %v6424_v9, %v20625_v24  ;;  %v20780_v51 = vadd.f32 %v6383_v25, %v6283_v33  ;;  %v15253_v9 = vcombine.low %v3769_v45, %v3778_v0  ;;  %v17425_v33 = vld [vmem:[#allocation3 + $0x2ec] ss:$72 sps:$4 sm:$0xff]  }
 0x327   :  { %v6426_v19 = vpop.f32.mrf.mxu0  ;;  %v6385_v14 = vpop.f32.mrf.mxu1 }
 0x328   :  { %v6427_v28 = vadd.f32 %v6426_v19, %v20630_v32 }
 0x329   :  { %v20782_v30 = vpop.f32.mrf.mxu0  ;;  %v6386_v56 = vpop.f32.mrf.mxu1 }
 0x32b   :  { %v6432_v24 = vpop.f32.mrf.mxu0 }
 0x32c   :  { %v6433_v50 = vadd.f32 %v6432_v24, %v20685_v10 }
 0x32d   :  { %7037 = vmatmul.mubr.bf16.gmra.mxu0 %v15235_v11  ;;  %v6434_v43 = vpop.f32.mrf.mxu0 }
 0x32e   :  { %7046 = vmatprep.mubr.bf16.mxu0 %v15254_v17  ;;  %v6435_v3 = vadd.f32 %v6434_v43, %v20691_v27 }
 0x32f   :  { %v6523_v6 = vpop.f32.mrf.mxu1  ;;  %v6436_v32 = vpop.f32.mrf.mxu0 }
 0x330   :  { %v20786_v44 = vadd.f32 %v6523_v6, %v6423_v62  ;;  %v6437_v58 = vadd.f32 %v6436_v32, %v20695_v21 }
 0x331   :  { %v6525_v35 = vpop.f32.mrf.mxu1  ;;  %v20789_v38 = vpop.f32.mrf.mxu0 }
 0x332   :  { %v20791_v54 = vadd.f32 %v6525_v35, %v6425_v29 }
 0x333   :  { %v6527_v36 = vpop.f32.mrf.mxu1  ;;  %v6442_v10 = vpop.f32.mrf.mxu0 }
 0x334   :  { %v20793_v19 = vadd.f32 %v6527_v36, %v6427_v28  ;;  %v6443_v27 = vadd.f32 %v6442_v10, %v20710_v20  ;;  %v17427_v28 = vld [vmem:[#allocation3 + $0x2e8] ss:$72 sps:$4 sm:$0xff]   ;;  %v17428_v20 = vld [vmem:[#allocation3 + $0x1a4] ss:$280 sps:$4 sm:$0xff]  }
 0x335   :  { %7047 = vmatmul.mubr.bf16.gmra.mxu0 %v15253_v9  ;;  %v20796_v25 = vpop.f32.mrf.mxu1  ;;  %v6444_v62 = vpop.f32.mrf.mxu0 }
 0x336   :  { %7056 = vmatprep.mubr.bf16.mxu0 %v17425_v33  ;;  %v6445_v21 = vadd.f32 %v6444_v62, %v20716_v12 }
 0x337   :  { %v6533_v11 = vpop.f32.mrf.mxu1  ;;  %v6446_v14 = vpop.f32.mrf.mxu0 }
 0x338   :  { %v20799_v17 = vadd.f32 %v6533_v11, %v6433_v50  ;;  %v6447_v29 = vadd.f32 %v6446_v14, %v20720_v4  ;;  %v17436_v14 = vld [vmem:[#allocation4 + $0x970] ss:$8 sps:$4 sm:$0xff]  }
 0x339   :  { %v6535_v0 = vpop.f32.mrf.mxu1  ;;  %v20802_v45 = vpop.f32.mrf.mxu0 }
 0x33a   :  { %v20804_v24 = vadd.f32 %v6535_v0, %v6435_v3  ;;  %v17438_v0 = vld [vmem:[#allocation4 + $0x974] ss:$8 sps:$4 sm:$0xff]  }
 0x33b   :  { %v6537_v56 = vpop.f32.mrf.mxu1  ;;  %10265 = vmatprep.subr.bf16.mxu1 %v17438_v0 }
 0x33c   :  { %v20806_v6 = vadd.f32 %v6537_v56, %v6437_v58  ;;  %v17430_v58 = vld [vmem:[#allocation3 + $0x1a0] ss:$280 sps:$4 sm:$0xff]   ;;  %10266 = vmatpush1.bf16.msra.mxu1 %v17436_v14 }
 0x33d   :  { %7057 = vmatmul.mubr.bf16.gmra.mxu0 %v17427_v28  ;;  %v6452_v43 = vpop.f32.mrf.mxu0  ;;  %v20809_v32 = vpop.f32.mrf.mxu1 }
 0x33e   :  { %v6453_v12 = vadd.f32 %v6452_v43, %v20732_v53  ;;  %7066 = vmatprep.mubr.bf16.mxu0 %v17428_v20  ;;  %v17433_v53 = vld [vmem:[#allocation3 + $0x34c] ss:$-504 sps:$4 sm:$0xff]   ;;  %v17439_v43 = vld [vmem:[#allocation4 + $0x960] ss:$8 sps:$4 sm:$0xff]  }
 0x33f   :  { %v6454_v50 = vpop.f32.mrf.mxu0  ;;  %v6543_v35 = vpop.f32.mrf.mxu1 }
 0x340   :  { %v6455_v4 = vadd.f32 %v6454_v50, %v20738_v52  ;;  %v20812_v36 = vadd.f32 %v6543_v35, %v6443_v27  ;;  %v17441_v50 = vld [vmem:[#allocation4 + $0x964] ss:$8 sps:$4 sm:$0xff]  }
 0x341   :  { %v6456_v9 = vpop.f32.mrf.mxu0  ;;  %v6545_v33 = vpop.f32.mrf.mxu1  ;;  %10267 = vmatprep.subr.bf16.mxu1 %v17441_v50  ;;  %v17447_v50 = vld [vmem:[#allocation4 + $0xa74] ss:$8 sps:$4 sm:$0xff]  }
 0x342   :  { %v6457_v3 = vadd.f32 %v6456_v9, %v20742_v59  ;;  %v20817_v62 = vadd.f32 %v6545_v33, %v6445_v21  ;;  %v3841_v33 = vld [vmem:[#allocation3 + $0x28] sm:$0x11]  ;;  %10268 = vmatpush1.bf16.msra.mxu1 %v17439_v43  ;;  %10348 = vmatprep.subr.bf16.mxu0 %v17447_v50  ;;  %v17454_v50 = vld [vmem:[#allocation4 + $0x930] ss:$8 sps:$4 sm:$0xff]  }
 0x343   :  { %v20815_v10 = vpop.f32.mrf.mxu0  ;;  %v6547_v11 = vpop.f32.mrf.mxu1  ;;  %v15326_v0 = vcombine.high %v3841_v33, %v3841_v33 }
 0x344   :  { %v20819_v56 = vadd.f32 %v6547_v11, %v6447_v29 }
 0x345   :  { %7067 = vmatmul.mubr.bf16.gmra.mxu0 %v17430_v58  ;;  %v6462_v28 = vpop.f32.mrf.mxu0  ;;  %v20822_v27 = vpop.f32.mrf.mxu1 }
 0x346   :  { %v6463_v52 = vadd.f32 %v6462_v28, %v20751_v49  ;;  %7076 = vmatprep.mubr.bf16.mxu0 %v17433_v53  ;;  %v17431_v49 = vld [vmem:[#allocation3 + $0x348] ss:$-504 sps:$4 sm:$0xff]   ;;  %v17444_v28 = vld [vmem:[#allocation4 + $0x954] ss:$8 sps:$4 sm:$0xff]  }
 0x347   :  { %v6464_v59 = vpop.f32.mrf.mxu0  ;;  %v6553_v20 = vpop.f32.mrf.mxu1  ;;  %10269 = vmatprep.subr.bf16.mxu1 %v17444_v28  ;;  %v15325_v28 = vcombine.low %v3841_v33, %v3841_v33  ;;  %v17459_v33 = vld [vmem:[#allocation4 + $0xa54] ss:$8 sps:$4 sm:$0xff]  }
 0x348   :  { %v6465_v21 = vadd.f32 %v6464_v59, %v20754_v34  ;;  %v20825_v9 = vadd.f32 %v6553_v20, %v6453_v12  ;;  %v17442_v34 = vld [vmem:[#allocation4 + $0x950] ss:$8 sps:$4 sm:$0xff]  }
 0x349   :  { %v6466_v35 = vpop.f32.mrf.mxu0  ;;  %v6555_v58 = vpop.f32.mrf.mxu1  ;;  %v17445_v20 = vld [vmem:[#allocation4 + $0xa70] ss:$8 sps:$4 sm:$0xff]   ;;  %10270 = vmatpush1.bf16.msra.mxu1 %v17442_v34 }
 0x34a   :  { %v6467_v29 = vadd.f32 %v6466_v35, %v20758_v37  ;;  %v20830_v53 = vadd.f32 %v6555_v58, %v6455_v4  ;;  %v17448_v58 = vld [vmem:[#allocation4 + $0x940] ss:$8 sps:$4 sm:$0xff]   ;;  %10349 = vmatpush1.bf16.msra.mxu0 %v17445_v20  ;;  %10271 = vmatprep.subr.bf16.mxu1 %v17450_v48  ;;  %v17457_v48 = vld [vmem:[#allocation4 + $0xa50] ss:$8 sps:$4 sm:$0xff]  }
 0x34b   :  { %v20828_v11 = vpop.f32.mrf.mxu0  ;;  %v6557_v14 = vpop.f32.mrf.mxu1 }
 0x34c   :  { %v20832_v18 = vadd.f32 %v6557_v14, %v6457_v3  ;;  %v17451_v14 = vld [vmem:[#allocation4 + $0xa60] ss:$8 sps:$4 sm:$0xff]  }
 0x34d   :  { %7077 = vmatmul.mubr.bf16.gmra.mxu0 %v17431_v49  ;;  %v6472_v59 = vpop.f32.mrf.mxu0  ;;  %v20835_v37 = vpop.f32.mrf.mxu1  ;;  %10272 = vmatpush1.bf16.msra.mxu1 %v17448_v58 }
 0x34e   :  { %v6473_v12 = vadd.f32 %v6472_v59, %v20764_v40  ;;  %7086 = vmatprep.mubr.bf16.mxu0 %v15326_v0  ;;  %v17453_v0 = vld [vmem:[#allocation4 + $0xa64] ss:$8 sps:$4 sm:$0xff]  }
 0x34f   :  { %v6474_v35 = vpop.f32.mrf.mxu0  ;;  %v6563_v43 = vpop.f32.mrf.mxu1  ;;  %10350 = vmatprep.subr.bf16.mxu0 %v17453_v0  ;;  %v17462_v0 = vld [vmem:[#allocation4 + $0x924] ss:$8 sps:$4 sm:$0xff]  }
 0x350   :  { %v6475_v4 = vadd.f32 %v6474_v35, %v20767_v26  ;;  %v20838_v39 = vadd.f32 %v6563_v43, %v6463_v52  ;;  %v17456_v35 = vld [vmem:[#allocation4 + $0x934] ss:$8 sps:$4 sm:$0xff]   ;;  %10351 = vmatpush1.bf16.msra.mxu0 %v17451_v14 }
 0x351   :  { %v6476_v49 = vpop.f32.mrf.mxu0  ;;  %v6565_v3 = vpop.f32.mrf.mxu1  ;;  %10273 = vmatprep.subr.bf16.mxu1 %v17456_v35  ;;  %10352 = vmatprep.subr.bf16.mxu0 %v17459_v33  ;;  %v17471_v33 = vld [vmem:[#allocation4 + $0xa34] ss:$8 sps:$4 sm:$0xff]  }
 0x352   :  { %v6477_v40 = vadd.f32 %v6476_v49, %v20769_v60  ;;  %v20843_v34 = vadd.f32 %v6565_v3, %v6465_v21  ;;  %10274 = vmatpush1.bf16.msra.mxu1 %v17454_v50  ;;  %v17460_v3 = vld [vmem:[#allocation4 + $0x920] ss:$8 sps:$4 sm:$0xff]   ;;  %v17466_v50 = vld [vmem:[#allocation4 + $0x910] ss:$8 sps:$4 sm:$0xff]  }
 0x353   :  { %v20841_v59 = vpop.f32.mrf.mxu0  ;;  %v6567_v26 = vpop.f32.mrf.mxu1  ;;  %10275 = vmatprep.subr.bf16.mxu1 %v17462_v0 }
 0x354   :  { %v20845_v43 = vadd.f32 %v6567_v26, %v6467_v29  ;;  %v17465_v29 = vld [vmem:[#allocation4 + $0xa44] ss:$8 sps:$4 sm:$0xff]   ;;  %10353 = vmatpush1.bf16.msra.mxu0 %v17457_v48  ;;  %v17472_v48 = vld [vmem:[#allocation4 + $0x900] ss:$8 sps:$4 sm:$0xff]  }
 0x355   :  { %7087 = vmatmul.mubr.bf16.gmra.mxu0 %v15325_v28  ;;  %v6482_v52 = vpop.f32.mrf.mxu0  ;;  %v20848_v20 = vpop.f32.mrf.mxu1  ;;  %10354 = vmatprep.subr.bf16.mxu0 %v17465_v29 }
 0x356   :  { %v6483_v60 = vadd.f32 %v6482_v52, %v20777_v23  ;;  %v17463_v23 = vld [vmem:[#allocation4 + $0xa40] ss:$8 sps:$4 sm:$0xff]   ;;  %10276 = vmatpush1.bf16.msra.mxu1 %v17460_v3  ;;  %v17468_v52 = vld [vmem:[#allocation4 + $0x914] ss:$8 sps:$4 sm:$0xff]   ;;  %v17477_v3 = vld [vmem:[#allocation4 + $0xa24] ss:$8 sps:$4 sm:$0xff]  }
 0x357   :  { %v6484_v49 = vpop.f32.mrf.mxu0  ;;  %v6573_v58 = vpop.f32.mrf.mxu1  ;;  %10277 = vmatprep.subr.bf16.mxu1 %v17468_v52  ;;  %v17480_v52 = vld [vmem:[#allocation4 + $0x9f4] ss:$8 sps:$4 sm:$0xff]  }
 0x358   :  { %v6485_v21 = vadd.f32 %v6484_v49, %v20780_v51  ;;  %v20851_v16 = vadd.f32 %v6573_v58, %v6473_v12  ;;  %10355 = vmatpush1.bf16.msra.mxu0 %v17463_v23  ;;  %v17469_v12 = vld [vmem:[#allocation4 + $0xa30] ss:$8 sps:$4 sm:$0xff]   ;;  %v17474_v58 = vld [vmem:[#allocation4 + $0x904] ss:$8 sps:$4 sm:$0xff]  }
 0x359   :  { %v6486_v28 = vpop.f32.mrf.mxu0  ;;  %v6575_v26 = vpop.f32.mrf.mxu1  ;;  %10356 = vmatprep.subr.bf16.mxu0 %v17471_v33 }
 0x35a   :  { %v20853_v35 = vadd.f32 %v6575_v26, %v6475_v4  ;;  %10278 = vmatpush1.bf16.msra.mxu1 %v17466_v50  ;;  %v17475_v26 = vld [vmem:[#allocation4 + $0xa20] ss:$8 sps:$4 sm:$0xff]  }
 0x35b   :  { %v6487_v14 = vpop.f32.mrf.mxu0  ;;  %v6577_v51 = vpop.f32.mrf.mxu1  ;;  %10279 = vmatprep.subr.bf16.mxu1 %v17474_v58 }
 0x35c   :  { %v20855_v49 = vadd.f32 %v6577_v51, %v6477_v40  ;;  %10357 = vmatpush1.bf16.msra.mxu0 %v17469_v12  ;;  %v17478_v14 = vld [vmem:[#allocation4 + $0x9f0] ss:$8 sps:$4 sm:$0xff]   ;;  %v17483_v12 = vld [vmem:[#allocation4 + $0xa14] ss:$8 sps:$4 sm:$0xff]  }
 0x35d   :  { %v20857_v28 = vpop.f32.mrf.mxu1  ;;  %10358 = vmatprep.subr.bf16.mxu0 %v17477_v3 }
 0x35e   :  { %10280 = vmatpush1.bf16.msra.mxu1 %v17472_v48 }
 0x35f   :  { %v6583_v0 = vpop.f32.mrf.mxu1  ;;  %10281 = vmatprep.subr.bf16.mxu1 %v17480_v52  ;;  %v17484_v52 = vld [vmem:[#allocation4 + $0x9e0] ss:$8 sps:$4 sm:$0xff]  }
 0x360   :  { %v20859_v4 = vadd.f32 %v6583_v0, %v6483_v60  ;;  %10359 = vmatpush1.bf16.msra.mxu0 %v17475_v26  ;;  %v17481_v0 = vld [vmem:[#allocation4 + $0xa10] ss:$8 sps:$4 sm:$0xff]  }
 0x361   :  { %v6585_v29 = vpop.f32.mrf.mxu1  ;;  %10360 = vmatprep.subr.bf16.mxu0 %v17483_v12  ;;  %v17493_v12 = vld [vmem:[#allocation4 + $0xaf0] ss:$8 sps:$4 sm:$0xff]  }
 0x362   :  { %v20861_v40 = vadd.f32 %v6585_v29, %v6485_v21  ;;  %10282 = vmatpush2.bf16.msra.mxu1 %v17478_v14 }
 0x363   :  { %v6587_v23 = vpop.f32.mrf.mxu1 }
 0x364   :  { %10361 = vmatpush1.bf16.msra.mxu0 %v17481_v0  ;;  %v17487_v23 = vld [vmem:[#allocation4 + $0xa00] ss:$8 sps:$4 sm:$0xff]   ;;  %v17490_v0 = vld [vmem:[#allocation4 + $0x9d0] ss:$8 sps:$4 sm:$0xff]  }
 0x365   :  { %v6624_v51 = vpop.f32.mrf.mxu0  ;;  %v6588_v33 = vpop.f32.mrf.mxu1 }
 0x366   :  { %v6625_v50 = vadd.f32 %v6624_v51, %v20786_v44  ;;  %v17486_v44 = vld [vmem:[#allocation4 + $0x9e4] ss:$8 sps:$4 sm:$0xff]  }
 0x367   :  { %v6626_v60 = vpop.f32.mrf.mxu0  ;;  %v17489_v51 = vld [vmem:[#allocation4 + $0xa04] ss:$8 sps:$4 sm:$0xff]   ;;  %10283 = vmatprep.subr.bf16.mxu1 %v17486_v44 }
 0x368   :  { %v6627_v58 = vadd.f32 %v6626_v60, %v20791_v54  ;;  %10284 = vmatpush2.bf16.msra.mxu1 %v17484_v52  ;;  %10362 = vmatprep.subr.bf16.mxu0 %v17489_v51  ;;  %v17496_v52 = vld [vmem:[#allocation4 + $0x9c0] ss:$8 sps:$4 sm:$0xff]  }
 0x369   :  { %v6628_v63 = vpop.f32.mrf.mxu0  ;;  %10363 = vmatpush1.bf16.msra.mxu0 %v17487_v23  ;;  %v17498_v23 = vld [vmem:[#allocation4 + $0x9c4] ss:$8 sps:$4 sm:$0xff]   ;;  %v17499_v51 = vld [vmem:[#allocation4 + $0xae0] ss:$8 sps:$4 sm:$0xff]  }
 0x36a   :  { %v6629_v21 = vadd.f32 %v6628_v63, %v20793_v19  ;;  %10364 = vmatprep.subr.bf16.mxu0 %v17495_v1 }
 0x36b   :  { %v20866_v48 = vpop.f32.mrf.mxu0 }
 0x36d   :  { %v6634_v3 = vpop.f32.mrf.mxu0  ;;  %10365 = vmatpush2.bf16.msra.mxu0 %v17493_v12  ;;  %v17505_v12 = vld [vmem:[#allocation4 + $0xad0] ss:$8 sps:$4 sm:$0xff]  }
 0x36e   :  { %v6635_v29 = vadd.f32 %v6634_v3, %v20799_v17  ;;  %v17492_v17 = vld [vmem:[#allocation4 + $0x9d4] ss:$8 sps:$4 sm:$0xff]  }
 0x36f   :  { %v6636_v26 = vpop.f32.mrf.mxu0  ;;  %v6725_v54 = vpop.f32.mrf.mxu1  ;;  %10285 = vmatprep.subr.bf16.mxu1 %v17492_v17 }
 0x370   :  { %v6637_v14 = vadd.f32 %v6636_v26, %v20804_v24  ;;  %v20870_v60 = vadd.f32 %v6725_v54, %v6625_v50  ;;  %10286 = vmatpush2.bf16.msra.mxu1 %v17490_v0  ;;  %v17504_v0 = vld [vmem:[#allocation4 + $0x9b4] ss:$8 sps:$4 sm:$0xff]  }
 0x371   :  { %v6638_v33 = vpop.f32.mrf.mxu0  ;;  %v6727_v19 = vpop.f32.mrf.mxu1  ;;  %10287 = vmatprep.subr.bf16.mxu1 %v17498_v23 }
 0x372   :  { %v6639_v63 = vadd.f32 %v6638_v33, %v20806_v6  ;;  %v20875_v61 = vadd.f32 %v6727_v19, %v6627_v58  ;;  %v17501_v33 = vld [vmem:[#allocation4 + $0xae4] ss:$8 sps:$4 sm:$0xff]  }
 0x373   :  { %v20873_v3 = vpop.f32.mrf.mxu0  ;;  %v6729_v24 = vpop.f32.mrf.mxu1  ;;  %10366 = vmatprep.subr.bf16.mxu0 %v17501_v33  ;;  %v17511_v33 = vld [vmem:[#allocation4 + $0xac0] ss:$8 sps:$4 sm:$0xff]  }
 0x374   :  { %v20877_v26 = vadd.f32 %v6729_v24, %v6629_v21  ;;  %10288 = vmatpush2.bf16.msra.mxu1 %v17496_v52  ;;  %10367 = vmatpush2.bf16.msra.mxu0 %v17499_v51  ;;  %v17502_v21 = vld [vmem:[#allocation4 + $0x9b0] ss:$8 sps:$4 sm:$0xff]   ;;  %v17508_v52 = vld [vmem:[#allocation4 + $0x9a0] ss:$8 sps:$4 sm:$0xff]   ;;  %v17510_v51 = vld [vmem:[#allocation4 + $0x9a4] ss:$8 sps:$4 sm:$0xff]  }
 0x375   :  { %v6644_v44 = vpop.f32.mrf.mxu0  ;;  %v20880_v6 = vpop.f32.mrf.mxu1  ;;  %10289 = vmatprep.subr.bf16.mxu1 %v17504_v0 }
 0x376   :  { %23627 = vst [vmem:[#allocation21_spill] sm:$0xff] %v20877_v26  ;;  %v6645_v50 = vadd.f32 %v6644_v44, %v20812_v36  ;;  %v17507_v26 = vld [vmem:[#allocation4 + $0xad4] ss:$8 sps:$4 sm:$0xff]  }
 0x377   :  { %v6646_v54 = vpop.f32.mrf.mxu0  ;;  %v6735_v19 = vpop.f32.mrf.mxu1  ;;  %10368 = vmatprep.subr.bf16.mxu0 %v17507_v26  ;;  %v17514_v26 = vld [vmem:[#allocation4 + $0x990] ss:$8 sps:$4 sm:$0xff]  }
 0x378   :  { %v6647_v58 = vadd.f32 %v6646_v54, %v20817_v62  ;;  %v20883_v46 = vadd.f32 %v6735_v19, %v6635_v29  ;;  %10290 = vmatpush2.bf16.msra.mxu1 %v17502_v21  ;;  %10369 = vmatpush2.bf16.msra.mxu0 %v17505_v12  ;;  %v17516_v21 = vld [vmem:[#allocation4 + $0x994] ss:$8 sps:$4 sm:$0xff]   ;;  %v17517_v12 = vld [vmem:[#allocation4 + $0xab0] ss:$8 sps:$4 sm:$0xff]  }
 0x379   :  { %v6648_v17 = vpop.f32.mrf.mxu0  ;;  %v6737_v36 = vpop.f32.mrf.mxu1  ;;  %10291 = vmatprep.subr.bf16.mxu1 %v17510_v51 }
 0x37a   :  { %v6649_v1 = vadd.f32 %v6648_v17, %v20819_v56  ;;  %v20888_v44 = vadd.f32 %v6737_v36, %v6637_v14  ;;  %v17513_v17 = vld [vmem:[#allocation4 + $0xac4] ss:$8 sps:$4 sm:$0xff]  }
 0x37b   :  { %v20886_v24 = vpop.f32.mrf.mxu0  ;;  %v6739_v62 = vpop.f32.mrf.mxu1  ;;  %10370 = vmatprep.subr.bf16.mxu0 %v17513_v17  ;;  %v17523_v17 = vld [vmem:[#allocation4 + $0xaa0] ss:$8 sps:$4 sm:$0xff]  }
 0x37c   :  { %23628 = vst [vmem:[#allocation46_spill] sm:$0xff] %v20888_v44  ;;  %v20890_v54 = vadd.f32 %v6739_v62, %v6639_v63  ;;  %10292 = vmatpush2.bf16.msra.mxu1 %v17508_v52  ;;  %10371 = vmatpush2.bf16.msra.mxu0 %v17511_v33  ;;  %v17520_v52 = vld [vmem:[#allocation4 + $0x980] ss:$8 sps:$4 sm:$0xff]   ;;  %v17522_v33 = vld [vmem:[#allocation4 + $0x984] ss:$8 sps:$4 sm:$0xff]  }
 0x37d   :  { %v6654_v23 = vpop.f32.mrf.mxu0  ;;  %v20893_v56 = vpop.f32.mrf.mxu1  ;;  %10293 = vmatprep.subr.bf16.mxu1 %v17516_v21 }
 0x37e   :  { %23629 = vst [vmem:[#allocation16_spill] sm:$0xff] %v20890_v54  ;;  %v6655_v29 = vadd.f32 %v6654_v23, %v20825_v9  ;;  %v17519_v54 = vld [vmem:[#allocation4 + $0xab4] ss:$8 sps:$4 sm:$0xff]  }
 0x37f   :  { %v6656_v19 = vpop.f32.mrf.mxu0  ;;  %v6745_v36 = vpop.f32.mrf.mxu1  ;;  %10372 = vmatprep.subr.bf16.mxu0 %v17519_v54  ;;  %v17528_v54 = vld [vmem:[#allocation4 + $0xb74] ss:$8 sps:$4 sm:$0xff]  }
 0x380   :  { %v6657_v14 = vadd.f32 %v6656_v19, %v20830_v53  ;;  %v20896_v44 = vadd.f32 %v6745_v36, %v6645_v50  ;;  %10294 = vmatpush2.bf16.msra.mxu1 %v17514_v26  ;;  %10373 = vmatpush2.bf16.msra.mxu0 %v17517_v12  ;;  %v17529_v26 = vld [vmem:[#allocation4 + $0xa90] ss:$8 sps:$4 sm:$0xff]  }
 0x381   :  { %v6658_v0 = vpop.f32.mrf.mxu0  ;;  %v6747_v9 = vpop.f32.mrf.mxu1  ;;  %10295 = vmatprep.subr.bf16.mxu1 %v17522_v33 }
 0x382   :  { %v6659_v63 = vadd.f32 %v6658_v0, %v20832_v18  ;;  %v20901_v23 = vadd.f32 %v6747_v9, %v6647_v58  ;;  %v17525_v0 = vld [vmem:[#allocation4 + $0xaa4] ss:$8 sps:$4 sm:$0xff]  }
 0x383   :  { %v20899_v62 = vpop.f32.mrf.mxu0  ;;  %v6749_v53 = vpop.f32.mrf.mxu1  ;;  %10374 = vmatprep.subr.bf16.mxu0 %v17525_v0 }
 0x384   :  { %23630 = vst [vmem:[#allocation47_spill] sm:$0xff] %v20901_v23  ;;  %v20903_v19 = vadd.f32 %v6749_v53, %v6649_v1  ;;  %10296 = vmatpush2.bf16.msra.mxu1 %v17520_v52  ;;  %10375 = vmatpush2.bf16.msra.mxu0 %v17523_v17 }
 0x385   :  { %v6664_v51 = vpop.f32.mrf.mxu0  ;;  %v20906_v18 = vpop.f32.mrf.mxu1  ;;  %10431 = vmatprep.subr.bf16.mxu1 %v17528_v54  ;;  %v17543_v54 = vld [vmem:[#allocation4 + $0xc74] ss:$8 sps:$4 sm:$0xff]  }
 0x386   :  { %23631 = vst [vmem:[#allocation20_spill] sm:$0xff] %v20903_v19  ;;  %v6665_v50 = vadd.f32 %v6664_v51, %v20838_v39  ;;  %v17531_v51 = vld [vmem:[#allocation4 + $0xa94] ss:$8 sps:$4 sm:$0xff]  }
 0x387   :  { %v6666_v36 = vpop.f32.mrf.mxu0  ;;  %v6755_v9 = vpop.f32.mrf.mxu1  ;;  %10376 = vmatprep.subr.bf16.mxu0 %v17531_v51 }
 0x388   :  { %v6667_v58 = vadd.f32 %v6666_v36, %v20843_v34  ;;  %v20909_v23 = vadd.f32 %v6755_v9, %v6655_v29  ;;  %10377 = vmatpush2.bf16.msra.mxu0 %v17529_v26  ;;  %v17537_v36 = vld [vmem:[#allocation4 + $0xa84] ss:$8 sps:$4 sm:$0xff]  }
 0x389   :  { %v6668_v21 = vpop.f32.mrf.mxu0  ;;  %v6757_v39 = vpop.f32.mrf.mxu1  ;;  %10378 = vmatprep.subr.bf16.mxu0 %v17537_v36 }
 0x38a   :  { %23632 = vst [vmem:[#allocation15_spill] sm:$0xff] %v20909_v23  ;;  %v6669_v1 = vadd.f32 %v6668_v21, %v20845_v43  ;;  %v20914_v53 = vadd.f32 %v6757_v39, %v6657_v14  ;;  %v17535_v43 = vld [vmem:[#allocation4 + $0xa80] ss:$8 sps:$4 sm:$0xff]  }
 0x38b   :  { %v20912_v12 = vpop.f32.mrf.mxu0  ;;  %v6759_v19 = vpop.f32.mrf.mxu1 }
 0x38c   :  { %23633 = vst [vmem:[#allocation35_spill] sm:$0xff] %v20914_v53  ;;  %v20916_v33 = vadd.f32 %v6759_v19, %v6659_v63  ;;  %10379 = vmatpush2.bf16.msra.mxu0 %v17535_v43 }
 0x38d   :  { %v6674_v34 = vpop.f32.mrf.mxu0  ;;  %v20919_v52 = vpop.f32.mrf.mxu1  ;;  %10514 = vmatprep.subr.bf16.mxu0 %v17543_v54 }
 0x38e   :  { %23634 = vst [vmem:[#allocation19_spill] sm:$0xff] %v20916_v33  ;;  %v6675_v29 = vadd.f32 %v6674_v34, %v20851_v16 }
 0x38f   :  { %v6676_v17 = vpop.f32.mrf.mxu0  ;;  %v6765_v9 = vpop.f32.mrf.mxu1 }
 0x390   :  { %v6677_v0 = vadd.f32 %v6676_v17, %v20853_v35  ;;  %v20922_v21 = vadd.f32 %v6765_v9, %v6665_v50 }
 0x391   :  { %v6678_v14 = vpop.f32.mrf.mxu0  ;;  %v6767_v63 = vpop.f32.mrf.mxu1 }
 0x392   :  { %23635 = vst [vmem:[#allocation38_spill] sm:$0xff] %v20922_v21  ;;  %v6679_v39 = vadd.f32 %v6678_v14, %v20855_v49  ;;  %v20927_v16 = vadd.f32 %v6767_v63, %v6667_v58 }
 0x393   :  { %v20925_v19 = vpop.f32.mrf.mxu0  ;;  %v6769_v26 = vpop.f32.mrf.mxu1 }
 0x394   :  { %23636 = vst [vmem:[#allocation34_spill] sm:$0xff] %v20927_v16  ;;  %v20929_v34 = vadd.f32 %v6769_v26, %v6669_v1 }
 0x395   :  { %v6684_v51 = vpop.f32.mrf.mxu0  ;;  %v20932_v17 = vpop.f32.mrf.mxu1 }
 0x396   :  { %23637 = vst [vmem:[#allocation40_spill] sm:$0xff] %v20929_v34  ;;  %v6685_v35 = vadd.f32 %v6684_v51, %v20859_v4 }
 0x397   :  { %v6686_v50 = vpop.f32.mrf.mxu0  ;;  %v6775_v49 = vpop.f32.mrf.mxu1 }
 0x398   :  { %v6687_v36 = vadd.f32 %v6686_v50, %v20861_v40  ;;  %v20935_v43 = vadd.f32 %v6775_v49, %v6675_v29 }
 0x399   :  { %v6688_v9 = vpop.f32.mrf.mxu0  ;;  %v6777_v14 = vpop.f32.mrf.mxu1 }
 0x39a   :  { %23638 = vst [vmem:[#allocation17_spill] sm:$0xff] %v20935_v43  ;;  %v20937_v63 = vadd.f32 %v6777_v14, %v6677_v0 }
 0x39b   :  { %v6689_v58 = vpop.f32.mrf.mxu0  ;;  %v6779_v16 = vpop.f32.mrf.mxu1 }
 0x39c   :  { %23639 = vst [vmem:[#allocation36_spill] sm:$0xff] %v20937_v63  ;;  %v20939_v21 = vadd.f32 %v6779_v16, %v6679_v39 }
 0x39d   :  { %v20941_v1 = vpop.f32.mrf.mxu1 }
 0x39e   :  { %23640 = vst [vmem:[#allocation28_spill] sm:$0xff] %v20939_v21 }
 0x39f   :  { %v6785_v54 = vpop.f32.mrf.mxu1 }
 0x3a0   :  { %v20943_v4 = vadd.f32 %v6785_v54, %v6685_v35 }
 0x3a1   :  { %v6787_v26 = vpop.f32.mrf.mxu1 }
 0x3a2   :  { %23641 = vst [vmem:[#allocation41_spill] sm:$0xff] %v20943_v4  ;;  %v20945_v51 = vadd.f32 %v6787_v26, %v6687_v36 }
 0x3a3   :  { %v6789_v40 = vpop.f32.mrf.mxu1 }
 0x3a4   :  { %23642 = vst [vmem:[#allocation53_spill] sm:$0xff] %v20945_v51 }
 0x3a5   :  { %v20947_v50 = vpop.f32.mrf.mxu0  ;;  %v6790_v29 = vpop.f32.mrf.mxu1 }
 0x3a7   :  { %v20949_v49 = vpop.f32.mrf.mxu0 }
 0x3a9   :  { %v20951_v9 = vpop.f32.mrf.mxu0 }
 0x3ab   :  { %v20953_v0 = vpop.f32.mrf.mxu0 }
 0x3ad   :  { %v20955_v39 = vpop.f32.mrf.mxu0 }
 0x3af   :  { %v20957_v16 = vpop.f32.mrf.mxu0  ;;  %v20959_v14 = vpop.f32.mrf.mxu1 }
 0x3b1   :  { %v20961_v35 = vpop.f32.mrf.mxu0  ;;  %v20963_v36 = vpop.f32.mrf.mxu1 }
 0x3b3   :  { %v20965_v58 = vpop.f32.mrf.mxu0  ;;  %v20967_v54 = vpop.f32.mrf.mxu1 }
 0x3b5   :  { %v20969_v26 = vpop.f32.mrf.mxu0  ;;  %v20971_v40 = vpop.f32.mrf.mxu1 }
 0x3b6   :  { %23643 = vst [vmem:[#allocation33_spill] sm:$0xff] %v20971_v40 }
 0x3b7   :  { %v20973_v29 = vpop.f32.mrf.mxu0  ;;  %v20975_v51 = vpop.f32.mrf.mxu1 }
 0x3b8   :  { %23644 = vst [vmem:[#allocation49_spill] sm:$0xff] %v20973_v29  ;;  %23645 = vst [vmem:[#allocation37_spill] sm:$0xff] %v20975_v51 }
 0x3b9   :  { %v20977_v4 = vpop.f32.mrf.mxu0  ;;  %v20979_v21 = vpop.f32.mrf.mxu1 }
 0x3ba   :  { %23646 = vst [vmem:[#allocation50_spill] sm:$0xff] %v20977_v4  ;;  %23647 = vst [vmem:[#allocation45_spill] sm:$0xff] %v20979_v21 }
 0x3bb   :  { %v20981_v63 = vpop.f32.mrf.mxu0  ;;  %v20983_v43 = vpop.f32.mrf.mxu1 }
 0x3bc   :  { %23648 = vst [vmem:[#allocation54_spill] sm:$0xff] %v20981_v63  ;;  %23649 = vst [vmem:[#allocation48_spill] sm:$0xff] %v20983_v43 }
 0x3bd   :  { %v20985_v34 = vpop.f32.mrf.mxu0  ;;  %v20987_v33 = vpop.f32.mrf.mxu1 }
 0x3be   :  { %23650 = vst [vmem:[#allocation22_spill] sm:$0xff] %v20985_v34  ;;  %23651 = vst [vmem:[#allocation51_spill] sm:$0xff] %v20987_v33 }
 0x3bf   :  { %v20989_v53 = vpop.f32.mrf.mxu0  ;;  %v20991_v23 = vpop.f32.mrf.mxu1 }
 0x3c0   :  { %23652 = vst [vmem:[#allocation52_spill] sm:$0xff] %v20989_v53  ;;  %23653 = vst [vmem:[#allocation29_spill] sm:$0xff] %v20991_v23 }
 0x3c1   :  { %v20993_v40 = vpop.f32.mrf.mxu0  ;;  %v20995_v29 = vpop.f32.mrf.mxu1 }
 0x3c2   :  { %23654 = vst [vmem:[#allocation55_spill] sm:$0xff] %v20993_v40  ;;  %23655 = vst [vmem:[#allocation56_spill] sm:$0xff] %v20995_v29 }
 0x3c3   :  { %v20997_v51 = vpop.f32.mrf.mxu0  ;;  %v20999_v4 = vpop.f32.mrf.mxu1 }
 0x3c4   :  { %23656 = vst [vmem:[#allocation31_spill] sm:$0xff] %v20997_v51  ;;  %23657 = vst [vmem:[#allocation32_spill] sm:$0xff] %v20999_v4 }
 0x3c5   :  { %v21001_v21 = vpop.f32.mrf.mxu0  ;;  %v21003_v63 = vpop.f32.mrf.mxu1 }
 0x3c6   :  { %23658 = vst [vmem:[#allocation12_spill] sm:$0xff] %v21001_v21  ;;  %23659 = vst [vmem:[#allocation24_spill] sm:$0xff] %v21003_v63 }
 0x3c7   :  { %v21005_v43 = vpop.f32.mrf.mxu0  ;;  %v21007_v34 = vpop.f32.mrf.mxu1 }
 0x3c8   :  { %23660 = vst [vmem:[#allocation23_spill] sm:$0xff] %v21005_v43  ;;  %23661 = vst [vmem:[#allocation27_spill] sm:$0xff] %v21007_v34 }
 0x3c9   :  { %v21009_v33 = vpop.f32.mrf.mxu0  ;;  %v21011_v53 = vpop.f32.mrf.mxu1 }
 0x3ca   :  { %23662 = vst [vmem:[#allocation42_spill] sm:$0xff] %v21009_v33  ;;  %23663 = vst [vmem:[#allocation57_spill] sm:$0xff] %v21011_v53 }
 0x3cb   :  { %v21013_v23 = vpop.f32.mrf.mxu0  ;;  %v21015_v40 = vpop.f32.mrf.mxu1 }
 0x3cc   :  { %23664 = vst [vmem:[#allocation58_spill] sm:$0xff] %v21015_v40  ;;  %v6227_v40 = vadd.f32 %v20651_v5, %v20602_v47 }
 0x3cd   :  { %v21017_v29 = vpop.f32.mrf.mxu0  ;;  %v21019_v51 = vpop.f32.mrf.mxu1 }
 0x3ce   :  { %23665 = vst [vmem:[#allocation59_spill] sm:$0xff] %v21017_v29  ;;  %23666 = vst [vmem:[#allocation60_spill] sm:$0xff] %v21019_v51  ;;  %v6237_v51 = vadd.f32 %v20673_v13, %v20602_v47  ;;  %v6277_v13 = vadd.f32 %v20756_v2, %v20602_v47 }
 0x3cf   :  { %v21021_v4 = vpop.f32.mrf.mxu0  ;;  %v21023_v21 = vpop.f32.mrf.mxu1 }
 0x3d0   :  { %23667 = vst [vmem:[#allocation61_spill] sm:$0xff] %v21021_v4  ;;  %23668 = vst [vmem:[#allocation62_spill] sm:$0xff] %v21023_v21  ;;  %v6247_v21 = vadd.f32 %v20693_v15, %v20602_v47  ;;  %v6338_v5 = vadd.f32 %v20700_v7, %v6237_v51 }
 0x3d1   :  { %v21025_v63 = vpop.f32.mrf.mxu0  ;;  %v21027_v43 = vpop.f32.mrf.mxu1 }
 0x3d2   :  { %23669 = vst [vmem:[#allocation63_spill] sm:$0xff] %v21025_v63  ;;  %23670 = vst [vmem:[#allocation64_spill] sm:$0xff] %v21027_v43  ;;  %v6257_v43 = vadd.f32 %v20718_v41, %v20602_v47 }
 0x3d3   :  { %v21029_v34 = vpop.f32.mrf.mxu0  ;;  %v21031_v33 = vpop.f32.mrf.mxu1 }
 0x3d4   :  { %23671 = vst [vmem:[#allocation65_spill] sm:$0xff] %v21029_v34  ;;  %23672 = vst [vmem:[#allocation66_spill] sm:$0xff] %v21031_v33  ;;  %v6267_v34 = vadd.f32 %v20740_v55, %v20602_v47  ;;  %v6358_v15 = vadd.f32 %v20744_v22, %v6257_v43  ;;  %v6378_v55 = vadd.f32 %v20772_v31, %v6277_v13  ;;  %v23683_v13 = vld [vmem:[#allocation50_spill] sm:$0xff] }
 0x3d5   :  { %v21033_v53 = vpop.f32.mrf.mxu0  ;;  %v21039_v29 = vpop.f32.mrf.mxu1 }
 0x3d6   :  { %23673 = vst [vmem:[#allocation67_spill] sm:$0xff] %v21033_v53  ;;  %23674 = vst [vmem:[#allocation68_spill] sm:$0xff] %v21039_v29  ;;  %v6328_v53 = vadd.f32 %v20675_v42, %v6227_v40  ;;  %v6348_v29 = vadd.f32 %v20725_v8, %v6247_v21  ;;  %v6368_v41 = vadd.f32 %v20760_v57, %v6267_v34 }
 0x3d7   :  { %v21047_v33 = vpop.f32.mrf.mxu0  ;;  %v21053_v63 = vpop.f32.mrf.mxu1  ;;  %v6439_v42 = vadd.f32 %v20789_v38, %v6338_v5  ;;  %v6459_v47 = vadd.f32 %v20815_v10, %v6358_v15  ;;  %v6479_v21 = vadd.f32 %v20841_v59, %v6378_v55  ;;  %v23682_v5 = vld [vmem:[#allocation20_spill] sm:$0xff]  ;;  %v23684_v15 = vld [vmem:[#allocation37_spill] sm:$0xff] }
 0x3d8   :  { %23675 = vst [vmem:[#allocation69_spill] sm:$0xff] %v21047_v33  ;;  %v6429_v33 = vadd.f32 %v20782_v30, %v6328_v53  ;;  %v6449_v7 = vadd.f32 %v20802_v45, %v6348_v29  ;;  %v6469_v2 = vadd.f32 %v20828_v11, %v6368_v41  ;;  %v23681_v29 = vld [vmem:[#allocation33_spill] sm:$0xff] }
 0x3d9   :  { %v6890_v4 = vpop.f32.mrf.mxu0  ;;  %v21061_v40 = vpop.f32.mrf.mxu1  ;;  %v6540_v57 = vadd.f32 %v20809_v32, %v6439_v42  ;;  %v6560_v38 = vadd.f32 %v20835_v37, %v6459_v47  ;;  %v6580_v45 = vadd.f32 %v20857_v28, %v6479_v21  ;;  %v23688_v47 = vld [vmem:[#allocation15_spill] sm:$0xff] }
 0x3da   :  { %v6530_v22 = vadd.f32 %v20796_v25, %v6429_v33  ;;  %v6550_v30 = vadd.f32 %v20822_v27, %v6449_v7  ;;  %v6570_v53 = vadd.f32 %v20848_v20, %v6469_v2  ;;  %v23678_v4 = vld [vmem:[#allocation16_spill] sm:$0xff]  ;;  %v23689_v2 = vld [vmem:[#allocation22_spill] sm:$0xff] }
 0x3db   :  { %v6891_v8 = vpop.f32.mrf.mxu0  ;;  %v21069_v31 = vpop.f32.mrf.mxu1  ;;  %v6641_v11 = vadd.f32 %v20873_v3, %v6540_v57  ;;  %v6661_v32 = vadd.f32 %v20899_v62, %v6560_v38  ;;  %v6681_v20 = vadd.f32 %v20925_v19, %v6580_v45  ;;  %v23687_v7 = vld [vmem:[#allocation48_spill] sm:$0xff] }
 0x3dc   :  { %v6631_v10 = vadd.f32 %v20866_v48, %v6530_v22  ;;  %v6651_v25 = vadd.f32 %v20886_v24, %v6550_v30  ;;  %v6671_v59 = vadd.f32 %v20912_v12, %v6570_v53  ;;  %v6827_v24 = vadd.f32 %v20947_v50, %v20870_v60  ;;  %v23676_v12 = vld [vmem:[#allocation21_spill] sm:$0xff]  ;;  %v23690_v22 = vld [vmem:[#allocation35_spill] sm:$0xff]  ;;  %v23691_v57 = vld [vmem:[#allocation52_spill] sm:$0xff] }
 0x3dd   :  { %v21077_v34 = vpop.f32.mrf.mxu1  ;;  %v6742_v37 = vadd.f32 %v20893_v56, %v6641_v11  ;;  %v6762_v48 = vadd.f32 %v20919_v52, %v6661_v32  ;;  %v6782_v62 = vadd.f32 %v20941_v1, %v6681_v20  ;;  %v6831_v56 = vadd.f32 %v20951_v9, %v23676_v12  ;;  %v23677_v52 = vld [vmem:[#allocation46_spill] sm:$0xff]  ;;  %v23692_v30 = vld [vmem:[#allocation51_spill] sm:$0xff]  ;;  %v23693_v53 = vld [vmem:[#allocation29_spill] sm:$0xff] }
 0x3de   :  { %v6732_v27 = vadd.f32 %v20880_v6, %v6631_v10  ;;  %v6752_v28 = vadd.f32 %v20906_v18, %v6651_v25  ;;  %v6772_v3 = vadd.f32 %v20932_v17, %v6671_v59  ;;  %v6829_v6 = vadd.f32 %v20949_v49, %v20875_v61  ;;  %v23694_v11 = vld [vmem:[#allocation19_spill] sm:$0xff] }
 0x3df   :  { %v21085_v33 = vpop.f32.mrf.mxu1  ;;  %v6837_v18 = vadd.f32 %v20955_v39, %v20883_v46  ;;  %v6839_v17 = vadd.f32 %v20957_v16, %v23677_v52  ;;  %v6841_v60 = vadd.f32 %v20961_v35, %v23678_v4  ;;  %v6928_v1 = vadd.f32 %v20959_v14, %v6827_v24  ;;  %v23680_v46 = vld [vmem:[#allocation49_spill] sm:$0xff]  ;;  %v23695_v25 = vld [vmem:[#allocation55_spill] sm:$0xff]  ;;  %v23698_v24 = vld [vmem:[#allocation38_spill] sm:$0xff] }
 0x3e0   :  { %v6833_v19 = vadd.f32 %v20953_v0, %v6732_v27  ;;  %v6843_v61 = vadd.f32 %v20965_v58, %v6742_v37  ;;  %v6930_v51 = vadd.f32 %v20963_v36, %v6829_v6  ;;  %v6847_v50 = vadd.f32 %v20969_v26, %v20896_v44  ;;  %v23679_v0 = vld [vmem:[#allocation47_spill] sm:$0xff]  ;;  %v23685_v58 = vld [vmem:[#allocation54_spill] sm:$0xff]  ;;  %v23686_v36 = vld [vmem:[#allocation45_spill] sm:$0xff] }
 0x3e1   :  { %v21098_v43 = vpop.f32.mrf.mxu1  ;;  %v6932_v49 = vadd.f32 %v20967_v54, %v6831_v56  ;;  %v6849_v39 = vadd.f32 %v23680_v46, %v23679_v0  ;;  %v6851_v35 = vadd.f32 %v23683_v13, %v23682_v5  ;;  %v6938_v14 = vadd.f32 %v23684_v15, %v6837_v18  ;;  %v23696_v59 = vld [vmem:[#allocation31_spill] sm:$0xff]  ;;  %v23697_v37 = vld [vmem:[#allocation56_spill] sm:$0xff]  ;;  %v23701_v18 = vld [vmem:[#allocation34_spill] sm:$0xff] }
 0x3e2   :  { %v6934_v16 = vadd.f32 %v23681_v29, %v6833_v19  ;;  %v6853_v55 = vadd.f32 %v23685_v58, %v6752_v28  ;;  %v6940_v42 = vadd.f32 %v23686_v36, %v6839_v17  ;;  %v6942_v44 = vadd.f32 %v23687_v7, %v6841_v60  ;;  %v23699_v6 = vld [vmem:[#allocation12_spill] sm:$0xff]  ;;  %v23702_v52 = vld [vmem:[#allocation23_spill] sm:$0xff]  ;;  %v23706_v46 = vld [vmem:[#allocation42_spill] sm:$0xff] }
 0x3e3   :  { %v6991_v9 = vpop.f32.mrf.mxu1  ;;  %v6857_v8 = vadd.f32 %v23689_v2, %v23688_v47  ;;  %v6859_v21 = vadd.f32 %v23691_v57, %v23690_v22  ;;  %v21126_v38 = vadd.f32 %v23692_v30, %v6843_v61  ;;  %v21129_v45 = vadd.f32 %v23693_v53, %v6847_v50  ;;  %v23700_v56 = vld [vmem:[#allocation32_spill] sm:$0xff]  ;;  %v23704_v61 = vld [vmem:[#allocation27_spill] sm:$0xff]  ;;  %v23707_v5 = vld [vmem:[#allocation57_spill] sm:$0xff] }
 0x3e4   :  { %v6861_v32 = vadd.f32 %v23695_v25, %v23694_v11  ;;  %v6863_v27 = vadd.f32 %v23696_v59, %v6762_v48  ;;  %v21135_v20 = vadd.f32 %v23697_v37, %v6849_v39  ;;  %v6867_v12 = vadd.f32 %v23699_v6, %v23698_v24  ;;  %v23703_v4 = vld [vmem:[#allocation24_spill] sm:$0xff]  ;;  %v23709_v58 = vld [vmem:[#allocation17_spill] sm:$0xff]  ;;  %v23716_v57 = vld [vmem:[#allocation62_spill] sm:$0xff] }
 0x3e5   :  { %v7028_v41 = vpop.f32.mrf.mxu0  ;;  %v6992_v54 = vpop.f32.mrf.mxu1  ;;  %v21140_v19 = vadd.f32 %v23700_v56, %v6851_v35  ;;  %v6869_v17 = vadd.f32 %v23702_v52, %v23701_v18  ;;  %v21145_v60 = vadd.f32 %v23703_v4, %v6853_v55  ;;  %v21148_v50 = vadd.f32 %v23704_v61, %v6857_v8  ;;  %v23708_v35 = vld [vmem:[#allocation58_spill] sm:$0xff]  ;;  %v23710_v55 = vld [vmem:[#allocation59_spill] sm:$0xff]  ;;  %v23711_v7 = vld [vmem:[#allocation60_spill] sm:$0xff] }
 0x3e6   :  { %v7029_v26 = vadd.f32 %v7028_v41, %v6928_v1  ;;  %v6873_v29 = vadd.f32 %v21013_v23, %v6772_v3  ;;  %v21154_v13 = vadd.f32 %v23707_v5, %v6859_v21  ;;  %v21157_v15 = vadd.f32 %v23708_v35, %v6861_v32  ;;  %v23712_v47 = vld [vmem:[#allocation36_spill] sm:$0xff]  ;;  %v23713_v2 = vld [vmem:[#allocation61_spill] sm:$0xff]  ;;  %v23715_v23 = vld [vmem:[#allocation63_spill] sm:$0xff] }
 0x3e7   :  { %v7030_v10 = vpop.f32.mrf.mxu0  ;;  %v6877_v36 = vadd.f32 %v23710_v55, %v23709_v58  ;;  %v21162_v54 = vadd.f32 %v23711_v7, %v6863_v27  ;;  %v6879_v8 = vadd.f32 %v23713_v2, %v23712_v47  ;;  %v23714_v22 = vld [vmem:[#allocation28_spill] sm:$0xff]  ;;  %v21169_v21 = vadd.f32 %v23716_v57, %v6867_v12  ;;  %v23717_v59 = vld [vmem:[#allocation65_spill] sm:$0xff]  ;;  %v23720_v24 = vld [vmem:[#allocation67_spill] sm:$0xff] }
 0x3e8   :  { %v7031_v28 = vadd.f32 %v7030_v10, %v6930_v51  ;;  %v7095_v48 = vmax.f32 %v7029_v26, 0.0  ;;  %v23705_v51 = vld [vmem:[#allocation40_spill] sm:$0xff]  ;;  %v6881_v3 = vadd.f32 %v23715_v23, %v23714_v22  ;;  %v21174_v27 = vadd.f32 %v23717_v59, %v6782_v62  ;;  %v23721_v12 = vld [vmem:[#allocation66_spill] sm:$0xff] }
 0x3e9   :  { %v7032_v1 = vpop.f32.mrf.mxu0  ;;  %v6871_v39 = vadd.f32 %v23706_v46, %v23705_v51  ;;  %v23722_v52 = vld [vmem:[#allocation68_spill] sm:$0xff]  ;;  %v21190_v62 = vadd.f32 %v21053_v63, %v6877_v36  ;;  %v17534_v55 = vld [vmem:[#allocation4 + $0xb64] ss:$8 sps:$4 sm:$0xff]  }
 0x3ea   :  { %v7096_v9 = vmax.f32 %v7031_v28, 0.0  ;;  %v7033_v0 = vadd.f32 %v7032_v1, %v6932_v49  ;;  %v23719_v28 = vld [vmem:[#allocation41_spill] sm:$0xff]  ;;  %v21187_v4 = vadd.f32 %v23722_v52, %v6873_v29  ;;  %v17526_v29 = vld [vmem:[#allocation4 + $0xb70] ss:$8 sps:$4 sm:$0xff]   ;;  %v21197_v36 = vadd.f32 %v21069_v31, %v6881_v3 }
 0x3eb   :  { %v7034_v41 = vpop.f32.mrf.mxu0  ;;  %v21181_v6 = vadd.f32 %v23720_v24, %v23719_v28  ;;  %v21184_v56 = vadd.f32 %v23721_v12, %v6871_v39  ;;  %v17532_v31 = vld [vmem:[#allocation4 + $0xb60] ss:$8 sps:$4 sm:$0xff]  }
 0x3ec   :  { %v16577_v26 = vpack.c.bf16 %v7096_v9, %v7095_v48  ;;  %v7035_v49 = vadd.f32 %v7034_v41, %v6934_v16  ;;  %v7097_v30 = vmax.f32 %v7033_v0, 0.0  ;;  %v23718_v16 = vld [vmem:[#allocation64_spill] sm:$0xff] }
 0x3ed   :  { %v7038_v53 = vpop.f32.mrf.mxu0  ;;  %v21177_v37 = vadd.f32 %v23718_v16, %v6869_v17  ;;  %v21193_v17 = vadd.f32 %v21061_v40, %v6879_v8 }
 0x3ee   :  { %7201 = vst [vmem:[#allocation2] sm:$0xff] %v16577_v26  ;;  %v7098_v10 = vmax.f32 %v7035_v49, 0.0  ;;  %v21171_v11 = vadd.f32 %v7038_v53, %v6938_v14  ;;  %v7249_v25 = vshrl.u32 %v16577_v26, 16  ;;  %v7252_v32 = vshll.u32 %v16577_v26, 16  ;;  %v17540_v53 = vld [vmem:[#allocation4 + $0xb54] ss:$8 sps:$4 sm:$0xff]  }
 0x3ef   :  { %v7040_v18 = vpop.f32.mrf.mxu0  ;;  %v18350_v35 = vpack.c.bf16 %v7097_v30, %v7095_v48 }
 0x3f0   :  { %v16578_v14 = vpack.c.bf16 %v7098_v10, %v7097_v30  ;;  %v7041_v1 = vadd.f32 %v7040_v18, %v6940_v42  ;;  %v7251_v61 = vrot.slane %v7249_v25, 4  ;;  %v7099_v0 = vmax.f32 %v21171_v11, 0.0 }
 0x3f1   :  { %v7042_v51 = vpop.f32.mrf.mxu0  ;;  %v7254_v46 = vrot.slane %v7252_v32, 5  ;;  %v18351_v41 = vpack.c.bf16 %v7098_v10, %v7096_v9  ;;  %v17965_v10 = vld [vmem:[#allocation4 + $0x13a4] ss:$8 sps:$4 sm:$0xff]  }
 0x3f2   :  { %7202 = vst [vmem:[#allocation2 + $0x8] sm:$0xff] %v16578_v14  ;;  %v7100_v39 = vmax.f32 %v7041_v1, 0.0  ;;  %v7043_v5 = vadd.f32 %v7042_v51, %v6942_v44  ;;  %v7258_v7 = vshll.u32 %v16578_v14, 16  ;;  %v7262_v26 = vshrl.u32 %v16578_v14, 16 }
 0x3f3   :  { %v7044_v58 = vpop.f32.mrf.mxu0  ;;  %v7255_v42 = vor.u32 %v7254_v46, %v7251_v61  ;;  %v7390_v63 = vrot.slane %v16578_v14, 5  ;;  %10297 = vmatprep.mubr.bf16.mxu1 %v18351_v41 }
 0x3f4   :  { %v21199_v40 = vpack.c.bf16 %v7100_v39, %v7099_v0  ;;  %v7101_v49 = vmax.f32 %v7043_v5, 0.0  ;;  %v7045_v47 = vadd.f32 %v7044_v58, %v21126_v38  ;;  %10298 = vmatmul.mubr.bf16.vlgmr.msra.gmra.mxu1 %v18350_v35  ;;  %v7260_v48 = vrot.slane %v7258_v7, 5  ;;  %v17538_v5 = vld [vmem:[#allocation4 + $0xb50] ss:$8 sps:$4 sm:$0xff]   ;;  %v17546_v58 = vld [vmem:[#allocation4 + $0xb44] ss:$8 sps:$4 sm:$0xff]  }
 0x3f5   :  { %v7048_v2 = vpop.f32.mrf.mxu0  ;;  %v7256_v44 = vrot.slane %v7255_v42, 4  ;;  %v7264_v9 = vrot.slane %v7262_v26, 4  ;;  %v7368_v8 = vld [vmem:[#allocation2] sm:$0xee]  ;;  %v7392_v22 = vrot.slane %v7390_v63, 4  ;;  %10432 = vmatpush1.bf16.msra.mxu1 %v17526_v29 }
 0x3f6   :  { %7203 = vst [vmem:[#allocation2 + $0x10] sm:$0xff] %v21199_v40  ;;  %v7102_v23 = vmax.f32 %v7045_v47, 0.0  ;;  %v21204_v57 = vadd.f32 %v7048_v2, %v21129_v45  ;;  %v7268_v3 = vshll.u32 %v21199_v40, 16  ;;  %v7272_v38 = vshrl.u32 %v21199_v40, 16  ;;  %10433 = vmatprep.subr.bf16.mxu1 %v17534_v55 }
 0x3f7   :  { %v7050_v30 = vpop.f32.mrf.mxu0  ;;  %v7261_v11 = vsel %vm19331_vm13, %v7256_v44, %v7260_v48  ;;  %v7265_v25 = vor.u32 %v7264_v9, %v7260_v48  ;;  %v15629_v32 = vrot.slane %v7368_v8, 9  ;;  %v7393_v59 = vrot.slane %v21199_v40, 5 }
 0x3f8   :  { %v21211_v16 = vpack.c.bf16 %v7102_v23, %v7101_v49  ;;  %v7103_v45 = vmax.f32 %v21204_v57, 0.0  ;;  %v21215_v28 = vadd.f32 %v7050_v30, %v21135_v20  ;;  %v7270_v24 = vrot.slane %v7268_v3, 5 }
 0x3f9   :  { %v7052_v12 = vpop.f32.mrf.mxu0  ;;  %v7266_v18 = vrot.slane %v7265_v25, 4  ;;  %v7274_v52 = vrot.slane %v7272_v38, 4  ;;  %v21223_v1 = vsel %vm19517_vm10, %v15629_v32, %v7390_v63  ;;  %v21229_v61 = vsel %vm19517_vm10, %v7392_v22, %v7393_v59  ;;  %10434 = vmatpush1.bf16.msra.mxu1 %v17532_v31  ;;  %v21245_v8 = vld [vmem:[#allocation2 + $0x8] sm:$0xee] }
 0x3fa   :  { %7204 = vst [vmem:[#allocation2 + $0x18] sm:$0xff] %v21211_v16  ;;  %v7104_v20 = vmax.f32 %v21215_v28, 0.0  ;;  %v7053_v51 = vadd.f32 %v7052_v12, %v21140_v19  ;;  %v18352_v46 = vpack.c.bf16 %v7102_v23, %v7100_v39  ;;  %v18353_v35 = vpack.c.bf16 %v7101_v49, %v7099_v0  ;;  %10435 = vmatprep.subr.bf16.mxu1 %v17540_v53  ;;  %v17541_v0 = vld [vmem:[#allocation4 + $0xc70] ss:$8 sps:$4 sm:$0xff]   ;;  %v17544_v49 = vld [vmem:[#allocation4 + $0xb40] ss:$8 sps:$4 sm:$0xff]  }
 0x3fb   :  { %v7054_v41 = vpop.f32.mrf.mxu0  ;;  %v7271_v29 = vsel %vm19331_vm13, %v7266_v18, %v7270_v24  ;;  %v7275_v55 = vor.u32 %v7274_v52, %v7270_v24  ;;  %v7278_v42 = vshll.u32 %v21211_v16, 16  ;;  %v7282_v7 = vshrl.u32 %v21211_v16, 16  ;;  %v17549_v23 = vld [vmem:[#allocation4 + $0xc64] ss:$8 sps:$4 sm:$0xff]  }
 0x3fc   :  { %v16581_v26 = vpack.c.bf16 %v7104_v20, %v7103_v45  ;;  %v7105_v63 = vmax.f32 %v7053_v51, 0.0  ;;  %v7055_v19 = vadd.f32 %v7054_v41, %v21145_v60  ;;  %10307 = vmatprep.mubr.bf16.mxu1 %v18352_v46  ;;  %v15635_v39 = vcombine.low %v7261_v11, %v7271_v29  ;;  %v17547_v46 = vld [vmem:[#allocation4 + $0xc60] ss:$8 sps:$4 sm:$0xff]  }
 0x3fd   :  { %v7058_v47 = vpop.f32.mrf.mxu0  ;;  %10308 = vmatmul.mubr.bf16.gmra.mxu1 %v18353_v35  ;;  %v15636_v2 = vcombine.high %v7261_v11, %v7271_v29  ;;  %v7276_v44 = vrot.slane %v7275_v55, 4  ;;  %v7280_v48 = vrot.slane %v7278_v42, 5  ;;  %v7284_v9 = vrot.slane %v7282_v7, 4  ;;  %v17552_v11 = vld [vmem:[#allocation4 + $0xb34] ss:$8 sps:$4 sm:$0xff]  }
 0x3fe   :  { %7205 = vst [vmem:[#allocation2 + $0x20] sm:$0xff] %v16581_v26  ;;  %v7106_v22 = vmax.f32 %v7055_v19, 0.0  ;;  %v21248_v60 = vadd.f32 %v7058_v47, %v21148_v50  ;;  %10436 = vmatpush1.bf16.msra.mxu1 %v17538_v5  ;;  %v7288_v31 = vshll.u32 %v16581_v26, 16  ;;  %v7292_v30 = vshrl.u32 %v16581_v26, 16  ;;  %v17550_v55 = vld [vmem:[#allocation4 + $0xb30] ss:$8 sps:$4 sm:$0xff]  }
 0x3ff   :  { %v7060_v53 = vpop.f32.mrf.mxu0  ;;  %10380 = vmatprep.mubr.bf16.mxu0 %v15636_v2  ;;  %10437 = vmatprep.subr.bf16.mxu1 %v17546_v58  ;;  %v21252_v25 = vsel %vm19331_vm13, %v7276_v44, %v7280_v48  ;;  %v7285_v32 = vor.u32 %v7284_v9, %v7280_v48  ;;  %v15637_v28 = vcombine.low %v21223_v1, %v21229_v61  ;;  %v7450_v18 = vshrl.u32 %v21245_v8, 16  ;;  %v17558_v47 = vld [vmem:[#allocation4 + $0xb24] ss:$8 sps:$4 sm:$0xff]  }
 0x400   :  { %v16582_v24 = vpack.c.bf16 %v7106_v22, %v7105_v63  ;;  %v21257_v50 = vadd.f32 %v7060_v53, %v21154_v13  ;;  %10381 = vmatmul.mubr.bf16.vlgmr.msra.gmra.mxu0 %v15635_v39  ;;  %v7290_v12 = vrot.slane %v7288_v31, 5  ;;  %v7107_v52 = vmax.f32 %v21248_v60, 0.0 }
 0x401   :  { %v7062_v51 = vpop.f32.mrf.mxu0  ;;  %10515 = vmatpush1.bf16.msra.mxu0 %v17541_v0  ;;  %v7286_v5 = vrot.slane %v7285_v32, 4  ;;  %v7294_v35 = vrot.slane %v7292_v30, 4  ;;  %v15638_v41 = vcombine.high %v21223_v1, %v21229_v61  ;;  %v18354_v58 = vpack.c.bf16 %v7106_v22, %v7104_v20  ;;  %v17555_v0 = vld [vmem:[#allocation4 + $0xc54] ss:$8 sps:$4 sm:$0xff]   ;;  %v17556_v22 = vld [vmem:[#allocation4 + $0xb20] ss:$8 sps:$4 sm:$0xff]  }
 0x402   :  { %7206 = vst [vmem:[#allocation2 + $0x28] sm:$0xff] %v16582_v24  ;;  %v7108_v29 = vmax.f32 %v21257_v50, 0.0  ;;  %v21265_v13 = vadd.f32 %v7062_v51, %v21157_v15  ;;  %10438 = vmatpush1.bf16.msra.mxu1 %v17544_v49  ;;  %10516 = vmatprep.subr.bf16.mxu0 %v17549_v23  ;;  %v18355_v26 = vpack.c.bf16 %v7105_v63, %v7103_v45  ;;  %v7298_v44 = vshll.u32 %v16582_v24, 16  ;;  %v17553_v63 = vld [vmem:[#allocation4 + $0xc50] ss:$8 sps:$4 sm:$0xff]  }
 0x403   :  { %v7064_v19 = vpop.f32.mrf.mxu0  ;;  %10439 = vmatprep.subr.bf16.mxu1 %v17552_v11  ;;  %v7291_v39 = vsel %vm19331_vm13, %v7286_v5, %v7290_v12  ;;  %v7295_v2 = vor.u32 %v7294_v35, %v7290_v12  ;;  %v7302_v48 = vshrl.u32 %v16582_v24, 16  ;;  %10317 = vmatprep.mubr.bf16.mxu1 %v18354_v58  ;;  %v17564_v51 = vld [vmem:[#allocation4 + $0xb14] ss:$8 sps:$4 sm:$0xff]   ;;  %v21284_v5 = vrot.slane %v7450_v18, 5  ;;  %v17565_v50 = vld [vmem:[#allocation4 + $0xc30] ss:$8 sps:$4 sm:$0xff]  }
 0x404   :  { %v16583_v15 = vpack.c.bf16 %v7108_v29, %v7107_v52  ;;  %v7109_v20 = vmax.f32 %v21265_v13, 0.0  ;;  %v7065_v57 = vadd.f32 %v7064_v19, %v21162_v54  ;;  %v15654_v45 = vcombine.high %v21252_v25, %v7291_v39  ;;  %v17561_v54 = vld [vmem:[#allocation4 + $0xc44] ss:$8 sps:$4 sm:$0xff]   ;;  %v17631_v61 = vld [vmem:[#allocation4 + $0xc80] ss:$8 sps:$4 sm:$0xff]  }
 0x405   :  { %v7068_v49 = vpop.f32.mrf.mxu0  ;;  %10517 = vmatpush1.bf16.msra.mxu0 %v17547_v46  ;;  %10318 = vmatmul.mubr.bf16.gmra.mxu1 %v18355_v26  ;;  %v15653_v9 = vcombine.low %v21252_v25, %v7291_v39  ;;  %v7296_v23 = vrot.slane %v7295_v2, 4  ;;  %v7300_v31 = vrot.slane %v7298_v44, 5  ;;  %v7304_v30 = vrot.slane %v7302_v48, 4  ;;  %v17559_v39 = vld [vmem:[#allocation4 + $0xc40] ss:$8 sps:$4 sm:$0xff]  }
 0x406   :  { %7207 = vst [vmem:[#allocation2 + $0x30] sm:$0xff] %v16583_v15  ;;  %v7110_v53 = vmax.f32 %v7065_v57, 0.0  ;;  %v7069_v11 = vadd.f32 %v7068_v49, %v21169_v21  ;;  %10390 = vmatprep.mubr.bf16.mxu0 %v15654_v45  ;;  %10440 = vmatpush1.bf16.msra.mxu1 %v17550_v55  ;;  %7232 = vst [vmem:[#allocation3 + $0x240] sm:$0xff] %v16583_v15  ;;  %v7308_v32 = vshll.u32 %v16583_v15, 16  ;;  %v7312_v24 = vshrl.u32 %v16583_v15, 16 }
 0x407   :  { %v7070_v12 = vpop.f32.mrf.mxu0  ;;  %10518 = vmatprep.subr.bf16.mxu0 %v17555_v0  ;;  %10441 = vmatprep.subr.bf16.mxu1 %v17558_v47  ;;  %v21282_v25 = vsel %vm19331_vm13, %v7296_v23, %v7300_v31  ;;  %v7305_v46 = vor.u32 %v7304_v30, %v7300_v31  ;;  %v7453_v35 = vshll.u32 %v21245_v8, 16  ;;  %v21290_v55 = vrot.slane %v7272_v38, 5  ;;  %v17562_v44 = vld [vmem:[#allocation4 + $0xb10] ss:$8 sps:$4 sm:$0xff]   ;;  %v17567_v57 = vld [vmem:[#allocation4 + $0xc34] ss:$8 sps:$4 sm:$0xff]  }
 0x408   :  { %v16584_v21 = vpack.c.bf16 %v7110_v53, %v7109_v20  ;;  %v7071_v13 = vadd.f32 %v7070_v12, %v21177_v37  ;;  %10391 = vmatmul.mubr.bf16.gmra.mxu0 %v15653_v9  ;;  %v7310_v58 = vrot.slane %v7308_v32, 5  ;;  %v7111_v26 = vmax.f32 %v7069_v11, 0.0  ;;  %v17570_v45 = vld [vmem:[#allocation4 + $0xb04] ss:$8 sps:$4 sm:$0xff]   ;;  %v17568_v23 = vld [vmem:[#allocation4 + $0xb00] ss:$8 sps:$4 sm:$0xff]  }
 0x409   :  { %v7072_v19 = vpop.f32.mrf.mxu0  ;;  %10519 = vmatpush1.bf16.msra.mxu0 %v17553_v63  ;;  %v7306_v0 = vrot.slane %v7305_v46, 4  ;;  %v7314_v47 = vrot.slane %v7312_v24, 4  ;;  %v7455_v2 = vrot.slane %v7453_v35, 6  ;;  %v18356_v37 = vpack.c.bf16 %v7109_v20, %v7107_v52  ;;  %v17573_v32 = vld [vmem:[#allocation4 + $0xc24] ss:$8 sps:$4 sm:$0xff]  }
 0x40a   :  { %7208 = vst [vmem:[#allocation2 + $0x38] sm:$0xff] %v16584_v21  ;;  %v7112_v18 = vmax.f32 %v7071_v13, 0.0  ;;  %v7073_v8 = vadd.f32 %v7072_v19, %v21184_v56  ;;  %10442 = vmatpush1.bf16.msra.mxu1 %v17556_v22  ;;  %10520 = vmatprep.subr.bf16.mxu0 %v17561_v54  ;;  %v18357_v38 = vpack.c.bf16 %v7110_v53, %v7108_v29  ;;  %v7318_v49 = vshll.u32 %v16584_v21, 16  ;;  %v17576_v12 = vld [vmem:[#allocation4 + $0xbf4] ss:$8 sps:$4 sm:$0xff]  }
 0x40b   :  { %v7074_v48 = vpop.f32.mrf.mxu0  ;;  %10443 = vmatprep.subr.bf16.mxu1 %v17564_v51  ;;  %v7311_v15 = vsel %vm19331_vm13, %v7306_v0, %v7310_v58  ;;  %v7315_v63 = vor.u32 %v7314_v47, %v7310_v58  ;;  %v7322_v9 = vshrl.u32 %v16584_v21, 16  ;;  %v7464_v52 = vrot.slane %v7268_v3, 6  ;;  %v17571_v58 = vld [vmem:[#allocation4 + $0xc20] ss:$8 sps:$4 sm:$0xff]  }
 0x40c   :  { %v21299_v56 = vpack.c.bf16 %v7112_v18, %v7111_v26  ;;  %v7075_v22 = vadd.f32 %v7074_v48, %v21187_v4  ;;  %10327 = vmatprep.mubr.bf16.mxu1 %v18357_v38  ;;  %v15672_v60 = vcombine.high %v21282_v25, %v7311_v15  ;;  %v15671_v20 = vcombine.low %v21282_v25, %v7311_v15  ;;  %v23726_v38 = vld [vmem:[#allocation69_spill] sm:$0xff] }
 0x40d   :  { %v7078_v29 = vpop.f32.mrf.mxu0  ;;  %10521 = vmatpush1.bf16.msra.mxu0 %v17559_v39  ;;  %10328 = vmatmul.mubr.bf16.gmra.mxu1 %v18356_v37  ;;  %v7316_v31 = vrot.slane %v7315_v63, 4  ;;  %v7320_v30 = vrot.slane %v7318_v49, 5  ;;  %v7324_v53 = vrot.slane %v7322_v9, 4  ;;  %v7113_v11 = vmax.f32 %v7073_v8, 0.0  ;;  %v17574_v39 = vld [vmem:[#allocation4 + $0xbf0] ss:$8 sps:$4 sm:$0xff]  }
 0x40e   :  { %7209 = vst [vmem:[#allocation2 + $0x40] sm:$0xff] %v21299_v56  ;;  %v7114_v4 = vmax.f32 %v7075_v22, 0.0  ;;  %v7079_v54 = vadd.f32 %v7078_v29, %v21190_v62  ;;  %10400 = vmatprep.mubr.bf16.mxu0 %v15672_v60  ;;  %10444 = vmatpush1.bf16.msra.mxu1 %v17562_v44  ;;  %v7328_v3 = vshll.u32 %v21299_v56, 16  ;;  %v7332_v46 = vshrl.u32 %v21299_v56, 16  ;;  %v23725_v37 = vld [vmem:[#allocation53_spill] sm:$0xff] }
 0x40f   :  { %v7080_v24 = vpop.f32.mrf.mxu0  ;;  %10522 = vmatprep.subr.bf16.mxu0 %v17567_v57  ;;  %10445 = vmatprep.subr.bf16.mxu1 %v17570_v45  ;;  %v7321_v51 = vsel %vm19331_vm13, %v7316_v31, %v7320_v30  ;;  %v7325_v25 = vor.u32 %v7324_v53, %v7320_v30  ;;  %v7456_v35 = vor.u32 %v7455_v2, %v21284_v5  ;;  %v7471_v5 = vrot.slane %v7282_v7, 5  ;;  %v17579_v2 = vld [vmem:[#allocation4 + $0xc14] ss:$8 sps:$4 sm:$0xff]  }
 0x410   :  { %v6984_v62 = vadd.f32 %v21077_v34, %v21174_v27  ;;  %v16586_v21 = vpack.c.bf16 %v7114_v4, %v7113_v11  ;;  %v7081_v13 = vadd.f32 %v7080_v24, %v21193_v17  ;;  %10401 = vmatmul.mubr.bf16.gmra.mxu0 %v15671_v20  ;;  %v21316_v26 = vrot.slane %v7328_v3, 5  ;;  %7362 = vst [vmem:[#allocation3 + $0x98] sm:$0xff] %v7321_v51  ;;  %v17588_v53 = vld [vmem:[#allocation4 + $0xbd4] ss:$8 sps:$4 sm:$0xff]   ;;  %v17586_v3 = vld [vmem:[#allocation4 + $0xbd0] ss:$8 sps:$4 sm:$0xff]  }
 0x411   :  { %v7082_v19 = vpop.f32.mrf.mxu0  ;;  %10523 = vmatpush1.bf16.msra.mxu0 %v17565_v50  ;;  %v7326_v0 = vrot.slane %v7325_v25, 4  ;;  %v7457_v47 = vrot.slane %v7456_v35, 4  ;;  %v7465_v18 = vor.u32 %v7464_v52, %v21290_v55  ;;  %v7115_v34 = vmax.f32 %v7079_v54, 0.0  ;;  %v17582_v55 = vld [vmem:[#allocation4 + $0xbe4] ss:$8 sps:$4 sm:$0xff]  }
 0x412   :  { %7210 = vst [vmem:[#allocation2 + $0x48] sm:$0xff] %v16586_v21  ;;  %v7116_v27 = vmax.f32 %v7081_v13, 0.0  ;;  %v7083_v17 = vadd.f32 %v7082_v19, %v21197_v36  ;;  %10446 = vmatpush1.bf16.msra.mxu1 %v17568_v23  ;;  %10524 = vmatprep.subr.bf16.mxu0 %v17573_v32  ;;  %v7474_v8 = vrot.slane %v7278_v42, 6  ;;  %v6889_v44 = vadd.f32 %v23726_v38, %v23725_v37  ;;  %v17577_v42 = vld [vmem:[#allocation4 + $0xc10] ss:$8 sps:$4 sm:$0xff]  }
 0x413   :  { %v7084_v48 = vpop.f32.mrf.mxu0  ;;  %10447 = vmatprep.subr.bf16.mxu1 %v17576_v12  ;;  %v7331_v7 = vsel %vm19331_vm13, %v7326_v0, %v21316_v26  ;;  %v7334_v15 = vrot.slane %v7332_v46, 4  ;;  %v6988_v36 = vadd.f32 %v21085_v33, %v21181_v6  ;;  %v21333_v22 = vsel %vm19574_vm11, %v7457_v47, %v7465_v18  ;;  %v17580_v6 = vld [vmem:[#allocation4 + $0xbe0] ss:$8 sps:$4 sm:$0xff]   ;;  %v17585_v23 = vld [vmem:[#allocation4 + $0xc04] ss:$8 sps:$4 sm:$0xff]  }
 0x414   :  { %v16587_v57 = vpack.c.bf16 %v7116_v27, %v7115_v34  ;;  %v7085_v45 = vadd.f32 %v7084_v48, %v6984_v62  ;;  %v15689_v63 = vcombine.low %v7321_v51, %v7331_v7  ;;  %v15690_v16 = vcombine.high %v7321_v51, %v7331_v7  ;;  %v7235_v54 = vld [vmem:[#allocation3 + $0x250] sm:$0x11]  ;;  %v7213_v27 = vld [vmem:[#allocation2 + $0x60] sm:$0x11] }
 0x415   :  { %v7088_v49 = vpop.f32.mrf.mxu0  ;;  %10525 = vmatpush1.bf16.msra.mxu0 %v17571_v58  ;;  %v7467_v60 = vrot.slane %v7465_v18, 4  ;;  %v21335_v50 = vor.u32 %v7474_v8, %v7471_v5  ;;  %v6990_v52 = vadd.f32 %v21098_v43, %v6889_v44  ;;  %v7117_v29 = vmax.f32 %v7083_v17, 0.0  ;;  %v17583_v32 = vld [vmem:[#allocation4 + $0xc00] ss:$8 sps:$4 sm:$0xff]   ;;  %v7365_v18 = vld [vmem:[#allocation3 + $0x180] sm:$0x11] }
 0x416   :  { %7211 = vst [vmem:[#allocation2 + $0x50] sm:$0xff] %v16587_v57  ;;  %v7118_v20 = vmax.f32 %v7085_v45, 0.0  ;;  %v7089_v33 = vadd.f32 %v7088_v49, %v6988_v36  ;;  %10448 = vmatpush2.bf16.msra.mxu1 %v17574_v39  ;;  %10526 = vmatprep.subr.bf16.mxu0 %v17579_v2  ;;  %v7335_v30 = vor.u32 %v7334_v15, %v21316_v26  ;;  %v21348_v62 = vld [vmem:[#allocation2 + $0x30] sm:$0xff]  ;;  %v17591_v39 = vld [vmem:[#allocation4 + $0xcf4] ss:$8 sps:$4 sm:$0xff]  }
 0x417   :  { %v7090_v31 = vpop.f32.mrf.mxu0  ;;  %10410 = vmatprep.mubr.bf16.mxu0 %v15690_v16  ;;  %10449 = vmatprep.subr.bf16.mxu1 %v17582_v55  ;;  %v21342_v11 = vsel %vm19574_vm11, %v7467_v60, %v21335_v50  ;;  %v17594_v5 = vld [vmem:[#allocation4 + $0xbc4] ss:$8 sps:$4 sm:$0xff]   ;;  %v7405_v8 = vrot.slane %v21348_v62, 5  ;;  %v17589_v38 = vld [vmem:[#allocation4 + $0xcf0] ss:$8 sps:$4 sm:$0xff]   ;;  %v7477_v1 = vrot.slane %v21335_v50, 4 }
 0x418   :  { %v16588_v43 = vpack.c.bf16 %v7118_v20, %v7117_v29  ;;  %v7091_v4 = vadd.f32 %v7090_v31, %v6990_v52  ;;  %10411 = vmatmul.mubr.bf16.gmra.mxu0 %v15689_v63  ;;  %v15639_v24 = vcombine.low %v21333_v22, %v21342_v11  ;;  %v7119_v12 = vmax.f32 %v7089_v33, 0.0  ;;  %v21357_v44 = vld [vmem:[#allocation2 + $0x38] sm:$0xff]  ;;  %v21359_v48 = vld [vmem:[#allocation2 + $0x40] sm:$0xff]  ;;  %v17592_v15 = vld [vmem:[#allocation4 + $0xbc0] ss:$8 sps:$4 sm:$0xff]  }
 0x419   :  { %v7092_v51 = vpop.f32.mrf.mxu0  ;;  %v7225_v25 = vld [vmem:[#allocation2 + $0x48] sm:$0x11]  ;;  %10527 = vmatpush1.bf16.msra.mxu0 %v17577_v42  ;;  %v15640_v35 = vcombine.high %v21333_v22, %v21342_v11  ;;  %v7336_v47 = vrot.slane %v7335_v30, 4  ;;  %v17600_v45 = vld [vmem:[#allocation4 + $0xbb4] ss:$8 sps:$4 sm:$0xff]   ;;  %v7407_v63 = vrot.slane %v7405_v8, 4 }
 0x41a   :  { %v7247_v46 = vld [vmem:[#allocation2 + $0x48] sm:$0x11]  ;;  %7212 = vst [vmem:[#allocation2 + $0x58] sm:$0xff] %v16588_v43  ;;  %v7120_v21 = vmax.f32 %v7091_v4, 0.0  ;;  %v7236_v58 = vsel %vm19740_vm12, %v7225_v25, %v7235_v54  ;;  %10450 = vmatpush2.bf16.msra.mxu1 %v17580_v6  ;;  %10528 = vmatprep.subr.bf16.mxu0 %v17585_v23  ;;  %v7408_v49 = vrot.slane %v21357_v44, 5  ;;  %v7411_v16 = vrot.slane %v21359_v48, 5 }
 0x41b   :  { %v7338_v26 = vshll.u32 %v7247_v46, 16  ;;  %v7342_v19 = vshrl.u32 %v7247_v46, 16  ;;  %v7093_v0 = vpop.f32.mrf.mxu0  ;;  %7237 = vst [vmem:[#allocation3 + $0x250] sm:$0x11] %v7236_v58  ;;  %10451 = vmatprep.subr.bf16.mxu1 %v17588_v53  ;;  %v21355_v37 = vld [vmem:[#allocation2 + $0x48] sm:$0xff]  ;;  %v7509_v60 = vshrl.u32 %v21357_v44, 16 }
 0x41c   :  { %v16589_v34 = vpack.c.bf16 %v7120_v21, %v7119_v12  ;;  %7977 = vst [vmem:[#allocation3 + $0x2e8] sm:$0xff] %v21355_v37  ;;  %v17597_v36 = vld [vmem:[#allocation4 + $0xce4] ss:$8 sps:$4 sm:$0xff]   ;;  %v17595_v42 = vld [vmem:[#allocation4 + $0xce0] ss:$8 sps:$4 sm:$0xff]   ;;  %v7512_v52 = vshll.u32 %v21357_v44, 16  ;;  %v21379_v6 = vsel %vm19517_vm10, %v7407_v63, %v7408_v49 }
 0x41d   :  { %v7340_v17 = vrot.slane %v7338_v26, 5  ;;  %v7366_v2 = vsel %vm19740_vm12, %v7342_v19, %v7365_v18  ;;  %10529 = vmatpush1.bf16.msra.mxu0 %v17583_v32  ;;  %v21366_v57 = vld [vmem:[#allocation2 + $0x50] sm:$0xff]  ;;  %v17603_v33 = vld [vmem:[#allocation4 + $0xcd4] ss:$8 sps:$4 sm:$0xff]   ;;  %v7410_v23 = vrot.slane %v7408_v49, 4  ;;  %7433 = vst [vmem:[#allocation3 + $0xe0] sm:$0xff] %v21379_v6 }
 0x41e   :  { %7367 = vst [vmem:[#allocation3 + $0x180] sm:$0x11] %v7366_v2  ;;  %v7214_v7 = vsel %vm19740_vm12, %v16589_v34, %v7213_v27  ;;  %10452 = vmatpush2.bf16.msra.mxu1 %v17586_v3  ;;  %10530 = vmatprep.subr.bf16.mxu0 %v17591_v39  ;;  %7978 = vst [vmem:[#allocation3 + $0x330] sm:$0xff] %v21366_v57  ;;  %v17598_v53 = vld [vmem:[#allocation4 + $0xbb0] ss:$8 sps:$4 sm:$0xff]   ;;  %v7511_v54 = vrot.slane %v7509_v60, 5 }
 0x41f   :  { %v7341_v55 = vsel %vm19331_vm13, %v7336_v47, %v7340_v17  ;;  %7215 = vst [vmem:[#allocation2 + $0x60] sm:$0x11] %v7214_v7  ;;  %10453 = vmatprep.subr.bf16.mxu1 %v17594_v5  ;;  %v21387_v4 = vsel %vm19517_vm10, %v7410_v23, %v7411_v16  ;;  %v7377_v32 = vld [vmem:[#allocation2 + $0x48] sm:$0x33]  ;;  %v17601_v51 = vld [vmem:[#allocation4 + $0xcd0] ss:$8 sps:$4 sm:$0xff]  }
 0x420   :  { %v21393_v25 = vld [vmem:[#allocation2 + $0x48] sm:$0xff]  ;;  %v21395_v26 = vld [vmem:[#allocation2 + $0x20] sm:$0xff]  ;;  %v7413_v47 = vrot.slane %v7411_v16, 4  ;;  %v7414_v18 = vrot.slane %v7377_v32, 5  ;;  %v21402_v5 = vld [vmem:[#allocation2 + $0x18] sm:$0xff]  ;;  %v23379_v27 = vshrl.u32 %v21359_v48, 16 }
 0x421   :  { %10531 = vmatpush2.bf16.msra.mxu0 %v17589_v38  ;;  %v21375_v29 = vld [vmem:[#allocation2 + $0x58] sm:$0xff]  ;;  %v17604_v46 = vld [vmem:[#allocation4 + $0xba0] ss:$8 sps:$4 sm:$0xff]   ;;  %v17606_v21 = vld [vmem:[#allocation4 + $0xba4] ss:$8 sps:$4 sm:$0xff]   ;;  %v23378_v17 = vshll.u32 %v21359_v48, 16 }
 0x422   :  { %v8064_v20 = vld [vmem:[#allocation3 + $0x250] sm:$0x11]  ;;  %10454 = vmatpush2.bf16.msra.mxu1 %v17592_v15  ;;  %10532 = vmatprep.subr.bf16.mxu0 %v17597_v36  ;;  %7979 = vst [vmem:[#allocation3 + $0x1a0] sm:$0xff] %v21375_v29  ;;  %v17612_v39 = vld [vmem:[#allocation4 + $0xb94] ss:$8 sps:$4 sm:$0xff]   ;;  %v23377_v2 = vshrl.u32 %v21393_v25, 16  ;;  %v21416_v15 = vsel %vm19517_vm10, %v7413_v47, %v7414_v18 }
 0x423   :  { %v15705_v31 = vcombine.low %v21299_v56, %v8064_v20  ;;  %v15706_v30 = vcombine.high %v21299_v56, %v8064_v20  ;;  %10455 = vmatprep.subr.bf16.mxu1 %v17600_v45  ;;  %v7514_v56 = vrot.slane %v7512_v52, 6  ;;  %v17609_v58 = vld [vmem:[#allocation4 + $0xcc4] ss:$8 sps:$4 sm:$0xff]   ;;  %v17607_v19 = vld [vmem:[#allocation4 + $0xcc0] ss:$8 sps:$4 sm:$0xff]   ;;  %v7416_v36 = vrot.slane %v7414_v18, 4 }
 0x424   :  { %v7436_v34 = vld [vmem:[#allocation3 + $0x320] sm:$0x11]  ;;  %v21411_v7 = vld [vmem:[#allocation2 + $0x28] sm:$0xff]  ;;  %v7482_v45 = vshll.u32 %v21395_v26, 16  ;;  %v7521_v63 = vrot.slane %v23379_v27, 5  ;;  %v7531_v49 = vrot.slane %v23377_v2, 5 }
 0x425   :  { %v8065_v43 = vld [vmem:[#allocation3 + $0x180] sm:$0x11]  ;;  %10337 = vmatprep.mubr.bf16.mxu1 %v15706_v30  ;;  %10533 = vmatpush2.bf16.msra.mxu0 %v17595_v42  ;;  %v21400_v0 = vor.u32 %v7514_v56, %v7511_v54  ;;  %v7448_v16 = vld [vmem:[#allocation2 + $0x50] sm:$0x33]  ;;  %v7396_v20 = vrot.slane %v21402_v5, 5  ;;  %v7399_v30 = vrot.slane %v21395_v26, 5 }
 0x426   :  { %v15707_v3 = vcombine.low %v7341_v55, %v8065_v43  ;;  %v15708_v12 = vcombine.high %v7341_v55, %v8065_v43  ;;  %10338 = vmatmul.mubr.bf16.gmra.mxu1 %v15705_v31  ;;  %10534 = vmatprep.subr.bf16.mxu0 %v17603_v33  ;;  %v17615_v38 = vld [vmem:[#allocation4 + $0xcb4] ss:$8 sps:$4 sm:$0xff]   ;;  %v7479_v55 = vshrl.u32 %v21395_v26, 16  ;;  %v17610_v42 = vld [vmem:[#allocation4 + $0xb90] ss:$8 sps:$4 sm:$0xff]   ;;  %v7437_v33 = vsel %vm19740_vm12, %v7416_v36, %v7436_v34 }
 0x427   :  { %10463 = vmatprep.mubr.bf16.mxu1 %v15638_v41  ;;  %10456 = vmatpush2.bf16.msra.mxu1 %v17598_v53  ;;  %v23376_v41 = vshll.u32 %v21393_v25, 16  ;;  %v17613_v31 = vld [vmem:[#allocation4 + $0xcb0] ss:$8 sps:$4 sm:$0xff]   ;;  %v7489_v53 = vshrl.u32 %v21411_v7, 16  ;;  %7438 = vst [vmem:[#allocation3 + $0x320] sm:$0x11] %v7437_v33 }
 0x428   :  { %10420 = vmatprep.mubr.bf16.mxu0 %v15708_v12  ;;  %10457 = vmatprep.subr.bf16.mxu1 %v17606_v21  ;;  %v7517_v43 = vrot.slane %v21400_v0, 4  ;;  %v17618_v32 = vld [vmem:[#allocation4 + $0xb84] ss:$8 sps:$4 sm:$0xff]   ;;  %v7542_v56 = vshll.u32 %v7448_v16, 16  ;;  %v7502_v18 = vshll.u32 %v21348_v62, 16 }
 0x429   :  { %10421 = vmatmul.mubr.bf16.gmra.mxu0 %v15707_v3  ;;  %v7534_v23 = vrot.slane %v23376_v41, 6  ;;  %v7492_v3 = vshll.u32 %v21411_v7, 16  ;;  %v17621_v21 = vld [vmem:[#allocation4 + $0xca4] ss:$8 sps:$4 sm:$0xff]   ;;  %v17616_v36 = vld [vmem:[#allocation4 + $0xb80] ss:$8 sps:$4 sm:$0xff]  }
 0x42a   :  { %10546 = vmatprep.mubr.bf16.mxu0 %v15640_v35  ;;  %10535 = vmatpush2.bf16.msra.mxu0 %v17601_v51  ;;  %v7524_v35 = vrot.slane %v23378_v17, 6  ;;  %v7539_v51 = vshrl.u32 %v7448_v16, 16  ;;  %v17624_v33 = vld [vmem:[#allocation4 + $0xd74] ss:$8 sps:$4 sm:$0xff]   ;;  %v7504_v41 = vrot.slane %v7502_v18, 6 }
 0x42b   :  { %10536 = vmatprep.subr.bf16.mxu0 %v17609_v58  ;;  %10458 = vmatpush2.bf16.msra.mxu1 %v17604_v46  ;;  %v7535_v12 = vor.u32 %v7534_v23, %v7531_v49  ;;  %v7481_v46 = vrot.slane %v7479_v55, 5  ;;  %v7484_v58 = vrot.slane %v7482_v45, 6  ;;  %v7398_v49 = vrot.slane %v7396_v20, 4  ;;  %v17622_v17 = vld [vmem:[#allocation4 + $0xd70] ss:$8 sps:$4 sm:$0xff]  }
 0x42c   :  { %v7525_v54 = vor.u32 %v7524_v35, %v7521_v63  ;;  %10459 = vmatprep.subr.bf16.mxu1 %v17612_v39  ;;  %v7499_v39 = vshrl.u32 %v21348_v62, 16  ;;  %v7541_v34 = vrot.slane %v7539_v51, 5  ;;  %v17619_v63 = vld [vmem:[#allocation4 + $0xca0] ss:$8 sps:$4 sm:$0xff]   ;;  %v7395_v35 = vrot.slane %v7393_v59, 4 }
 0x42d   :  { %v7402_v23 = vrot.slane %v21411_v7, 5  ;;  %v21458_v40 = vsel %vm19517_vm10, %v7398_v49, %v7399_v30  ;;  %v17627_v59 = vld [vmem:[#allocation4 + $0xc94] ss:$8 sps:$4 sm:$0xff]   ;;  %v7485_v51 = vor.u32 %v7484_v58, %v7481_v46  ;;  %v17625_v46 = vld [vmem:[#allocation4 + $0xc90] ss:$8 sps:$4 sm:$0xff]  }
 0x42e   :  { %10537 = vmatpush2.bf16.msra.mxu0 %v17607_v19  ;;  %v21440_v47 = vsel %vm19574_vm11, %v7517_v43, %v7525_v54  ;;  %v7527_v19 = vrot.slane %v7525_v54, 4  ;;  %v7491_v43 = vrot.slane %v7489_v53, 5  ;;  %v7547_v54 = vrot.slane %v7541_v34, 4  ;;  %v17630_v58 = vld [vmem:[#allocation4 + $0xd64] ss:$8 sps:$4 sm:$0xff]  }
 0x42f   :  { %10538 = vmatprep.subr.bf16.mxu0 %v17615_v38  ;;  %7564 = vst [vmem:[#allocation3 + $0x2b0] sm:$0xff] %v21440_v47  ;;  %v7544_v38 = vrot.slane %v7542_v56, 6  ;;  %10460 = vmatpush2.bf16.msra.mxu1 %v17610_v42  ;;  %v7494_v42 = vrot.slane %v7492_v3, 6  ;;  %v7537_v56 = vrot.slane %v7535_v12, 4  ;;  %v7397_v49 = vsel %vm19517_vm10, %v7395_v35, %v7396_v20  ;;  %v17633_v27 = vld [vmem:[#allocation4 + $0xc84] ss:$8 sps:$4 sm:$0xff]  }
 0x430   :  { %v21449_v16 = vsel %vm19574_vm11, %v7527_v19, %v7535_v12  ;;  %10461 = vmatprep.subr.bf16.mxu1 %v17618_v32  ;;  %v7567_v32 = vld [vmem:[#allocation3 + $0x50] sm:$0x11]  ;;  %v7501_v19 = vrot.slane %v7499_v39, 5  ;;  %v7401_v20 = vrot.slane %v7399_v30, 4  ;;  %v15655_v50 = vcombine.low %v7397_v49, %v21458_v40 }
 0x431   :  { %v7568_v2 = vsel %vm19740_vm12, %v7547_v54, %v7567_v32  ;;  %v7674_v32 = vshll.u32 %v21402_v5, 16  ;;  %v17953_v13 = vld [vmem:[#allocation4 + $0x13c4] ss:$8 sps:$4 sm:$0xff]  }
 0x432   :  { %10539 = vmatpush2.bf16.msra.mxu0 %v17613_v31  ;;  %v7545_v31 = vor.u32 %v7544_v38, %v7541_v34  ;;  %7569 = vst [vmem:[#allocation3 + $0x50] sm:$0x11] %v7568_v2  ;;  %v7404_v34 = vrot.slane %v7402_v23, 4  ;;  %v21473_v38 = vor.u32 %v7494_v42, %v7491_v43  ;;  %v21486_v35 = vor.u32 %v7504_v41, %v7501_v19  ;;  %v17628_v43 = vld [vmem:[#allocation4 + $0xd60] ss:$8 sps:$4 sm:$0xff]  }
 0x433   :  { %10540 = vmatprep.subr.bf16.mxu0 %v17621_v21  ;;  %v7671_v21 = vshrl.u32 %v21402_v5, 16  ;;  %10462 = vmatpush2.bf16.msra.mxu1 %v17616_v36  ;;  %v15656_v36 = vcombine.high %v7397_v49, %v21458_v40  ;;  %v21490_v30 = vsel %vm19517_vm10, %v7401_v20, %v7402_v23  ;;  %v7686_v23 = vrot.slane %v7482_v45, 7  ;;  %v17634_v49 = vld [vmem:[#allocation4 + $0xd50] ss:$8 sps:$4 sm:$0xff]  }
 0x434   :  { %v21471_v12 = vsel %vm19574_vm11, %v7537_v56, %v7545_v31  ;;  %10597 = vmatprep.subr.bf16.mxu1 %v17624_v33  ;;  %v21484_v2 = vsel %vm19517_vm10, %v7404_v34, %v7405_v8  ;;  %v7676_v33 = vrot.slane %v7674_v32, 7  ;;  %v7607_v56 = vrot.slane %v21357_v44, 6  ;;  %v17642_v32 = vld [vmem:[#allocation4 + $0xd44] ss:$8 sps:$4 sm:$0xff]  }
 0x435   :  { %v7673_v54 = vrot.slane %v7671_v21, 6  ;;  %v15674_v42 = vcombine.high %v21490_v30, %v21484_v2  ;;  %v21510_v31 = vsel %vm19574_vm11, %v7477_v1, %v7485_v51  ;;  %v15673_v19 = vcombine.low %v21490_v30, %v21484_v2  ;;  %v17741_v44 = vld [vmem:[#allocation4 + $0x1064] ss:$8 sps:$4 sm:$0xff]  }
 0x436   :  { %10541 = vmatpush2.bf16.msra.mxu0 %v17619_v63  ;;  %10464 = vmatmul.mubr.bf16.vlgmr.msra.gmra.mxu1 %v15637_v28  ;;  %v7487_v63 = vrot.slane %v7485_v51, 4  ;;  %v17636_v28 = vld [vmem:[#allocation4 + $0xd54] ss:$8 sps:$4 sm:$0xff]   ;;  %v15692_v40 = vcombine.high %v21379_v6, %v21387_v4  ;;  %v7497_v51 = vrot.slane %v21473_v38, 4  ;;  %v7613_v20 = vrot.slane %v21393_v25, 6 }
 0x437   :  { %10542 = vmatprep.subr.bf16.mxu0 %v17627_v59  ;;  %10473 = vmatprep.mubr.bf16.mxu1 %v15656_v36  ;;  %v21498_v41 = vor.u32 %v7676_v33, %v7673_v54  ;;  %v17639_v59 = vld [vmem:[#allocation4 + $0xe74] ss:$8 sps:$4 sm:$0xff]   ;;  %v7696_v54 = vrot.slane %v7492_v3, 7  ;;  %v7610_v36 = vrot.slane %v21359_v48, 6 }
 0x438   :  { %10598 = vmatpush1.bf16.msra.mxu1 %v17622_v17  ;;  %v21496_v8 = vsel %vm19574_vm11, %v7487_v63, %v21473_v38  ;;  %v7683_v17 = vrot.slane %v7479_v55, 6  ;;  %v7507_v55 = vrot.slane %v21486_v35, 4  ;;  %v7609_v38 = vrot.slane %v7607_v56, 4 }
 0x439   :  { %10599 = vmatprep.subr.bf16.mxu1 %v17630_v58  ;;  %v15658_v45 = vcombine.high %v21510_v31, %v21496_v8  ;;  %v15657_v21 = vcombine.low %v21510_v31, %v21496_v8  ;;  %v7679_v58 = vrot.slane %v21498_v41, 4  ;;  %v7703_v63 = vrot.slane %v7499_v39, 6 }
 0x43a   :  { %10543 = vmatpush2.bf16.msra.mxu0 %v17625_v46  ;;  %v17637_v46 = vld [vmem:[#allocation4 + $0xe70] ss:$8 sps:$4 sm:$0xff]   ;;  %v7687_v34 = vor.u32 %v7686_v23, %v7683_v17  ;;  %v21549_v39 = vsel %vm20107_vm3, %v7609_v38, %v7610_v36  ;;  %v7612_v23 = vrot.slane %v7610_v36, 4  ;;  %v15691_v31 = vcombine.low %v21379_v6, %v21387_v4  ;;  %v7769_v4 = vld [vmem:[#allocation3 + $0x228] sm:$0x11] }
 0x43b   :  { %10544 = vmatprep.subr.bf16.mxu0 %v17633_v27  ;;  %v7693_v27 = vrot.slane %v7489_v53, 6  ;;  %v21527_v53 = vsel %vm19574_vm11, %v7507_v55, %v21400_v0  ;;  %v17645_v0 = vld [vmem:[#allocation4 + $0xe64] ss:$8 sps:$4 sm:$0xff]   ;;  %7635 = vst [vmem:[#allocation3 + $0x1b8] sm:$0xff] %v21549_v39  ;;  %v17643_v55 = vld [vmem:[#allocation4 + $0xe60] ss:$8 sps:$4 sm:$0xff]  }
 0x43c   :  { %10600 = vmatpush1.bf16.msra.mxu1 %v17628_v43  ;;  %v21540_v43 = vsel %vm19338_vm14, %v7679_v58, %v7687_v34  ;;  %v7689_v1 = vrot.slane %v7687_v34, 4  ;;  %v17651_v58 = vld [vmem:[#allocation4 + $0xe54] ss:$8 sps:$4 sm:$0xff]   ;;  %v17646_v38 = vld [vmem:[#allocation4 + $0xd30] ss:$8 sps:$4 sm:$0xff]  }
 0x43d   :  { %10601 = vmatprep.subr.bf16.mxu1 %v17636_v28  ;;  %v7697_v3 = vor.u32 %v7696_v54, %v7693_v27  ;;  %v7579_v28 = vld [vmem:[#allocation2 + $0x50] sm:$0x77]  ;;  %v17648_v27 = vld [vmem:[#allocation4 + $0xd34] ss:$8 sps:$4 sm:$0xff]  }
 0x43e   :  { %10545 = vmatpush2.bf16.msra.mxu0 %v17631_v61  ;;  %10474 = vmatmul.mubr.bf16.gmra.mxu1 %v15655_v50  ;;  %v7706_v61 = vrot.slane %v7502_v18, 7  ;;  %v7713_v50 = vrot.slane %v7509_v60, 6  ;;  %v17640_v18 = vld [vmem:[#allocation4 + $0xd40] ss:$8 sps:$4 sm:$0xff]  }
 0x43f   :  { %10680 = vmatprep.subr.bf16.mxu0 %v17639_v59  ;;  %10483 = vmatprep.mubr.bf16.mxu1 %v15674_v42  ;;  %v7716_v59 = vrot.slane %v7512_v52, 7  ;;  %v21557_v42 = vsel %vm19338_vm14, %v7689_v1, %v7697_v3  ;;  %v7699_v22 = vrot.slane %v7697_v3, 4  ;;  %v21564_v52 = vsel %vm20107_vm3, %v7612_v23, %v7613_v20 }
 0x440   :  { %10602 = vmatpush1.bf16.msra.mxu1 %v17634_v49  ;;  %v7707_v11 = vor.u32 %v7706_v61, %v7703_v63  ;;  %v15662_v60 = vcombine.high %v21540_v43, %v21557_v42  ;;  %v7616_v49 = vrot.slane %v7579_v28, 6  ;;  %v15695_v34 = vcombine.low %v21549_v39, %v21564_v52 }
 0x441   :  { %10547 = vmatmul.mubr.bf16.vlgmr.msra.gmra.mxu0 %v15639_v24  ;;  %v7615_v24 = vrot.slane %v7613_v20, 4  ;;  %10603 = vmatprep.subr.bf16.mxu1 %v17642_v32  ;;  %v7717_v36 = vor.u32 %v7716_v59, %v7713_v50  ;;  %v23731_v1 = vshrl.u32 %v21359_v48, 16  ;;  %v21585_v61 = vsel %vm19574_vm11, %v7497_v51, %v21486_v35 }
 0x442   :  { %10556 = vmatprep.mubr.bf16.mxu0 %v15658_v45  ;;  %10681 = vmatpush1.bf16.msra.mxu0 %v17637_v46  ;;  %v15661_v45 = vcombine.low %v21540_v43, %v21557_v42  ;;  %v15696_v46 = vcombine.high %v21549_v39, %v21564_v52  ;;  %v21574_v54 = vsel %vm19338_vm14, %v7699_v22, %v7707_v11  ;;  %v7709_v32 = vrot.slane %v7707_v11, 4  ;;  %v17754_v43 = vld [vmem:[#allocation4 + $0xf10] ss:$8 sps:$4 sm:$0xff]   ;;  %v17763_v52 = vld [vmem:[#allocation4 + $0x1020] ss:$8 sps:$4 sm:$0xff]  }
 0x443   :  { %10682 = vmatprep.subr.bf16.mxu0 %v17645_v0  ;;  %v21578_v20 = vsel %vm20107_vm3, %v7615_v24, %v7616_v49  ;;  %v7618_v63 = vrot.slane %v7616_v49, 4  ;;  %v7638_v0 = vld [vmem:[#allocation3 + $0x300] sm:$0x11]  ;;  %v7723_v3 = vrot.slane %v23731_v1, 6  ;;  %v23732_v28 = vshll.u32 %v21359_v48, 16 }
 0x444   :  { %10604 = vmatpush1.bf16.msra.mxu1 %v17640_v18  ;;  %v23733_v50 = vshrl.u32 %v21393_v25, 16  ;;  %v23734_v22 = vshll.u32 %v21393_v25, 16  ;;  %v7650_v24 = vld [vmem:[#allocation2 + $0x50] sm:$0x77]  ;;  %v17649_v49 = vld [vmem:[#allocation4 + $0xe50] ss:$8 sps:$4 sm:$0xff]   ;;  %v15676_v18 = vcombine.high %v21585_v61, %v21527_v53  ;;  %v21597_v35 = vsel %vm19338_vm14, %v7709_v32, %v7717_v36 }
 0x445   :  { %v7726_v23 = vrot.slane %v23732_v28, 7  ;;  %10605 = vmatprep.subr.bf16.mxu1 %v17648_v27  ;;  %v17654_v1 = vld [vmem:[#allocation4 + $0xd24] ss:$8 sps:$4 sm:$0xff]   ;;  %v7639_v48 = vsel %vm19740_vm12, %v7618_v63, %v7638_v0  ;;  %v15680_v51 = vcombine.high %v21574_v54, %v21597_v35  ;;  %v7719_v27 = vrot.slane %v7717_v36, 4  ;;  %v17655_v63 = vld [vmem:[#allocation4 + $0xe40] ss:$8 sps:$4 sm:$0xff]  }
 0x446   :  { %v7733_v59 = vrot.slane %v23733_v50, 6  ;;  %v7736_v11 = vrot.slane %v23734_v22, 7  ;;  %10683 = vmatpush1.bf16.msra.mxu0 %v17643_v55  ;;  %10484 = vmatmul.mubr.bf16.gmra.mxu1 %v15673_v19  ;;  %v17657_v25 = vld [vmem:[#allocation4 + $0xe44] ss:$8 sps:$4 sm:$0xff]   ;;  %7640 = vst [vmem:[#allocation3 + $0x300] sm:$0x11] %v7639_v48  ;;  %v15679_v55 = vcombine.low %v21574_v54, %v21597_v35  ;;  %v15675_v50 = vcombine.low %v21585_v61, %v21527_v53 }
 0x447   :  { %10684 = vmatprep.subr.bf16.mxu0 %v17651_v58  ;;  %v7727_v28 = vor.u32 %v7726_v23, %v7723_v3  ;;  %10493 = vmatprep.mubr.bf16.mxu1 %v15692_v40  ;;  %v7741_v30 = vshrl.u32 %v7650_v24, 16  ;;  %v17652_v19 = vld [vmem:[#allocation4 + $0xd20] ss:$8 sps:$4 sm:$0xff]   ;;  %v7744_v36 = vshll.u32 %v7650_v24, 16  ;;  %v17660_v0 = vld [vmem:[#allocation4 + $0xd14] ss:$8 sps:$4 sm:$0xff]  }
 0x448   :  { %v7737_v2 = vor.u32 %v7736_v11, %v7733_v59  ;;  %10606 = vmatpush1.bf16.msra.mxu1 %v17646_v38  ;;  %v21618_v40 = vld [vmem:[#allocation2 + $0x10] sm:$0xff]  ;;  %v17663_v38 = vld [vmem:[#allocation4 + $0xe34] ss:$8 sps:$4 sm:$0xff]   ;;  %v7641_v59 = vld [vmem:[#allocation2 + $0x8] sm:$0xcc] }
 0x449   :  { %10557 = vmatmul.mubr.bf16.gmra.mxu0 %v15657_v21  ;;  %v21616_v58 = vsel %vm19338_vm14, %v7719_v27, %v7727_v28  ;;  %v7729_v32 = vrot.slane %v7727_v28, 4  ;;  %10607 = vmatprep.subr.bf16.mxu1 %v17654_v1  ;;  %v7743_v8 = vrot.slane %v7741_v30, 6  ;;  %v21623_v21 = vld [vmem:[#allocation3 + $0x320] sm:$0x11]  ;;  %v7746_v23 = vrot.slane %v7744_v36, 7 }
 0x44a   :  { %10566 = vmatprep.mubr.bf16.mxu0 %v15676_v18  ;;  %10685 = vmatpush1.bf16.msra.mxu0 %v17649_v49  ;;  %7766 = vst [vmem:[#allocation3 + $0x220] sm:$0xff] %v21616_v58  ;;  %v17658_v24 = vld [vmem:[#allocation4 + $0xd10] ss:$8 sps:$4 sm:$0xff]   ;;  %v7592_v49 = vrot.slane %v21618_v40, 6  ;;  %v7595_v18 = vrot.slane %v21402_v5, 6  ;;  %v7739_v1 = vrot.slane %v7737_v2, 4  ;;  %v15710_v53 = vcombine.high %v21416_v15, %v21623_v21 }
 0x44b   :  { %10686 = vmatprep.subr.bf16.mxu0 %v17657_v25  ;;  %v21627_v3 = vsel %vm19338_vm14, %v7729_v32, %v7737_v2  ;;  %v7749_v6 = vrot.slane %v7743_v8, 4  ;;  %v7747_v48 = vor.u32 %v7746_v23, %v7743_v8  ;;  %v17661_v61 = vld [vmem:[#allocation4 + $0xe30] ss:$8 sps:$4 sm:$0xff]   ;;  %v17666_v25 = vld [vmem:[#allocation4 + $0xd04] ss:$8 sps:$4 sm:$0xff]   ;;  %v7661_v27 = vshrl.u32 %v21618_v40, 16 }
 0x44c   :  { %v15697_v22 = vcombine.low %v21616_v58, %v21627_v3  ;;  %v15698_v11 = vcombine.high %v21616_v58, %v21627_v3  ;;  %10608 = vmatpush1.bf16.msra.mxu1 %v17652_v19  ;;  %v7664_v28 = vshll.u32 %v21618_v40, 16  ;;  %v15694_v2 = vcombine.high %v21440_v47, %v21449_v16  ;;  %v17669_v19 = vld [vmem:[#allocation4 + $0xe24] ss:$8 sps:$4 sm:$0xff]   ;;  %v17664_v40 = vld [vmem:[#allocation4 + $0xd00] ss:$8 sps:$4 sm:$0xff]  }
 0x44d   :  { %10609 = vmatprep.subr.bf16.mxu1 %v17660_v0  ;;  %v7770_v30 = vsel %vm19740_vm12, %v7749_v6, %v7769_v4  ;;  %v7652_v32 = vshrl.u32 %v7641_v59, 16  ;;  %v7655_v36 = vshll.u32 %v7641_v59, 16  ;;  %v7570_v0 = vld [vmem:[#allocation2 + $0x8] sm:$0xcc]  ;;  %v7663_v23 = vrot.slane %v7661_v27, 6  ;;  %v21649_v4 = vld [vmem:[#allocation2 + $0x40] sm:$0xff] }
 0x44e   :  { %10687 = vmatpush1.bf16.msra.mxu0 %v17655_v63  ;;  %10494 = vmatmul.mubr.bf16.gmra.mxu1 %v15691_v31  ;;  %v21647_v63 = vsel %vm19338_vm14, %v7739_v1, %v7747_v48  ;;  %7771 = vst [vmem:[#allocation3 + $0x228] sm:$0x11] %v7770_v30  ;;  %v17667_v8 = vld [vmem:[#allocation4 + $0xe20] ss:$8 sps:$4 sm:$0xff]   ;;  %v7594_v31 = vrot.slane %v7592_v49, 4  ;;  %v7666_v6 = vrot.slane %v7664_v28, 7  ;;  %v15693_v30 = vcombine.low %v21440_v47, %v21449_v16 }
 0x44f   :  { %10688 = vmatprep.subr.bf16.mxu0 %v17663_v38  ;;  %10503 = vmatprep.mubr.bf16.mxu1 %v15710_v53  ;;  %v17672_v38 = vld [vmem:[#allocation4 + $0xdf4] ss:$8 sps:$4 sm:$0xff]   ;;  %v15630_v59 = vrot.slane %v7570_v0, 10  ;;  %v7654_v1 = vrot.slane %v7652_v32, 6  ;;  %v7657_v48 = vrot.slane %v7655_v36, 7  ;;  %v23380_v28 = vrot.slane %v21649_v4, 7 }
 0x450   :  { %10610 = vmatpush1.bf16.msra.mxu1 %v17658_v24  ;;  %v17675_v24 = vld [vmem:[#allocation4 + $0xe14] ss:$8 sps:$4 sm:$0xff]   ;;  %v8067_v53 = vld [vmem:[#allocation3 + $0x50] sm:$0x11]  ;;  %v7667_v36 = vor.u32 %v7666_v6, %v7663_v23  ;;  %v7812_v16 = vrot.slane %v21355_v37, 7  ;;  %v7904_v23 = vshrl.u32 %v21649_v4, 16 }
 0x451   :  { %10567 = vmatmul.mubr.bf16.gmra.mxu0 %v15675_v50  ;;  %10611 = vmatprep.subr.bf16.mxu1 %v17666_v25  ;;  %v21655_v50 = vsel %vm20107_vm3, %v7594_v31, %v7595_v18  ;;  %v17670_v25 = vld [vmem:[#allocation4 + $0xdf0] ss:$8 sps:$4 sm:$0xff]   ;;  %v21661_v27 = vsel %vm20107_vm3, %v15630_v59, %v7592_v49  ;;  %v17678_v32 = vld [vmem:[#allocation4 + $0xde4] ss:$8 sps:$4 sm:$0xff]   ;;  %v7658_v49 = vor.u32 %v7657_v48, %v7654_v1  ;;  %v17676_v0 = vld [vmem:[#allocation4 + $0xde0] ss:$8 sps:$4 sm:$0xff]  }
 0x452   :  { %10576 = vmatprep.mubr.bf16.mxu0 %v15694_v2  ;;  %10689 = vmatpush1.bf16.msra.mxu0 %v17661_v61  ;;  %v15709_v61 = vcombine.low %v21416_v15, %v21623_v21  ;;  %v15642_v2 = vcombine.high %v21661_v27, %v21655_v50  ;;  %v15712_v15 = vcombine.high %v21471_v12, %v8067_v53  ;;  %v17681_v21 = vld [vmem:[#allocation4 + $0xe04] ss:$8 sps:$4 sm:$0xff]   ;;  %v7811_v47 = vrot.slane %v23380_v28, 4  ;;  %v17684_v31 = vld [vmem:[#allocation4 + $0xdd4] ss:$8 sps:$4 sm:$0xff]  }
 0x453   :  { %10690 = vmatprep.subr.bf16.mxu0 %v17669_v19  ;;  %v17673_v19 = vld [vmem:[#allocation4 + $0xe10] ss:$8 sps:$4 sm:$0xff]   ;;  %v17687_v6 = vld [vmem:[#allocation4 + $0xef4] ss:$8 sps:$4 sm:$0xff]   ;;  %v7659_v59 = vrot.slane %v7658_v49, 4  ;;  %v7814_v48 = vrot.slane %v7812_v16, 4 }
 0x454   :  { %10612 = vmatpush1.bf16.msra.mxu1 %v17664_v40  ;;  %v7815_v40 = vrot.slane %v21366_v57, 7  ;;  %v21676_v1 = vsel %vm20361_vm4, %v7811_v47, %v7812_v16  ;;  %v17690_v49 = vld [vmem:[#allocation4 + $0xdc4] ss:$8 sps:$4 sm:$0xff]   ;;  %v21699_v16 = vrot.slane %v7904_v23, 7  ;;  %v17688_v23 = vld [vmem:[#allocation4 + $0xdc0] ss:$8 sps:$4 sm:$0xff]  }
 0x455   :  { %10613 = vmatprep.subr.bf16.mxu1 %v17672_v38  ;;  %v7669_v38 = vrot.slane %v7667_v36, 4  ;;  %7837 = vst [vmem:[#allocation3 + $0x1f8] sm:$0xff] %v21676_v1  ;;  %v17696_v47 = vld [vmem:[#allocation4 + $0xdb4] ss:$8 sps:$4 sm:$0xff]   ;;  %v17729_v5 = vld [vmem:[#allocation4 + $0xe84] ss:$8 sps:$4 sm:$0xff]  }
 0x456   :  { %10691 = vmatpush1.bf16.msra.mxu0 %v17667_v8  ;;  %10504 = vmatmul.mubr.bf16.gmra.mxu1 %v15709_v61  ;;  %v17679_v8 = vld [vmem:[#allocation4 + $0xe00] ss:$8 sps:$4 sm:$0xff]   ;;  %v17771_v35 = vld [vmem:[#allocation4 + $0x1014] ss:$8 sps:$4 sm:$0xff]   ;;  %v17778_v3 = vld [vmem:[#allocation4 + $0xfd0] ss:$8 sps:$4 sm:$0xff]  }
 0x457   :  { %10692 = vmatprep.subr.bf16.mxu0 %v17675_v24  ;;  %10629 = vmatprep.mubr.bf16.mxu1 %v15642_v2  ;;  %v21681_v61 = vsel %vm19338_vm14, %v7669_v38, %v21498_v41  ;;  %v17682_v2 = vld [vmem:[#allocation4 + $0xdd0] ss:$8 sps:$4 sm:$0xff]   ;;  %v15711_v41 = vcombine.low %v21471_v12, %v8067_v53  ;;  %v17693_v38 = vld [vmem:[#allocation4 + $0xee4] ss:$8 sps:$4 sm:$0xff]   ;;  %v17947_v24 = vld [vmem:[#allocation4 + $0x13d4] ss:$8 sps:$4 sm:$0xff]  }
 0x458   :  { %10614 = vmatpush2.bf16.msra.mxu1 %v17670_v25  ;;  %v7818_v25 = vrot.slane %v21375_v29, 7 }
 0x459   :  { %10577 = vmatmul.mubr.bf16.gmra.mxu0 %v15693_v30  ;;  %10615 = vmatprep.subr.bf16.mxu1 %v17678_v32  ;;  %v7913_v30 = vshrl.u32 %v21355_v37, 16  ;;  %v21692_v32 = vsel %vm20361_vm4, %v7814_v48, %v7815_v40 }
 0x45a   :  { %10586 = vmatprep.mubr.bf16.mxu0 %v15712_v15  ;;  %10693 = vmatpush1.bf16.msra.mxu0 %v17673_v19  ;;  %v21688_v19 = vsel %vm19338_vm14, %v7659_v59, %v7667_v36  ;;  %v7817_v15 = vrot.slane %v7815_v40, 4  ;;  %v7820_v53 = vrot.slane %v7818_v25, 4  ;;  %v7840_v40 = vld [vmem:[#allocation3 + $0x1a8] sm:$0x11]  ;;  %v7922_v59 = vshrl.u32 %v21366_v57, 16 }
 0x45b   :  { %10694 = vmatprep.subr.bf16.mxu0 %v17681_v21  ;;  %v17685_v21 = vld [vmem:[#allocation4 + $0xef0] ss:$8 sps:$4 sm:$0xff]   ;;  %v15644_v36 = vcombine.high %v21688_v19, %v21681_v61 }
 0x45c   :  { %10616 = vmatpush2.bf16.msra.mxu1 %v17676_v0  ;;  %v21705_v12 = vsel %vm20361_vm4, %v7817_v15, %v7818_v25  ;;  %v7841_v48 = vsel %vm19740_vm12, %v7820_v53, %v7840_v40  ;;  %v7911_v25 = vrot.slane %v21699_v16, 4  ;;  %v17941_v0 = vld [vmem:[#allocation4 + $0x13e4] ss:$8 sps:$4 sm:$0xff]  }
 0x45d   :  { %10617 = vmatprep.subr.bf16.mxu1 %v17684_v31  ;;  %v7916_v31 = vshll.u32 %v21355_v37, 16  ;;  %7842 = vst [vmem:[#allocation3 + $0x1a8] sm:$0x11] %v7841_v48  ;;  %v17699_v37 = vld [vmem:[#allocation4 + $0xed4] ss:$8 sps:$4 sm:$0xff]  }
 0x45e   :  { %10695 = vmatpush1.bf16.msra.mxu0 %v17679_v8  ;;  %v7915_v8 = vrot.slane %v7913_v30, 7  ;;  %v7925_v30 = vshll.u32 %v21366_v57, 16  ;;  %v17697_v57 = vld [vmem:[#allocation4 + $0xed0] ss:$8 sps:$4 sm:$0xff]  }
 0x45f   :  { %10696 = vmatprep.subr.bf16.mxu0 %v17687_v6  ;;  %v17691_v6 = vld [vmem:[#allocation4 + $0xee0] ss:$8 sps:$4 sm:$0xff]  }
 0x460   :  { %10618 = vmatpush2.bf16.msra.mxu1 %v17682_v2  ;;  %v7918_v15 = vor.u32 %v7916_v31, %v7915_v8  ;;  %v7931_v2 = vshrl.u32 %v21375_v29, 16  ;;  %v7920_v53 = vrot.slane %v7915_v8, 4  ;;  %v7934_v31 = vshll.u32 %v21375_v29, 16 }
 0x461   :  { %10587 = vmatmul.mubr.bf16.gmra.mxu0 %v15711_v41  ;;  %10619 = vmatprep.subr.bf16.mxu1 %v17690_v49  ;;  %v7924_v41 = vrot.slane %v7922_v59, 7  ;;  %v17694_v49 = vld [vmem:[#allocation4 + $0xdb0] ss:$8 sps:$4 sm:$0xff]  }
 0x462   :  { %10712 = vmatprep.mubr.bf16.mxu0 %v15644_v36  ;;  %10697 = vmatpush2.bf16.msra.mxu0 %v17685_v21  ;;  %v7970_v36 = vld [vmem:[#allocation2 + $0x60] sm:$0x11]  ;;  %v21716_v28 = vsel %vm20197_vm0, %v7911_v25, %v7918_v15  ;;  %v7933_v40 = vrot.slane %v7931_v2, 7  ;;  %v7980_v59 = vld [vmem:[#allocation3 + $0x2b8] sm:$0x11] }
 0x463   :  { %10698 = vmatprep.subr.bf16.mxu0 %v17693_v38  ;;  %v7927_v21 = vor.u32 %v7925_v30, %v7924_v41  ;;  %7955 = vst [vmem:[#allocation3 + $0x60] sm:$0xff] %v21716_v28  ;;  %v17702_v38 = vld [vmem:[#allocation4 + $0xda4] ss:$8 sps:$4 sm:$0xff]   ;;  %v7929_v25 = vrot.slane %v7924_v41, 4  ;;  %v7981_v8 = vsel %vm19740_vm12, %v7970_v36, %v7980_v59  ;;  %v17700_v2 = vld [vmem:[#allocation4 + $0xda0] ss:$8 sps:$4 sm:$0xff]  }
 0x464   :  { %10620 = vmatpush2.bf16.msra.mxu1 %v17688_v23  ;;  %v17705_v23 = vld [vmem:[#allocation4 + $0xec4] ss:$8 sps:$4 sm:$0xff]   ;;  %7982 = vst [vmem:[#allocation3 + $0x2b8] sm:$0x11] %v7981_v8  ;;  %v17703_v36 = vld [vmem:[#allocation4 + $0xec0] ss:$8 sps:$4 sm:$0xff]  }
 0x465   :  { %10621 = vmatprep.subr.bf16.mxu1 %v17696_v47  ;;  %v21722_v48 = vsel %vm20197_vm0, %v7920_v53, %v7927_v21  ;;  %v7938_v47 = vrot.slane %v7933_v40, 4  ;;  %v7958_v30 = vld [vmem:[#allocation3 + $0x70] sm:$0x11]  ;;  %v17708_v53 = vld [vmem:[#allocation4 + $0xd94] ss:$8 sps:$4 sm:$0xff]   ;;  %v7598_v59 = vrot.slane %v21395_v26, 6 }
 0x466   :  { %10699 = vmatpush2.bf16.msra.mxu0 %v17691_v6  ;;  %v15701_v15 = vcombine.low %v21716_v28, %v21722_v48  ;;  %v15702_v29 = vcombine.high %v21716_v28, %v21722_v48  ;;  %v7936_v6 = vor.u32 %v7934_v31, %v7933_v40  ;;  %v17711_v21 = vld [vmem:[#allocation4 + $0xeb4] ss:$8 sps:$4 sm:$0xff]   ;;  %v17706_v40 = vld [vmem:[#allocation4 + $0xd90] ss:$8 sps:$4 sm:$0xff]   ;;  %v17714_v31 = vld [vmem:[#allocation4 + $0xd84] ss:$8 sps:$4 sm:$0xff]  }
 0x467   :  { %10700 = vmatprep.subr.bf16.mxu0 %v17699_v37  ;;  %v7959_v37 = vsel %vm19740_vm12, %v7938_v47, %v7958_v30  ;;  %v7601_v8 = vrot.slane %v21411_v7, 6  ;;  %v17723_v47 = vld [vmem:[#allocation4 + $0xe94] ss:$8 sps:$4 sm:$0xff]   ;;  %v7597_v30 = vrot.slane %v7595_v18, 4  ;;  %v17718_v26 = vld [vmem:[#allocation4 + $0xf70] ss:$8 sps:$4 sm:$0xff]   ;;  %v15641_v7 = vcombine.low %v21661_v27, %v21655_v50 }
 0x468   :  { %10622 = vmatpush2.bf16.msra.mxu1 %v17694_v49  ;;  %v21732_v41 = vsel %vm20197_vm0, %v7929_v25, %v7936_v6  ;;  %7960 = vst [vmem:[#allocation3 + $0x70] sm:$0x11] %v7959_v37  ;;  %v17709_v49 = vld [vmem:[#allocation4 + $0xeb0] ss:$8 sps:$4 sm:$0xff]   ;;  %v17717_v25 = vld [vmem:[#allocation4 + $0xea4] ss:$8 sps:$4 sm:$0xff]  }
 0x469   :  { %10623 = vmatprep.subr.bf16.mxu1 %v17702_v38  ;;  %v17715_v38 = vld [vmem:[#allocation4 + $0xea0] ss:$8 sps:$4 sm:$0xff]   ;;  %v17720_v6 = vld [vmem:[#allocation4 + $0xf74] ss:$8 sps:$4 sm:$0xff]   ;;  %v7599_v37 = vsel %vm20107_vm3, %v7597_v30, %v7598_v59  ;;  %v17857_v28 = vld [vmem:[#allocation4 + $0x11c4] ss:$8 sps:$4 sm:$0xff]  }
 0x46a   :  { %10701 = vmatpush2.bf16.msra.mxu0 %v17697_v57  ;;  %v17712_v57 = vld [vmem:[#allocation4 + $0xd80] ss:$8 sps:$4 sm:$0xff]   ;;  %v17732_v50 = vld [vmem:[#allocation4 + $0xf54] ss:$8 sps:$4 sm:$0xff]  }
 0x46b   :  { %10702 = vmatprep.subr.bf16.mxu0 %v17705_v23  ;;  %v7600_v23 = vrot.slane %v7598_v59, 4  ;;  %v17724_v18 = vld [vmem:[#allocation4 + $0xf60] ss:$8 sps:$4 sm:$0xff]  }
 0x46c   :  { %10624 = vmatpush2.bf16.msra.mxu1 %v17700_v2  ;;  %v17739_v30 = vld [vmem:[#allocation4 + $0x1060] ss:$8 sps:$4 sm:$0xff]  }
 0x46d   :  { %10625 = vmatprep.subr.bf16.mxu1 %v17708_v53  ;;  %v7602_v2 = vsel %vm20107_vm3, %v7600_v23, %v7601_v8  ;;  %v17726_v53 = vld [vmem:[#allocation4 + $0xf64] ss:$8 sps:$4 sm:$0xff]   ;;  %v17855_v48 = vld [vmem:[#allocation4 + $0x11c0] ss:$8 sps:$4 sm:$0xff]  }
 0x46e   :  { %10703 = vmatpush2.bf16.msra.mxu0 %v17703_v36  ;;  %v17721_v36 = vld [vmem:[#allocation4 + $0xe90] ss:$8 sps:$4 sm:$0xff]   ;;  %v15659_v59 = vcombine.low %v7599_v37, %v7602_v2 }
 0x46f   :  { %10704 = vmatprep.subr.bf16.mxu0 %v17711_v21  ;;  %v7604_v21 = vrot.slane %v21348_v62, 6 }
 0x470   :  { %10626 = vmatpush2.bf16.msra.mxu1 %v17706_v40  ;;  %v15660_v40 = vcombine.high %v7599_v37, %v7602_v2  ;;  %v17744_v2 = vld [vmem:[#allocation4 + $0xf34] ss:$8 sps:$4 sm:$0xff]   ;;  %v17750_v37 = vld [vmem:[#allocation4 + $0xf24] ss:$8 sps:$4 sm:$0xff]  }
 0x471   :  { %10627 = vmatprep.subr.bf16.mxu1 %v17714_v31  ;;  %v7606_v27 = vrot.slane %v7604_v21, 4  ;;  %v17735_v31 = vld [vmem:[#allocation4 + $0x1074] ss:$8 sps:$4 sm:$0xff]  }
 0x472   :  { %10705 = vmatpush2.bf16.msra.mxu0 %v17709_v49  ;;  %v17727_v49 = vld [vmem:[#allocation4 + $0xe80] ss:$8 sps:$4 sm:$0xff]  }
 0x473   :  { %10706 = vmatprep.subr.bf16.mxu0 %v17717_v25  ;;  %v7603_v25 = vrot.slane %v7601_v8, 4  ;;  %v7608_v62 = vsel %vm20107_vm3, %v7606_v27, %v7607_v56  ;;  %v17738_v8 = vld [vmem:[#allocation4 + $0xf44] ss:$8 sps:$4 sm:$0xff]   ;;  %v17736_v56 = vld [vmem:[#allocation4 + $0xf40] ss:$8 sps:$4 sm:$0xff]  }
 0x474   :  { %10628 = vmatpush2.bf16.msra.mxu1 %v17712_v57  ;;  %v17730_v57 = vld [vmem:[#allocation4 + $0xf50] ss:$8 sps:$4 sm:$0xff]  }
 0x475   :  { %10763 = vmatprep.subr.bf16.mxu1 %v17720_v6  ;;  %v15643_v6 = vcombine.low %v21688_v19, %v21681_v61  ;;  %v17747_v61 = vld [vmem:[#allocation4 + $0x1054] ss:$8 sps:$4 sm:$0xff]  }
 0x476   :  { %10707 = vmatpush2.bf16.msra.mxu0 %v17715_v38  ;;  %v7605_v38 = vsel %vm20107_vm3, %v7603_v25, %v7604_v21  ;;  %v17756_v21 = vld [vmem:[#allocation4 + $0xf14] ss:$8 sps:$4 sm:$0xff]  }
 0x477   :  { %10708 = vmatprep.subr.bf16.mxu0 %v17723_v47  ;;  %10630 = vmatmul.mubr.bf16.vlgmr.msra.gmra.mxu1 %v15641_v7  ;;  %v15678_v23 = vcombine.high %v7605_v38, %v7608_v62  ;;  %v17733_v47 = vld [vmem:[#allocation4 + $0x1070] ss:$8 sps:$4 sm:$0xff]   ;;  %v15677_v19 = vcombine.low %v7605_v38, %v7608_v62  ;;  %v17760_v62 = vld [vmem:[#allocation4 + $0xf00] ss:$8 sps:$4 sm:$0xff]  }
 0x478   :  { %10639 = vmatprep.mubr.bf16.mxu1 %v15660_v40  ;;  %10764 = vmatpush1.bf16.msra.mxu1 %v17718_v26  ;;  %v17742_v26 = vld [vmem:[#allocation4 + $0xf30] ss:$8 sps:$4 sm:$0xff]  }
 0x479   :  { %10765 = vmatprep.subr.bf16.mxu1 %v17726_v53  ;;  %v17745_v7 = vld [vmem:[#allocation4 + $0x1050] ss:$8 sps:$4 sm:$0xff]   ;;  %v17751_v53 = vld [vmem:[#allocation4 + $0x1040] ss:$8 sps:$4 sm:$0xff]  }
 0x47a   :  { %10709 = vmatpush2.bf16.msra.mxu0 %v17721_v36  ;;  %v17753_v36 = vld [vmem:[#allocation4 + $0x1044] ss:$8 sps:$4 sm:$0xff]   ;;  %v21767_v40 = vld [vmem:[#allocation2 + $0x18] sm:$0xff] }
 0x47b   :  { %10710 = vmatprep.subr.bf16.mxu0 %v17729_v5  ;;  %v8068_v5 = vld [vmem:[#allocation3 + $0x300] sm:$0x11]  ;;  %v7794_v42 = vrot.slane %v21767_v40, 7 }
 0x47c   :  { %10766 = vmatpush1.bf16.msra.mxu1 %v17724_v18  ;;  %v17759_v18 = vld [vmem:[#allocation4 + $0x1034] ss:$8 sps:$4 sm:$0xff]  }
 0x47d   :  { %10767 = vmatprep.subr.bf16.mxu1 %v17732_v50  ;;  %v17765_v50 = vld [vmem:[#allocation4 + $0x1024] ss:$8 sps:$4 sm:$0xff]   ;;  %v7796_v39 = vrot.slane %v7794_v42, 4 }
 0x47e   :  { %10711 = vmatpush2.bf16.msra.mxu0 %v17727_v49  ;;  %v17762_v49 = vld [vmem:[#allocation4 + $0xf04] ss:$8 sps:$4 sm:$0xff]  }
 0x47f   :  { %10846 = vmatprep.subr.bf16.mxu0 %v17735_v31  ;;  %10640 = vmatmul.mubr.bf16.gmra.mxu1 %v15659_v59  ;;  %v7772_v31 = vld [vmem:[#allocation2 + $0x10] sm:$0x88]  ;;  %v7859_v59 = vshrl.u32 %v21767_v40, 16 }
 0x480   :  { %10649 = vmatprep.mubr.bf16.mxu1 %v15678_v23  ;;  %10768 = vmatpush1.bf16.msra.mxu1 %v17730_v57  ;;  %v15631_v57 = vrot.slane %v7772_v31, 11  ;;  %v17792_v31 = vld [vmem:[#allocation4 + $0xfb4] ss:$8 sps:$4 sm:$0xff]  }
 0x481   :  { %10713 = vmatmul.mubr.bf16.vlgmr.msra.gmra.mxu0 %v15643_v6  ;;  %10769 = vmatprep.subr.bf16.mxu1 %v17738_v8  ;;  %v17766_v6 = vld [vmem:[#allocation4 + $0xff0] ss:$8 sps:$4 sm:$0xff]  }
 0x482   :  { %10722 = vmatprep.mubr.bf16.mxu0 %v15662_v60  ;;  %10847 = vmatpush1.bf16.msra.mxu0 %v17733_v47  ;;  %v17748_v60 = vld [vmem:[#allocation4 + $0xf20] ss:$8 sps:$4 sm:$0xff]   ;;  %v21796_v23 = vsel %vm20361_vm4, %v15631_v57, %v7794_v42 }
 0x483   :  { %10848 = vmatprep.subr.bf16.mxu0 %v17741_v44  ;;  %v7843_v47 = vld [vmem:[#allocation2 + $0x10] sm:$0x88]  ;;  %v17769_v44 = vld [vmem:[#allocation4 + $0x1010] ss:$8 sps:$4 sm:$0xff]  }
 0x484   :  { %10770 = vmatpush1.bf16.msra.mxu1 %v17736_v56  ;;  %v17774_v56 = vld [vmem:[#allocation4 + $0xfe4] ss:$8 sps:$4 sm:$0xff]   ;;  %v17799_v57 = vld [vmem:[#allocation4 + $0x10c0] ss:$8 sps:$4 sm:$0xff]  }
 0x485   :  { %10771 = vmatprep.subr.bf16.mxu1 %v17744_v2 }
 0x486   :  { %10849 = vmatpush1.bf16.msra.mxu0 %v17739_v30  ;;  %v7861_v30 = vrot.slane %v7859_v59, 7  ;;  %v17796_v59 = vld [vmem:[#allocation4 + $0xfa0] ss:$8 sps:$4 sm:$0xff]  }
 0x487   :  { %10650 = vmatmul.mubr.bf16.gmra.mxu1 %v15677_v19  ;;  %10850 = vmatprep.subr.bf16.mxu0 %v17747_v61  ;;  %v17777_v61 = vld [vmem:[#allocation4 + $0x1004] ss:$8 sps:$4 sm:$0xff]   ;;  %v7854_v19 = vshrl.u32 %v7843_v47, 16 }
 0x488   :  { %10659 = vmatprep.mubr.bf16.mxu1 %v15696_v46  ;;  %10772 = vmatpush1.bf16.msra.mxu1 %v17742_v26  ;;  %v21769_v46 = vld [vmem:[#allocation2 + $0x20] sm:$0xff]  ;;  %v7862_v26 = vshll.u32 %v21767_v40, 16  ;;  %v21820_v47 = vld [vmem:[#allocation2 + $0x30] sm:$0xff] }
 0x489   :  { %10723 = vmatmul.mubr.bf16.gmra.mxu0 %v15661_v45  ;;  %10773 = vmatprep.subr.bf16.mxu1 %v17750_v37  ;;  %v15714_v45 = vcombine.high %v21578_v20, %v8068_v5  ;;  %v7797_v27 = vrot.slane %v21769_v46, 7  ;;  %v7868_v25 = vshrl.u32 %v21769_v46, 16  ;;  %v7871_v2 = vshll.u32 %v21769_v46, 16  ;;  %v17772_v37 = vld [vmem:[#allocation4 + $0xfe0] ss:$8 sps:$4 sm:$0xff]  }
 0x48a   :  { %10732 = vmatprep.mubr.bf16.mxu0 %v15680_v51  ;;  %10851 = vmatpush1.bf16.msra.mxu0 %v17745_v7  ;;  %v17757_v51 = vld [vmem:[#allocation4 + $0x1030] ss:$8 sps:$4 sm:$0xff]  }
 0x48b   :  { %10852 = vmatprep.subr.bf16.mxu0 %v17753_v36  ;;  %v21789_v54 = vsel %vm20361_vm4, %v7796_v39, %v7797_v27  ;;  %v21791_v38 = vrot.slane %v7868_v25, 7  ;;  %v17775_v36 = vld [vmem:[#allocation4 + $0x1000] ss:$8 sps:$4 sm:$0xff]   ;;  %v17795_v25 = vld [vmem:[#allocation4 + $0x10d4] ss:$8 sps:$4 sm:$0xff]  }
 0x48c   :  { %10774 = vmatpush1.bf16.msra.mxu1 %v17748_v60  ;;  %v15646_v8 = vcombine.high %v21796_v23, %v21789_v54  ;;  %v17780_v60 = vld [vmem:[#allocation4 + $0xfd4] ss:$8 sps:$4 sm:$0xff]   ;;  %v17793_v39 = vld [vmem:[#allocation4 + $0x10d0] ss:$8 sps:$4 sm:$0xff]  }
 0x48d   :  { %10775 = vmatprep.subr.bf16.mxu1 %v17756_v21  ;;  %v7873_v7 = vor.u32 %v7871_v2, %v21791_v38  ;;  %v7866_v21 = vrot.slane %v7861_v30, 4  ;;  %v7803_v2 = vrot.slane %v21820_v47, 7 }
 0x48e   :  { %10853 = vmatpush1.bf16.msra.mxu0 %v17751_v53  ;;  %v7864_v53 = vor.u32 %v7862_v26, %v7861_v30  ;;  %v17813_v30 = vld [vmem:[#allocation4 + $0x10a4] ss:$8 sps:$4 sm:$0xff]   ;;  %v17816_v26 = vld [vmem:[#allocation4 + $0x1174] ss:$8 sps:$4 sm:$0xff]  }
 0x48f   :  { %10660 = vmatmul.mubr.bf16.gmra.mxu1 %v15695_v34  ;;  %10854 = vmatprep.subr.bf16.mxu0 %v17759_v18  ;;  %v17768_v34 = vld [vmem:[#allocation4 + $0xff4] ss:$8 sps:$4 sm:$0xff]   ;;  %v15632_v18 = vrot.slane %v7854_v19, 11  ;;  %v21809_v58 = vsel %vm20197_vm0, %v7866_v21, %v7873_v7  ;;  %v17811_v19 = vld [vmem:[#allocation4 + $0x10a0] ss:$8 sps:$4 sm:$0xff]   ;;  %v7799_v21 = vrot.slane %v7797_v27, 4 }
 0x490   :  { %10669 = vmatprep.mubr.bf16.mxu1 %v15714_v45  ;;  %10776 = vmatpush1.bf16.msra.mxu1 %v17754_v43  ;;  %v17781_v43 = vld [vmem:[#allocation4 + $0x10f0] ss:$8 sps:$4 sm:$0xff]   ;;  %v17786_v45 = vld [vmem:[#allocation4 + $0xfc4] ss:$8 sps:$4 sm:$0xff]  }
 0x491   :  { %10733 = vmatmul.mubr.bf16.gmra.mxu0 %v15679_v55  ;;  %10777 = vmatprep.subr.bf16.mxu1 %v17762_v49  ;;  %v8069_v55 = vld [vmem:[#allocation3 + $0x228] sm:$0x11]  ;;  %v21814_v42 = vsel %vm20197_vm0, %v15632_v18, %v7864_v53  ;;  %v17814_v18 = vld [vmem:[#allocation4 + $0x1170] ss:$8 sps:$4 sm:$0xff]  }
 0x492   :  { %10742 = vmatprep.mubr.bf16.mxu0 %v15698_v11  ;;  %10855 = vmatpush1.bf16.msra.mxu0 %v17757_v51  ;;  %v15713_v11 = vcombine.low %v21578_v20, %v8068_v5  ;;  %v15716_v20 = vcombine.high %v21647_v63, %v8069_v55  ;;  %v17783_v5 = vld [vmem:[#allocation4 + $0x10f4] ss:$8 sps:$4 sm:$0xff]   ;;  %v15648_v51 = vcombine.high %v21814_v42, %v21809_v58  ;;  %v17789_v49 = vld [vmem:[#allocation4 + $0x10e4] ss:$8 sps:$4 sm:$0xff]  }
 0x493   :  { %10856 = vmatprep.subr.bf16.mxu0 %v17765_v50  ;;  %v17784_v50 = vld [vmem:[#allocation4 + $0xfc0] ss:$8 sps:$4 sm:$0xff]  }
 0x494   :  { %10778 = vmatpush1.bf16.msra.mxu1 %v17760_v62  ;;  %v17790_v62 = vld [vmem:[#allocation4 + $0xfb0] ss:$8 sps:$4 sm:$0xff]  }
 0x495   :  { %10779 = vmatprep.subr.bf16.mxu1 %v17768_v34  ;;  %v17801_v34 = vld [vmem:[#allocation4 + $0x10c4] ss:$8 sps:$4 sm:$0xff]  }
 0x496   :  { %10857 = vmatpush1.bf16.msra.mxu0 %v17763_v52  ;;  %v17798_v52 = vld [vmem:[#allocation4 + $0xfa4] ss:$8 sps:$4 sm:$0xff]  }
 0x497   :  { %10670 = vmatmul.mubr.bf16.gmra.mxu1 %v15713_v11  ;;  %10858 = vmatprep.subr.bf16.mxu0 %v17771_v35  ;;  %v17804_v35 = vld [vmem:[#allocation4 + $0xf94] ss:$8 sps:$4 sm:$0xff]   ;;  %v21818_v11 = vld [vmem:[#allocation2 + $0x28] sm:$0xff] }
 0x498   :  { %10795 = vmatprep.mubr.bf16.mxu1 %v15646_v8  ;;  %10780 = vmatpush2.bf16.msra.mxu1 %v17766_v6  ;;  %v17802_v6 = vld [vmem:[#allocation4 + $0xf90] ss:$8 sps:$4 sm:$0xff]  }
 0x499   :  { %10743 = vmatmul.mubr.bf16.gmra.mxu0 %v15697_v22  ;;  %10781 = vmatprep.subr.bf16.mxu1 %v17774_v56  ;;  %v15715_v22 = vcombine.low %v21647_v63, %v8069_v55  ;;  %v17787_v63 = vld [vmem:[#allocation4 + $0x10e0] ss:$8 sps:$4 sm:$0xff]   ;;  %v17807_v55 = vld [vmem:[#allocation4 + $0x10b4] ss:$8 sps:$4 sm:$0xff]   ;;  %v17805_v8 = vld [vmem:[#allocation4 + $0x10b0] ss:$8 sps:$4 sm:$0xff]  }
 0x49a   :  { %10752 = vmatprep.mubr.bf16.mxu0 %v15716_v20  ;;  %10859 = vmatpush1.bf16.msra.mxu0 %v17769_v44  ;;  %v17810_v44 = vld [vmem:[#allocation4 + $0xf84] ss:$8 sps:$4 sm:$0xff]   ;;  %v7800_v56 = vrot.slane %v21818_v11, 7  ;;  %v17808_v20 = vld [vmem:[#allocation4 + $0xf80] ss:$8 sps:$4 sm:$0xff]  }
 0x49b   :  { %10860 = vmatprep.subr.bf16.mxu0 %v17777_v61  ;;  %v7886_v61 = vshrl.u32 %v21820_v47, 16 }
 0x49c   :  { %10782 = vmatpush2.bf16.msra.mxu1 %v17772_v37  ;;  %v7802_v7 = vrot.slane %v7800_v56, 4  ;;  %v17819_v37 = vld [vmem:[#allocation4 + $0x1094] ss:$8 sps:$4 sm:$0xff]  }
 0x49d   :  { %10783 = vmatprep.subr.bf16.mxu1 %v17780_v60  ;;  %v7877_v60 = vshrl.u32 %v21818_v11, 16 }
 0x49e   :  { %10861 = vmatpush1.bf16.msra.mxu0 %v17775_v36  ;;  %v21825_v36 = vld [vmem:[#allocation2 + $0x38] sm:$0xff] }
 0x49f   :  { %10862 = vmatprep.subr.bf16.mxu0 %v17783_v5  ;;  %v7804_v5 = vsel %vm20361_vm4, %v7802_v7, %v7803_v2  ;;  %v7806_v27 = vrot.slane %v21825_v36, 7 }
 0x4a0   :  { %10784 = vmatpush2.bf16.msra.mxu1 %v17778_v3  ;;  %v8363_v3 = vld [vmem:[#allocation6 + $0x2] ss:$4 sm:$0x3] }
 0x4a1   :  { %10753 = vmatmul.mubr.bf16.gmra.mxu0 %v15715_v22  ;;  %10785 = vmatprep.subr.bf16.mxu1 %v17786_v45  ;;  %v21832_v22 = vrot.slane %v7886_v61, 7  ;;  %v7801_v45 = vsel %vm20361_vm4, %v7799_v21, %v7800_v56  ;;  %v7895_v56 = vshrl.u32 %v21825_v36, 16 }
 0x4a2   :  { %10878 = vmatprep.mubr.bf16.mxu0 %v15648_v51  ;;  %10863 = vmatpush2.bf16.msra.mxu0 %v17781_v43  ;;  %v15645_v43 = vcombine.low %v21796_v23, %v21789_v54  ;;  %v17817_v51 = vld [vmem:[#allocation4 + $0x1090] ss:$8 sps:$4 sm:$0xff]   ;;  %v17820_v54 = vld [vmem:[#allocation4 + $0x1160] ss:$8 sps:$4 sm:$0xff]   ;;  %v7880_v23 = vshll.u32 %v21818_v11, 16 }
 0x4a3   :  { %10864 = vmatprep.subr.bf16.mxu0 %v17789_v49 }
 0x4a4   :  { %10786 = vmatpush2.bf16.msra.mxu1 %v17784_v50  ;;  %v17822_v50 = vld [vmem:[#allocation4 + $0x1164] ss:$8 sps:$4 sm:$0xff]  }
 0x4a5   :  { %10787 = vmatprep.subr.bf16.mxu1 %v17792_v31  ;;  %v17825_v31 = vld [vmem:[#allocation4 + $0x1084] ss:$8 sps:$4 sm:$0xff]  }
 0x4a6   :  { %10865 = vmatpush2.bf16.msra.mxu0 %v17787_v63  ;;  %v15664_v63 = vcombine.high %v7801_v45, %v7804_v5 }
 0x4a7   :  { %10866 = vmatprep.subr.bf16.mxu0 %v17795_v25  ;;  %v7879_v25 = vrot.slane %v7877_v60, 7  ;;  %v7875_v60 = vrot.slane %v21791_v38, 4  ;;  %v7897_v38 = vrot.slane %v7895_v56, 7 }
 0x4a8   :  { %10788 = vmatpush2.bf16.msra.mxu1 %v17790_v62  ;;  %v7889_v62 = vshll.u32 %v21820_v47, 16 }
 0x4a9   :  { %10789 = vmatprep.subr.bf16.mxu1 %v17798_v52 }
 0x4aa   :  { %10867 = vmatpush2.bf16.msra.mxu0 %v17793_v39  ;;  %v7891_v52 = vor.u32 %v7889_v62, %v21832_v22  ;;  %v7898_v62 = vshll.u32 %v21825_v36, 16 }
 0x4ab   :  { %10868 = vmatprep.subr.bf16.mxu0 %v17801_v34  ;;  %v23737_v34 = vld [vmem:[#allocation44_spill] sm:$0xff] }
 0x4ac   :  { %10790 = vmatpush2.bf16.msra.mxu1 %v17796_v59  ;;  %v21843_v59 = vrot.slane %v8363_v3, %v23737_v34 }
 0x4ad   :  { %10791 = vmatprep.subr.bf16.mxu1 %v17804_v35 }
 0x4ae   :  { %10869 = vmatpush2.bf16.msra.mxu0 %v17799_v57  ;;  %v17823_v57 = vld [vmem:[#allocation4 + $0x1080] ss:$8 sps:$4 sm:$0xff]  }
 0x4af   :  { %10870 = vmatprep.subr.bf16.mxu0 %v17807_v55  ;;  %v17828_v55 = vld [vmem:[#allocation4 + $0x1154] ss:$8 sps:$4 sm:$0xff]  }
 0x4b0   :  { %10792 = vmatpush2.bf16.msra.mxu1 %v17802_v6  ;;  %v7808_v6 = vrot.slane %v7806_v27, 4 }
 0x4b1   :  { %10793 = vmatprep.subr.bf16.mxu1 %v17810_v44  ;;  %v7884_v44 = vrot.slane %v7879_v25, 4 }
 0x4b2   :  { %10871 = vmatpush2.bf16.msra.mxu0 %v17805_v8  ;;  %v7882_v8 = vor.u32 %v7880_v23, %v7879_v25 }
 0x4b3   :  { %10872 = vmatprep.subr.bf16.mxu0 %v17813_v30  ;;  %v23738_v30 = vld [vmem:[#allocation39_spill] sm:$0xff]  ;;  %v7892_v21 = vsel %vm20197_vm0, %v7884_v44, %v7891_v52 }
 0x4b4   :  { %v10299_v53 = vpop.f32.mrf.mxu1  ;;  %10794 = vmatpush2.bf16.msra.mxu1 %v17808_v20  ;;  %v21849_v20 = vrot.slane %v8363_v3, %v23738_v30  ;;  %v15663_v3 = vcombine.low %v7801_v45, %v7804_v5  ;;  %v17939_v30 = vld [vmem:[#allocation4 + $0x13e0] ss:$8 sps:$4 sm:$0xff]  }
 0x4b5   :  { %10929 = vmatprep.subr.bf16.mxu1 %v17816_v26  ;;  %v23739_v26 = vrot.slane %v21649_v4, 7 }
 0x4b6   :  { %10873 = vmatpush2.bf16.msra.mxu0 %v17811_v19  ;;  %v10301_v49 = vpop.f32.mrf.mxu1  ;;  %v7805_v19 = vrot.slane %v7803_v2, 4 }
 0x4b7   :  { %10874 = vmatprep.subr.bf16.mxu0 %v17819_v37  ;;  %10796 = vmatmul.mubr.bf16.vlgmr.msra.gmra.mxu1 %v15645_v43  ;;  %v7810_v7 = vsel %vm20361_vm4, %v7808_v6, %v23739_v26  ;;  %v15647_v37 = vcombine.low %v21814_v42, %v21809_v58  ;;  %v17826_v43 = vld [vmem:[#allocation4 + $0x1150] ss:$8 sps:$4 sm:$0xff]   ;;  %v7883_v58 = vsel %vm20197_vm0, %v7875_v60, %v7882_v8  ;;  %v17831_v42 = vld [vmem:[#allocation4 + $0x1144] ss:$8 sps:$4 sm:$0xff]   ;;  %v7902_v8 = vrot.slane %v7897_v38, 4 }
 0x4b8   :  { %v10303_v39 = vpop.f32.mrf.mxu1  ;;  %10805 = vmatprep.mubr.bf16.mxu1 %v15664_v63  ;;  %10930 = vmatpush1.bf16.msra.mxu1 %v17814_v18  ;;  %v10300_v18 = vadd.f32 %v10299_v53, %v21843_v59  ;;  %v7807_v2 = vsel %vm20361_vm4, %v7805_v19, %v7806_v27  ;;  %v10302_v25 = vadd.f32 %v10301_v49, %v21849_v20  ;;  %v17832_v60 = vld [vmem:[#allocation4 + $0x1130] ss:$8 sps:$4 sm:$0xff]  }
 0x4b9   :  { %10931 = vmatprep.subr.bf16.mxu1 %v17822_v50  ;;  %v15682_v50 = vcombine.high %v7807_v2, %v7810_v7  ;;  %v15666_v5 = vcombine.high %v7883_v58, %v7892_v21  ;;  %v10304_v23 = vadd.f32 %v10303_v39, %v21843_v59  ;;  %v7900_v6 = vor.u32 %v7898_v62, %v7897_v38  ;;  %v8070_v62 = vld [vmem:[#allocation3 + $0x1a8] sm:$0x11] }
 0x4ba   :  { %10875 = vmatpush2.bf16.msra.mxu0 %v17817_v51  ;;  %v21845_v35 = vpop.f32.mrf.mxu1 }
 0x4bb   :  { %10876 = vmatprep.subr.bf16.mxu0 %v17825_v31  ;;  %v7907_v31 = vshll.u32 %v21649_v4, 16  ;;  %v17829_v4 = vld [vmem:[#allocation4 + $0x1140] ss:$8 sps:$4 sm:$0xff]  }
 0x4bc   :  { %10932 = vmatpush1.bf16.msra.mxu1 %v17820_v54 }
 0x4bd   :  { %v10309_v61 = vpop.f32.mrf.mxu1  ;;  %10933 = vmatprep.subr.bf16.mxu1 %v17828_v55  ;;  %v7909_v54 = vor.u32 %v7907_v31, %v21699_v16  ;;  %v17834_v55 = vld [vmem:[#allocation4 + $0x1134] ss:$8 sps:$4 sm:$0xff]   ;;  %v7893_v16 = vrot.slane %v21832_v22, 4 }
 0x4be   :  { %10877 = vmatpush2.bf16.msra.mxu0 %v17823_v57  ;;  %v10310_v26 = vadd.f32 %v10309_v61, %v21843_v59  ;;  %v23740_v61 = vcombine.high %v21676_v1, %v21692_v32 }
 0x4bf   :  { %v10311_v51 = vpop.f32.mrf.mxu1  ;;  %10806 = vmatmul.mubr.bf16.gmra.mxu1 %v15663_v3  ;;  %v7910_v39 = vsel %vm20197_vm0, %v7902_v8, %v7909_v54  ;;  %v15665_v3 = vcombine.low %v7883_v58, %v7892_v21  ;;  %v17835_v58 = vld [vmem:[#allocation4 + $0x1120] ss:$8 sps:$4 sm:$0xff]   ;;  %v17843_v8 = vld [vmem:[#allocation4 + $0x1104] ss:$8 sps:$4 sm:$0xff]  }
 0x4c0   :  { %v10382_v63 = vpop.f32.mrf.mxu0  ;;  %10815 = vmatprep.mubr.bf16.mxu1 %v15682_v50  ;;  %10934 = vmatpush1.bf16.msra.mxu1 %v17826_v43  ;;  %v7901_v50 = vsel %vm20197_vm0, %v7893_v16, %v7900_v6 }
 0x4c1   :  { %v21867_v53 = vadd.f32 %v10382_v63, %v10300_v18  ;;  %v10313_v45 = vpop.f32.mrf.mxu1  ;;  %10879 = vmatmul.mubr.bf16.vlgmr.msra.gmra.mxu0 %v15647_v37  ;;  %10935 = vmatprep.subr.bf16.mxu1 %v17831_v42  ;;  %v15681_v37 = vcombine.low %v7807_v2, %v7810_v7  ;;  %v17837_v63 = vld [vmem:[#allocation4 + $0x1124] ss:$8 sps:$4 sm:$0xff]   ;;  %v10312_v42 = vadd.f32 %v10311_v51, %v21849_v20 }
 0x4c2   :  { %v10384_v27 = vpop.f32.mrf.mxu0  ;;  %10888 = vmatprep.mubr.bf16.mxu0 %v15666_v5  ;;  %v15684_v38 = vcombine.high %v7901_v50, %v7910_v39  ;;  %v10314_v21 = vadd.f32 %v10313_v45, %v21843_v59  ;;  %v17840_v5 = vld [vmem:[#allocation4 + $0x1114] ss:$8 sps:$4 sm:$0xff]  }
 0x4c3   :  { %v21872_v52 = vadd.f32 %v10384_v27, %v10302_v25  ;;  %v21874_v49 = vpop.f32.mrf.mxu1 }
 0x4c4   :  { %v10386_v57 = vpop.f32.mrf.mxu0  ;;  %10936 = vmatpush1.bf16.msra.mxu1 %v17829_v4  ;;  %v17838_v4 = vld [vmem:[#allocation4 + $0x1110] ss:$8 sps:$4 sm:$0xff]  }
 0x4c5   :  { %v21876_v44 = vadd.f32 %v10386_v57, %v10304_v23  ;;  %v10319_v56 = vpop.f32.mrf.mxu1  ;;  %10937 = vmatprep.subr.bf16.mxu1 %v17834_v55  ;;  %v15718_v57 = vcombine.high %v21705_v12, %v8070_v62  ;;  %v15683_v55 = vcombine.low %v7901_v50, %v7910_v39 }
 0x4c6   :  { %v21878_v19 = vpop.f32.mrf.mxu0  ;;  %v10320_v23 = vadd.f32 %v10319_v56, %v21843_v59 }
 0x4c7   :  { %v10321_v18 = vpop.f32.mrf.mxu1  ;;  %10816 = vmatmul.mubr.bf16.gmra.mxu1 %v15681_v37 }
 0x4c8   :  { %v10392_v43 = vpop.f32.mrf.mxu0  ;;  %10825 = vmatprep.mubr.bf16.mxu1 %v23740_v61  ;;  %10938 = vmatpush1.bf16.msra.mxu1 %v17832_v60  ;;  %v10322_v16 = vadd.f32 %v10321_v18, %v21849_v20 }
 0x4c9   :  { %v21887_v22 = vadd.f32 %v10392_v43, %v10310_v26  ;;  %v10323_v31 = vpop.f32.mrf.mxu1  ;;  %10889 = vmatmul.mubr.bf16.gmra.mxu0 %v15665_v3  ;;  %10939 = vmatprep.subr.bf16.mxu1 %v17837_v63  ;;  %v23741_v26 = vcombine.low %v21676_v1, %v21692_v32  ;;  %v17841_v3 = vld [vmem:[#allocation4 + $0x1100] ss:$8 sps:$4 sm:$0xff]   ;;  %v17846_v1 = vld [vmem:[#allocation4 + $0x11f4] ss:$8 sps:$4 sm:$0xff]  }
 0x4ca   :  { %v10394_v7 = vpop.f32.mrf.mxu0  ;;  %10898 = vmatprep.mubr.bf16.mxu0 %v15684_v38  ;;  %v10324_v60 = vadd.f32 %v10323_v31, %v21843_v59  ;;  %v8071_v63 = vld [vmem:[#allocation3 + $0x70] sm:$0x11]  ;;  %v15717_v38 = vcombine.low %v21705_v12, %v8070_v62  ;;  %v17844_v31 = vld [vmem:[#allocation4 + $0x11f0] ss:$8 sps:$4 sm:$0xff]  }
 0x4cb   :  { %v21893_v2 = vadd.f32 %v10394_v7, %v10312_v42  ;;  %v21895_v25 = vpop.f32.mrf.mxu1 }
 0x4cc   :  { %v10396_v51 = vpop.f32.mrf.mxu0  ;;  %10940 = vmatpush1.bf16.msra.mxu1 %v17835_v58 }
 0x4cd   :  { %v21897_v27 = vadd.f32 %v10396_v51, %v10314_v21  ;;  %10941 = vmatprep.subr.bf16.mxu1 %v17840_v5  ;;  %v10329_v45 = vpop.f32.mrf.mxu1  ;;  %v17851_v21 = vld [vmem:[#allocation4 + $0x11e4] ss:$8 sps:$4 sm:$0xff]   ;;  %v15720_v5 = vcombine.high %v21732_v41, %v8071_v63 }
 0x4ce   :  { %v21899_v54 = vpop.f32.mrf.mxu0  ;;  %v10330_v42 = vadd.f32 %v10329_v45, %v21843_v59 }
 0x4cf   :  { %10826 = vmatmul.mubr.bf16.gmra.mxu1 %v23741_v26  ;;  %v10331_v18 = vpop.f32.mrf.mxu1 }
 0x4d0   :  { %v10402_v6 = vpop.f32.mrf.mxu0  ;;  %10835 = vmatprep.mubr.bf16.mxu1 %v15718_v57  ;;  %10942 = vmatpush1.bf16.msra.mxu1 %v17838_v4  ;;  %v10332_v58 = vadd.f32 %v10331_v18, %v21849_v20  ;;  %v17849_v4 = vld [vmem:[#allocation4 + $0x11e0] ss:$8 sps:$4 sm:$0xff]   ;;  %v17854_v57 = vld [vmem:[#allocation4 + $0x11d4] ss:$8 sps:$4 sm:$0xff]  }
 0x4d1   :  { %v21907_v37 = vadd.f32 %v10402_v6, %v10320_v23  ;;  %10899 = vmatmul.mubr.bf16.gmra.mxu0 %v15683_v55  ;;  %10943 = vmatprep.subr.bf16.mxu1 %v17843_v8  ;;  %v10333_v61 = vpop.f32.mrf.mxu1  ;;  %v17852_v6 = vld [vmem:[#allocation4 + $0x11d0] ss:$8 sps:$4 sm:$0xff]   ;;  %v15719_v8 = vcombine.low %v21732_v41, %v8071_v63  ;;  %v17863_v41 = vld [vmem:[#allocation4 + $0x11a4] ss:$8 sps:$4 sm:$0xff]  }
 0x4d2   :  { %v10404_v56 = vpop.f32.mrf.mxu0  ;;  %10908 = vmatprep.mubr.bf16.mxu0 %v15702_v29  ;;  %v15650_v29 = vcombine.high %v21767_v40, %v21769_v46  ;;  %v10334_v62 = vadd.f32 %v10333_v61, %v21843_v59 }
 0x4d3   :  { %v21913_v39 = vadd.f32 %v10404_v56, %v10322_v16  ;;  %v17860_v16 = vld [vmem:[#allocation4 + $0x11b4] ss:$8 sps:$4 sm:$0xff]  }
 0x4d4   :  { %v10406_v43 = vpop.f32.mrf.mxu0  ;;  %10944 = vmatpush1.bf16.msra.mxu1 %v17841_v3  ;;  %v17858_v3 = vld [vmem:[#allocation4 + $0x11b0] ss:$8 sps:$4 sm:$0xff]  }
 0x4d5   :  { %v21915_v32 = vadd.f32 %v10406_v43, %v10324_v60  ;;  %10945 = vmatprep.subr.bf16.mxu1 %v17846_v1 }
 0x4d6   :  { %v21917_v50 = vpop.f32.mrf.mxu0 }
 0x4d7   :  { %10836 = vmatmul.mubr.bf16.gmra.mxu1 %v15717_v38 }
 0x4d8   :  { %v10412_v7 = vpop.f32.mrf.mxu0  ;;  %10961 = vmatprep.mubr.bf16.mxu1 %v15650_v29  ;;  %10946 = vmatpush2.bf16.msra.mxu1 %v17844_v31  ;;  %v17861_v29 = vld [vmem:[#allocation4 + $0x11a0] ss:$8 sps:$4 sm:$0xff]  }
 0x4d9   :  { %v21924_v51 = vadd.f32 %v10412_v7, %v10330_v42  ;;  %10909 = vmatmul.mubr.bf16.gmra.mxu0 %v15701_v15  ;;  %10947 = vmatprep.subr.bf16.mxu1 %v17851_v21  ;;  %v21936_v15 = vpop.f32.mrf.mxu1  ;;  %v17866_v21 = vld [vmem:[#allocation4 + $0x1194] ss:$8 sps:$4 sm:$0xff]  }
 0x4da   :  { %v10414_v12 = vpop.f32.mrf.mxu0  ;;  %10918 = vmatprep.mubr.bf16.mxu0 %v15720_v5  ;;  %v17864_v5 = vld [vmem:[#allocation4 + $0x1190] ss:$8 sps:$4 sm:$0xff]  }
 0x4db   :  { %v21931_v23 = vadd.f32 %v10414_v12, %v10332_v58  ;;  %v17869_v12 = vld [vmem:[#allocation4 + $0x1184] ss:$8 sps:$4 sm:$0xff]  }
 0x4dc   :  { %v10416_v45 = vpop.f32.mrf.mxu0  ;;  %10948 = vmatpush2.bf16.msra.mxu1 %v17849_v4 }
 0x4dd   :  { %v21933_v55 = vadd.f32 %v10416_v45, %v10334_v62  ;;  %10949 = vmatprep.subr.bf16.mxu1 %v17854_v57  ;;  %v17867_v62 = vld [vmem:[#allocation4 + $0x1180] ss:$8 sps:$4 sm:$0xff]   ;;  %v15649_v45 = vcombine.low %v21767_v40, %v21769_v46  ;;  %v15667_v46 = vcombine.low %v21818_v11, %v21820_v47 }
 0x4de   :  { %v21938_v56 = vpop.f32.mrf.mxu0 }
 0x4e0   :  { %10950 = vmatpush2.bf16.msra.mxu1 %v17852_v6  ;;  %v15668_v6 = vcombine.high %v21818_v11, %v21820_v47 }
 0x4e1   :  { %10919 = vmatmul.mubr.bf16.gmra.mxu0 %v15719_v8  ;;  %10951 = vmatprep.subr.bf16.mxu1 %v17857_v28 }
 0x4e4   :  { %10952 = vmatpush2.bf16.msra.mxu1 %v17855_v48 }
 0x4e5   :  { %10953 = vmatprep.subr.bf16.mxu1 %v17860_v16 }
 0x4e6   :  { %v10339_v26 = vpop.f32.mrf.mxu1 }
 0x4e7   :  { %v10340_v60 = vadd.f32 %v10339_v26, %v21843_v59 }
 0x4e8   :  { %v10341_v18 = vpop.f32.mrf.mxu1  ;;  %10954 = vmatpush2.bf16.msra.mxu1 %v17858_v3 }
 0x4e9   :  { %v10422_v43 = vpop.f32.mrf.mxu0  ;;  %v10342_v1 = vadd.f32 %v10341_v18, %v21849_v20  ;;  %10955 = vmatprep.subr.bf16.mxu1 %v17863_v41 }
 0x4ea   :  { %v21942_v63 = vadd.f32 %v10422_v43, %v10340_v60  ;;  %v10343_v42 = vpop.f32.mrf.mxu1  ;;  %v18342_v43 = vld [vmem:[#allocation2 + $0x40] sm:$0xff] }
 0x4eb   :  { %v10424_v38 = vpop.f32.mrf.mxu0  ;;  %v10344_v31 = vadd.f32 %v10343_v42, %v21843_v59 }
 0x4ec   :  { %v21945_v61 = vadd.f32 %v10424_v38, %v10342_v1  ;;  %10956 = vmatpush2.bf16.msra.mxu1 %v17861_v29  ;;  %v21949_v4 = vpop.f32.mrf.mxu1 }
 0x4ed   :  { %v10426_v7 = vpop.f32.mrf.mxu0  ;;  %10957 = vmatprep.subr.bf16.mxu1 %v17866_v21 }
 0x4ee   :  { %v21947_v58 = vadd.f32 %v10426_v7, %v10344_v31 }
 0x4ef   :  { %v21960_v60 = vpop.f32.mrf.mxu0 }
 0x4f0   :  { %10958 = vmatpush2.bf16.msra.mxu1 %v17864_v5  ;;  %v15685_v5 = vcombine.low %v21825_v36, %v18342_v43 }
 0x4f1   :  { %10959 = vmatprep.subr.bf16.mxu1 %v17869_v12 }
 0x4f4   :  { %10960 = vmatpush2.bf16.msra.mxu1 %v17867_v62  ;;  %v18343_v62 = vld [vmem:[#allocation3 + $0x2e8] sm:$0xff] }
 0x4f6   :  { %v10465_v59 = vpop.f32.mrf.mxu1 }
 0x4f7   :  { %v10466_v57 = vadd.f32 %v10465_v59, %v21867_v53  ;;  %10962 = vmatmul.mubr.bf16.vlgmr.msra.gmra.mxu1 %v15649_v45  ;;  %v18344_v59 = vld [vmem:[#allocation3 + $0x330] sm:$0xff] }
 0x4f8   :  { %v10467_v8 = vpop.f32.mrf.mxu1  ;;  %10971 = vmatprep.mubr.bf16.mxu1 %v15668_v6  ;;  %v15704_v45 = vcombine.high %v18343_v62, %v18344_v59 }
 0x4f9   :  { %v10468_v28 = vadd.f32 %v10467_v8, %v21872_v52  ;;  %v15686_v52 = vcombine.high %v21825_v36, %v18342_v43 }
 0x4fa   :  { %v10469_v48 = vpop.f32.mrf.mxu1 }
 0x4fb   :  { %v10470_v16 = vadd.f32 %v10469_v48, %v21876_v44 }
 0x4fc   :  { %v21958_v26 = vpop.f32.mrf.mxu1 }
 0x4fe   :  { %v10475_v3 = vpop.f32.mrf.mxu1 }
 0x4ff   :  { %v10476_v40 = vadd.f32 %v10475_v3, %v21887_v22  ;;  %10972 = vmatmul.mubr.bf16.gmra.mxu1 %v15667_v46 }
 0x500   :  { %v10477_v41 = vpop.f32.mrf.mxu1  ;;  %10981 = vmatprep.mubr.bf16.mxu1 %v15686_v52 }
 0x501   :  { %v10548_v53 = vpop.f32.mrf.mxu0  ;;  %v10478_v44 = vadd.f32 %v10477_v41, %v21893_v2  ;;  %v18345_v41 = vld [vmem:[#allocation3 + $0x1a0] sm:$0xff] }
 0x502   :  { %v21965_v18 = vadd.f32 %v10548_v53, %v10466_v57  ;;  %v10479_v38 = vpop.f32.mrf.mxu1  ;;  %v15703_v53 = vcombine.low %v18343_v62, %v18344_v59 }
 0x503   :  { %v10550_v1 = vpop.f32.mrf.mxu0  ;;  %v10480_v22 = vadd.f32 %v10479_v38, %v21897_v27 }
 0x504   :  { %v21969_v42 = vadd.f32 %v10550_v1, %v10468_v28  ;;  %v21974_v11 = vpop.f32.mrf.mxu1 }
 0x505   :  { %v10552_v31 = vpop.f32.mrf.mxu0 }
 0x506   :  { %v21972_v29 = vadd.f32 %v10552_v31, %v10470_v16  ;;  %v10485_v7 = vpop.f32.mrf.mxu1 }
 0x507   :  { %v21976_v47 = vpop.f32.mrf.mxu0  ;;  %v10486_v21 = vadd.f32 %v10485_v7, %v21907_v37  ;;  %10982 = vmatmul.mubr.bf16.gmra.mxu1 %v15685_v5 }
 0x508   :  { %v10487_v57 = vpop.f32.mrf.mxu1  ;;  %10991 = vmatprep.mubr.bf16.mxu1 %v15704_v45 }
 0x509   :  { %v10558_v2 = vpop.f32.mrf.mxu0  ;;  %v10488_v27 = vadd.f32 %v10487_v57, %v21913_v39 }
 0x50a   :  { %v21980_v12 = vadd.f32 %v10558_v2, %v10476_v40  ;;  %v10489_v28 = vpop.f32.mrf.mxu1  ;;  %v8072_v40 = vld [vmem:[#allocation3 + $0x2b8] sm:$0x11] }
 0x50b   :  { %v10560_v6 = vpop.f32.mrf.mxu0  ;;  %v10490_v48 = vadd.f32 %v10489_v28, %v21915_v32  ;;  %v15721_v59 = vcombine.low %v18345_v41, %v8072_v40  ;;  %v17878_v28 = vld [vmem:[#allocation4 + $0x1274] ss:$8 sps:$4 sm:$0xff]  }
 0x50c   :  { %v21983_v8 = vadd.f32 %v10560_v6, %v10478_v44  ;;  %v21988_v36 = vpop.f32.mrf.mxu1  ;;  %v15722_v44 = vcombine.high %v18345_v41, %v8072_v40  ;;  %13781 = vmatprep.subr.bf16.mxu0 %v17878_v28  ;;  %v17896_v28 = vld [vmem:[#allocation4 + $0x1234] ss:$8 sps:$4 sm:$0xff]  }
 0x50d   :  { %v10562_v37 = vpop.f32.mrf.mxu0 }
 0x50e   :  { %v21986_v16 = vadd.f32 %v10562_v37, %v10480_v22  ;;  %v10495_v46 = vpop.f32.mrf.mxu1 }
 0x50f   :  { %v21990_v3 = vpop.f32.mrf.mxu0  ;;  %v10496_v43 = vadd.f32 %v10495_v46, %v21924_v51  ;;  %10992 = vmatmul.mubr.bf16.gmra.mxu1 %v15703_v53 }
 0x510   :  { %v10497_v1 = vpop.f32.mrf.mxu1  ;;  %11001 = vmatprep.mubr.bf16.mxu1 %v15722_v44 }
 0x511   :  { %v10568_v39 = vpop.f32.mrf.mxu0  ;;  %v10498_v32 = vadd.f32 %v10497_v1, %v21931_v23 }
 0x512   :  { %v21993_v52 = vadd.f32 %v10568_v39, %v10486_v21  ;;  %v10499_v31 = vpop.f32.mrf.mxu1 }
 0x513   :  { %v10570_v38 = vpop.f32.mrf.mxu0  ;;  %v10500_v7 = vadd.f32 %v10499_v31, %v21933_v55 }
 0x514   :  { %v21996_v22 = vadd.f32 %v10570_v38, %v10488_v27  ;;  %v22001_v51 = vpop.f32.mrf.mxu1  ;;  %v17876_v27 = vld [vmem:[#allocation4 + $0x1270] ss:$8 sps:$4 sm:$0xff]  }
 0x515   :  { %v10572_v5 = vpop.f32.mrf.mxu0  ;;  %13782 = vmatpush1.bf16.msra.mxu0 %v17876_v27  ;;  %v17885_v38 = vld [vmem:[#allocation4 + $0x1370] ss:$8 sps:$4 sm:$0xff]   ;;  %v17893_v27 = vld [vmem:[#allocation4 + $0x1364] ss:$8 sps:$4 sm:$0xff]  }
 0x516   :  { %v21999_v2 = vadd.f32 %v10572_v5, %v10490_v48  ;;  %v10505_v62 = vpop.f32.mrf.mxu1  ;;  %v17887_v5 = vld [vmem:[#allocation4 + $0x1374] ss:$8 sps:$4 sm:$0xff]  }
 0x517   :  { %v22003_v21 = vpop.f32.mrf.mxu0  ;;  %v10506_v45 = vadd.f32 %v10505_v62, %v21942_v63  ;;  %11002 = vmatmul.mubr.bf16.gmra.mxu1 %v15721_v59  ;;  %v17879_v63 = vld [vmem:[#allocation4 + $0x1260] ss:$8 sps:$4 sm:$0xff]   ;;  %13852 = vmatprep.subr.bf16.mxu1 %v17887_v5 }
 0x518   :  { %v10507_v6 = vpop.f32.mrf.mxu1  ;;  %13853 = vmatpush1.bf16.msra.mxu1 %v17885_v38  ;;  %v17888_v59 = vld [vmem:[#allocation4 + $0x1240] ss:$8 sps:$4 sm:$0xff]   ;;  %v17914_v38 = vld [vmem:[#allocation4 + $0x1204] ss:$8 sps:$4 sm:$0xff]  }
 0x519   :  { %v10578_v57 = vpop.f32.mrf.mxu0  ;;  %v10508_v55 = vadd.f32 %v10507_v6, %v21945_v61  ;;  %v17882_v61 = vld [vmem:[#allocation4 + $0x1250] ss:$8 sps:$4 sm:$0xff]   ;;  %v17891_v6 = vld [vmem:[#allocation4 + $0x1360] ss:$8 sps:$4 sm:$0xff]   ;;  %13854 = vmatprep.subr.bf16.mxu1 %v17893_v27 }
 0x51a   :  { %v22006_v23 = vadd.f32 %v10578_v57, %v10496_v43  ;;  %v10509_v46 = vpop.f32.mrf.mxu1  ;;  %v17881_v43 = vld [vmem:[#allocation4 + $0x1264] ss:$8 sps:$4 sm:$0xff]   ;;  %v17912_v5 = vld [vmem:[#allocation4 + $0x1200] ss:$8 sps:$4 sm:$0xff]   ;;  %v17918_v27 = vld [vmem:[#allocation4 + $0x12f0] ss:$8 sps:$4 sm:$0xff]  }
 0x51b   :  { %v10580_v37 = vpop.f32.mrf.mxu0  ;;  %v10510_v53 = vadd.f32 %v10509_v46, %v21947_v58  ;;  %13783 = vmatprep.subr.bf16.mxu0 %v17881_v43  ;;  %v17890_v57 = vld [vmem:[#allocation4 + $0x1244] ss:$8 sps:$4 sm:$0xff]   ;;  %v17908_v43 = vld [vmem:[#allocation4 + $0x1214] ss:$8 sps:$4 sm:$0xff]  }
 0x51c   :  { %v22009_v48 = vadd.f32 %v10580_v37, %v10498_v32  ;;  %13784 = vmatpush1.bf16.msra.mxu0 %v17879_v63  ;;  %v17884_v32 = vld [vmem:[#allocation4 + $0x1254] ss:$8 sps:$4 sm:$0xff]   ;;  %13855 = vmatpush1.bf16.msra.mxu1 %v17891_v6  ;;  %v17897_v37 = vld [vmem:[#allocation4 + $0x1350] ss:$8 sps:$4 sm:$0xff]   ;;  %v17902_v46 = vld [vmem:[#allocation4 + $0x1224] ss:$8 sps:$4 sm:$0xff]  }
 0x51d   :  { %v10582_v39 = vpop.f32.mrf.mxu0  ;;  %13785 = vmatprep.subr.bf16.mxu0 %v17884_v32  ;;  %v17903_v63 = vld [vmem:[#allocation4 + $0x1340] ss:$8 sps:$4 sm:$0xff]   ;;  %v17909_v32 = vld [vmem:[#allocation4 + $0x1330] ss:$8 sps:$4 sm:$0xff]  }
 0x51e   :  { %v22012_v40 = vadd.f32 %v10582_v39, %v10500_v7  ;;  %v17905_v39 = vld [vmem:[#allocation4 + $0x1344] ss:$8 sps:$4 sm:$0xff]  }
 0x51f   :  { %v22014_v41 = vpop.f32.mrf.mxu0 }
 0x520   :  { %13786 = vmatpush1.bf16.msra.mxu0 %v17882_v61  ;;  %v17906_v61 = vld [vmem:[#allocation4 + $0x1210] ss:$8 sps:$4 sm:$0xff]  }
 0x521   :  { %v10588_v44 = vpop.f32.mrf.mxu0  ;;  %13787 = vmatprep.subr.bf16.mxu0 %v17890_v57  ;;  %v22022_v57 = vpop.f32.mrf.mxu1 }
 0x522   :  { %v22016_v1 = vadd.f32 %v10588_v44, %v10506_v45  ;;  %v17894_v45 = vld [vmem:[#allocation4 + $0x1230] ss:$8 sps:$4 sm:$0xff]   ;;  %v17911_v44 = vld [vmem:[#allocation4 + $0x1334] ss:$8 sps:$4 sm:$0xff]  }
 0x523   :  { %v10590_v31 = vpop.f32.mrf.mxu0 }
 0x524   :  { %v22018_v62 = vadd.f32 %v10590_v31, %v10508_v55  ;;  %13788 = vmatpush1.bf16.msra.mxu0 %v17888_v59  ;;  %v17899_v55 = vld [vmem:[#allocation4 + $0x1354] ss:$8 sps:$4 sm:$0xff]   ;;  %v17917_v31 = vld [vmem:[#allocation4 + $0x1324] ss:$8 sps:$4 sm:$0xff]  }
 0x525   :  { %v10592_v58 = vpop.f32.mrf.mxu0  ;;  %13789 = vmatprep.subr.bf16.mxu0 %v17896_v28  ;;  %13856 = vmatprep.subr.bf16.mxu1 %v17899_v55  ;;  %v17920_v59 = vld [vmem:[#allocation4 + $0x12f4] ss:$8 sps:$4 sm:$0xff]  }
 0x526   :  { %v22020_v7 = vadd.f32 %v10592_v58, %v10510_v53  ;;  %v17900_v53 = vld [vmem:[#allocation4 + $0x1220] ss:$8 sps:$4 sm:$0xff]   ;;  %13857 = vmatpush1.bf16.msra.mxu1 %v17897_v37 }
 0x527   :  { %13858 = vmatprep.subr.bf16.mxu1 %v17905_v39  ;;  %v17915_v58 = vld [vmem:[#allocation4 + $0x1320] ss:$8 sps:$4 sm:$0xff]   ;;  %v17921_v39 = vld [vmem:[#allocation4 + $0x1310] ss:$8 sps:$4 sm:$0xff]  }
 0x528   :  { %13790 = vmatpush1.bf16.msra.mxu0 %v17894_v45 }
 0x529   :  { %13791 = vmatprep.subr.bf16.mxu0 %v17902_v46 }
 0x52a   :  { %13859 = vmatpush1.bf16.msra.mxu1 %v17903_v63 }
 0x52b   :  { %13860 = vmatprep.subr.bf16.mxu1 %v17911_v44 }
 0x52c   :  { %13792 = vmatpush1.bf16.msra.mxu0 %v17900_v53  ;;  %v17923_v53 = vld [vmem:[#allocation4 + $0x1314] ss:$8 sps:$4 sm:$0xff]  }
 0x52d   :  { %13793 = vmatprep.subr.bf16.mxu0 %v17908_v43  ;;  %v22035_v43 = vpop.f32.mrf.mxu0 }
 0x52e   :  { %13861 = vmatpush1.bf16.msra.mxu1 %v17909_v32 }
 0x52f   :  { %13862 = vmatprep.subr.bf16.mxu1 %v17917_v31  ;;  %v17926_v31 = vld [vmem:[#allocation4 + $0x12e4] ss:$8 sps:$4 sm:$0xff]  }
 0x530   :  { %13794 = vmatpush1.bf16.msra.mxu0 %v17906_v61 }
 0x531   :  { %13795 = vmatprep.subr.bf16.mxu0 %v17914_v38  ;;  %v17924_v38 = vld [vmem:[#allocation4 + $0x12e0] ss:$8 sps:$4 sm:$0xff]  }
 0x532   :  { %13863 = vmatpush1.bf16.msra.mxu1 %v17915_v58 }
 0x533   :  { %13864 = vmatprep.subr.bf16.mxu1 %v17923_v53 }
 0x534   :  { %13796 = vmatpush1.bf16.msra.mxu0 %v17912_v5  ;;  %v17927_v5 = vld [vmem:[#allocation4 + $0x1300] ss:$8 sps:$4 sm:$0xff]  }
 0x535   :  { %13797 = vmatprep.subr.bf16.mxu0 %v17920_v59  ;;  %v17929_v59 = vld [vmem:[#allocation4 + $0x1304] ss:$8 sps:$4 sm:$0xff]  }
 0x536   :  { %13865 = vmatpush1.bf16.msra.mxu1 %v17921_v39  ;;  %v17933_v39 = vld [vmem:[#allocation4 + $0x13f0] ss:$8 sps:$4 sm:$0xff]  }
 0x537   :  { %v10631_v6 = vpop.f32.mrf.mxu1  ;;  %13866 = vmatprep.subr.bf16.mxu1 %v17929_v59  ;;  %v17938_v59 = vld [vmem:[#allocation4 + $0x12c4] ss:$8 sps:$4 sm:$0xff]  }
 0x538   :  { %v22025_v45 = vadd.f32 %v10631_v6, %v21965_v18  ;;  %13798 = vmatpush2.bf16.msra.mxu0 %v17918_v27 }
 0x539   :  { %v10633_v28 = vpop.f32.mrf.mxu1  ;;  %13799 = vmatprep.subr.bf16.mxu0 %v17926_v31 }
 0x53a   :  { %v22028_v37 = vadd.f32 %v10633_v28, %v21969_v42  ;;  %13867 = vmatpush1.bf16.msra.mxu1 %v17927_v5  ;;  %v17936_v5 = vld [vmem:[#allocation4 + $0x12c0] ss:$8 sps:$4 sm:$0xff]  }
 0x53b   :  { %v10635_v55 = vpop.f32.mrf.mxu1 }
 0x53c   :  { %v22031_v46 = vadd.f32 %v10635_v55, %v21972_v29  ;;  %13800 = vmatpush2.bf16.msra.mxu0 %v17924_v38  ;;  %v17932_v55 = vld [vmem:[#allocation4 + $0x12d4] ss:$8 sps:$4 sm:$0xff]  }
 0x53d   :  { %v22033_v63 = vpop.f32.mrf.mxu1  ;;  %13801 = vmatprep.subr.bf16.mxu0 %v17932_v55 }
 0x53f   :  { %v10641_v18 = vpop.f32.mrf.mxu1 }
 0x540   :  { %v22038_v44 = vadd.f32 %v10641_v18, %v21980_v12  ;;  %v17935_v18 = vld [vmem:[#allocation4 + $0x13f4] ss:$8 sps:$4 sm:$0xff]  }
 0x541   :  { %v22040_v61 = vpop.f32.mrf.mxu0  ;;  %v10643_v42 = vpop.f32.mrf.mxu1  ;;  %13868 = vmatprep.subr.bf16.mxu1 %v17935_v18  ;;  %v17945_v18 = vld [vmem:[#allocation4 + $0x13d0] ss:$8 sps:$4 sm:$0xff]  }
 0x542   :  { %v22043_v32 = vadd.f32 %v10643_v42, %v21983_v8  ;;  %v17930_v8 = vld [vmem:[#allocation4 + $0x12d0] ss:$8 sps:$4 sm:$0xff]   ;;  %13869 = vmatpush2.bf16.msra.mxu1 %v17933_v39 }
 0x543   :  { %v22045_v29 = vpop.f32.mrf.mxu0  ;;  %v10645_v58 = vpop.f32.mrf.mxu1  ;;  %13802 = vmatpush2.bf16.msra.mxu0 %v17930_v8  ;;  %13870 = vmatprep.subr.bf16.mxu1 %v17941_v0  ;;  %v17944_v8 = vld [vmem:[#allocation4 + $0x12b4] ss:$8 sps:$4 sm:$0xff]   ;;  %v17948_v0 = vld [vmem:[#allocation4 + $0x12a0] ss:$8 sps:$4 sm:$0xff]  }
 0x544   :  { %v22048_v6 = vadd.f32 %v10645_v58, %v21986_v16  ;;  %13803 = vmatprep.subr.bf16.mxu0 %v17938_v59 }
 0x545   :  { %v22050_v27 = vpop.f32.mrf.mxu0  ;;  %v22052_v12 = vpop.f32.mrf.mxu1 }
 0x546   :  { %13871 = vmatpush2.bf16.msra.mxu1 %v17939_v30  ;;  %v17950_v30 = vld [vmem:[#allocation4 + $0x12a4] ss:$8 sps:$4 sm:$0xff]  }
 0x547   :  { %v22054_v28 = vpop.f32.mrf.mxu0  ;;  %v10651_v53 = vpop.f32.mrf.mxu1  ;;  %13804 = vmatpush2.bf16.msra.mxu0 %v17936_v5  ;;  %13872 = vmatprep.subr.bf16.mxu1 %v17947_v24  ;;  %v17951_v5 = vld [vmem:[#allocation4 + $0x13c0] ss:$8 sps:$4 sm:$0xff]   ;;  %v17954_v24 = vld [vmem:[#allocation4 + $0x1290] ss:$8 sps:$4 sm:$0xff]  }
 0x548   :  { %v22057_v42 = vadd.f32 %v10651_v53, %v21993_v52  ;;  %13805 = vmatprep.subr.bf16.mxu0 %v17944_v8 }
 0x549   :  { %v22059_v16 = vpop.f32.mrf.mxu0  ;;  %v10653_v58 = vpop.f32.mrf.mxu1 }
 0x54a   :  { %v22062_v38 = vadd.f32 %v10653_v58, %v21996_v22  ;;  %v17942_v22 = vld [vmem:[#allocation4 + $0x12b0] ss:$8 sps:$4 sm:$0xff]   ;;  %13873 = vmatpush2.bf16.msra.mxu1 %v17945_v18 }
 0x54b   :  { %v22064_v31 = vpop.f32.mrf.mxu0  ;;  %v10655_v34 = vpop.f32.mrf.mxu1  ;;  %13806 = vmatpush2.bf16.msra.mxu0 %v17942_v22  ;;  %13874 = vmatprep.subr.bf16.mxu1 %v17953_v13  ;;  %v17957_v22 = vld [vmem:[#allocation4 + $0x13b0] ss:$8 sps:$4 sm:$0xff]   ;;  %v17960_v13 = vld [vmem:[#allocation4 + $0x1280] ss:$8 sps:$4 sm:$0xff]  }
 0x54c   :  { %v22067_v52 = vadd.f32 %v10655_v34, %v21999_v2  ;;  %13807 = vmatprep.subr.bf16.mxu0 %v17950_v30 }
 0x54d   :  { %v22069_v53 = vpop.f32.mrf.mxu0  ;;  %v22071_v55 = vpop.f32.mrf.mxu1 }
 0x54e   :  { %13875 = vmatpush2.bf16.msra.mxu1 %v17951_v5 }
 0x54f   :  { %v22073_v39 = vpop.f32.mrf.mxu0  ;;  %v10661_v58 = vpop.f32.mrf.mxu1  ;;  %13808 = vmatpush2.bf16.msra.mxu0 %v17948_v0  ;;  %v17963_v0 = vld [vmem:[#allocation4 + $0x13a0] ss:$8 sps:$4 sm:$0xff]  }
 0x550   :  { %v22076_v33 = vadd.f32 %v10661_v58, %v22006_v23  ;;  %v17959_v58 = vld [vmem:[#allocation4 + $0x13b4] ss:$8 sps:$4 sm:$0xff]  }
 0x551   :  { %v10663_v34 = vpop.f32.mrf.mxu1  ;;  %v22081_v59 = vpop.f32.mrf.mxu0  ;;  %13876 = vmatprep.subr.bf16.mxu1 %v17959_v58  ;;  %v17983_v58 = vld [vmem:[#allocation4 + $0x1574] ss:$8 sps:$4 sm:$0xff]  }
 0x552   :  { %v22079_v2 = vadd.f32 %v10663_v34, %v22009_v48  ;;  %v17956_v48 = vld [vmem:[#allocation4 + $0x1294] ss:$8 sps:$4 sm:$0xff]   ;;  %13877 = vmatpush2.bf16.msra.mxu1 %v17957_v22 }
 0x553   :  { %v10665_v17 = vpop.f32.mrf.mxu1  ;;  %v22088_v8 = vpop.f32.mrf.mxu0  ;;  %13809 = vmatprep.subr.bf16.mxu0 %v17956_v48  ;;  %13878 = vmatprep.subr.bf16.mxu1 %v17965_v10 }
 0x554   :  { %v22084_v9 = vadd.f32 %v10665_v17, %v22012_v40  ;;  %13810 = vmatpush2.bf16.msra.mxu0 %v17954_v24  ;;  %v17962_v40 = vld [vmem:[#allocation4 + $0x1284] ss:$8 sps:$4 sm:$0xff]   ;;  %v17969_v24 = vld [vmem:[#allocation4 + $0x1390] ss:$8 sps:$4 sm:$0xff]  }
 0x555   :  { %v22086_v23 = vpop.f32.mrf.mxu1  ;;  %v22096_v30 = vpop.f32.mrf.mxu0  ;;  %13811 = vmatprep.subr.bf16.mxu0 %v17962_v40 }
 0x556   :  { %23742 = vst [vmem:[#allocation21_spill] sm:$0xff] %v22084_v9  ;;  %13879 = vmatpush2.bf16.msra.mxu1 %v17963_v0 }
 0x557   :  { %v10671_v18 = vpop.f32.mrf.mxu1  ;;  %v22101_v48 = vpop.f32.mrf.mxu0 }
 0x558   :  { %v22091_v34 = vadd.f32 %v10671_v18, %v22016_v1  ;;  %13812 = vmatpush2.bf16.msra.mxu0 %v17960_v13  ;;  %v17968_v1 = vld [vmem:[#allocation4 + $0x1474] ss:$8 sps:$4 sm:$0xff]   ;;  %v17977_v18 = vld [vmem:[#allocation4 + $0x1384] ss:$8 sps:$4 sm:$0xff]  }
 0x559   :  { %v10673_v14 = vpop.f32.mrf.mxu1  ;;  %13923 = vmatprep.subr.bf16.mxu0 %v17968_v1  ;;  %v22103_v22 = vpop.f32.mrf.mxu0 }
 0x55a   :  { %23743 = vst [vmem:[#allocation46_spill] sm:$0xff] %v22091_v34  ;;  %v22094_v17 = vadd.f32 %v10673_v14, %v22018_v62  ;;  %v17971_v14 = vld [vmem:[#allocation4 + $0x1394] ss:$8 sps:$4 sm:$0xff]   ;;  %v17975_v62 = vld [vmem:[#allocation4 + $0x1380] ss:$8 sps:$4 sm:$0xff]  }
 0x55b   :  { %v10675_v5 = vpop.f32.mrf.mxu1  ;;  %13880 = vmatprep.subr.bf16.mxu1 %v17971_v14 }
 0x55c   :  { %23744 = vst [vmem:[#allocation16_spill] sm:$0xff] %v22094_v17  ;;  %v22099_v9 = vadd.f32 %v10675_v5, %v22020_v7  ;;  %13881 = vmatpush2.bf16.msra.mxu1 %v17969_v24  ;;  %v22105_v7 = vpop.f32.mrf.mxu0 }
 0x55d   :  { %13882 = vmatprep.subr.bf16.mxu1 %v17977_v18  ;;  %v22113_v0 = vpop.f32.mrf.mxu1 }
 0x55e   :  { %23745 = vst [vmem:[#allocation47_spill] sm:$0xff] %v22099_v9  ;;  %v22107_v10 = vpop.f32.mrf.mxu0 }
 0x560   :  { %13883 = vmatpush2.bf16.msra.mxu1 %v17975_v62  ;;  %v22109_v13 = vpop.f32.mrf.mxu0 }
 0x561   :  { %13994 = vmatprep.subr.bf16.mxu1 %v17983_v58  ;;  %23746 = vst [vmem:[#allocation49_spill] sm:$0xff] %v22109_v13 }
 0x562   :  { %v22111_v40 = vpop.f32.mrf.mxu0 }
 0x563   :  { %23747 = vst [vmem:[#allocation33_spill] sm:$0xff] %v22111_v40 }
 0x564   :  { %v22115_v5 = vpop.f32.mrf.mxu0 }
 0x565   :  { %23748 = vst [vmem:[#allocation20_spill] sm:$0xff] %v22115_v5 }
 0x566   :  { %v22121_v14 = vpop.f32.mrf.mxu0 }
 0x567   :  { %23750 = vst [vmem:[#allocation37_spill] sm:$0xff] %v22121_v14 }
 0x568   :  { %v22127_v58 = vpop.f32.mrf.mxu0 }
 0x569   :  { %23753 = vst [vmem:[#allocation48_spill] sm:$0xff] %v22127_v58 }
 0x577   :  { %v22117_v1 = vpop.f32.mrf.mxu1 }
 0x579   :  { %v22119_v24 = vpop.f32.mrf.mxu1 }
 0x57a   :  { %23749 = vst [vmem:[#allocation50_spill] sm:$0xff] %v22119_v24 }
 0x57b   :  { %v22123_v62 = vpop.f32.mrf.mxu1 }
 0x57c   :  { %23751 = vst [vmem:[#allocation54_spill] sm:$0xff] %v22123_v62 }
 0x57d   :  { %v22125_v18 = vpop.f32.mrf.mxu1 }
 0x57e   :  { %23752 = vst [vmem:[#allocation45_spill] sm:$0xff] %v22125_v18 }
 0x57f   :  { %v22129_v9 = vpop.f32.mrf.mxu1 }
 0x580   :  { %23754 = vst [vmem:[#allocation15_spill] sm:$0xff] %v22129_v9 }
 0x581   :  { %v22131_v17 = vpop.f32.mrf.mxu0  ;;  %v22133_v40 = vpop.f32.mrf.mxu1 }
 0x582   :  { %23755 = vst [vmem:[#allocation22_spill] sm:$0xff] %v22131_v17  ;;  %23756 = vst [vmem:[#allocation35_spill] sm:$0xff] %v22133_v40 }
 0x583   :  { %v22135_v34 = vpop.f32.mrf.mxu0  ;;  %v22137_v5 = vpop.f32.mrf.mxu1 }
 0x584   :  { %23757 = vst [vmem:[#allocation52_spill] sm:$0xff] %v22135_v34  ;;  %23758 = vst [vmem:[#allocation51_spill] sm:$0xff] %v22137_v5 }
 0x585   :  { %v22139_v13 = vpop.f32.mrf.mxu0  ;;  %v22141_v24 = vpop.f32.mrf.mxu1 }
 0x586   :  { %23759 = vst [vmem:[#allocation29_spill] sm:$0xff] %v22139_v13  ;;  %23760 = vst [vmem:[#allocation19_spill] sm:$0xff] %v22141_v24 }
 0x587   :  { %v22143_v14 = vpop.f32.mrf.mxu0  ;;  %v22147_v18 = vpop.f32.mrf.mxu1 }
 0x588   :  { %23761 = vst [vmem:[#allocation55_spill] sm:$0xff] %v22143_v14  ;;  %23763 = vst [vmem:[#allocation56_spill] sm:$0xff] %v22147_v18 }
 0x589   :  { %v22145_v62 = vpop.f32.mrf.mxu0  ;;  %v22151_v9 = vpop.f32.mrf.mxu1 }
 0x58a   :  { %23762 = vst [vmem:[#allocation31_spill] sm:$0xff] %v22145_v62  ;;  %23765 = vst [vmem:[#allocation12_spill] sm:$0xff] %v22151_v9 }
 0x58b   :  { %v22149_v58 = vpop.f32.mrf.mxu0  ;;  %v22155_v40 = vpop.f32.mrf.mxu1 }
 0x58c   :  { %23764 = vst [vmem:[#allocation38_spill] sm:$0xff] %v22149_v58 }
 0x58d   :  { %v22153_v17 = vpop.f32.mrf.mxu0  ;;  %v22159_v5 = vpop.f32.mrf.mxu1 }
 0x58e   :  { %23766 = vst [vmem:[#allocation32_spill] sm:$0xff] %v22153_v17  ;;  %23768 = vst [vmem:[#allocation23_spill] sm:$0xff] %v22159_v5 }
 0x58f   :  { %v22157_v34 = vpop.f32.mrf.mxu0  ;;  %v22163_v24 = vpop.f32.mrf.mxu1 }
 0x590   :  { %23767 = vst [vmem:[#allocation34_spill] sm:$0xff] %v22157_v34  ;;  %23770 = vst [vmem:[#allocation27_spill] sm:$0xff] %v22163_v24  ;;  %v10306_v34 = vadd.f32 %v21845_v35, %v21849_v20 }
 0x591   :  { %v22161_v13 = vpop.f32.mrf.mxu0  ;;  %v22167_v62 = vpop.f32.mrf.mxu1 }
 0x592   :  { %23769 = vst [vmem:[#allocation24_spill] sm:$0xff] %v22161_v13  ;;  %23772 = vst [vmem:[#allocation42_spill] sm:$0xff] %v22167_v62  ;;  %v10346_v13 = vadd.f32 %v21949_v4, %v21849_v20  ;;  %v10389_v62 = vadd.f32 %v21878_v19, %v10306_v34 }
 0x593   :  { %v22165_v14 = vpop.f32.mrf.mxu0  ;;  %v22171_v58 = vpop.f32.mrf.mxu1 }
 0x594   :  { %23771 = vst [vmem:[#allocation40_spill] sm:$0xff] %v22165_v14  ;;  %23774 = vst [vmem:[#allocation58_spill] sm:$0xff] %v22171_v58  ;;  %v10316_v14 = vadd.f32 %v21874_v49, %v21849_v20  ;;  %v10472_v49 = vadd.f32 %v21958_v26, %v10389_v62  ;;  %v23790_v62 = vld [vmem:[#allocation45_spill] sm:$0xff] }
 0x595   :  { %v22169_v18 = vpop.f32.mrf.mxu0  ;;  %v22175_v17 = vpop.f32.mrf.mxu1 }
 0x596   :  { %23773 = vst [vmem:[#allocation57_spill] sm:$0xff] %v22169_v18  ;;  %23776 = vst [vmem:[#allocation59_spill] sm:$0xff] %v22175_v17  ;;  %v10326_v18 = vadd.f32 %v21895_v25, %v21849_v20  ;;  %v10399_v35 = vadd.f32 %v21899_v54, %v10316_v14  ;;  %v10555_v25 = vadd.f32 %v21976_v47, %v10472_v49  ;;  %v23789_v14 = vld [vmem:[#allocation22_spill] sm:$0xff] }
 0x597   :  { %v22173_v9 = vpop.f32.mrf.mxu0  ;;  %v22190_v17 = vpop.f32.mrf.mxu1  ;;  %v10715_v47 = vadd.f32 %v22040_v61, %v22025_v45  ;;  %v10729_v45 = vadd.f32 %v22069_v53, %v22048_v6  ;;  %v10737_v61 = vadd.f32 %v22088_v8, %v22062_v38  ;;  %v10747_v6 = vadd.f32 %v22105_v7, %v22079_v2  ;;  %v23780_v53 = vld [vmem:[#allocation46_spill] sm:$0xff]  ;;  %v23786_v2 = vld [vmem:[#allocation37_spill] sm:$0xff] }
 0x598   :  { %23775 = vst [vmem:[#allocation17_spill] sm:$0xff] %v22173_v9  ;;  %v10336_v9 = vadd.f32 %v21936_v15, %v21849_v20  ;;  %v10409_v58 = vadd.f32 %v21917_v50, %v10326_v18  ;;  %v10482_v19 = vadd.f32 %v21974_v11, %v10399_v35  ;;  %v23784_v8 = vld [vmem:[#allocation50_spill] sm:$0xff] }
 0x599   :  { %v22181_v5 = vpop.f32.mrf.mxu0  ;;  %v22204_v34 = vpop.f32.mrf.mxu1  ;;  %v10798_v38 = vadd.f32 %v22117_v1, %v10715_v47 }
 0x59a   :  { %23777 = vst [vmem:[#allocation60_spill] sm:$0xff] %v22181_v5  ;;  %v10419_v4 = vadd.f32 %v21938_v56, %v10336_v9  ;;  %v10429_v5 = vadd.f32 %v21960_v60, %v10346_v13  ;;  %v10492_v20 = vadd.f32 %v21988_v36, %v10409_v58  ;;  %v10565_v9 = vadd.f32 %v21990_v3, %v10482_v19  ;;  %v23787_v13 = vld [vmem:[#allocation48_spill] sm:$0xff]  ;;  %v23791_v58 = vld [vmem:[#allocation15_spill] sm:$0xff] }
 0x59b   :  { %v22197_v24 = vpop.f32.mrf.mxu0  ;;  %v10638_v60 = vadd.f32 %v22033_v63, %v10555_v25  ;;  %v10717_v36 = vadd.f32 %v22045_v29, %v22028_v37  ;;  %v10881_v1 = vadd.f32 %v23789_v14, %v10798_v38  ;;  %v23793_v19 = vld [vmem:[#allocation52_spill] sm:$0xff] }
 0x59c   :  { %v10502_v15 = vadd.f32 %v22001_v51, %v10419_v4  ;;  %v10512_v54 = vadd.f32 %v22022_v57, %v10429_v5  ;;  %v10575_v50 = vadd.f32 %v22003_v21, %v10492_v20  ;;  %v10719_v51 = vadd.f32 %v22050_v27, %v22031_v46  ;;  %v23788_v5 = vld [vmem:[#allocation54_spill] sm:$0xff]  ;;  %v23792_v4 = vld [vmem:[#allocation35_spill] sm:$0xff] }
 0x59d   :  { %v22211_v11 = vpop.f32.mrf.mxu0  ;;  %v10648_v3 = vadd.f32 %v22052_v12, %v10565_v9  ;;  %v10721_v21 = vadd.f32 %v22054_v28, %v10638_v60  ;;  %v10727_v57 = vadd.f32 %v22064_v31, %v22043_v32  ;;  %v10735_v46 = vadd.f32 %v22081_v59, %v22057_v42  ;;  %v23778_v28 = vld [vmem:[#allocation21_spill] sm:$0xff]  ;;  %v23782_v59 = vld [vmem:[#allocation16_spill] sm:$0xff] }
 0x59e   :  { %v10585_v56 = vadd.f32 %v22014_v41, %v10502_v15  ;;  %v10595_v26 = vadd.f32 %v22035_v43, %v10512_v54  ;;  %v10725_v41 = vadd.f32 %v22059_v16, %v22038_v44  ;;  %v10658_v63 = vadd.f32 %v22071_v55, %v10575_v50  ;;  %v22226_v43 = vpop.f32.mrf.mxu1  ;;  %v23779_v31 = vld [vmem:[#allocation49_spill] sm:$0xff]  ;;  %v23794_v54 = vld [vmem:[#allocation51_spill] sm:$0xff] }
 0x59f   :  { %v10731_v37 = vadd.f32 %v22073_v39, %v10648_v3  ;;  %v10739_v44 = vadd.f32 %v22096_v30, %v22067_v52  ;;  %v10745_v27 = vadd.f32 %v22103_v22, %v22076_v33  ;;  %v22241_v12 = vpop.f32.mrf.mxu0  ;;  %v10749_v42 = vadd.f32 %v22107_v10, %v23778_v28  ;;  %v23781_v55 = vld [vmem:[#allocation33_spill] sm:$0xff]  ;;  %v23785_v22 = vld [vmem:[#allocation47_spill] sm:$0xff]  ;;  %v23798_v3 = vld [vmem:[#allocation56_spill] sm:$0xff] }
 0x5a0   :  { %v10668_v32 = vadd.f32 %v22086_v23, %v10585_v56  ;;  %v10741_v29 = vadd.f32 %v22101_v48, %v10658_v63  ;;  %v10678_v16 = vadd.f32 %v22113_v0, %v10595_v26  ;;  %v10755_v39 = vadd.f32 %v23781_v55, %v23780_v53  ;;  %v23783_v23 = vld [vmem:[#allocation20_spill] sm:$0xff]  ;;  %v10843_v48 = vpop.f32.mrf.mxu1  ;;  %v23795_v50 = vld [vmem:[#allocation29_spill] sm:$0xff]  ;;  %v23796_v26 = vld [vmem:[#allocation19_spill] sm:$0xff] }
 0x5a1   :  { %v10757_v33 = vadd.f32 %v23783_v23, %v23782_v59  ;;  %v10800_v30 = vadd.f32 %v23784_v8, %v10717_v36  ;;  %v10759_v7 = vadd.f32 %v23786_v2, %v23785_v22  ;;  %v10802_v0 = vadd.f32 %v23788_v5, %v10719_v51  ;;  %v10920_v20 = vpop.f32.mrf.mxu0  ;;  %v23797_v36 = vld [vmem:[#allocation55_spill] sm:$0xff]  ;;  %v23802_v53 = vld [vmem:[#allocation32_spill] sm:$0xff] }
 0x5a2   :  { %v10751_v52 = vadd.f32 %v23779_v31, %v10668_v32  ;;  %v10761_v10 = vadd.f32 %v23787_v13, %v10678_v16  ;;  %v10804_v18 = vadd.f32 %v23790_v62, %v10721_v21  ;;  %v10808_v35 = vadd.f32 %v23791_v58, %v10725_v41  ;;  %v23799_v21 = vld [vmem:[#allocation31_spill] sm:$0xff]  ;;  %v23800_v41 = vld [vmem:[#allocation12_spill] sm:$0xff]  ;;  %v23801_v16 = vld [vmem:[#allocation38_spill] sm:$0xff] }
 0x5a3   :  { %v10810_v49 = vadd.f32 %v23792_v4, %v10727_v57  ;;  %v10883_v25 = vadd.f32 %v23793_v19, %v10800_v30  ;;  %v10812_v9 = vadd.f32 %v23794_v54, %v10729_v45  ;;  %v10885_v56 = vadd.f32 %v23795_v50, %v10802_v0  ;;  %v23803_v59 = vld [vmem:[#allocation23_spill] sm:$0xff]  ;;  %v23806_v2 = vld [vmem:[#allocation24_spill] sm:$0xff]  ;;  %v10922_v13 = vpop.f32.mrf.mxu0  ;;  %v23812_v19 = vld [vmem:[#allocation17_spill] sm:$0xff] }
 0x5a4   :  { %v10814_v60 = vadd.f32 %v23796_v26, %v10731_v37  ;;  %v10887_v51 = vadd.f32 %v23797_v36, %v10804_v18  ;;  %v10818_v63 = vadd.f32 %v23798_v3, %v10735_v46  ;;  %v10891_v32 = vadd.f32 %v23799_v21, %v10808_v35  ;;  %v23804_v37 = vld [vmem:[#allocation34_spill] sm:$0xff]  ;;  %v23805_v30 = vld [vmem:[#allocation27_spill] sm:$0xff] }
 0x5a5   :  { %v10820_v28 = vadd.f32 %v23800_v41, %v10737_v61  ;;  %v10893_v38 = vadd.f32 %v23801_v16, %v10810_v49  ;;  %v10822_v31 = vadd.f32 %v22155_v40, %v10739_v44  ;;  %v10895_v45 = vadd.f32 %v23802_v53, %v10812_v9  ;;  %v23807_v61 = vld [vmem:[#allocation42_spill] sm:$0xff]  ;;  %v23808_v40 = vld [vmem:[#allocation40_spill] sm:$0xff]  ;;  %v23811_v4 = vld [vmem:[#allocation59_spill] sm:$0xff]  ;;  %v10924_v26 = vpop.f32.mrf.mxu0 }
 0x5a6   :  { %v10824_v23 = vadd.f32 %v23803_v59, %v10741_v29  ;;  %v10897_v8 = vadd.f32 %v23804_v37, %v10814_v60  ;;  %v10828_v22 = vadd.f32 %v23805_v30, %v10745_v27  ;;  %v22278_v46 = vadd.f32 %v23806_v2, %v10818_v63  ;;  %v23809_v18 = vld [vmem:[#allocation58_spill] sm:$0xff]  ;;  %v23810_v29 = vld [vmem:[#allocation57_spill] sm:$0xff]  ;;  %v23813_v9 = vld [vmem:[#allocation60_spill] sm:$0xff] }
 0x5a7   :  { %v10830_v0 = vadd.f32 %v23807_v61, %v10747_v6  ;;  %v22282_v44 = vadd.f32 %v23808_v40, %v10820_v28  ;;  %v10832_v58 = vadd.f32 %v23809_v18, %v10749_v42  ;;  %v22286_v35 = vadd.f32 %v23810_v29, %v10822_v31  ;;  %v10926_v16 = vpop.f32.mrf.mxu0  ;;  %v17966_v53 = vld [vmem:[#allocation4 + $0x1470] ss:$8 sps:$4 sm:$0xff]   ;;  %v17972_v18 = vld [vmem:[#allocation4 + $0x1460] ss:$8 sps:$4 sm:$0xff]  }
 0x5a8   :  { %v10834_v27 = vadd.f32 %v23811_v4, %v10751_v52  ;;  %v22294_v50 = vadd.f32 %v23813_v9, %v10828_v22  ;;  %v17980_v4 = vld [vmem:[#allocation4 + $0x1454] ss:$8 sps:$4 sm:$0xff]  }
 0x5a9   :  { %v22298_v42 = vadd.f32 %v22197_v24, %v10830_v0 }
 0x5b7   :  { %v10963_v15 = vpop.f32.mrf.mxu1 }
 0x5b8   :  { %v10964_v47 = vadd.f32 %v10963_v15, %v10881_v1  ;;  %v10838_v15 = vadd.f32 %v22190_v17, %v10755_v39  ;;  %v10842_v17 = vadd.f32 %v22226_v43, %v10759_v7  ;;  %v22304_v39 = vadd.f32 %v22211_v11, %v10832_v58 }
 0x5b9   :  { %v10965_v57 = vpop.f32.mrf.mxu1 }
 0x5ba   :  { %v10966_v55 = vadd.f32 %v10965_v57, %v10883_v25  ;;  %v11012_v14 = vmax.f32 %v10964_v47, 0.0  ;;  %v22290_v25 = vadd.f32 %v23812_v19, %v10824_v23 }
 0x5bb   :  { %v10967_v5 = vpop.f32.mrf.mxu1 }
 0x5bc   :  { %v11013_v1 = vmax.f32 %v10966_v55, 0.0  ;;  %v10968_v62 = vadd.f32 %v10967_v5, %v10885_v56  ;;  %v10840_v56 = vadd.f32 %v22204_v34, %v10757_v33  ;;  %v22307_v34 = vadd.f32 %v22241_v12, %v10834_v27  ;;  %v17974_v55 = vld [vmem:[#allocation4 + $0x1464] ss:$8 sps:$4 sm:$0xff]  }
 0x5bd   :  { %v10969_v49 = vpop.f32.mrf.mxu1  ;;  %v22309_v33 = vadd.f32 %v10920_v20, %v10838_v15 }
 0x5be   :  { %v16590_v6 = vpack.c.bf16 %v11013_v1, %v11012_v14  ;;  %v10970_v54 = vadd.f32 %v10969_v49, %v10887_v51  ;;  %v11014_v60 = vmax.f32 %v10968_v62, 0.0  ;;  %v10844_v51 = vadd.f32 %v10843_v48, %v10761_v10 }
 0x5bf   :  { %v10973_v47 = vpop.f32.mrf.mxu1  ;;  %v22311_v57 = vadd.f32 %v10922_v13, %v10840_v56 }
 0x5c0   :  { %11092 = vst [vmem:[#allocation2] sm:$0xff] %v16590_v6  ;;  %v11015_v52 = vmax.f32 %v10970_v54, 0.0  ;;  %v22300_v36 = vadd.f32 %v10973_v47, %v10891_v32  ;;  %v11128_v3 = vshrl.u32 %v16590_v6, 16  ;;  %v11131_v63 = vshll.u32 %v16590_v6, 16 }
 0x5c1   :  { %v10975_v24 = vpop.f32.mrf.mxu1  ;;  %v22313_v32 = vadd.f32 %v10924_v26, %v10842_v17  ;;  %v18358_v12 = vpack.c.bf16 %v11014_v60, %v11012_v14  ;;  %v22316_v30 = vadd.f32 %v10926_v16, %v10844_v51 }
 0x5c2   :  { %v16591_v21 = vpack.c.bf16 %v11015_v52, %v11014_v60  ;;  %v10976_v41 = vadd.f32 %v10975_v24, %v10893_v38  ;;  %v11130_v28 = vrot.slane %v11128_v3, 4  ;;  %v11016_v43 = vmax.f32 %v22300_v36, 0.0  ;;  %v17978_v24 = vld [vmem:[#allocation4 + $0x1450] ss:$8 sps:$4 sm:$0xff]  }
 0x5c3   :  { %v10977_v7 = vpop.f32.mrf.mxu1  ;;  %v11133_v11 = vrot.slane %v11131_v63, 5  ;;  %v18359_v31 = vpack.c.bf16 %v11015_v52, %v11013_v1  ;;  %v11258_v52 = vld [vmem:[#allocation3 + $0xe0] sm:$0x11] }
 0x5c4   :  { %11093 = vst [vmem:[#allocation2 + $0x8] sm:$0xff] %v16591_v21  ;;  %v11017_v48 = vmax.f32 %v10976_v41, 0.0  ;;  %v10978_v10 = vadd.f32 %v10977_v7, %v10895_v45  ;;  %v11137_v38 = vshll.u32 %v16591_v21, 16  ;;  %v11141_v23 = vshrl.u32 %v16591_v21, 16 }
 0x5c5   :  { %v10979_v20 = vpop.f32.mrf.mxu1  ;;  %v11134_v59 = vor.u32 %v11133_v11, %v11130_v28  ;;  %v11227_v37 = vrot.slane %v16591_v21, 5  ;;  %13813 = vmatprep.mubr.bf16.mxu0 %v18359_v31  ;;  %v17986_v28 = vld [vmem:[#allocation4 + $0x1444] ss:$8 sps:$4 sm:$0xff]  }
 0x5c6   :  { %v22318_v22 = vpack.c.bf16 %v11017_v48, %v11016_v43  ;;  %v11018_v2 = vmax.f32 %v10978_v10, 0.0  ;;  %v10980_v13 = vadd.f32 %v10979_v20, %v10897_v8  ;;  %13814 = vmatmul.mubr.bf16.vlgmr.msra.gmra.mxu0 %v18358_v12  ;;  %v11139_v45 = vrot.slane %v11137_v38, 5  ;;  %v17981_v12 = vld [vmem:[#allocation4 + $0x1570] ss:$8 sps:$4 sm:$0xff]  }
 0x5c7   :  { %v10983_v5 = vpop.f32.mrf.mxu1  ;;  %v11135_v61 = vrot.slane %v11134_v59, 4  ;;  %v11143_v0 = vrot.slane %v11141_v23, 4  ;;  %v11211_v14 = vld [vmem:[#allocation2] sm:$0xee]  ;;  %v11229_v1 = vrot.slane %v11227_v37, 4  ;;  %13924 = vmatpush1.bf16.msra.mxu0 %v17966_v53 }
 0x5c8   :  { %11094 = vst [vmem:[#allocation2 + $0x10] sm:$0xff] %v22318_v22  ;;  %v11019_v62 = vmax.f32 %v10980_v13, 0.0  ;;  %v22322_v40 = vadd.f32 %v10983_v5, %v22278_v46  ;;  %v11147_v58 = vshll.u32 %v22318_v22, 16  ;;  %v11151_v8 = vshrl.u32 %v22318_v22, 16  ;;  %13925 = vmatprep.subr.bf16.mxu0 %v17974_v55  ;;  %v17984_v55 = vld [vmem:[#allocation4 + $0x1440] ss:$8 sps:$4 sm:$0xff]  }
 0x5c9   :  { %v10985_v29 = vpop.f32.mrf.mxu1  ;;  %v11140_v49 = vsel %vm19331_vm13, %v11135_v61, %v11139_v45  ;;  %v11144_v19 = vor.u32 %v11143_v0, %v11139_v45  ;;  %v16022_v15 = vrot.slane %v11211_v14, 9  ;;  %v11230_v6 = vrot.slane %v22318_v22, 5  ;;  %v17992_v45 = vld [vmem:[#allocation4 + $0x1434] ss:$8 sps:$4 sm:$0xff]   ;;  %v18014_v22 = vld [vmem:[#allocation4 + $0x1404] ss:$8 sps:$4 sm:$0xff]  }
 0x5ca   :  { %v22329_v54 = vpack.c.bf16 %v11019_v62, %v11018_v2  ;;  %v11020_v46 = vmax.f32 %v22322_v40, 0.0  ;;  %v22333_v9 = vadd.f32 %v10985_v29, %v22282_v44  ;;  %v11149_v56 = vrot.slane %v11147_v58, 5 }
 0x5cb   :  { %v10987_v26 = vpop.f32.mrf.mxu1  ;;  %v11145_v60 = vrot.slane %v11144_v19, 4  ;;  %v11153_v47 = vrot.slane %v11151_v8, 4  ;;  %v22341_v36 = vsel %vm19517_vm10, %v16022_v15, %v11227_v37  ;;  %v22347_v3 = vsel %vm19517_vm10, %v11229_v1, %v11230_v6  ;;  %13926 = vmatpush1.bf16.msra.mxu0 %v17972_v18  ;;  %v22361_v31 = vld [vmem:[#allocation2 + $0x8] sm:$0xee] }
 0x5cc   :  { %11095 = vst [vmem:[#allocation2 + $0x18] sm:$0xff] %v22329_v54  ;;  %v11021_v44 = vmax.f32 %v22333_v9, 0.0  ;;  %v10988_v63 = vadd.f32 %v10987_v26, %v22286_v35  ;;  %v18360_v17 = vpack.c.bf16 %v11018_v2, %v11016_v43  ;;  %v18361_v51 = vpack.c.bf16 %v11019_v62, %v11017_v48  ;;  %13927 = vmatprep.subr.bf16.mxu0 %v17980_v4  ;;  %v17989_v2 = vld [vmem:[#allocation4 + $0x1564] ss:$8 sps:$4 sm:$0xff]   ;;  %v17987_v19 = vld [vmem:[#allocation4 + $0x1560] ss:$8 sps:$4 sm:$0xff]  }
 0x5cd   :  { %v10989_v21 = vpop.f32.mrf.mxu1  ;;  %v11150_v41 = vsel %vm19331_vm13, %v11145_v60, %v11149_v56  ;;  %v11154_v16 = vor.u32 %v11153_v47, %v11149_v56  ;;  %v11157_v7 = vshll.u32 %v22329_v54, 16  ;;  %v11161_v11 = vshrl.u32 %v22329_v54, 16 }
 0x5ce   :  { %v22358_v10 = vpack.c.bf16 %v11021_v44, %v11020_v46  ;;  %v11022_v35 = vmax.f32 %v10988_v63, 0.0  ;;  %v10990_v43 = vadd.f32 %v10989_v21, %v22290_v25  ;;  %13823 = vmatprep.mubr.bf16.mxu0 %v18361_v51  ;;  %v16028_v48 = vcombine.low %v11140_v49, %v11150_v41  ;;  %v17990_v51 = vld [vmem:[#allocation4 + $0x1430] ss:$8 sps:$4 sm:$0xff]  }
 0x5cf   :  { %v10993_v53 = vpop.f32.mrf.mxu1  ;;  %13824 = vmatmul.mubr.bf16.gmra.mxu0 %v18360_v17  ;;  %v16029_v20 = vcombine.high %v11140_v49, %v11150_v41  ;;  %v11155_v59 = vrot.slane %v11154_v16, 4  ;;  %v11159_v38 = vrot.slane %v11157_v7, 5  ;;  %v11163_v23 = vrot.slane %v11161_v11, 4 }
 0x5d0   :  { %11096 = vst [vmem:[#allocation2 + $0x20] sm:$0xff] %v22358_v10  ;;  %v11023_v37 = vmax.f32 %v10990_v43, 0.0  ;;  %v10994_v25 = vadd.f32 %v10993_v53, %v22294_v50  ;;  %13928 = vmatpush1.bf16.msra.mxu0 %v17978_v24  ;;  %v11167_v13 = vshll.u32 %v22358_v10, 16  ;;  %v11171_v5 = vshrl.u32 %v22358_v10, 16  ;;  %v17995_v24 = vld [vmem:[#allocation4 + $0x1554] ss:$8 sps:$4 sm:$0xff]  }
 0x5d1   :  { %v10995_v61 = vpop.f32.mrf.mxu1  ;;  %13884 = vmatprep.mubr.bf16.mxu1 %v16029_v20  ;;  %13929 = vmatprep.subr.bf16.mxu0 %v17986_v28  ;;  %v22373_v0 = vsel %vm19331_vm13, %v11155_v59, %v11159_v38  ;;  %v11164_v14 = vor.u32 %v11163_v23, %v11159_v38  ;;  %v16030_v1 = vcombine.low %v22341_v36, %v22347_v3  ;;  %v11269_v50 = vshrl.u32 %v22361_v31, 16  ;;  %v17998_v28 = vld [vmem:[#allocation4 + $0x1424] ss:$8 sps:$4 sm:$0xff]   ;;  %v17996_v20 = vld [vmem:[#allocation4 + $0x1420] ss:$8 sps:$4 sm:$0xff]  }
 0x5d2   :  { %v22378_v62 = vpack.c.bf16 %v11023_v37, %v11022_v35  ;;  %v11024_v18 = vmax.f32 %v10994_v25, 0.0  ;;  %v10996_v29 = vadd.f32 %v10995_v61, %v22298_v42  ;;  %13885 = vmatmul.mubr.bf16.vlgmr.msra.gmra.mxu1 %v16028_v48  ;;  %v11169_v4 = vrot.slane %v11167_v13, 5  ;;  %v18003_v25 = vld [vmem:[#allocation4 + $0x1544] ss:$8 sps:$4 sm:$0xff]  }
 0x5d3   :  { %v10997_v49 = vpop.f32.mrf.mxu1  ;;  %13995 = vmatpush1.bf16.msra.mxu1 %v17981_v12  ;;  %v11165_v15 = vrot.slane %v11164_v14, 4  ;;  %v11173_v9 = vrot.slane %v11171_v5, 4  ;;  %v16031_v56 = vcombine.high %v22341_v36, %v22347_v3  ;;  %v22387_v26 = vrot.slane %v11269_v50, 5  ;;  %v11627_v60 = vld [vmem:[#allocation2 + $0x18] sm:$0xff] }
 0x5d4   :  { %11097 = vst [vmem:[#allocation2 + $0x28] sm:$0xff] %v22378_v62  ;;  %v11025_v42 = vmax.f32 %v10996_v29, 0.0  ;;  %v10998_v47 = vadd.f32 %v10997_v49, %v22304_v39  ;;  %13930 = vmatpush1.bf16.msra.mxu0 %v17984_v55  ;;  %13996 = vmatprep.subr.bf16.mxu1 %v17989_v2  ;;  %v18362_v63 = vpack.c.bf16 %v11022_v35, %v11020_v46  ;;  %11634 = vst [vmem:[#allocation3 + $0x268] sm:$0xff] %v11627_v60 }
 0x5d5   :  { %v18363_v17 = vpack.c.bf16 %v11023_v37, %v11021_v44  ;;  %v10999_v21 = vpop.f32.mrf.mxu1  ;;  %13931 = vmatprep.subr.bf16.mxu0 %v17992_v45  ;;  %v11170_v41 = vsel %vm19331_vm13, %v11165_v15, %v11169_v4  ;;  %v11174_v16 = vor.u32 %v11173_v9, %v11169_v4  ;;  %v11177_v43 = vshll.u32 %v22378_v62, 16  ;;  %v17993_v44 = vld [vmem:[#allocation4 + $0x1550] ss:$8 sps:$4 sm:$0xff]  }
 0x5d6   :  { %v11181_v39 = vshrl.u32 %v22378_v62, 16  ;;  %v16596_v48 = vpack.c.bf16 %v11025_v42, %v11024_v18  ;;  %v11026_v12 = vmax.f32 %v10998_v47, 0.0  ;;  %v11000_v40 = vadd.f32 %v10999_v21, %v22307_v34  ;;  %v11117_v21 = vld [vmem:[#allocation3 + $0x240] sm:$0x11] }
 0x5d7   :  { %13833 = vmatprep.mubr.bf16.mxu0 %v18363_v17  ;;  %v16046_v46 = vcombine.low %v22373_v0, %v11170_v41  ;;  %v11003_v35 = vpop.f32.mrf.mxu1  ;;  %13997 = vmatpush1.bf16.msra.mxu1 %v17987_v19  ;;  %v16047_v53 = vcombine.high %v22373_v0, %v11170_v41  ;;  %v11175_v55 = vrot.slane %v11174_v16, 4  ;;  %v11179_v59 = vrot.slane %v11177_v43, 5  ;;  %v22404_v23 = vld [vmem:[#allocation2 + $0x20] sm:$0xff]  ;;  %v18001_v19 = vld [vmem:[#allocation4 + $0x1540] ss:$8 sps:$4 sm:$0xff]  }
 0x5d8   :  { %13834 = vmatmul.mubr.bf16.gmra.mxu0 %v18362_v63  ;;  %v11183_v38 = vrot.slane %v11181_v39, 4  ;;  %11098 = vst [vmem:[#allocation2 + $0x30] sm:$0xff] %v16596_v48  ;;  %v11027_v34 = vmax.f32 %v11000_v40, 0.0  ;;  %v11004_v37 = vadd.f32 %v11003_v35, %v22309_v33  ;;  %13998 = vmatprep.subr.bf16.mxu1 %v17995_v24  ;;  %v11272_v2 = vshll.u32 %v22361_v31, 16  ;;  %11635 = vst [vmem:[#allocation3 + $0x370] sm:$0xff] %v22404_v23 }
 0x5d9   :  { %13932 = vmatpush1.bf16.msra.mxu0 %v17990_v51  ;;  %v11280_v61 = vrot.slane %v11151_v8, 5  ;;  %v11005_v45 = vpop.f32.mrf.mxu1  ;;  %13894 = vmatprep.mubr.bf16.mxu1 %v16047_v53  ;;  %v18006_v0 = vld [vmem:[#allocation4 + $0x1414] ss:$8 sps:$4 sm:$0xff]   ;;  %v22413_v14 = vsel %vm19331_vm13, %v11175_v55, %v11179_v59  ;;  %v11283_v33 = vrot.slane %v11147_v58, 6  ;;  %v11290_v31 = vrot.slane %v11161_v11, 5 }
 0x5da   :  { %13933 = vmatprep.subr.bf16.mxu0 %v17998_v28  ;;  %v11184_v50 = vor.u32 %v11183_v38, %v11179_v59  ;;  %v16597_v18 = vpack.c.bf16 %v11027_v34, %v11026_v12  ;;  %v11028_v29 = vmax.f32 %v11004_v37, 0.0  ;;  %v11006_v8 = vadd.f32 %v11005_v45, %v22311_v57  ;;  %13895 = vmatmul.mubr.bf16.gmra.mxu1 %v16046_v46  ;;  %v18004_v57 = vld [vmem:[#allocation4 + $0x1410] ss:$8 sps:$4 sm:$0xff]   ;;  %v18009_v63 = vld [vmem:[#allocation4 + $0x1534] ss:$8 sps:$4 sm:$0xff]  }
 0x5db   :  { %v11274_v4 = vrot.slane %v11272_v2, 6  ;;  %v11007_v49 = vpop.f32.mrf.mxu1  ;;  %13999 = vmatpush1.bf16.msra.mxu1 %v17993_v44  ;;  %v11284_v9 = vor.u32 %v11283_v33, %v11280_v61  ;;  %v11293_v60 = vrot.slane %v11157_v7, 6  ;;  %v11232_v58 = vrot.slane %v11230_v6, 4  ;;  %v11629_v42 = vld [vmem:[#allocation2 + $0x28] sm:$0xff]  ;;  %v18007_v7 = vld [vmem:[#allocation4 + $0x1530] ss:$8 sps:$4 sm:$0xff]  }
 0x5dc   :  { %v22420_v15 = vrot.slane %v11184_v50, 4  ;;  %11099 = vst [vmem:[#allocation2 + $0x38] sm:$0xff] %v16597_v18  ;;  %v11029_v11 = vmax.f32 %v11006_v8, 0.0  ;;  %v11008_v47 = vadd.f32 %v11007_v49, %v22313_v32  ;;  %14000 = vmatprep.subr.bf16.mxu1 %v18003_v25  ;;  %v11233_v51 = vrot.slane %v22329_v54, 5  ;;  %11636 = vst [vmem:[#allocation3 + $0x1d0] sm:$0xff] %v11629_v42 }
 0x5dd   :  { %13934 = vmatpush1.bf16.msra.mxu0 %v17996_v20  ;;  %v11275_v17 = vor.u32 %v11274_v4, %v22387_v26  ;;  %v11009_v24 = vpop.f32.mrf.mxu1  ;;  %v11286_v6 = vrot.slane %v11284_v9, 4  ;;  %v22429_v41 = vor.u32 %v11293_v60, %v11290_v31  ;;  %v11236_v28 = vrot.slane %v22358_v10, 5  ;;  %v18012_v26 = vld [vmem:[#allocation4 + $0x1400] ss:$8 sps:$4 sm:$0xff]   ;;  %v18017_v40 = vld [vmem:[#allocation4 + $0x1524] ss:$8 sps:$4 sm:$0xff]  }
 0x5de   :  { %13935 = vmatprep.subr.bf16.mxu0 %v18006_v0  ;;  %v11239_v32 = vrot.slane %v22378_v62, 5  ;;  %v16598_v16 = vpack.c.bf16 %v11029_v11, %v11028_v29  ;;  %v11030_v48 = vmax.f32 %v11008_v47, 0.0  ;;  %v11010_v12 = vadd.f32 %v11009_v24, %v22316_v30  ;;  %v11208_v61 = vld [vmem:[#allocation3 + $0x98] sm:$0x11]  ;;  %v11101_v8 = vld [vmem:[#allocation2 + $0x48] sm:$0x11] }
 0x5df   :  { %v11276_v54 = vrot.slane %v11275_v17, 4  ;;  %v11110_v46 = vld [vmem:[#allocation2 + $0x30] sm:$0x11]  ;;  %14001 = vmatpush1.bf16.msra.mxu1 %v18001_v19  ;;  %v22437_v53 = vsel %vm19574_vm11, %v11286_v6, %v22429_v41  ;;  %v22441_v20 = vsel %vm19517_vm10, %v11232_v58, %v11233_v51  ;;  %v11235_v55 = vrot.slane %v11233_v51, 4  ;;  %v18020_v45 = vld [vmem:[#allocation4 + $0x14f4] ss:$8 sps:$4 sm:$0xff]  }
 0x5e0   :  { %v11126_v44 = vld [vmem:[#allocation2 + $0x30] sm:$0x11]  ;;  %v11238_v59 = vrot.slane %v11236_v28, 4  ;;  %11100 = vst [vmem:[#allocation2 + $0x40] sm:$0xff] %v16598_v16  ;;  %v11031_v38 = vmax.f32 %v11010_v12, 0.0  ;;  %v11118_v34 = vsel %vm19740_vm12, %v11110_v46, %v11117_v21  ;;  %14002 = vmatprep.subr.bf16.mxu1 %v18009_v63  ;;  %v11241_v31 = vrot.slane %v11239_v32, 4 }
 0x5e1   :  { %v11187_v37 = vshll.u32 %v11126_v44, 16  ;;  %13936 = vmatpush1.bf16.msra.mxu0 %v18004_v57  ;;  %v11191_v25 = vshrl.u32 %v11126_v44, 16  ;;  %v11217_v2 = vld [vmem:[#allocation2 + $0x30] sm:$0x33]  ;;  %11119 = vst [vmem:[#allocation3 + $0x240] sm:$0x11] %v11118_v34  ;;  %v22447_v0 = vsel %vm19574_vm11, %v11276_v54, %v11284_v9  ;;  %v22451_v50 = vsel %vm19517_vm10, %v11235_v55, %v11236_v28 }
 0x5e2   :  { %13937 = vmatprep.subr.bf16.mxu0 %v18014_v22  ;;  %v22455_v33 = vsel %vm19517_vm10, %v11238_v59, %v11239_v32  ;;  %v22457_v18 = vld [vmem:[#allocation2 + $0x30] sm:$0xff]  ;;  %v16599_v29 = vpack.c.bf16 %v11031_v38, %v11030_v48  ;;  %v18018_v60 = vld [vmem:[#allocation4 + $0x14f0] ss:$8 sps:$4 sm:$0xff]   ;;  %v18023_v58 = vld [vmem:[#allocation4 + $0x1514] ss:$8 sps:$4 sm:$0xff]   ;;  %v16033_v42 = vcombine.high %v22447_v0, %v22437_v53  ;;  %v16049_v47 = vcombine.high %v22441_v20, %v22451_v50 }
 0x5e3   :  { %v11189_v4 = vrot.slane %v11187_v37, 5  ;;  %v11209_v49 = vsel %vm19740_vm12, %v11191_v25, %v11208_v61  ;;  %v18015_v19 = vld [vmem:[#allocation4 + $0x1520] ss:$8 sps:$4 sm:$0xff]   ;;  %11637 = vst [vmem:[#allocation3 + $0x130] sm:$0xff] %v22457_v18  ;;  %14003 = vmatpush1.bf16.msra.mxu1 %v18007_v7  ;;  %v11242_v57 = vrot.slane %v11217_v2, 5  ;;  %v22470_v63 = vld [vmem:[#allocation2 + $0x38] sm:$0xff] }
 0x5e4   :  { %11210 = vst [vmem:[#allocation3 + $0x98] sm:$0x11] %v11209_v49  ;;  %v11102_v17 = vsel %vm19740_vm12, %v16599_v29, %v11101_v8  ;;  %14004 = vmatprep.subr.bf16.mxu1 %v18017_v40  ;;  %v18026_v24 = vld [vmem:[#allocation4 + $0x14e4] ss:$8 sps:$4 sm:$0xff]   ;;  %v11296_v21 = vrot.slane %v22429_v41, 4  ;;  %v11300_v7 = vrot.slane %v11171_v5, 5 }
 0x5e5   :  { %v11190_v51 = vsel %vm19331_vm13, %v22420_v15, %v11189_v4  ;;  %13938 = vmatpush1.bf16.msra.mxu0 %v18012_v26  ;;  %v22480_v22 = vld [vmem:[#allocation2 + $0x30] sm:$0xff]  ;;  %11638 = vst [vmem:[#allocation3 + $0xd0] sm:$0xff] %v22470_v63  ;;  %11103 = vst [vmem:[#allocation2 + $0x48] sm:$0x11] %v11102_v17  ;;  %v22487_v27 = vsel %vm19517_vm10, %v11241_v31, %v11242_v57  ;;  %v11244_v15 = vrot.slane %v11242_v57, 4  ;;  %v11303_v12 = vrot.slane %v11167_v13, 6 }
 0x5e6   :  { %v16064_v6 = vcombine.low %v22413_v14, %v11190_v51  ;;  %v16065_v28 = vcombine.high %v22413_v14, %v11190_v51  ;;  %13939 = vmatprep.subr.bf16.mxu0 %v18020_v45  ;;  %v11267_v32 = vld [vmem:[#allocation2 + $0x38] sm:$0x33]  ;;  %v22489_v41 = vld [vmem:[#allocation2 + $0x8] sm:$0xcc]  ;;  %v11310_v14 = vrot.slane %v11181_v39, 5  ;;  %v11313_v40 = vrot.slane %v11177_v43, 6 }
 0x5e7   :  { %v18021_v16 = vld [vmem:[#allocation4 + $0x1510] ss:$8 sps:$4 sm:$0xff]   ;;  %14005 = vmatpush1.bf16.msra.mxu1 %v18015_v19  ;;  %v18029_v26 = vld [vmem:[#allocation4 + $0x1504] ss:$8 sps:$4 sm:$0xff]   ;;  %v11259_v54 = vsel %vm19740_vm12, %v11244_v15, %v11258_v52  ;;  %v11318_v46 = vshrl.u32 %v22480_v22, 16  ;;  %v11321_v44 = vshll.u32 %v22480_v22, 16  ;;  %v11304_v13 = vor.u32 %v11303_v12, %v11300_v7 }
 0x5e8   :  { %13904 = vmatprep.mubr.bf16.mxu1 %v16065_v28  ;;  %v22505_v55 = vld [vmem:[#allocation2 + $0x40] sm:$0xff]  ;;  %11260 = vst [vmem:[#allocation3 + $0xe0] sm:$0x11] %v11259_v54  ;;  %v11328_v39 = vshrl.u32 %v11267_v32, 16  ;;  %v11331_v59 = vshll.u32 %v11267_v32, 16  ;;  %v16023_v38 = vrot.slane %v22489_v41, 10  ;;  %14006 = vmatprep.subr.bf16.mxu1 %v18023_v58  ;;  %v11314_v37 = vor.u32 %v11313_v40, %v11310_v14 }
 0x5e9   :  { %v11697_v10 = vld [vmem:[#allocation3 + $0x240] sm:$0x11]  ;;  %13905 = vmatmul.mubr.bf16.gmra.mxu1 %v16064_v6  ;;  %13940 = vmatpush2.bf16.msra.mxu0 %v18018_v60  ;;  %11639 = vst [vmem:[#allocation3 + $0x190] sm:$0xff] %v22505_v55  ;;  %v18024_v34 = vld [vmem:[#allocation4 + $0x14e0] ss:$8 sps:$4 sm:$0xff]   ;;  %v11320_v25 = vrot.slane %v11318_v46, 5  ;;  %v22517_v31 = vsel %vm19574_vm11, %v11296_v21, %v11304_v13 }
 0x5ea   :  { %v16080_v62 = vcombine.low %v11697_v10, %v11697_v10  ;;  %v16081_v43 = vcombine.high %v11697_v10, %v11697_v10  ;;  %13941 = vmatprep.subr.bf16.mxu0 %v18026_v24  ;;  %v22511_v2 = vld [vmem:[#allocation2 + $0x10] sm:$0xff]  ;;  %v22513_v61 = vld [vmem:[#allocation2 + $0x18] sm:$0xff]  ;;  %v11306_v29 = vrot.slane %v11304_v13, 4  ;;  %v11323_v8 = vrot.slane %v11321_v44, 6  ;;  %v11403_v28 = vld [vmem:[#allocation2 + $0x8] sm:$0xcc] }
 0x5eb   :  { %v11698_v45 = vld [vmem:[#allocation3 + $0x98] sm:$0x11]  ;;  %v11330_v4 = vrot.slane %v11328_v39, 5  ;;  %14007 = vmatpush1.bf16.msra.mxu1 %v18021_v16  ;;  %v18027_v60 = vld [vmem:[#allocation4 + $0x1500] ss:$8 sps:$4 sm:$0xff]   ;;  %v11316_v57 = vrot.slane %v11314_v37, 4 }
 0x5ec   :  { %13843 = vmatprep.mubr.bf16.mxu0 %v16081_v43  ;;  %v16082_v49 = vcombine.low %v11698_v45, %v11698_v45  ;;  %v16083_v19 = vcombine.high %v11698_v45, %v11698_v45  ;;  %v18032_v58 = vld [vmem:[#allocation4 + $0x14d4] ss:$8 sps:$4 sm:$0xff]   ;;  %v11333_v17 = vrot.slane %v11331_v59, 6  ;;  %14008 = vmatprep.subr.bf16.mxu1 %v18029_v26  ;;  %v22523_v24 = vsel %vm19574_vm11, %v11306_v29, %v11314_v37  ;;  %v11350_v12 = vld [vmem:[#allocation3 + $0x2b0] sm:$0x11] }
 0x5ed   :  { %13844 = vmatmul.mubr.bf16.gmra.mxu0 %v16080_v62  ;;  %v18035_v51 = vld [vmem:[#allocation4 + $0x15f4] ss:$8 sps:$4 sm:$0xff]   ;;  %v11324_v21 = vor.u32 %v11323_v8, %v11320_v25  ;;  %v11369_v7 = vrot.slane %v22511_v2, 6  ;;  %v11372_v6 = vrot.slane %v22513_v61, 6  ;;  %v11336_v16 = vrot.slane %v11330_v4, 4  ;;  %v22557_v8 = vld [vmem:[#allocation2 + $0x28] sm:$0xff] }
 0x5ee   :  { %13955 = vmatprep.mubr.bf16.mxu0 %v16031_v56  ;;  %13914 = vmatprep.mubr.bf16.mxu1 %v16083_v19  ;;  %v11334_v41 = vor.u32 %v11333_v17, %v11330_v4  ;;  %v18030_v14 = vld [vmem:[#allocation4 + $0x14d0] ss:$8 sps:$4 sm:$0xff]   ;;  %v18038_v13 = vld [vmem:[#allocation4 + $0x14c4] ss:$8 sps:$4 sm:$0xff]   ;;  %v11411_v59 = vshrl.u32 %v11403_v28, 16  ;;  %v11414_v62 = vshll.u32 %v11403_v28, 16 }
 0x5ef   :  { %13942 = vmatpush2.bf16.msra.mxu0 %v18024_v34  ;;  %v18033_v52 = vld [vmem:[#allocation4 + $0x15f0] ss:$8 sps:$4 sm:$0xff]   ;;  %v22536_v26 = vsel %vm19574_vm11, %v11316_v57, %v11324_v21  ;;  %v11326_v40 = vrot.slane %v11324_v21, 4  ;;  %v22540_v56 = vsel %vm20107_vm3, %v16023_v38, %v11369_v7  ;;  %v11371_v10 = vrot.slane %v11369_v7, 4  ;;  %14009 = vmatpush1.bf16.msra.mxu1 %v18027_v60  ;;  %v18041_v34 = vld [vmem:[#allocation4 + $0x15e4] ss:$8 sps:$4 sm:$0xff]  }
 0x5f0   :  { %13943 = vmatprep.subr.bf16.mxu0 %v18032_v58  ;;  %v11351_v39 = vsel %vm19740_vm12, %v11336_v16, %v11350_v12  ;;  %v11420_v43 = vshrl.u32 %v22511_v2, 16  ;;  %14010 = vmatprep.subr.bf16.mxu1 %v18035_v51  ;;  %v11423_v38 = vshll.u32 %v22511_v2, 16  ;;  %v18036_v25 = vld [vmem:[#allocation4 + $0x14c0] ss:$8 sps:$4 sm:$0xff]   ;;  %v11413_v29 = vrot.slane %v11411_v59, 6 }
 0x5f1   :  { %13915 = vmatmul.mubr.bf16.gmra.mxu1 %v16082_v49  ;;  %v22547_v37 = vsel %vm19574_vm11, %v11326_v40, %v11334_v41  ;;  %11352 = vst [vmem:[#allocation3 + $0x2b0] sm:$0x11] %v11351_v39  ;;  %v22555_v45 = vsel %vm20107_vm3, %v11371_v10, %v11372_v6  ;;  %v18039_v4 = vld [vmem:[#allocation4 + $0x15e0] ss:$8 sps:$4 sm:$0xff]   ;;  %v11416_v49 = vrot.slane %v11414_v62, 7  ;;  %v11430_v58 = vshrl.u32 %v22513_v61, 16 }
 0x5f2   :  { %14026 = vmatprep.mubr.bf16.mxu1 %v16033_v42  ;;  %v11422_v19 = vrot.slane %v11420_v43, 6  ;;  %v11359_v2 = vld [vmem:[#allocation2 + $0x38] sm:$0x77]  ;;  %v11425_v42 = vrot.slane %v11423_v38, 7  ;;  %v11433_v57 = vshll.u32 %v22513_v61, 16  ;;  %v11374_v17 = vrot.slane %v11372_v6, 4 }
 0x5f3   :  { %13944 = vmatpush2.bf16.msra.mxu0 %v18030_v14  ;;  %14011 = vmatpush2.bf16.msra.mxu1 %v18033_v52  ;;  %v18044_v60 = vld [vmem:[#allocation4 + $0x14b4] ss:$8 sps:$4 sm:$0xff]   ;;  %v11417_v21 = vor.u32 %v11416_v49, %v11413_v29  ;;  %v11375_v7 = vrot.slane %v22404_v23, 6  ;;  %v11378_v28 = vrot.slane %v22557_v8, 6  ;;  %v11381_v41 = vrot.slane %v22480_v22, 6 }
 0x5f4   :  { %13945 = vmatprep.subr.bf16.mxu0 %v18038_v13  ;;  %14012 = vmatprep.subr.bf16.mxu1 %v18041_v34  ;;  %v18047_v51 = vld [vmem:[#allocation4 + $0x15d4] ss:$8 sps:$4 sm:$0xff]   ;;  %v11426_v16 = vor.u32 %v11425_v42, %v11422_v19  ;;  %v11432_v12 = vrot.slane %v11430_v58, 6  ;;  %v11435_v14 = vrot.slane %v11433_v57, 7  ;;  %v11384_v52 = vrot.slane %v11359_v2, 6 }
 0x5f5   :  { %v18042_v40 = vld [vmem:[#allocation4 + $0x14b0] ss:$8 sps:$4 sm:$0xff]   ;;  %v11418_v6 = vrot.slane %v11417_v21, 4  ;;  %v22572_v10 = vsel %vm20107_vm3, %v11374_v17, %v11375_v7  ;;  %v11377_v13 = vrot.slane %v11375_v7, 4  ;;  %v18050_v59 = vld [vmem:[#allocation4 + $0x14a4] ss:$8 sps:$4 sm:$0xff]  }
 0x5f6   :  { %v18045_v39 = vld [vmem:[#allocation4 + $0x15d0] ss:$8 sps:$4 sm:$0xff]   ;;  %v11428_v62 = vrot.slane %v11426_v16, 4  ;;  %v11436_v43 = vor.u32 %v11435_v14, %v11432_v12  ;;  %v11380_v34 = vrot.slane %v11378_v28, 4  ;;  %v18053_v38 = vld [vmem:[#allocation4 + $0x15c4] ss:$8 sps:$4 sm:$0xff]  }
 0x5f7   :  { %13946 = vmatpush2.bf16.msra.mxu0 %v18036_v25  ;;  %14013 = vmatpush2.bf16.msra.mxu1 %v18039_v4  ;;  %v22576_v49 = vsel %vm19338_vm14, %v11418_v6, %v11426_v16  ;;  %v22580_v25 = vsel %vm20107_vm3, %v11377_v13, %v11378_v28  ;;  %v11383_v19 = vrot.slane %v11381_v41, 4  ;;  %v11386_v2 = vrot.slane %v11384_v52, 4  ;;  %v18048_v42 = vld [vmem:[#allocation4 + $0x14a0] ss:$8 sps:$4 sm:$0xff]   ;;  %v11400_v21 = vld [vmem:[#allocation3 + $0x1b8] sm:$0x11] }
 0x5f8   :  { %13947 = vmatprep.subr.bf16.mxu0 %v18044_v60  ;;  %14014 = vmatprep.subr.bf16.mxu1 %v18047_v51  ;;  %v22584_v4 = vsel %vm19338_vm14, %v11428_v62, %v11436_v43  ;;  %v22592_v51 = vsel %vm20107_vm3, %v11380_v34, %v11381_v41  ;;  %v18051_v7 = vld [vmem:[#allocation4 + $0x15c0] ss:$8 sps:$4 sm:$0xff]   ;;  %v11438_v12 = vrot.slane %v11436_v43, 4  ;;  %v11409_v14 = vld [vmem:[#allocation2 + $0x38] sm:$0x77]  ;;  %v11443_v62 = vshll.u32 %v22404_v23, 16 }
 0x5f9   :  { %v22598_v16 = vsel %vm20107_vm3, %v11383_v19, %v11384_v52  ;;  %v18056_v6 = vld [vmem:[#allocation4 + $0x1494] ss:$8 sps:$4 sm:$0xff]   ;;  %v11495_v34 = vld [vmem:[#allocation2 + $0x10] sm:$0x88]  ;;  %v11450_v52 = vshrl.u32 %v22557_v8, 16  ;;  %v11453_v43 = vshll.u32 %v22557_v8, 16 }
 0x5fa   :  { %v18059_v54 = vld [vmem:[#allocation4 + $0x15b4] ss:$8 sps:$4 sm:$0xff]   ;;  %v18054_v19 = vld [vmem:[#allocation4 + $0x1490] ss:$8 sps:$4 sm:$0xff]   ;;  %v11445_v28 = vrot.slane %v11443_v62, 7  ;;  %v11470_v41 = vshrl.u32 %v11409_v14, 16 }
 0x5fb   :  { %13948 = vmatpush2.bf16.msra.mxu0 %v18042_v40  ;;  %14015 = vmatpush2.bf16.msra.mxu1 %v18045_v39  ;;  %v11440_v40 = vshrl.u32 %v22404_v23, 16  ;;  %v11401_v39 = vsel %vm19740_vm12, %v11386_v2, %v11400_v21  ;;  %v11452_v60 = vrot.slane %v11450_v52, 6  ;;  %v11455_v2 = vrot.slane %v11453_v43, 7  ;;  %v18057_v35 = vld [vmem:[#allocation4 + $0x15b0] ss:$8 sps:$4 sm:$0xff]  }
 0x5fc   :  { %13949 = vmatprep.subr.bf16.mxu0 %v18050_v59  ;;  %14016 = vmatprep.subr.bf16.mxu1 %v18053_v38  ;;  %v11462_v59 = vrot.slane %v11318_v46, 6  ;;  %11402 = vst [vmem:[#allocation3 + $0x1b8] sm:$0x11] %v11401_v39  ;;  %v11465_v38 = vrot.slane %v11321_v44, 7  ;;  %v11473_v21 = vshll.u32 %v11409_v14, 16  ;;  %v16024_v17 = vrot.slane %v11495_v34, 11 }
 0x5fd   :  { %v11442_v13 = vrot.slane %v11440_v40, 6  ;;  %v11545_v46 = vld [vmem:[#allocation2 + $0x10] sm:$0x88]  ;;  %v11472_v32 = vrot.slane %v11470_v41, 6  ;;  %v11511_v22 = vrot.slane %v22513_v61, 7  ;;  %v11514_v48 = vrot.slane %v22404_v23, 7 }
 0x5fe   :  { %v18062_v15 = vld [vmem:[#allocation4 + $0x1484] ss:$8 sps:$4 sm:$0xff]   ;;  %v11466_v39 = vor.u32 %v11465_v38, %v11462_v59  ;;  %v11475_v9 = vrot.slane %v11473_v21, 7  ;;  %v18060_v11 = vld [vmem:[#allocation4 + $0x1480] ss:$8 sps:$4 sm:$0xff]  }
 0x5ff   :  { %13950 = vmatpush2.bf16.msra.mxu0 %v18048_v42  ;;  %14017 = vmatpush2.bf16.msra.mxu1 %v18051_v7  ;;  %v11446_v5 = vor.u32 %v11445_v28, %v11442_v13  ;;  %v18065_v44 = vld [vmem:[#allocation4 + $0x15a4] ss:$8 sps:$4 sm:$0xff]   ;;  %v11456_v42 = vor.u32 %v11455_v2, %v11452_v60  ;;  %v22628_v34 = vsel %vm20361_vm4, %v16024_v17, %v11511_v22  ;;  %v11553_v28 = vshrl.u32 %v11545_v46, 16  ;;  %v18063_v13 = vld [vmem:[#allocation4 + $0x15a0] ss:$8 sps:$4 sm:$0xff]  }
 0x600   :  { %13951 = vmatprep.subr.bf16.mxu0 %v18056_v6  ;;  %14018 = vmatprep.subr.bf16.mxu1 %v18059_v54  ;;  %v11468_v54 = vrot.slane %v11466_v39, 4  ;;  %v11476_v59 = vor.u32 %v11475_v9, %v11472_v32  ;;  %v11478_v60 = vrot.slane %v11472_v32, 4  ;;  %v18068_v38 = vld [vmem:[#allocation4 + $0x1674] ss:$8 sps:$4 sm:$0xff]   ;;  %v22636_v17 = vrot.slane %v11440_v40, 7 }
 0x601   :  { %v22624_v14 = vsel %vm19338_vm14, %v11438_v12, %v11446_v5  ;;  %v11448_v7 = vrot.slane %v11446_v5, 4  ;;  %v11458_v41 = vrot.slane %v11456_v42, 4  ;;  %v11513_v12 = vrot.slane %v11511_v22, 4  ;;  %v11492_v40 = vld [vmem:[#allocation3 + $0x220] sm:$0x11] }
 0x602   :  { %v11560_v5 = vrot.slane %v11430_v58, 7  ;;  %v22648_v32 = vsel %vm19338_vm14, %v11468_v54, %v11476_v59  ;;  %v18066_v46 = vld [vmem:[#allocation4 + $0x1670] ss:$8 sps:$4 sm:$0xff]   ;;  %v11572_v59 = vor.u32 %v22636_v17, %v11443_v62  ;;  %v11523_v62 = vrot.slane %v22470_v63, 7  ;;  %v11640_v6 = vld [vmem:[#allocation3 + $0x2e8] sm:$0x11] }
 0x603   :  { %13952 = vmatpush2.bf16.msra.mxu0 %v18054_v19  ;;  %14019 = vmatpush2.bf16.msra.mxu1 %v18057_v35  ;;  %v22632_v2 = vsel %vm19338_vm14, %v11448_v7, %v11456_v42  ;;  %v18071_v19 = vld [vmem:[#allocation4 + $0x1594] ss:$8 sps:$4 sm:$0xff]   ;;  %v22656_v22 = vsel %vm20361_vm4, %v11513_v12, %v11514_v48  ;;  %v18069_v42 = vld [vmem:[#allocation4 + $0x1590] ss:$8 sps:$4 sm:$0xff]   ;;  %v18074_v7 = vld [vmem:[#allocation4 + $0x1664] ss:$8 sps:$4 sm:$0xff]  }
 0x604   :  { %13953 = vmatprep.subr.bf16.mxu0 %v18062_v15  ;;  %14020 = vmatprep.subr.bf16.mxu1 %v18065_v44  ;;  %v16054_v21 = vcombine.low %v22624_v14, %v22632_v2  ;;  %v16055_v9 = vcombine.high %v22624_v14, %v22632_v2  ;;  %v22644_v15 = vsel %vm19338_vm14, %v11458_v41, %v11466_v39  ;;  %v16025_v44 = vrot.slane %v11553_v28, 11  ;;  %v18077_v28 = vld [vmem:[#allocation4 + $0x1584] ss:$8 sps:$4 sm:$0xff]   ;;  %v18207_v14 = vld [vmem:[#allocation4 + $0x1930] ss:$8 sps:$4 sm:$0xff]  }
 0x605   :  { %v16072_v35 = vcombine.low %v22644_v15, %v22648_v32  ;;  %v16073_v58 = vcombine.high %v22644_v15, %v22648_v32  ;;  %v11493_v39 = vsel %vm19740_vm12, %v11478_v60, %v11492_v40  ;;  %v11563_v29 = vor.u32 %v11560_v5, %v11433_v57  ;;  %v18080_v40 = vld [vmem:[#allocation4 + $0x1654] ss:$8 sps:$4 sm:$0xff]   ;;  %v18214_v2 = vld [vmem:[#allocation4 + $0x1804] ss:$8 sps:$4 sm:$0xff]   ;;  %v18221_v15 = vld [vmem:[#allocation4 + $0x1910] ss:$8 sps:$4 sm:$0xff]  }
 0x606   :  { %v16038_v41 = vcombine.low %v22628_v34, %v22656_v22  ;;  %11494 = vst [vmem:[#allocation3 + $0x220] sm:$0x11] %v11493_v39  ;;  %v11565_v54 = vrot.slane %v11560_v5, 4  ;;  %v11517_v60 = vrot.slane %v22557_v8, 7  ;;  %v11526_v12 = vrot.slane %v22505_v55, 7 }
 0x607   :  { %13954 = vmatpush2.bf16.msra.mxu0 %v18060_v11  ;;  %14021 = vmatpush2.bf16.msra.mxu1 %v18063_v13  ;;  %v16039_v11 = vcombine.high %v22628_v34, %v22656_v22  ;;  %v22671_v57 = vsel %vm20197_vm0, %v16025_v44, %v11563_v29  ;;  %v11516_v13 = vrot.slane %v11514_v48, 4  ;;  %v18072_v48 = vld [vmem:[#allocation4 + $0x1660] ss:$8 sps:$4 sm:$0xff]   ;;  %v11525_v44 = vrot.slane %v11523_v62, 4  ;;  %v18226_v32 = vld [vmem:[#allocation4 + $0x18e4] ss:$8 sps:$4 sm:$0xff]  }
 0x608   :  { %14065 = vmatprep.subr.bf16.mxu0 %v18068_v38  ;;  %14022 = vmatprep.subr.bf16.mxu1 %v18071_v19  ;;  %v11520_v38 = vrot.slane %v22457_v18, 7  ;;  %v22680_v23 = vsel %vm20197_vm0, %v11565_v54, %v11572_v59  ;;  %v18075_v19 = vld [vmem:[#allocation4 + $0x1580] ss:$8 sps:$4 sm:$0xff]   ;;  %v11528_v29 = vrot.slane %v11526_v12, 4  ;;  %v18089_v54 = vld [vmem:[#allocation4 + $0x1764] ss:$8 sps:$4 sm:$0xff]   ;;  %v23824_v5 = vcombine.low %v22447_v0, %v22437_v53 }
 0x609   :  { %v16041_v36 = vcombine.high %v22671_v57, %v22680_v23  ;;  %v22693_v3 = vsel %vm20361_vm4, %v11516_v13, %v11517_v60  ;;  %v22711_v13 = vsel %vm20361_vm4, %v11525_v44, %v11526_v12  ;;  %v18081_v12 = vld [vmem:[#allocation4 + $0x1770] ss:$8 sps:$4 sm:$0xff]   ;;  %v18086_v44 = vld [vmem:[#allocation4 + $0x1644] ss:$8 sps:$4 sm:$0xff]   ;;  %v11606_v53 = vshll.u32 %v22505_v55, 16 }
 0x60a   :  { %13956 = vmatmul.mubr.bf16.vlgmr.msra.gmra.mxu0 %v16030_v1  ;;  %v11519_v1 = vrot.slane %v11517_v60, 4  ;;  %v11522_v39 = vrot.slane %v11520_v38, 4  ;;  %v18087_v0 = vld [vmem:[#allocation4 + $0x1760] ss:$8 sps:$4 sm:$0xff]  }
 0x60b   :  { %13965 = vmatprep.mubr.bf16.mxu0 %v16049_v47  ;;  %14066 = vmatpush1.bf16.msra.mxu0 %v18066_v46  ;;  %v18083_v47 = vld [vmem:[#allocation4 + $0x1774] ss:$8 sps:$4 sm:$0xff]  }
 0x60c   :  { %14023 = vmatpush2.bf16.msra.mxu1 %v18069_v42  ;;  %14067 = vmatprep.subr.bf16.mxu0 %v18074_v7  ;;  %v22697_v46 = vsel %vm20361_vm4, %v11519_v1, %v11520_v38  ;;  %v11542_v7 = vld [vmem:[#allocation3 + $0x1f8] sm:$0x11]  ;;  %v11603_v38 = vshrl.u32 %v22505_v55, 16 }
 0x60d   :  { %14024 = vmatprep.subr.bf16.mxu1 %v18077_v28  ;;  %v16057_v42 = vcombine.high %v22693_v3, %v22697_v46  ;;  %v22707_v28 = vsel %vm20361_vm4, %v11522_v39, %v11523_v62  ;;  %v11543_v60 = vsel %vm19740_vm12, %v11528_v29, %v11542_v7  ;;  %v18078_v1 = vld [vmem:[#allocation4 + $0x1650] ss:$8 sps:$4 sm:$0xff]   ;;  %v11578_v62 = vrot.slane %v11450_v52, 7  ;;  %v11633_v39 = vld [vmem:[#allocation2 + $0x48] sm:$0x11] }
 0x60e   :  { %11544 = vst [vmem:[#allocation3 + $0x1f8] sm:$0x11] %v11543_v60  ;;  %v11585_v7 = vshrl.u32 %v22457_v18, 16  ;;  %v11574_v52 = vrot.slane %v22636_v17, 4  ;;  %v11641_v8 = vsel %vm19740_vm12, %v11633_v39, %v11640_v6 }
 0x60f   :  { %14068 = vmatpush1.bf16.msra.mxu0 %v18072_v48  ;;  %v11581_v60 = vor.u32 %v11578_v62, %v11453_v43  ;;  %v23823_v48 = vcombine.high %v22455_v33, %v22487_v27  ;;  %v18084_v43 = vld [vmem:[#allocation4 + $0x1640] ss:$8 sps:$4 sm:$0xff]   ;;  %11642 = vst [vmem:[#allocation3 + $0x2e8] sm:$0x11] %v11641_v8 }
 0x610   :  { %14025 = vmatpush2.bf16.msra.mxu1 %v18075_v19  ;;  %14069 = vmatprep.subr.bf16.mxu0 %v18080_v40  ;;  %v11594_v19 = vshrl.u32 %v22470_v63, 16  ;;  %v23822_v40 = vcombine.low %v22441_v20, %v22451_v50  ;;  %v11587_v20 = vrot.slane %v11585_v7, 7  ;;  %v11583_v7 = vrot.slane %v11578_v62, 4 }
 0x611   :  { %14136 = vmatprep.subr.bf16.mxu1 %v18083_v47  ;;  %v11588_v47 = vshll.u32 %v22457_v18, 16  ;;  %v23825_v18 = vcombine.high %v22517_v31, %v22523_v24  ;;  %v22747_v17 = vsel %vm20197_vm0, %v11574_v52, %v11581_v60  ;;  %v11624_v60 = vld [vmem:[#allocation3 + $0x60] sm:$0x11] }
 0x612   :  { %13966 = vmatmul.mubr.bf16.gmra.mxu0 %v23822_v40  ;;  %v11596_v50 = vrot.slane %v11594_v19, 7  ;;  %v11597_v40 = vshll.u32 %v22470_v63, 16  ;;  %v11699_v19 = vld [vmem:[#allocation3 + $0xe0] sm:$0x11] }
 0x613   :  { %13975 = vmatprep.mubr.bf16.mxu0 %v23823_v48  ;;  %14027 = vmatmul.mubr.bf16.vlgmr.msra.gmra.mxu1 %v23824_v5  ;;  %v11605_v48 = vrot.slane %v11603_v38, 7  ;;  %v18092_v5 = vld [vmem:[#allocation4 + $0x1634] ss:$8 sps:$4 sm:$0xff]   ;;  %v11590_v39 = vor.u32 %v11588_v47, %v11587_v20  ;;  %v16085_v47 = vcombine.high %v11699_v19, %v11699_v19 }
 0x614   :  { %14070 = vmatpush1.bf16.msra.mxu0 %v18078_v1  ;;  %14036 = vmatprep.mubr.bf16.mxu1 %v23825_v18  ;;  %v11592_v1 = vrot.slane %v11587_v20, 4  ;;  %v11599_v6 = vor.u32 %v11597_v40, %v11596_v50  ;;  %v18097_v18 = vld [vmem:[#allocation4 + $0x1754] ss:$8 sps:$4 sm:$0xff]   ;;  %v18095_v20 = vld [vmem:[#allocation4 + $0x1750] ss:$8 sps:$4 sm:$0xff]  }
 0x615   :  { %14137 = vmatpush1.bf16.msra.mxu1 %v18081_v12  ;;  %14071 = vmatprep.subr.bf16.mxu0 %v18086_v44  ;;  %v11608_v29 = vor.u32 %v11606_v53, %v11605_v48  ;;  %v11610_v59 = vrot.slane %v11605_v48, 4  ;;  %v22752_v52 = vsel %vm20197_vm0, %v11583_v7, %v11590_v39  ;;  %v11601_v12 = vrot.slane %v11596_v50, 4  ;;  %v18090_v44 = vld [vmem:[#allocation4 + $0x1630] ss:$8 sps:$4 sm:$0xff]   ;;  %v18100_v40 = vld [vmem:[#allocation4 + $0x1624] ss:$8 sps:$4 sm:$0xff]  }
 0x616   :  { %14138 = vmatprep.subr.bf16.mxu1 %v18089_v54  ;;  %v22756_v38 = vsel %vm20197_vm0, %v11592_v1, %v11599_v6  ;;  %v16058_v62 = vcombine.low %v22747_v17, %v22752_v52  ;;  %v16059_v54 = vcombine.high %v22747_v17, %v22752_v52  ;;  %v16069_v48 = vcombine.high %v22536_v26, %v22547_v37  ;;  %v18103_v53 = vld [vmem:[#allocation4 + $0x1744] ss:$8 sps:$4 sm:$0xff]   ;;  %v18104_v1 = vld [vmem:[#allocation4 + $0x1610] ss:$8 sps:$4 sm:$0xff]  }
 0x617   :  { %v22764_v8 = vsel %vm20197_vm0, %v11601_v12, %v11608_v29  ;;  %v11625_v50 = vsel %vm19740_vm12, %v11610_v59, %v11624_v60  ;;  %v23827_v59 = vcombine.low %v22517_v31, %v22523_v24  ;;  %v18106_v29 = vld [vmem:[#allocation4 + $0x1614] ss:$8 sps:$4 sm:$0xff]   ;;  %v11700_v7 = vld [vmem:[#allocation3 + $0x2b0] sm:$0x11]  ;;  %v16084_v39 = vcombine.low %v11699_v19, %v11699_v19  ;;  %v18107_v24 = vld [vmem:[#allocation4 + $0x1730] ss:$8 sps:$4 sm:$0xff]  }
 0x618   :  { %14072 = vmatpush1.bf16.msra.mxu0 %v18084_v43  ;;  %v23826_v43 = vcombine.low %v22455_v33, %v22487_v27  ;;  %v16077_v61 = vcombine.high %v22756_v38, %v22764_v8  ;;  %11626 = vst [vmem:[#allocation3 + $0x60] sm:$0x11] %v11625_v50  ;;  %v18098_v33 = vld [vmem:[#allocation4 + $0x1620] ss:$8 sps:$4 sm:$0xff]   ;;  %v16068_v6 = vcombine.low %v22536_v26, %v22547_v37  ;;  %v18120_v26 = vld [vmem:[#allocation4 + $0x16f4] ss:$8 sps:$4 sm:$0xff]  }
 0x619   :  { %14139 = vmatpush1.bf16.msra.mxu1 %v18087_v0  ;;  %14073 = vmatprep.subr.bf16.mxu0 %v18092_v5  ;;  %v16076_v0 = vcombine.low %v22756_v38, %v22764_v8  ;;  %v18101_v27 = vld [vmem:[#allocation4 + $0x1740] ss:$8 sps:$4 sm:$0xff]   ;;  %v18109_v5 = vld [vmem:[#allocation4 + $0x1734] ss:$8 sps:$4 sm:$0xff]   ;;  %v16035_v31 = vcombine.high %v22540_v56, %v22555_v45  ;;  %v16087_v12 = vcombine.high %v11700_v7, %v11700_v7  ;;  %v18126_v50 = vld [vmem:[#allocation4 + $0x16e4] ss:$8 sps:$4 sm:$0xff]  }
 0x61a   :  { %13976 = vmatmul.mubr.bf16.gmra.mxu0 %v23826_v43  ;;  %14140 = vmatprep.subr.bf16.mxu1 %v18097_v18  ;;  %v18114_v18 = vld [vmem:[#allocation4 + $0x1604] ss:$8 sps:$4 sm:$0xff]   ;;  %v18112_v19 = vld [vmem:[#allocation4 + $0x1600] ss:$8 sps:$4 sm:$0xff]   ;;  %v18123_v37 = vld [vmem:[#allocation4 + $0x1714] ss:$8 sps:$4 sm:$0xff]   ;;  %v16037_v43 = vcombine.high %v22576_v49, %v22584_v4 }
 0x61b   :  { %13985 = vmatprep.mubr.bf16.mxu0 %v16085_v47  ;;  %14037 = vmatmul.mubr.bf16.gmra.mxu1 %v23827_v59  ;;  %v18115_v60 = vld [vmem:[#allocation4 + $0x1720] ss:$8 sps:$4 sm:$0xff]   ;;  %v18118_v47 = vld [vmem:[#allocation4 + $0x16f0] ss:$8 sps:$4 sm:$0xff]   ;;  %v18307_v8 = vld [vmem:[#allocation4 + $0x1ae4] ss:$8 sps:$4 sm:$0xff]  }
 0x61c   :  { %14074 = vmatpush1.bf16.msra.mxu0 %v18090_v44  ;;  %14046 = vmatprep.mubr.bf16.mxu1 %v16069_v48  ;;  %v18117_v44 = vld [vmem:[#allocation4 + $0x1724] ss:$8 sps:$4 sm:$0xff]   ;;  %v18127_v59 = vld [vmem:[#allocation4 + $0x1700] ss:$8 sps:$4 sm:$0xff]  }
 0x61d   :  { %14141 = vmatpush1.bf16.msra.mxu1 %v18095_v20  ;;  %14075 = vmatprep.subr.bf16.mxu0 %v18100_v40  ;;  %v16086_v20 = vcombine.low %v11700_v7, %v11700_v7  ;;  %v18121_v40 = vld [vmem:[#allocation4 + $0x1710] ss:$8 sps:$4 sm:$0xff]   ;;  %v18129_v48 = vld [vmem:[#allocation4 + $0x1704] ss:$8 sps:$4 sm:$0xff]  }
 0x61e   :  { %14142 = vmatprep.subr.bf16.mxu1 %v18103_v53  ;;  %v18124_v53 = vld [vmem:[#allocation4 + $0x16e0] ss:$8 sps:$4 sm:$0xff]   ;;  %v18138_v7 = vld [vmem:[#allocation4 + $0x16c4] ss:$8 sps:$4 sm:$0xff]  }
 0x61f   :  { %v11704_v52 = vld [vmem:[#allocation3 + $0x60] sm:$0x11] }
 0x620   :  { %14076 = vmatpush1.bf16.msra.mxu0 %v18098_v33  ;;  %v18132_v33 = vld [vmem:[#allocation4 + $0x16d4] ss:$8 sps:$4 sm:$0xff]  }
 0x621   :  { %14143 = vmatpush1.bf16.msra.mxu1 %v18101_v27  ;;  %14077 = vmatprep.subr.bf16.mxu0 %v18106_v29  ;;  %v18135_v27 = vld [vmem:[#allocation4 + $0x17f4] ss:$8 sps:$4 sm:$0xff]   ;;  %v18130_v29 = vld [vmem:[#allocation4 + $0x16d0] ss:$8 sps:$4 sm:$0xff]  }
 0x622   :  { %13986 = vmatmul.mubr.bf16.gmra.mxu0 %v16084_v39  ;;  %14144 = vmatprep.subr.bf16.mxu1 %v18109_v5  ;;  %v18133_v5 = vld [vmem:[#allocation4 + $0x17f0] ss:$8 sps:$4 sm:$0xff]   ;;  %v18141_v39 = vld [vmem:[#allocation4 + $0x17e4] ss:$8 sps:$4 sm:$0xff]  }
 0x623   :  { %14047 = vmatmul.mubr.bf16.gmra.mxu1 %v16068_v6  ;;  %14097 = vmatprep.mubr.bf16.mxu0 %v16035_v31  ;;  %v18139_v6 = vld [vmem:[#allocation4 + $0x17e0] ss:$8 sps:$4 sm:$0xff]   ;;  %v18144_v31 = vld [vmem:[#allocation4 + $0x16b4] ss:$8 sps:$4 sm:$0xff]  }
 0x624   :  { %14078 = vmatpush1.bf16.msra.mxu0 %v18104_v1  ;;  %14056 = vmatprep.mubr.bf16.mxu1 %v16087_v12  ;;  %v18136_v1 = vld [vmem:[#allocation4 + $0x16c0] ss:$8 sps:$4 sm:$0xff]   ;;  %v18145_v12 = vld [vmem:[#allocation4 + $0x17d0] ss:$8 sps:$4 sm:$0xff]  }
 0x625   :  { %14145 = vmatpush1.bf16.msra.mxu1 %v18107_v24  ;;  %14079 = vmatprep.subr.bf16.mxu0 %v18114_v18  ;;  %v18147_v24 = vld [vmem:[#allocation4 + $0x17d4] ss:$8 sps:$4 sm:$0xff]   ;;  %v18142_v18 = vld [vmem:[#allocation4 + $0x16b0] ss:$8 sps:$4 sm:$0xff]  }
 0x626   :  { %14146 = vmatprep.subr.bf16.mxu1 %v18117_v44  ;;  %v18150_v44 = vld [vmem:[#allocation4 + $0x16a4] ss:$8 sps:$4 sm:$0xff]  }
 0x628   :  { %14080 = vmatpush1.bf16.msra.mxu0 %v18112_v19  ;;  %v18153_v19 = vld [vmem:[#allocation4 + $0x17c4] ss:$8 sps:$4 sm:$0xff]  }
 0x629   :  { %14147 = vmatpush1.bf16.msra.mxu1 %v18115_v60  ;;  %14081 = vmatprep.subr.bf16.mxu0 %v18120_v26  ;;  %v18148_v60 = vld [vmem:[#allocation4 + $0x16a0] ss:$8 sps:$4 sm:$0xff]  }
 0x62a   :  { %14148 = vmatprep.subr.bf16.mxu1 %v18123_v37  ;;  %v18151_v26 = vld [vmem:[#allocation4 + $0x17c0] ss:$8 sps:$4 sm:$0xff]   ;;  %v18156_v37 = vld [vmem:[#allocation4 + $0x1694] ss:$8 sps:$4 sm:$0xff]  }
 0x62b   :  { %14057 = vmatmul.mubr.bf16.gmra.mxu1 %v16086_v20  ;;  %v18154_v20 = vld [vmem:[#allocation4 + $0x1690] ss:$8 sps:$4 sm:$0xff]  }
 0x62c   :  { %14082 = vmatpush2.bf16.msra.mxu0 %v18118_v47  ;;  %14168 = vmatprep.mubr.bf16.mxu1 %v16037_v43  ;;  %v18159_v47 = vld [vmem:[#allocation4 + $0x17b4] ss:$8 sps:$4 sm:$0xff]   ;;  %v18165_v43 = vld [vmem:[#allocation4 + $0x17a4] ss:$8 sps:$4 sm:$0xff]  }
 0x62d   :  { %14149 = vmatpush1.bf16.msra.mxu1 %v18121_v40  ;;  %14083 = vmatprep.subr.bf16.mxu0 %v18126_v50  ;;  %v18157_v40 = vld [vmem:[#allocation4 + $0x17b0] ss:$8 sps:$4 sm:$0xff]   ;;  %v18162_v50 = vld [vmem:[#allocation4 + $0x1684] ss:$8 sps:$4 sm:$0xff]  }
 0x62e   :  { %14150 = vmatprep.subr.bf16.mxu1 %v18129_v48  ;;  %v18160_v48 = vld [vmem:[#allocation4 + $0x1680] ss:$8 sps:$4 sm:$0xff]  }
 0x630   :  { %14084 = vmatpush2.bf16.msra.mxu0 %v18124_v53  ;;  %v18163_v53 = vld [vmem:[#allocation4 + $0x17a0] ss:$8 sps:$4 sm:$0xff]  }
 0x631   :  { %14151 = vmatpush1.bf16.msra.mxu1 %v18127_v59  ;;  %14085 = vmatprep.subr.bf16.mxu0 %v18132_v33  ;;  %v18168_v59 = vld [vmem:[#allocation4 + $0x1874] ss:$8 sps:$4 sm:$0xff]  }
 0x632   :  { %14152 = vmatprep.subr.bf16.mxu1 %v18135_v27  ;;  %v18171_v33 = vld [vmem:[#allocation4 + $0x1794] ss:$8 sps:$4 sm:$0xff]   ;;  %v18166_v27 = vld [vmem:[#allocation4 + $0x1870] ss:$8 sps:$4 sm:$0xff]  }
 0x634   :  { %14086 = vmatpush2.bf16.msra.mxu0 %v18130_v29  ;;  %v18169_v29 = vld [vmem:[#allocation4 + $0x1790] ss:$8 sps:$4 sm:$0xff]  }
 0x635   :  { %14153 = vmatpush2.bf16.msra.mxu1 %v18133_v5  ;;  %14087 = vmatprep.subr.bf16.mxu0 %v18138_v7  ;;  %v18174_v5 = vld [vmem:[#allocation4 + $0x1864] ss:$8 sps:$4 sm:$0xff]  }
 0x636   :  { %14154 = vmatprep.subr.bf16.mxu1 %v18141_v39  ;;  %v18177_v7 = vld [vmem:[#allocation4 + $0x1784] ss:$8 sps:$4 sm:$0xff]   ;;  %v23828_v39 = vcombine.low %v22540_v56, %v22555_v45  ;;  %v23830_v45 = vcombine.low %v22572_v10, %v22580_v25 }
 0x637   :  { %v18186_v56 = vld [vmem:[#allocation4 + $0x1844] ss:$8 sps:$4 sm:$0xff]  }
 0x638   :  { %14088 = vmatpush2.bf16.msra.mxu0 %v18136_v1  ;;  %v23829_v1 = vcombine.high %v22572_v10, %v22580_v25  ;;  %v18192_v10 = vld [vmem:[#allocation4 + $0x1834] ss:$8 sps:$4 sm:$0xff]  }
 0x639   :  { %14155 = vmatpush2.bf16.msra.mxu1 %v18139_v6  ;;  %14089 = vmatprep.subr.bf16.mxu0 %v18144_v31  ;;  %v18172_v6 = vld [vmem:[#allocation4 + $0x1860] ss:$8 sps:$4 sm:$0xff]   ;;  %v11701_v25 = vld [vmem:[#allocation3 + $0x1b8] sm:$0x11] }
 0x63a   :  { %14156 = vmatprep.subr.bf16.mxu1 %v18147_v24  ;;  %v18175_v31 = vld [vmem:[#allocation4 + $0x1780] ss:$8 sps:$4 sm:$0xff]   ;;  %v18180_v24 = vld [vmem:[#allocation4 + $0x1854] ss:$8 sps:$4 sm:$0xff]  }
 0x63c   :  { %14090 = vmatpush2.bf16.msra.mxu0 %v18142_v18  ;;  %v18183_v18 = vld [vmem:[#allocation4 + $0x1974] ss:$8 sps:$4 sm:$0xff]  }
 0x63d   :  { %14157 = vmatpush2.bf16.msra.mxu1 %v18145_v12  ;;  %14091 = vmatprep.subr.bf16.mxu0 %v18150_v44  ;;  %v18178_v12 = vld [vmem:[#allocation4 + $0x1850] ss:$8 sps:$4 sm:$0xff]  }
 0x63e   :  { %14158 = vmatprep.subr.bf16.mxu1 %v18153_v19  ;;  %v18181_v44 = vld [vmem:[#allocation4 + $0x1970] ss:$8 sps:$4 sm:$0xff]   ;;  %v18189_v19 = vld [vmem:[#allocation4 + $0x1964] ss:$8 sps:$4 sm:$0xff]  }
 0x640   :  { %14092 = vmatpush2.bf16.msra.mxu0 %v18148_v60  ;;  %v23831_v60 = vcombine.high %v22592_v51, %v22598_v16 }
 0x641   :  { %14159 = vmatpush2.bf16.msra.mxu1 %v18151_v26  ;;  %14093 = vmatprep.subr.bf16.mxu0 %v18156_v37  ;;  %v23832_v26 = vcombine.low %v22576_v49, %v22584_v4  ;;  %v18184_v37 = vld [vmem:[#allocation4 + $0x1840] ss:$8 sps:$4 sm:$0xff]   ;;  %v18195_v49 = vld [vmem:[#allocation4 + $0x1950] ss:$8 sps:$4 sm:$0xff]   ;;  %v18200_v4 = vld [vmem:[#allocation4 + $0x1824] ss:$8 sps:$4 sm:$0xff]  }
 0x642   :  { %14160 = vmatprep.subr.bf16.mxu1 %v18159_v47  ;;  %v18187_v47 = vld [vmem:[#allocation4 + $0x1960] ss:$8 sps:$4 sm:$0xff]  }
 0x644   :  { %14094 = vmatpush2.bf16.msra.mxu0 %v18154_v20  ;;  %v18197_v20 = vld [vmem:[#allocation4 + $0x1954] ss:$8 sps:$4 sm:$0xff]  }
 0x645   :  { %14161 = vmatpush2.bf16.msra.mxu1 %v18157_v40  ;;  %14095 = vmatprep.subr.bf16.mxu0 %v18162_v50  ;;  %v18190_v40 = vld [vmem:[#allocation4 + $0x1830] ss:$8 sps:$4 sm:$0xff]   ;;  %v16089_v50 = vcombine.high %v11701_v25, %v11701_v25 }
 0x646   :  { %14162 = vmatprep.subr.bf16.mxu1 %v18165_v43  ;;  %v23833_v43 = vcombine.low %v22592_v51, %v22598_v16  ;;  %v18209_v51 = vld [vmem:[#allocation4 + $0x1934] ss:$8 sps:$4 sm:$0xff]  }
 0x647   :  { %v11702_v16 = vld [vmem:[#allocation3 + $0x220] sm:$0x11] }
 0x648   :  { %14096 = vmatpush2.bf16.msra.mxu0 %v18160_v48  ;;  %v18198_v48 = vld [vmem:[#allocation4 + $0x1820] ss:$8 sps:$4 sm:$0xff]  }
 0x649   :  { %14163 = vmatpush2.bf16.msra.mxu1 %v18163_v53  ;;  %14207 = vmatprep.subr.bf16.mxu0 %v18168_v59  ;;  %v18201_v53 = vld [vmem:[#allocation4 + $0x1940] ss:$8 sps:$4 sm:$0xff]   ;;  %v18206_v59 = vld [vmem:[#allocation4 + $0x1814] ss:$8 sps:$4 sm:$0xff]  }
 0x64a   :  { %14164 = vmatprep.subr.bf16.mxu1 %v18171_v33  ;;  %v16088_v33 = vcombine.low %v11701_v25, %v11701_v25  ;;  %v18253_v25 = vld [vmem:[#allocation4 + $0x19c4] ss:$8 sps:$4 sm:$0xff]  }
 0x64b   :  { %14098 = vmatmul.mubr.bf16.vlgmr.msra.gmra.mxu0 %v23828_v39  ;;  %v18223_v39 = vld [vmem:[#allocation4 + $0x1914] ss:$8 sps:$4 sm:$0xff]  }
 0x64c   :  { %14107 = vmatprep.mubr.bf16.mxu0 %v23829_v1  ;;  %14208 = vmatpush1.bf16.msra.mxu0 %v18166_v27  ;;  %v18204_v27 = vld [vmem:[#allocation4 + $0x1810] ss:$8 sps:$4 sm:$0xff]  }
 0x64d   :  { %14165 = vmatpush2.bf16.msra.mxu1 %v18169_v29  ;;  %14209 = vmatprep.subr.bf16.mxu0 %v18174_v5  ;;  %v18217_v29 = vld [vmem:[#allocation4 + $0x1924] ss:$8 sps:$4 sm:$0xff]   ;;  %v18215_v5 = vld [vmem:[#allocation4 + $0x1920] ss:$8 sps:$4 sm:$0xff]   ;;  %v18218_v1 = vld [vmem:[#allocation4 + $0x18f0] ss:$8 sps:$4 sm:$0xff]  }
 0x64e   :  { %14166 = vmatprep.subr.bf16.mxu1 %v18177_v7  ;;  %v18220_v7 = vld [vmem:[#allocation4 + $0x18f4] ss:$8 sps:$4 sm:$0xff]  }
 0x650   :  { %14210 = vmatpush1.bf16.msra.mxu0 %v18172_v6  ;;  %v16090_v6 = vcombine.low %v11702_v16, %v11702_v16 }
 0x651   :  { %14167 = vmatpush2.bf16.msra.mxu1 %v18175_v31  ;;  %14211 = vmatprep.subr.bf16.mxu0 %v18180_v24  ;;  %v18227_v31 = vld [vmem:[#allocation4 + $0x1900] ss:$8 sps:$4 sm:$0xff]   ;;  %v18232_v24 = vld [vmem:[#allocation4 + $0x18d4] ss:$8 sps:$4 sm:$0xff]  }
 0x652   :  { %14278 = vmatprep.subr.bf16.mxu1 %v18183_v18  ;;  %v18235_v18 = vld [vmem:[#allocation4 + $0x19f4] ss:$8 sps:$4 sm:$0xff]  }
 0x653   :  { %14108 = vmatmul.mubr.bf16.gmra.mxu0 %v23830_v45  ;;  %v18241_v45 = vld [vmem:[#allocation4 + $0x19e4] ss:$8 sps:$4 sm:$0xff]  }
 0x654   :  { %14117 = vmatprep.mubr.bf16.mxu0 %v23831_v60  ;;  %14169 = vmatmul.mubr.bf16.vlgmr.msra.gmra.mxu1 %v23832_v26  ;;  %v18244_v60 = vld [vmem:[#allocation4 + $0x18b4] ss:$8 sps:$4 sm:$0xff]  }
 0x655   :  { %14212 = vmatpush1.bf16.msra.mxu0 %v18178_v12  ;;  %14178 = vmatprep.mubr.bf16.mxu1 %v16055_v9  ;;  %v18203_v9 = vld [vmem:[#allocation4 + $0x1944] ss:$8 sps:$4 sm:$0xff]   ;;  %v18230_v12 = vld [vmem:[#allocation4 + $0x18d0] ss:$8 sps:$4 sm:$0xff]   ;;  %v18247_v26 = vld [vmem:[#allocation4 + $0x19d4] ss:$8 sps:$4 sm:$0xff]  }
 0x656   :  { %14279 = vmatpush1.bf16.msra.mxu1 %v18181_v44  ;;  %14213 = vmatprep.subr.bf16.mxu0 %v18186_v56  ;;  %v18233_v44 = vld [vmem:[#allocation4 + $0x19f0] ss:$8 sps:$4 sm:$0xff]   ;;  %v18238_v56 = vld [vmem:[#allocation4 + $0x18c4] ss:$8 sps:$4 sm:$0xff]  }
 0x657   :  { %14280 = vmatprep.subr.bf16.mxu1 %v18189_v19  ;;  %v18236_v19 = vld [vmem:[#allocation4 + $0x18c0] ss:$8 sps:$4 sm:$0xff]  }
 0x659   :  { %14214 = vmatpush1.bf16.msra.mxu0 %v18184_v37  ;;  %v18242_v37 = vld [vmem:[#allocation4 + $0x18b0] ss:$8 sps:$4 sm:$0xff]  }
 0x65a   :  { %14281 = vmatpush1.bf16.msra.mxu1 %v18187_v47  ;;  %14215 = vmatprep.subr.bf16.mxu0 %v18192_v10  ;;  %v18245_v47 = vld [vmem:[#allocation4 + $0x19d0] ss:$8 sps:$4 sm:$0xff]   ;;  %v18250_v10 = vld [vmem:[#allocation4 + $0x18a4] ss:$8 sps:$4 sm:$0xff]  }
 0x65b   :  { %14118 = vmatmul.mubr.bf16.gmra.mxu0 %v23833_v43  ;;  %14282 = vmatprep.subr.bf16.mxu1 %v18197_v20  ;;  %v18248_v20 = vld [vmem:[#allocation4 + $0x18a0] ss:$8 sps:$4 sm:$0xff]   ;;  %v18257_v43 = vld [vmem:[#allocation4 + $0x19b0] ss:$8 sps:$4 sm:$0xff]  }
 0x65c   :  { %14127 = vmatprep.mubr.bf16.mxu0 %v16089_v50  ;;  %14179 = vmatmul.mubr.bf16.gmra.mxu1 %v16054_v21  ;;  %v16091_v21 = vcombine.high %v11702_v16, %v11702_v16  ;;  %v18256_v50 = vld [vmem:[#allocation4 + $0x1894] ss:$8 sps:$4 sm:$0xff]  }
 0x65d   :  { %14216 = vmatpush1.bf16.msra.mxu0 %v18190_v40  ;;  %14188 = vmatprep.mubr.bf16.mxu1 %v16073_v58  ;;  %v18212_v58 = vld [vmem:[#allocation4 + $0x1800] ss:$8 sps:$4 sm:$0xff]   ;;  %v18271_v16 = vld [vmem:[#allocation4 + $0x1994] ss:$8 sps:$4 sm:$0xff]  }
 0x65e   :  { %14283 = vmatpush1.bf16.msra.mxu1 %v18195_v49  ;;  %14217 = vmatprep.subr.bf16.mxu0 %v18200_v4  ;;  %v18251_v40 = vld [vmem:[#allocation4 + $0x19c0] ss:$8 sps:$4 sm:$0xff]   ;;  %v18259_v49 = vld [vmem:[#allocation4 + $0x19b4] ss:$8 sps:$4 sm:$0xff]   ;;  %v18254_v4 = vld [vmem:[#allocation4 + $0x1890] ss:$8 sps:$4 sm:$0xff]  }
 0x65f   :  { %14284 = vmatprep.subr.bf16.mxu1 %v18203_v9  ;;  %v18262_v9 = vld [vmem:[#allocation4 + $0x1884] ss:$8 sps:$4 sm:$0xff]  }
 0x661   :  { %14218 = vmatpush1.bf16.msra.mxu0 %v18198_v48  ;;  %v18265_v48 = vld [vmem:[#allocation4 + $0x19a4] ss:$8 sps:$4 sm:$0xff]  }
 0x662   :  { %14285 = vmatpush1.bf16.msra.mxu1 %v18201_v53  ;;  %14219 = vmatprep.subr.bf16.mxu0 %v18206_v59  ;;  %v18260_v53 = vld [vmem:[#allocation4 + $0x1880] ss:$8 sps:$4 sm:$0xff]  }
 0x663   :  { %14128 = vmatmul.mubr.bf16.gmra.mxu0 %v16088_v33  ;;  %14286 = vmatprep.subr.bf16.mxu1 %v18209_v51  ;;  %v18263_v59 = vld [vmem:[#allocation4 + $0x19a0] ss:$8 sps:$4 sm:$0xff]   ;;  %v18268_v51 = vld [vmem:[#allocation4 + $0x1a74] ss:$8 sps:$4 sm:$0xff]  }
 0x664   :  { %14189 = vmatmul.mubr.bf16.gmra.mxu1 %v16072_v35  ;;  %14239 = vmatprep.mubr.bf16.mxu0 %v16039_v11  ;;  %v18229_v35 = vld [vmem:[#allocation4 + $0x1904] ss:$8 sps:$4 sm:$0xff]   ;;  %v18224_v11 = vld [vmem:[#allocation4 + $0x18e0] ss:$8 sps:$4 sm:$0xff]  }
 0x665   :  { %14220 = vmatpush1.bf16.msra.mxu0 %v18204_v27  ;;  %14198 = vmatprep.mubr.bf16.mxu1 %v16091_v21  ;;  %v18266_v27 = vld [vmem:[#allocation4 + $0x1a70] ss:$8 sps:$4 sm:$0xff]   ;;  %v18274_v21 = vld [vmem:[#allocation4 + $0x1a64] ss:$8 sps:$4 sm:$0xff]  }
 0x666   :  { %14287 = vmatpush1.bf16.msra.mxu1 %v18207_v14  ;;  %14221 = vmatprep.subr.bf16.mxu0 %v18214_v2  ;;  %v18269_v14 = vld [vmem:[#allocation4 + $0x1990] ss:$8 sps:$4 sm:$0xff]  }
 0x667   :  { %14288 = vmatprep.subr.bf16.mxu1 %v18217_v29  ;;  %v11996_v29 = vld [vmem:[#allocation6 + $0x3] ss:$4 sm:$0x3] }
 0x669   :  { %14222 = vmatpush1.bf16.msra.mxu0 %v18212_v58  ;;  %v18277_v58 = vld [vmem:[#allocation4 + $0x1984] ss:$8 sps:$4 sm:$0xff]  }
 0x66a   :  { %14289 = vmatpush1.bf16.msra.mxu1 %v18215_v5  ;;  %14223 = vmatprep.subr.bf16.mxu0 %v18220_v7  ;;  %v18272_v7 = vld [vmem:[#allocation4 + $0x1a60] ss:$8 sps:$4 sm:$0xff]  }
 0x66b   :  { %14290 = vmatprep.subr.bf16.mxu1 %v18223_v39  ;;  %v23834_v39 = vld [vmem:[#allocation44_spill] sm:$0xff] }
 0x66c   :  { %14199 = vmatmul.mubr.bf16.gmra.mxu1 %v16090_v6  ;;  %v18275_v6 = vld [vmem:[#allocation4 + $0x1980] ss:$8 sps:$4 sm:$0xff]  }
 0x66d   :  { %14224 = vmatpush2.bf16.msra.mxu0 %v18218_v1  ;;  %14310 = vmatprep.mubr.bf16.mxu1 %v16041_v36  ;;  %v18239_v36 = vld [vmem:[#allocation4 + $0x19e0] ss:$8 sps:$4 sm:$0xff]   ;;  %v22829_v1 = vrot.slane %v11996_v29, %v23834_v39  ;;  %v16095_v39 = vcombine.high %v11704_v52, %v11704_v52 }
 0x66e   :  { %14291 = vmatpush1.bf16.msra.mxu1 %v18221_v15  ;;  %14225 = vmatprep.subr.bf16.mxu0 %v18226_v32  ;;  %v18280_v32 = vld [vmem:[#allocation4 + $0x1a54] ss:$8 sps:$4 sm:$0xff]  }
 0x66f   :  { %14292 = vmatprep.subr.bf16.mxu1 %v18229_v35  ;;  %v23835_v35 = vld [vmem:[#allocation39_spill] sm:$0xff] }
 0x671   :  { %14226 = vmatpush2.bf16.msra.mxu0 %v18224_v11  ;;  %v22832_v11 = vrot.slane %v11996_v29, %v23835_v35 }
 0x672   :  { %14293 = vmatpush1.bf16.msra.mxu1 %v18227_v31  ;;  %14227 = vmatprep.subr.bf16.mxu0 %v18232_v24  ;;  %v18283_v24 = vld [vmem:[#allocation4 + $0x1a44] ss:$8 sps:$4 sm:$0xff]  }
 0x673   :  { %14294 = vmatprep.subr.bf16.mxu1 %v18235_v18 }
 0x675   :  { %14228 = vmatpush2.bf16.msra.mxu0 %v18230_v12  ;;  %v23836_v12 = vcombine.low %v22693_v3, %v22697_v46  ;;  %v18281_v46 = vld [vmem:[#allocation4 + $0x1a40] ss:$8 sps:$4 sm:$0xff]  }
 0x676   :  { %14295 = vmatpush2.bf16.msra.mxu1 %v18233_v44  ;;  %14229 = vmatprep.subr.bf16.mxu0 %v18238_v56  ;;  %v23837_v56 = vcombine.high %v22707_v28, %v22711_v13 }
 0x677   :  { %14296 = vmatprep.subr.bf16.mxu1 %v18241_v45  ;;  %v23838_v45 = vcombine.low %v22671_v57, %v22680_v23  ;;  %v11703_v57 = vld [vmem:[#allocation3 + $0x1f8] sm:$0x11] }
 0x679   :  { %14230 = vmatpush2.bf16.msra.mxu0 %v18236_v19 }
 0x67a   :  { %14297 = vmatpush2.bf16.msra.mxu1 %v18239_v36  ;;  %14231 = vmatprep.subr.bf16.mxu0 %v18244_v60 }
 0x67b   :  { %14298 = vmatprep.subr.bf16.mxu1 %v18247_v26 }
 0x67d   :  { %14232 = vmatpush2.bf16.msra.mxu0 %v18242_v37  ;;  %v18286_v37 = vld [vmem:[#allocation4 + $0x1a34] ss:$8 sps:$4 sm:$0xff]  }
 0x67e   :  { %14299 = vmatpush2.bf16.msra.mxu1 %v18245_v47  ;;  %14233 = vmatprep.subr.bf16.mxu0 %v18250_v10 }
 0x67f   :  { %14300 = vmatprep.subr.bf16.mxu1 %v18253_v25 }
 0x681   :  { %14234 = vmatpush2.bf16.msra.mxu0 %v18248_v20 }
 0x682   :  { %14301 = vmatpush2.bf16.msra.mxu1 %v18251_v40  ;;  %14235 = vmatprep.subr.bf16.mxu0 %v18256_v50  ;;  %v18284_v40 = vld [vmem:[#allocation4 + $0x1a30] ss:$8 sps:$4 sm:$0xff]   ;;  %v16093_v50 = vcombine.high %v11703_v57, %v11703_v57 }
 0x683   :  { %14302 = vmatprep.subr.bf16.mxu1 %v18259_v49 }
 0x685   :  { %14236 = vmatpush2.bf16.msra.mxu0 %v18254_v4  ;;  %v18291_v4 = vld [vmem:[#allocation4 + $0x1a24] ss:$8 sps:$4 sm:$0xff]  }
 0x686   :  { %14303 = vmatpush2.bf16.msra.mxu1 %v18257_v43  ;;  %14237 = vmatprep.subr.bf16.mxu0 %v18262_v9  ;;  %v13815_v33 = vpop.f32.mrf.mxu0  ;;  %v23839_v9 = vcombine.low %v22707_v28, %v22711_v13 }
 0x687   :  { %14304 = vmatprep.subr.bf16.mxu1 %v18265_v48  ;;  %v13816_v22 = vadd.f32 %v13815_v33, %v22829_v1  ;;  %v18294_v33 = vld [vmem:[#allocation4 + $0x1a14] ss:$8 sps:$4 sm:$0xff]  }
 0x688   :  { %v13817_v2 = vpop.f32.mrf.mxu0 }
 0x689   :  { %14238 = vmatpush2.bf16.msra.mxu0 %v18260_v53  ;;  %v13818_v18 = vadd.f32 %v13817_v2, %v22832_v11 }
 0x68a   :  { %14305 = vmatpush2.bf16.msra.mxu1 %v18263_v59  ;;  %14349 = vmatprep.subr.bf16.mxu0 %v18268_v51  ;;  %v13819_v5 = vpop.f32.mrf.mxu0 }
 0x68b   :  { %14306 = vmatprep.subr.bf16.mxu1 %v18271_v16  ;;  %v13820_v36 = vadd.f32 %v13819_v5, %v22829_v1  ;;  %v18289_v16 = vld [vmem:[#allocation4 + $0x1a20] ss:$8 sps:$4 sm:$0xff]  }
 0x68c   :  { %14240 = vmatmul.mubr.bf16.vlgmr.msra.gmra.mxu0 %v16038_v41  ;;  %v13821_v15 = vpop.f32.mrf.mxu0  ;;  %v18278_v41 = vld [vmem:[#allocation4 + $0x1a50] ss:$8 sps:$4 sm:$0xff]  }
 0x68d   :  { %14249 = vmatprep.mubr.bf16.mxu0 %v16057_v42  ;;  %14350 = vmatpush1.bf16.msra.mxu0 %v18266_v27  ;;  %v13822_v47 = vadd.f32 %v13821_v15, %v22832_v11 }
 0x68e   :  { %14307 = vmatpush2.bf16.msra.mxu1 %v18269_v14  ;;  %14351 = vmatprep.subr.bf16.mxu0 %v18274_v21  ;;  %v18292_v21 = vld [vmem:[#allocation4 + $0x1a10] ss:$8 sps:$4 sm:$0xff]  }
 0x68f   :  { %14308 = vmatprep.subr.bf16.mxu1 %v18277_v58  ;;  %v13825_v34 = vpop.f32.mrf.mxu0  ;;  %v22881_v58 = vld [vmem:[#allocation3 + $0x370] sm:$0xff] }
 0x690   :  { %v13826_v25 = vadd.f32 %v13825_v34, %v22829_v1 }
 0x691   :  { %14352 = vmatpush1.bf16.msra.mxu0 %v18272_v7  ;;  %v13827_v31 = vpop.f32.mrf.mxu0  ;;  %v18301_v7 = vld [vmem:[#allocation4 + $0x1a04] ss:$8 sps:$4 sm:$0xff]  }
 0x692   :  { %14309 = vmatpush2.bf16.msra.mxu1 %v18275_v6  ;;  %14353 = vmatprep.subr.bf16.mxu0 %v18280_v32  ;;  %v13886_v42 = vpop.f32.mrf.mxu1  ;;  %v13828_v43 = vadd.f32 %v13827_v31, %v22832_v11  ;;  %v18299_v6 = vld [vmem:[#allocation4 + $0x1a00] ss:$8 sps:$4 sm:$0xff]   ;;  %v18304_v32 = vld [vmem:[#allocation4 + $0x1af4] ss:$8 sps:$4 sm:$0xff]  }
 0x693   :  { %v22839_v44 = vadd.f32 %v13886_v42, %v13816_v22  ;;  %v13829_v60 = vpop.f32.mrf.mxu0  ;;  %v18302_v42 = vld [vmem:[#allocation4 + $0x1af0] ss:$8 sps:$4 sm:$0xff]  }
 0x694   :  { %14250 = vmatmul.mubr.bf16.gmra.mxu0 %v23836_v12  ;;  %v13888_v19 = vpop.f32.mrf.mxu1  ;;  %v13830_v59 = vadd.f32 %v13829_v60, %v22829_v1 }
 0x695   :  { %14259 = vmatprep.mubr.bf16.mxu0 %v23837_v56  ;;  %14311 = vmatmul.mubr.bf16.vlgmr.msra.gmra.mxu1 %v23838_v45  ;;  %v22851_v3 = vadd.f32 %v13888_v19, %v13818_v18 }
 0x696   :  { %14354 = vmatpush1.bf16.msra.mxu0 %v18278_v41  ;;  %14320 = vmatprep.mubr.bf16.mxu1 %v16059_v54  ;;  %v13890_v26 = vpop.f32.mrf.mxu1  ;;  %v13831_v54 = vpop.f32.mrf.mxu0 }
 0x697   :  { %14355 = vmatprep.subr.bf16.mxu0 %v18283_v24  ;;  %v22854_v10 = vadd.f32 %v13890_v26, %v13820_v36  ;;  %v13832_v27 = vadd.f32 %v13831_v54, %v22832_v11  ;;  %v16094_v24 = vcombine.low %v11704_v52, %v11704_v52  ;;  %v18305_v36 = vld [vmem:[#allocation4 + $0x1ae0] ss:$8 sps:$4 sm:$0xff]   ;;  %v18310_v26 = vld [vmem:[#allocation4 + $0x1ad4] ss:$8 sps:$4 sm:$0xff]   ;;  %v18308_v54 = vld [vmem:[#allocation4 + $0x1ad0] ss:$8 sps:$4 sm:$0xff]  }
 0x698   :  { %v13892_v23 = vpop.f32.mrf.mxu1  ;;  %v13835_v28 = vpop.f32.mrf.mxu0 }
 0x699   :  { %v22857_v20 = vadd.f32 %v13892_v23, %v13822_v47  ;;  %v13836_v35 = vadd.f32 %v13835_v28, %v22829_v1  ;;  %v18317_v28 = vld [vmem:[#allocation4 + $0x1aa0] ss:$8 sps:$4 sm:$0xff]  }
 0x69a   :  { %14356 = vmatpush1.bf16.msra.mxu0 %v18281_v46  ;;  %v13896_v49 = vpop.f32.mrf.mxu1  ;;  %v13837_v29 = vpop.f32.mrf.mxu0 }
 0x69b   :  { %14357 = vmatprep.subr.bf16.mxu0 %v18286_v37  ;;  %v22863_v48 = vadd.f32 %v13896_v49, %v13826_v25  ;;  %v13838_v22 = vadd.f32 %v13837_v29, %v22832_v11  ;;  %v18348_v29 = vld [vmem:[#allocation3 + $0x1d0] sm:$0xff] }
 0x69c   :  { %14260 = vmatmul.mubr.bf16.gmra.mxu0 %v23839_v9  ;;  %v13898_v53 = vpop.f32.mrf.mxu1  ;;  %v13839_v15 = vpop.f32.mrf.mxu0 }
 0x69d   :  { %14269 = vmatprep.mubr.bf16.mxu0 %v16093_v50  ;;  %14321 = vmatmul.mubr.bf16.gmra.mxu1 %v16058_v62  ;;  %v22872_v51 = vadd.f32 %v13898_v53, %v13828_v43  ;;  %v16092_v62 = vcombine.low %v11703_v57, %v11703_v57  ;;  %v18311_v53 = vld [vmem:[#allocation4 + $0x1ac0] ss:$8 sps:$4 sm:$0xff]  }
 0x69e   :  { %14358 = vmatpush1.bf16.msra.mxu0 %v18284_v40  ;;  %14330 = vmatprep.mubr.bf16.mxu1 %v16077_v61  ;;  %v13900_v13 = vpop.f32.mrf.mxu1  ;;  %v22879_v61 = vld [vmem:[#allocation3 + $0x268] sm:$0xff]  ;;  %v13841_v31 = vpop.f32.mrf.mxu0 }
 0x69f   :  { %14359 = vmatprep.subr.bf16.mxu0 %v18291_v4  ;;  %v22875_v14 = vadd.f32 %v13900_v13, %v13830_v59  ;;  %v16043_v5 = vcombine.high %v22879_v61, %v22881_v58  ;;  %v13842_v45 = vadd.f32 %v13841_v31, %v22832_v11  ;;  %v18313_v4 = vld [vmem:[#allocation4 + $0x1ac4] ss:$8 sps:$4 sm:$0xff]   ;;  %v18316_v59 = vld [vmem:[#allocation4 + $0x1ab4] ss:$8 sps:$4 sm:$0xff]  }
 0x6a0   :  { %v13902_v17 = vpop.f32.mrf.mxu1  ;;  %v18322_v13 = vld [vmem:[#allocation4 + $0x1a94] ss:$8 sps:$4 sm:$0xff]  }
 0x6a1   :  { %v22877_v2 = vadd.f32 %v13902_v17, %v13832_v27  ;;  %v18325_v27 = vld [vmem:[#allocation4 + $0x1a84] ss:$8 sps:$4 sm:$0xff]   ;;  %v18323_v17 = vld [vmem:[#allocation4 + $0x1a80] ss:$8 sps:$4 sm:$0xff]  }
 0x6a2   :  { %14360 = vmatpush1.bf16.msra.mxu0 %v18289_v16  ;;  %v18314_v16 = vld [vmem:[#allocation4 + $0x1ab0] ss:$8 sps:$4 sm:$0xff]  }
 0x6a3   :  { %14361 = vmatprep.subr.bf16.mxu0 %v18294_v33  ;;  %v18320_v33 = vld [vmem:[#allocation4 + $0x1a90] ss:$8 sps:$4 sm:$0xff]  }
 0x6a4   :  { %14270 = vmatmul.mubr.bf16.gmra.mxu0 %v16092_v62  ;;  %v16042_v62 = vcombine.low %v22879_v61, %v22881_v58 }
 0x6a5   :  { %14331 = vmatmul.mubr.bf16.gmra.mxu1 %v16076_v0  ;;  %14381 = vmatprep.mubr.bf16.mxu0 %v16043_v5  ;;  %v13840_v0 = vadd.f32 %v13839_v15, %v22829_v1  ;;  %v18349_v5 = vld [vmem:[#allocation3 + $0x130] sm:$0xff] }
 0x6a6   :  { %14362 = vmatpush1.bf16.msra.mxu0 %v18292_v21  ;;  %14340 = vmatprep.mubr.bf16.mxu1 %v16095_v39 }
 0x6a7   :  { %14363 = vmatprep.subr.bf16.mxu0 %v18301_v7  ;;  %v16061_v7 = vcombine.high %v18348_v29, %v18349_v5 }
 0x6a9   :  { %v13906_v34 = vpop.f32.mrf.mxu1 }
 0x6aa   :  { %v22890_v41 = vadd.f32 %v13906_v34, %v13836_v35  ;;  %14364 = vmatpush1.bf16.msra.mxu0 %v18299_v6 }
 0x6ab   :  { %v13908_v38 = vpop.f32.mrf.mxu1  ;;  %14365 = vmatprep.subr.bf16.mxu0 %v18304_v32 }
 0x6ac   :  { %v22893_v18 = vadd.f32 %v13908_v38, %v13838_v22 }
 0x6ad   :  { %v13845_v12 = vpop.f32.mrf.mxu0  ;;  %v13910_v56 = vpop.f32.mrf.mxu1  ;;  %14341 = vmatmul.mubr.bf16.gmra.mxu1 %v16094_v24 }
 0x6ae   :  { %v22896_v19 = vadd.f32 %v13910_v56, %v13840_v0  ;;  %14366 = vmatpush2.bf16.msra.mxu0 %v18302_v42  ;;  %v13846_v37 = vadd.f32 %v13845_v12, %v22829_v1  ;;  %v16060_v42 = vcombine.low %v18348_v29, %v18349_v5 }
 0x6af   :  { %v13847_v46 = vpop.f32.mrf.mxu0  ;;  %v13912_v60 = vpop.f32.mrf.mxu1  ;;  %14367 = vmatprep.subr.bf16.mxu0 %v18307_v8 }
 0x6b0   :  { %v22899_v47 = vadd.f32 %v13912_v60, %v13842_v45  ;;  %v13848_v25 = vadd.f32 %v13847_v46, %v22832_v11  ;;  %v18319_v11 = vld [vmem:[#allocation4 + $0x1aa4] ss:$8 sps:$4 sm:$0xff]  }
 0x6b1   :  { %v13849_v57 = vpop.f32.mrf.mxu0  ;;  %v13916_v23 = vpop.f32.mrf.mxu1 }
 0x6b2   :  { %v22902_v40 = vadd.f32 %v13916_v23, %v13846_v37  ;;  %14368 = vmatpush2.bf16.msra.mxu0 %v18305_v36  ;;  %v11705_v36 = vld [vmem:[#allocation3 + $0x2e8] sm:$0x11] }
 0x6b3   :  { %v13850_v50 = vpop.f32.mrf.mxu0  ;;  %v13918_v49 = vpop.f32.mrf.mxu1  ;;  %14369 = vmatprep.subr.bf16.mxu0 %v18310_v26  ;;  %v16097_v57 = vcombine.high %v11705_v36, %v11705_v36 }
 0x6b4   :  { %v22904_v43 = vadd.f32 %v13918_v49, %v13848_v25  ;;  %v23841_v25 = vcombine.low %v22470_v63, %v22505_v55 }
 0x6b5   :  { %v13920_v9 = vpop.f32.mrf.mxu1 }
 0x6b6   :  { %14370 = vmatpush2.bf16.msra.mxu0 %v18308_v54 }
 0x6b7   :  { %v13921_v1 = vpop.f32.mrf.mxu1  ;;  %14371 = vmatprep.subr.bf16.mxu0 %v18313_v4 }
 0x6ba   :  { %14372 = vmatpush2.bf16.msra.mxu0 %v18311_v53 }
 0x6bb   :  { %14373 = vmatprep.subr.bf16.mxu0 %v18316_v59 }
 0x6be   :  { %14374 = vmatpush2.bf16.msra.mxu0 %v18314_v16 }
 0x6bf   :  { %14375 = vmatprep.subr.bf16.mxu0 %v18319_v11  ;;  %v16096_v11 = vcombine.low %v11705_v36, %v11705_v36 }
 0x6c2   :  { %14376 = vmatpush2.bf16.msra.mxu0 %v18317_v28 }
 0x6c3   :  { %14377 = vmatprep.subr.bf16.mxu0 %v18322_v13 }
 0x6c6   :  { %14378 = vmatpush2.bf16.msra.mxu0 %v18320_v33 }
 0x6c7   :  { %14379 = vmatprep.subr.bf16.mxu0 %v18325_v27 }
 0x6ca   :  { %14380 = vmatpush2.bf16.msra.mxu0 %v18323_v17  ;;  %v13957_v52 = vpop.f32.mrf.mxu0 }
 0x6cb   :  { %v13958_v21 = vadd.f32 %v13957_v52, %v22839_v44 }
 0x6cc   :  { %v13959_v39 = vpop.f32.mrf.mxu0 }
 0x6cd   :  { %14382 = vmatmul.mubr.bf16.vlgmr.msra.gmra.mxu0 %v16042_v62  ;;  %v13960_v6 = vadd.f32 %v13959_v39, %v22851_v3  ;;  %v23840_v3 = vcombine.high %v22470_v63, %v22505_v55 }
 0x6ce   :  { %14391 = vmatprep.mubr.bf16.mxu0 %v16061_v7  ;;  %v13961_v15 = vpop.f32.mrf.mxu0 }
 0x6cf   :  { %v13962_v32 = vadd.f32 %v13961_v15, %v22854_v10 }
 0x6d0   :  { %v13963_v35 = vpop.f32.mrf.mxu0 }
 0x6d1   :  { %v13964_v34 = vadd.f32 %v13963_v35, %v22857_v20 }
 0x6d2   :  { %v13967_v22 = vpop.f32.mrf.mxu0 }
 0x6d3   :  { %v13968_v61 = vadd.f32 %v13967_v22, %v22863_v48  ;;  %v14028_v58 = vpop.f32.mrf.mxu1 }
 0x6d4   :  { %v14029_v44 = vadd.f32 %v14028_v58, %v13958_v21  ;;  %v13969_v31 = vpop.f32.mrf.mxu0 }
 0x6d5   :  { %14392 = vmatmul.mubr.bf16.gmra.mxu0 %v16060_v42  ;;  %v13970_v24 = vadd.f32 %v13969_v31, %v22872_v51  ;;  %v14030_v38 = vpop.f32.mrf.mxu1 }
 0x6d6   :  { %14401 = vmatprep.mubr.bf16.mxu0 %v23840_v3  ;;  %v14031_v8 = vadd.f32 %v14030_v38, %v13960_v6  ;;  %v13971_v10 = vpop.f32.mrf.mxu0 }
 0x6d7   :  { %v13972_v0 = vadd.f32 %v13971_v10, %v22875_v14  ;;  %v14032_v20 = vpop.f32.mrf.mxu1 }
 0x6d8   :  { %v14033_v12 = vadd.f32 %v14032_v20, %v13962_v32  ;;  %v13973_v56 = vpop.f32.mrf.mxu0 }
 0x6d9   :  { %v13974_v48 = vadd.f32 %v13973_v56, %v22877_v2  ;;  %v14034_v45 = vpop.f32.mrf.mxu1 }
 0x6da   :  { %v14035_v46 = vadd.f32 %v14034_v45, %v13964_v34  ;;  %v13977_v60 = vpop.f32.mrf.mxu0 }
 0x6db   :  { %v13978_v51 = vadd.f32 %v13977_v60, %v22890_v41  ;;  %v14038_v26 = vpop.f32.mrf.mxu1 }
 0x6dc   :  { %v14039_v37 = vadd.f32 %v14038_v26, %v13968_v61  ;;  %v13979_v23 = vpop.f32.mrf.mxu0 }
 0x6dd   :  { %14402 = vmatmul.mubr.bf16.gmra.mxu0 %v23841_v25  ;;  %v13980_v14 = vadd.f32 %v13979_v23, %v22893_v18  ;;  %v14040_v54 = vpop.f32.mrf.mxu1 }
 0x6de   :  { %14411 = vmatprep.mubr.bf16.mxu0 %v16097_v57  ;;  %v14041_v50 = vadd.f32 %v14040_v54, %v13970_v24  ;;  %v13981_v2 = vpop.f32.mrf.mxu0 }
 0x6df   :  { %v13982_v49 = vadd.f32 %v13981_v2, %v22896_v19  ;;  %v14042_v4 = vpop.f32.mrf.mxu1 }
 0x6e0   :  { %v14043_v9 = vadd.f32 %v14042_v4, %v13972_v0  ;;  %v13983_v53 = vpop.f32.mrf.mxu0 }
 0x6e1   :  { %v13984_v41 = vadd.f32 %v13983_v53, %v22899_v47  ;;  %v14044_v1 = vpop.f32.mrf.mxu1 }
 0x6e2   :  { %v14045_v59 = vadd.f32 %v14044_v1, %v13974_v48  ;;  %v13987_v16 = vpop.f32.mrf.mxu0 }
 0x6e3   :  { %v13988_v63 = vadd.f32 %v13987_v16, %v22902_v40  ;;  %v14048_v55 = vpop.f32.mrf.mxu1 }
 0x6e4   :  { %v14049_v28 = vadd.f32 %v14048_v55, %v13978_v51  ;;  %v13989_v18 = vpop.f32.mrf.mxu0 }
 0x6e5   :  { %14412 = vmatmul.mubr.bf16.gmra.mxu0 %v16096_v11  ;;  %v13990_v13 = vadd.f32 %v13989_v18, %v22904_v43  ;;  %v14050_v33 = vpop.f32.mrf.mxu1 }
 0x6e6   :  { %v14051_v27 = vadd.f32 %v14050_v33, %v13980_v14  ;;  %v13991_v19 = vpop.f32.mrf.mxu0 }
 0x6e7   :  { %v14052_v17 = vpop.f32.mrf.mxu1 }
 0x6e8   :  { %v14053_v52 = vadd.f32 %v14052_v17, %v13982_v49  ;;  %v13992_v62 = vpop.f32.mrf.mxu0 }
 0x6e9   :  { %v14054_v21 = vpop.f32.mrf.mxu1 }
 0x6ea   :  { %v14055_v47 = vadd.f32 %v14054_v21, %v13984_v41 }
 0x6eb   :  { %v14058_v29 = vpop.f32.mrf.mxu1 }
 0x6ec   :  { %v14059_v5 = vadd.f32 %v14058_v29, %v13988_v63 }
 0x6ed   :  { %v14060_v7 = vpop.f32.mrf.mxu1 }
 0x6ee   :  { %v14061_v39 = vadd.f32 %v14060_v7, %v13990_v13 }
 0x6ef   :  { %v14062_v6 = vpop.f32.mrf.mxu1 }
 0x6f1   :  { %v14063_v40 = vpop.f32.mrf.mxu1 }
 0x70b   :  { %v14099_v15 = vpop.f32.mrf.mxu0 }
 0x70c   :  { %v14100_v32 = vadd.f32 %v14099_v15, %v14029_v44 }
 0x70d   :  { %v14101_v35 = vpop.f32.mrf.mxu0 }
 0x70e   :  { %v14102_v34 = vadd.f32 %v14101_v35, %v14031_v8 }
 0x70f   :  { %v14103_v22 = vpop.f32.mrf.mxu0 }
 0x710   :  { %v14104_v43 = vadd.f32 %v14103_v22, %v14033_v12 }
 0x711   :  { %v14105_v42 = vpop.f32.mrf.mxu0 }
 0x712   :  { %v14106_v61 = vadd.f32 %v14105_v42, %v14035_v46 }
 0x713   :  { %v14109_v58 = vpop.f32.mrf.mxu0 }
 0x714   :  { %v14110_v31 = vadd.f32 %v14109_v58, %v14039_v37  ;;  %v14170_v24 = vpop.f32.mrf.mxu1 }
 0x715   :  { %v22928_v38 = vadd.f32 %v14170_v24, %v14100_v32  ;;  %v14111_v3 = vpop.f32.mrf.mxu0 }
 0x716   :  { %v14112_v10 = vadd.f32 %v14111_v3, %v14041_v50  ;;  %v14172_v0 = vpop.f32.mrf.mxu1 }
 0x717   :  { %v22930_v20 = vadd.f32 %v14172_v0, %v14102_v34  ;;  %v14113_v56 = vpop.f32.mrf.mxu0 }
 0x718   :  { %v14114_v48 = vadd.f32 %v14113_v56, %v14043_v9  ;;  %v14174_v45 = vpop.f32.mrf.mxu1 }
 0x719   :  { %v22932_v44 = vadd.f32 %v14174_v45, %v14104_v43  ;;  %v14115_v8 = vpop.f32.mrf.mxu0 }
 0x71a   :  { %v14116_v36 = vadd.f32 %v14115_v8, %v14045_v59  ;;  %v14176_v12 = vpop.f32.mrf.mxu1 }
 0x71b   :  { %v22934_v60 = vadd.f32 %v14176_v12, %v14106_v61  ;;  %v14119_v46 = vpop.f32.mrf.mxu0 }
 0x71c   :  { %v14120_v51 = vadd.f32 %v14119_v46, %v14049_v28  ;;  %v14180_v26 = vpop.f32.mrf.mxu1 }
 0x71d   :  { %v22936_v37 = vadd.f32 %v14180_v26, %v14110_v31  ;;  %v14121_v57 = vpop.f32.mrf.mxu0 }
 0x71e   :  { %v14122_v23 = vadd.f32 %v14121_v57, %v14051_v27  ;;  %v14182_v25 = vpop.f32.mrf.mxu1 }
 0x71f   :  { %v22938_v14 = vadd.f32 %v14182_v25, %v14112_v10  ;;  %v14123_v54 = vpop.f32.mrf.mxu0 }
 0x720   :  { %v14124_v50 = vadd.f32 %v14123_v54, %v14053_v52  ;;  %v14184_v2 = vpop.f32.mrf.mxu1 }
 0x721   :  { %v22940_v49 = vadd.f32 %v14184_v2, %v14114_v48  ;;  %v14125_v4 = vpop.f32.mrf.mxu0 }
 0x722   :  { %v14126_v9 = vadd.f32 %v14125_v4, %v14055_v47  ;;  %v14186_v53 = vpop.f32.mrf.mxu1 }
 0x723   :  { %v22942_v41 = vadd.f32 %v14186_v53, %v14116_v36  ;;  %v14129_v1 = vpop.f32.mrf.mxu0 }
 0x724   :  { %v14130_v59 = vadd.f32 %v14129_v1, %v14059_v5  ;;  %v14190_v16 = vpop.f32.mrf.mxu1 }
 0x725   :  { %v22944_v11 = vadd.f32 %v14190_v16, %v14120_v51  ;;  %v14131_v63 = vpop.f32.mrf.mxu0 }
 0x726   :  { %v14132_v55 = vadd.f32 %v14131_v63, %v14061_v39  ;;  %v14192_v28 = vpop.f32.mrf.mxu1 }
 0x727   :  { %v22946_v18 = vadd.f32 %v14192_v28, %v14122_v23  ;;  %v14133_v13 = vpop.f32.mrf.mxu0 }
 0x728   :  { %v14194_v33 = vpop.f32.mrf.mxu1 }
 0x729   :  { %v22948_v27 = vadd.f32 %v14194_v33, %v14124_v50  ;;  %v14134_v19 = vpop.f32.mrf.mxu0 }
 0x72a   :  { %v14196_v17 = vpop.f32.mrf.mxu1 }
 0x72b   :  { %v22950_v52 = vadd.f32 %v14196_v17, %v14126_v9 }
 0x72c   :  { %v14200_v62 = vpop.f32.mrf.mxu1 }
 0x72d   :  { %v22952_v21 = vadd.f32 %v14200_v62, %v14130_v59 }
 0x72e   :  { %v14202_v47 = vpop.f32.mrf.mxu1 }
 0x72f   :  { %v22954_v29 = vadd.f32 %v14202_v47, %v14132_v55 }
 0x730   :  { %v14204_v5 = vpop.f32.mrf.mxu1 }
 0x732   :  { %v14205_v7 = vpop.f32.mrf.mxu1 }
 0x74c   :  { %v14241_v39 = vpop.f32.mrf.mxu0 }
 0x74d   :  { %v14242_v4 = vadd.f32 %v14241_v39, %v22928_v38 }
 0x74e   :  { %v14243_v6 = vpop.f32.mrf.mxu0 }
 0x74f   :  { %v14244_v9 = vadd.f32 %v14243_v6, %v22930_v20 }
 0x750   :  { %v14245_v40 = vpop.f32.mrf.mxu0 }
 0x751   :  { %v14246_v59 = vadd.f32 %v14245_v40, %v22932_v44 }
 0x752   :  { %v14247_v15 = vpop.f32.mrf.mxu0 }
 0x753   :  { %v14248_v28 = vadd.f32 %v14247_v15, %v22934_v60 }
 0x754   :  { %v14251_v32 = vpop.f32.mrf.mxu0 }
 0x755   :  { %v14312_v35 = vpop.f32.mrf.mxu1  ;;  %v14252_v19 = vadd.f32 %v14251_v32, %v22936_v37 }
 0x756   :  { %v14253_v34 = vpop.f32.mrf.mxu0  ;;  %v14313_v53 = vadd.f32 %v14312_v35, %v14242_v4 }
 0x757   :  { %v14314_v22 = vpop.f32.mrf.mxu1  ;;  %v14254_v20 = vadd.f32 %v14253_v34, %v22938_v14 }
 0x758   :  { %v14255_v43 = vpop.f32.mrf.mxu0  ;;  %v14315_v16 = vadd.f32 %v14314_v22, %v14244_v9 }
 0x759   :  { %v14316_v42 = vpop.f32.mrf.mxu1  ;;  %v14256_v40 = vadd.f32 %v14255_v43, %v22940_v49 }
 0x75a   :  { %v14257_v61 = vpop.f32.mrf.mxu0  ;;  %v14317_v13 = vadd.f32 %v14316_v42, %v14246_v59 }
 0x75b   :  { %v14318_v58 = vpop.f32.mrf.mxu1  ;;  %v14258_v32 = vadd.f32 %v14257_v61, %v22942_v41 }
 0x75c   :  { %v14261_v31 = vpop.f32.mrf.mxu0  ;;  %v14319_v62 = vadd.f32 %v14318_v58, %v14248_v28 }
 0x75d   :  { %v14322_v24 = vpop.f32.mrf.mxu1 }
 0x75e   :  { %v14263_v3 = vpop.f32.mrf.mxu0  ;;  %v14323_v39 = vadd.f32 %v14322_v24, %v14252_v19 }
 0x75f   :  { %v14324_v10 = vpop.f32.mrf.mxu1 }
 0x760   :  { %v14265_v0 = vpop.f32.mrf.mxu0  ;;  %v14325_v22 = vadd.f32 %v14324_v10, %v14254_v20  ;;  %v14264_v10 = vadd.f32 %v14263_v3, %v22946_v18 }
 0x761   :  { %v14326_v56 = vpop.f32.mrf.mxu1 }
 0x762   :  { %v22956_v48 = vpop.f32.mrf.mxu0  ;;  %v14327_v58 = vadd.f32 %v14326_v56, %v14256_v40 }
 0x763   :  { %v14328_v45 = vpop.f32.mrf.mxu1 }
 0x764   :  { %v22958_v8 = vpop.f32.mrf.mxu0  ;;  %v14329_v34 = vadd.f32 %v14328_v45, %v14258_v32 }
 0x765   :  { %v14332_v36 = vpop.f32.mrf.mxu1 }
 0x766   :  { %v22960_v12 = vpop.f32.mrf.mxu0 }
 0x767   :  { %v14334_v46 = vpop.f32.mrf.mxu1 }
 0x768   :  { %v14275_v51 = vpop.f32.mrf.mxu0 }
 0x769   :  { %v22962_v26 = vpop.f32.mrf.mxu1 }
 0x76a   :  { %v14276_v57 = vpop.f32.mrf.mxu0 }
 0x76b   :  { %v22964_v23 = vpop.f32.mrf.mxu1 }
 0x76d   :  { %v22966_v25 = vpop.f32.mrf.mxu1 }
 0x76f   :  { %v22968_v54 = vpop.f32.mrf.mxu1 }
 0x771   :  { %v14346_v50 = vpop.f32.mrf.mxu1 }
 0x772   :  { %v14262_v50 = vadd.f32 %v14261_v31, %v22944_v11 }
 0x773   :  { %v14347_v2 = vpop.f32.mrf.mxu1 }
 0x774   :  { %v14333_v4 = vadd.f32 %v14332_v36, %v14262_v50 }
 0x78d   :  { %v14383_v1 = vpop.f32.mrf.mxu0 }
 0x78e   :  { %v14384_v63 = vadd.f32 %v14383_v1, %v14313_v53  ;;  %v14266_v1 = vadd.f32 %v14265_v0, %v22948_v27  ;;  %v14268_v0 = vadd.f32 %v22956_v48, %v22950_v52  ;;  %v14274_v48 = vadd.f32 %v22960_v12, %v22954_v29 }
 0x78f   :  { %v14385_v55 = vpop.f32.mrf.mxu0 }
 0x790   :  { %v14386_v33 = vadd.f32 %v14385_v55, %v14315_v16  ;;  %v14420_v47 = vmax.f32 %v14384_v63, 0.0  ;;  %v14335_v16 = vadd.f32 %v14334_v46, %v14264_v10  ;;  %v14337_v45 = vadd.f32 %v22962_v26, %v14266_v1 }
 0x791   :  { %v14387_v17 = vpop.f32.mrf.mxu0  ;;  %v14272_v63 = vadd.f32 %v22958_v8, %v22952_v21  ;;  %v14339_v19 = vadd.f32 %v22964_v23, %v14268_v0 }
 0x792   :  { %v14421_v5 = vmax.f32 %v14386_v33, 0.0  ;;  %v14388_v38 = vadd.f32 %v14387_v17, %v14317_v13 }
 0x793   :  { %v14389_v7 = vpop.f32.mrf.mxu0  ;;  %v14343_v8 = vadd.f32 %v22966_v25, %v14272_v63 }
 0x794   :  { %v16600_v6 = vpack.c.bf16 %v14421_v5, %v14420_v47  ;;  %v14390_v44 = vadd.f32 %v14389_v7, %v14319_v62  ;;  %v14422_v60 = vmax.f32 %v14388_v38, 0.0 }
 0x795   :  { %v14393_v35 = vpop.f32.mrf.mxu0 }
 0x796   :  { %14478 = vst [vmem:[#allocation2] sm:$0xff] %v16600_v6  ;;  %v14423_v15 = vmax.f32 %v14390_v44, 0.0  ;;  %v14394_v42 = vadd.f32 %v14393_v35, %v14323_v39  ;;  %v14345_v39 = vadd.f32 %v22968_v54, %v14274_v48 }
 0x797   :  { %v14395_v37 = vpop.f32.mrf.mxu0 }
 0x798   :  { %v16601_v51 = vpack.c.bf16 %v14423_v15, %v14422_v60  ;;  %v14396_v57 = vadd.f32 %v14395_v37, %v14325_v22  ;;  %v14424_v24 = vmax.f32 %v14394_v42, 0.0 }
 0x799   :  { %v14397_v14 = vpop.f32.mrf.mxu0 }
 0x79a   :  { %14479 = vst [vmem:[#allocation2 + $0x8] sm:$0xff] %v16601_v51  ;;  %v14425_v2 = vmax.f32 %v14396_v57, 0.0  ;;  %v14398_v49 = vadd.f32 %v14397_v14, %v14327_v58  ;;  %v14484_v57 = vld [vmem:[#allocation2 + $0x30] sm:$0x11] }
 0x79b   :  { %v14399_v43 = vpop.f32.mrf.mxu0 }
 0x79c   :  { %v16602_v9 = vpack.c.bf16 %v14425_v2, %v14424_v24  ;;  %v14400_v53 = vadd.f32 %v14399_v43, %v14329_v34  ;;  %v14426_v11 = vmax.f32 %v14398_v49, 0.0 }
 0x79d   :  { %v14487_v41 = vld [vmem:[#allocation2] sm:$0xf]  ;;  %v14638_v61 = vld [vmem:[#allocation2 + $0x4] sm:$0xf]  ;;  %v14403_v56 = vpop.f32.mrf.mxu0 }
 0x79e   :  { %v14548_v59 = vld [vmem:[#allocation2] sm:$0xf]  ;;  %14494 = vst.msk [vmem:[%s23295_s4] sm:$0xf] %vm331_vm2, %v14487_v41  ;;  %16417 = vst.msk [vmem:[%s23295_s4 + $0x70] sm:$0xf] %vm331_vm2, %v14638_v61  ;;  %v14404_v31 = vadd.f32 %v14403_v56, %v14333_v4 }
 0x79f   :  { %14480 = vst [vmem:[#allocation2 + $0x10] sm:$0xff] %v16602_v9  ;;  %v14427_v18 = vmax.f32 %v14400_v53, 0.0  ;;  %14562 = vrot.lane.b32.xlu1 %v14548_v59, %s18412_s13  ;;  %v14503_v27 = vld [vmem:[#allocation2] sm:$0xf]  ;;  %v14405_v3 = vpop.f32.mrf.mxu0  ;;  %v14655_v35 = vld [vmem:[#allocation2 + $0x4] sm:$0xf] }
 0x7a0   :  { %14517 = vrot.lane.b32.xlu0 %v14503_v27, %s18413_s16  ;;  %v14406_v46 = vadd.f32 %v14405_v3, %v14335_v16  ;;  %v14428_v17 = vmax.f32 %v14404_v31, 0.0  ;;  %v14593_v52 = vld [vmem:[#allocation2] sm:$0xf]  ;;  %v14700_v32 = vld [vmem:[#allocation2 + $0x4] sm:$0xf] }
 0x7a1   :  { %v16603_v36 = vpack.c.bf16 %v14427_v18, %v14426_v11  ;;  %v14407_v55 = vpop.f32.mrf.mxu0  ;;  %v14488_v28 = vld [vmem:[#allocation2 + $0x8] sm:$0xf]  ;;  %v14639_v33 = vld [vmem:[#allocation2 + $0xc] sm:$0xf]  ;;  %v14745_v2 = vld [vmem:[#allocation2 + $0x4] sm:$0xf] }
 0x7a2   :  { %v14504_v13 = vld [vmem:[#allocation2 + $0x8] sm:$0xf]  ;;  %v14429_v62 = vmax.f32 %v14406_v46, 0.0  ;;  %v14408_v47 = vadd.f32 %v14407_v55, %v14337_v45  ;;  %14495 = vst.msk [vmem:[%s23295_s4 + $0x4] sm:$0xf] %vm331_vm2, %v14488_v28 }
 0x7a3   :  { %14481 = vst [vmem:[#allocation2 + $0x18] sm:$0xff] %v16603_v36  ;;  %16418 = vst.msk [vmem:[%s23295_s4 + $0x74] sm:$0xf] %vm331_vm2, %v14639_v33  ;;  %14519 = vrot.lane.b32.xlu1 %v14504_v13, %s18413_s16  ;;  %v14409_v21 = vpop.f32.mrf.mxu0  ;;  %v14594_v38 = vld [vmem:[#allocation2 + $0x8] sm:$0xf] }
 0x7a4   :  { %14607 = vrot.lane.b32.xlu0 %v14593_v52, %s18414_s19  ;;  %v16604_v26 = vpack.c.bf16 %v14429_v62, %v14428_v17  ;;  %v14410_v23 = vadd.f32 %v14409_v21, %v14339_v19  ;;  %v14430_v6 = vmax.f32 %v14408_v47, 0.0  ;;  %v14656_v22 = vld [vmem:[#allocation2 + $0xc] sm:$0xf]  ;;  %v14549_v10 = vld [vmem:[#allocation2 + $0x8] sm:$0xf] }
 0x7a5   :  { %v14413_v5 = vpop.f32.mrf.mxu0  ;;  %v14701_v50 = vld [vmem:[#allocation2 + $0xc] sm:$0xf]  ;;  %v14500_v4 = vld [vmem:[%s23295_s4 + $0x18] sm:$0x1]  ;;  %v16423_v9 = vld [vmem:[%s23295_s4 + $0x88] sm:$0x1] }
 0x7a6   :  { %v14489_v7 = vld [vmem:[#allocation2 + $0x10] sm:$0xf]  ;;  %v14640_v20 = vld [vmem:[#allocation2 + $0x14] sm:$0xf]  ;;  %14482 = vst [vmem:[#allocation2 + $0x20] sm:$0xff] %v16604_v26  ;;  %v14431_v44 = vmax.f32 %v14410_v23, 0.0  ;;  %v14414_v40 = vadd.f32 %v14413_v5, %v14343_v8 }
 0x7a7   :  { %14609 = vrot.lane.b32.xlu1 %v14594_v38, %s18414_s19  ;;  %14496 = vst.msk [vmem:[%s23295_s4 + $0x8] sm:$0xf] %vm331_vm2, %v14489_v7  ;;  %16419 = vst.msk [vmem:[%s23295_s4 + $0x78] sm:$0xf] %vm331_vm2, %v14640_v20  ;;  %v14415_v29 = vpop.f32.mrf.mxu0  ;;  %v14746_v49 = vld [vmem:[#allocation2 + $0xc] sm:$0xf] }
 0x7a8   :  { %14669 = vrot.lane.b32.xlu0 %v14655_v35, %s18413_s16  ;;  %v16605_v12 = vpack.c.bf16 %v14431_v44, %v14430_v6  ;;  %v14416_v25 = vadd.f32 %v14415_v29, %v14345_v39  ;;  %v14432_v42 = vmax.f32 %v14414_v40, 0.0  ;;  %v14550_v53 = vld [vmem:[#allocation2 + $0x10] sm:$0xf]  ;;  %v14657_v27 = vld [vmem:[#allocation2 + $0x14] sm:$0xf] }
 0x7a9   :  { %v14417_v54 = vpop.f32.mrf.mxu0  ;;  %v14505_v1 = vld [vmem:[#allocation2 + $0x10] sm:$0xf]  ;;  %v14702_v0 = vld [vmem:[#allocation2 + $0x14] sm:$0xf] }
 0x7aa   :  { %v14490_v60 = vld [vmem:[#allocation2 + $0x18] sm:$0xf]  ;;  %v14641_v15 = vld [vmem:[#allocation2 + $0x1c] sm:$0xf]  ;;  %14483 = vst [vmem:[#allocation2 + $0x28] sm:$0xff] %v16605_v12  ;;  %v14433_v37 = vmax.f32 %v14416_v25, 0.0 }
 0x7ab   :  { %14671 = vrot.lane.b32.xlu1 %v14656_v22, %s18413_s16  ;;  %14497 = vst.msk [vmem:[%s23295_s4 + $0xc] sm:$0xf] %vm331_vm2, %v14490_v60  ;;  %16420 = vst.msk [vmem:[%s23295_s4 + $0x7c] sm:$0xf] %vm331_vm2, %v14641_v15  ;;  %v14418_v58 = vpop.f32.mrf.mxu0  ;;  %v14506_v11 = vld [vmem:[#allocation2 + $0x18] sm:$0xf] }
 0x7ac   :  { %14714 = vrot.lane.b32.xlu0 %v14700_v32, %s18412_s13  ;;  %v16606_v51 = vpack.c.bf16 %v14433_v37, %v14432_v42  ;;  %v14595_v18 = vld [vmem:[#allocation2 + $0x10] sm:$0xf]  ;;  %v14596_v31 = vld [vmem:[#allocation2 + $0x18] sm:$0xf]  ;;  %v14658_v3 = vld [vmem:[#allocation2 + $0x1c] sm:$0xf] }
 0x7ad   :  { %v14491_v14 = vld [vmem:[#allocation2 + $0x20] sm:$0xf]  ;;  %v14642_v34 = vld [vmem:[#allocation2 + $0x24] sm:$0xf]  ;;  %v14703_v45 = vld [vmem:[#allocation2 + $0x1c] sm:$0xf] }
 0x7ae   :  { %v14485_v24 = vsel %vm19740_vm12, %v16606_v51, %v14484_v57  ;;  %14498 = vst.msk [vmem:[%s23295_s4 + $0x10] sm:$0xf] %vm331_vm2, %v14491_v14  ;;  %16421 = vst.msk [vmem:[%s23295_s4 + $0x80] sm:$0xf] %vm331_vm2, %v14642_v34  ;;  %v14747_v36 = vld [vmem:[#allocation2 + $0x14] sm:$0xf] }
 0x7af   :  { %14716 = vrot.lane.b32.xlu1 %v14701_v50, %s18412_s13  ;;  %14486 = vst [vmem:[#allocation2 + $0x30] sm:$0x11] %v14485_v24  ;;  %v14748_v46 = vld [vmem:[#allocation2 + $0x1c] sm:$0xf]  ;;  %v14551_v63 = vld [vmem:[#allocation2 + $0x18] sm:$0xf] }
 0x7b0   :  { %14759 = vrot.lane.b32.xlu0 %v14745_v2, %s18414_s19  ;;  %v14552_v55 = vld [vmem:[#allocation2 + $0x20] sm:$0xf]  ;;  %v14659_v17 = vld [vmem:[#allocation2 + $0x24] sm:$0xf] }
 0x7b1   :  { %v14492_v43 = vld [vmem:[#allocation2 + $0x28] sm:$0xf]  ;;  %v14643_v30 = vld [vmem:[#allocation2 + $0x2c] sm:$0xf]  ;;  %v14507_v28 = vld [vmem:[#allocation2 + $0x20] sm:$0xf] }
 0x7b2   :  { %14499 = vst.msk [vmem:[%s23295_s4 + $0x14] sm:$0xf] %vm331_vm2, %v14492_v43  ;;  %16422 = vst.msk [vmem:[%s23295_s4 + $0x84] sm:$0xf] %vm331_vm2, %v14643_v30  ;;  %v14508_v13 = vld [vmem:[#allocation2 + $0x28] sm:$0xf] }
 0x7b3   :  { %14761 = vrot.lane.b32.xlu1 %v14746_v49, %s18414_s19  ;;  %v14597_v33 = vld [vmem:[#allocation2 + $0x20] sm:$0xf]  ;;  %v14598_v19 = vld [vmem:[#allocation2 + $0x28] sm:$0xf]  ;;  %v14660_v62 = vld [vmem:[#allocation2 + $0x2c] sm:$0xf] }
 0x7b4   :  { %14564 = vrot.lane.b32.xlu0 %v14549_v10, %s18412_s13  ;;  %v14704_v47 = vld [vmem:[#allocation2 + $0x24] sm:$0xf]  ;;  %v14705_v52 = vld [vmem:[#allocation2 + $0x2c] sm:$0xf]  ;;  %v14553_v21 = vld [vmem:[#allocation2 + $0x28] sm:$0xf] }
 0x7b5   :  { %v14750_v7 = vld [vmem:[#allocation2 + $0x2c] sm:$0xf]  ;;  %v14749_v20 = vld [vmem:[#allocation2 + $0x24] sm:$0xf] }
 0x7b6   :  { %v14493_v41 = vld [vmem:[#allocation2 + $0x30] sm:$0x1]  ;;  %v14644_v61 = vld [vmem:[#allocation2 + $0x34] sm:$0x1] }
 0x7b7   :  { %14566 = vrot.lane.b32.xlu1 %v14550_v53, %s18412_s13  ;;  %v14501_v59 = vsel %vm18850_vm5, %v14493_v41, %v14500_v4  ;;  %v14653_v16 = vsel %vm18850_vm5, %v14644_v61, %v16423_v9  ;;  %v14554_v48 = vld [vmem:[#allocation2 + $0x30] sm:$0x1]  ;;  %v14661_v26 = vld [vmem:[#allocation2 + $0x34] sm:$0x1] }
 0x7b8   :  { %14521 = vrot.lane.b32.xlu0 %v14505_v1, %s18413_s16  ;;  %14502 = vst [vmem:[%s23295_s4 + $0x18] sm:$0x1] %v14501_v59  ;;  %16424 = vst [vmem:[%s23295_s4 + $0x88] sm:$0x1] %v14653_v16  ;;  %v14509_v8 = vld [vmem:[#allocation2 + $0x30] sm:$0x1] }
 0x7b9   :  { %v14599_v23 = vld [vmem:[#allocation2 + $0x30] sm:$0x1]  ;;  %v14751_v5 = vld [vmem:[#allocation2 + $0x34] sm:$0x1] }
 0x7ba   :  { %v14706_v38 = vld [vmem:[#allocation2 + $0x34] sm:$0x1]  ;;  %v16407_v16 = vld [vmem:[%s23295_s4 + $0x50] sm:$0x1] }
 0x7bb   :  { %14523 = vrot.lane.b32.xlu1 %v14506_v11, %s18413_s16  ;;  %v16399_v11 = vld [vmem:[%s23295_s4 + $0x34] sm:$0x1] }
 0x7bc   :  { %14611 = vrot.lane.b32.xlu0 %v14595_v18, %s18414_s19 }
 0x7bf   :  { %14613 = vrot.lane.b32.xlu1 %v14596_v31, %s18414_s19 }
 0x7c0   :  { %14673 = vrot.lane.b32.xlu0 %v14657_v27, %s18413_s16 }
 0x7c3   :  { %14675 = vrot.lane.b32.xlu1 %v14658_v3, %s18413_s16 }
 0x7c4   :  { %14718 = vrot.lane.b32.xlu0 %v14702_v0, %s18412_s13  ;;  %v16431_v0 = vld [vmem:[%s23295_s4 + $0xa4] sm:$0x1] }
 0x7c7   :  { %14720 = vrot.lane.b32.xlu1 %v14703_v45, %s18412_s13  ;;  %v16415_v45 = vld [vmem:[%s23295_s4 + $0x6c] sm:$0x1] }
 0x7c8   :  { %14763 = vrot.lane.b32.xlu0 %v14747_v36, %s18414_s19 }
 0x7cb   :  { %14765 = vrot.lane.b32.xlu1 %v14748_v46, %s18414_s19 }
 0x7cc   :  { %14568 = vrot.lane.b32.xlu0 %v14551_v63, %s18412_s13 }
 0x7cf   :  { %14570 = vrot.lane.b32.xlu1 %v14552_v55, %s18412_s13 }
 0x7d0   :  { %14525 = vrot.lane.b32.xlu0 %v14507_v28, %s18413_s16  ;;  %v16447_v28 = vld [vmem:[%s23295_s4 + $0xdc] sm:$0x1] }
 0x7d3   :  { %14527 = vrot.lane.b32.xlu1 %v14508_v13, %s18413_s16  ;;  %v16439_v13 = vld [vmem:[%s23295_s4 + $0xc0] sm:$0x1] }
 0x7d4   :  { %14615 = vrot.lane.b32.xlu0 %v14597_v33, %s18414_s19 }
 0x7d7   :  { %14617 = vrot.lane.b32.xlu1 %v14598_v19, %s18414_s19 }
 0x7d8   :  { %14677 = vrot.lane.b32.xlu0 %v14659_v17, %s18413_s16 }
 0x7db   :  { %14679 = vrot.lane.b32.xlu1 %v14660_v62, %s18413_s16 }
 0x7dc   :  { %14722 = vrot.lane.b32.xlu0 %v14704_v47, %s18412_s13 }
 0x7df   :  { %14724 = vrot.lane.b32.xlu1 %v14705_v52, %s18412_s13 }
 0x7e0   :  { %14572 = vrot.lane.b32.xlu0 %v14553_v21, %s18412_s13 }
 0x7e3   :  { %14574 = vrot.lane.b32.xlu1 %v14554_v48, %s18412_s13 }
 0x7e4   :  { %14529 = vrot.lane.b32.xlu0 %v14509_v8, %s18413_s16 }
 0x7e7   :  { %14681 = vrot.lane.b32.xlu1 %v14661_v26, %s18413_s16 }
 0x7e8   :  { %14619 = vrot.lane.b32.xlu0 %v14599_v23, %s18414_s19 }
 0x7eb   :  { %14771 = vrot.lane.b32.xlu1 %v14751_v5, %s18414_s19 }
 0x7ec   :  { %14726 = vrot.lane.b32.xlu0 %v14706_v38, %s18412_s13 }
 0x7ef   :  { %14769 = vrot.lane.b32.xlu1 %v14750_v7, %s18414_s19 }
 0x7f0   :  { %14767 = vrot.lane.b32.xlu0 %v14749_v20, %s18414_s19 }
 0x811   :  { %v14563_v39 = vpop.permute.xlu1 %14562 }
 0x812   :  { %16401 = vst.msk [vmem:[%s23295_s4 + $0x38] sm:$0xf] %vm331_vm2, %v14563_v39  ;;  %v14518_v6 = vpop.permute.xlu0 %14517 }
 0x813   :  { %16393 = vst.msk [vmem:[%s23295_s4 + $0x1c] sm:$0xf] %vm331_vm2, %v14518_v6 }
 0x815   :  { %v14520_v44 = vpop.permute.xlu1 %14519 }
 0x816   :  { %16394 = vst.msk [vmem:[%s23295_s4 + $0x20] sm:$0xf] %vm331_vm2, %v14520_v44  ;;  %v14608_v40 = vpop.permute.xlu0 %14607 }
 0x817   :  { %16409 = vst.msk [vmem:[%s23295_s4 + $0x54] sm:$0xf] %vm331_vm2, %v14608_v40 }
 0x819   :  { %v14610_v35 = vpop.permute.xlu1 %14609 }
 0x81a   :  { %16410 = vst.msk [vmem:[%s23295_s4 + $0x58] sm:$0xf] %vm331_vm2, %v14610_v35  ;;  %v14670_v29 = vpop.permute.xlu0 %14669 }
 0x81b   :  { %16425 = vst.msk [vmem:[%s23295_s4 + $0x8c] sm:$0xf] %vm331_vm2, %v14670_v29 }
 0x81d   :  { %v14672_v12 = vpop.permute.xlu1 %14671 }
 0x81e   :  { %16426 = vst.msk [vmem:[%s23295_s4 + $0x90] sm:$0xf] %vm331_vm2, %v14672_v12  ;;  %v14715_v25 = vpop.permute.xlu0 %14714 }
 0x81f   :  { %16433 = vst.msk [vmem:[%s23295_s4 + $0xa8] sm:$0xf] %vm331_vm2, %v14715_v25 }
 0x821   :  { %v14717_v54 = vpop.permute.xlu1 %14716 }
 0x822   :  { %16434 = vst.msk [vmem:[%s23295_s4 + $0xac] sm:$0xf] %vm331_vm2, %v14717_v54  ;;  %v14760_v22 = vpop.permute.xlu0 %14759 }
 0x823   :  { %16441 = vst.msk [vmem:[%s23295_s4 + $0xc4] sm:$0xf] %vm331_vm2, %v14760_v22 }
 0x825   :  { %v14762_v60 = vpop.permute.xlu1 %14761 }
 0x826   :  { %16442 = vst.msk [vmem:[%s23295_s4 + $0xc8] sm:$0xf] %vm331_vm2, %v14762_v60  ;;  %v14565_v15 = vpop.permute.xlu0 %14564 }
 0x827   :  { %16402 = vst.msk [vmem:[%s23295_s4 + $0x3c] sm:$0xf] %vm331_vm2, %v14565_v15 }
 0x829   :  { %v14567_v42 = vpop.permute.xlu1 %14566 }
 0x82a   :  { %16403 = vst.msk [vmem:[%s23295_s4 + $0x40] sm:$0xf] %vm331_vm2, %v14567_v42  ;;  %v14522_v37 = vpop.permute.xlu0 %14521 }
 0x82b   :  { %16395 = vst.msk [vmem:[%s23295_s4 + $0x24] sm:$0xf] %vm331_vm2, %v14522_v37 }
 0x82d   :  { %v14524_v32 = vpop.permute.xlu1 %14523 }
 0x82e   :  { %16396 = vst.msk [vmem:[%s23295_s4 + $0x28] sm:$0xf] %vm331_vm2, %v14524_v32  ;;  %v14612_v58 = vpop.permute.xlu0 %14611 }
 0x82f   :  { %16411 = vst.msk [vmem:[%s23295_s4 + $0x5c] sm:$0xf] %vm331_vm2, %v14612_v58 }
 0x831   :  { %v14614_v51 = vpop.permute.xlu1 %14613 }
 0x832   :  { %16412 = vst.msk [vmem:[%s23295_s4 + $0x60] sm:$0xf] %vm331_vm2, %v14614_v51  ;;  %v14674_v57 = vpop.permute.xlu0 %14673 }
 0x833   :  { %16427 = vst.msk [vmem:[%s23295_s4 + $0x94] sm:$0xf] %vm331_vm2, %v14674_v57 }
 0x835   :  { %v14676_v50 = vpop.permute.xlu1 %14675 }
 0x836   :  { %16428 = vst.msk [vmem:[%s23295_s4 + $0x98] sm:$0xf] %vm331_vm2, %v14676_v50  ;;  %v14719_v14 = vpop.permute.xlu0 %14718 }
 0x837   :  { %16435 = vst.msk [vmem:[%s23295_s4 + $0xb0] sm:$0xf] %vm331_vm2, %v14719_v14 }
 0x839   :  { %v14721_v34 = vpop.permute.xlu1 %14720 }
 0x83a   :  { %16436 = vst.msk [vmem:[%s23295_s4 + $0xb4] sm:$0xf] %vm331_vm2, %v14721_v34  ;;  %v14764_v24 = vpop.permute.xlu0 %14763 }
 0x83b   :  { %16443 = vst.msk [vmem:[%s23295_s4 + $0xcc] sm:$0xf] %vm331_vm2, %v14764_v24 }
 0x83d   :  { %v14766_v2 = vpop.permute.xlu1 %14765 }
 0x83e   :  { %16444 = vst.msk [vmem:[%s23295_s4 + $0xd0] sm:$0xf] %vm331_vm2, %v14766_v2  ;;  %v14569_v49 = vpop.permute.xlu0 %14568 }
 0x83f   :  { %16404 = vst.msk [vmem:[%s23295_s4 + $0x44] sm:$0xf] %vm331_vm2, %v14569_v49 }
 0x841   :  { %v14571_v43 = vpop.permute.xlu1 %14570 }
 0x842   :  { %16405 = vst.msk [vmem:[%s23295_s4 + $0x48] sm:$0xf] %vm331_vm2, %v14571_v43  ;;  %v14526_v30 = vpop.permute.xlu0 %14525 }
 0x843   :  { %16397 = vst.msk [vmem:[%s23295_s4 + $0x2c] sm:$0xf] %vm331_vm2, %v14526_v30 }
 0x845   :  { %v14528_v10 = vpop.permute.xlu1 %14527 }
 0x846   :  { %16398 = vst.msk [vmem:[%s23295_s4 + $0x30] sm:$0xf] %vm331_vm2, %v14528_v10  ;;  %v14616_v4 = vpop.permute.xlu0 %14615 }
 0x847   :  { %16413 = vst.msk [vmem:[%s23295_s4 + $0x64] sm:$0xf] %vm331_vm2, %v14616_v4 }
 0x849   :  { %v14618_v9 = vpop.permute.xlu1 %14617 }
 0x84a   :  { %16414 = vst.msk [vmem:[%s23295_s4 + $0x68] sm:$0xf] %vm331_vm2, %v14618_v9  ;;  %v14678_v53 = vpop.permute.xlu0 %14677 }
 0x84b   :  { %16429 = vst.msk [vmem:[%s23295_s4 + $0x9c] sm:$0xf] %vm331_vm2, %v14678_v53 }
 0x84d   :  { %v14680_v1 = vpop.permute.xlu1 %14679 }
 0x84e   :  { %16430 = vst.msk [vmem:[%s23295_s4 + $0xa0] sm:$0xf] %vm331_vm2, %v14680_v1  ;;  %v14723_v41 = vpop.permute.xlu0 %14722 }
 0x84f   :  { %16437 = vst.msk [vmem:[%s23295_s4 + $0xb8] sm:$0xf] %vm331_vm2, %v14723_v41 }
 0x851   :  { %v14725_v61 = vpop.permute.xlu1 %14724 }
 0x852   :  { %16438 = vst.msk [vmem:[%s23295_s4 + $0xbc] sm:$0xf] %vm331_vm2, %v14725_v61  ;;  %v14573_v59 = vpop.permute.xlu0 %14572 }
 0x853   :  { %16406 = vst.msk [vmem:[%s23295_s4 + $0x4c] sm:$0xf] %vm331_vm2, %v14573_v59 }
 0x855   :  { %v14575_v18 = vpop.permute.xlu1 %14574 }
 0x856   :  { %v14591_v31 = vsel %vm18850_vm5, %v14575_v18, %v16407_v16  ;;  %v14530_v27 = vpop.permute.xlu0 %14529 }
 0x857   :  { %16408 = vst [vmem:[%s23295_s4 + $0x50] sm:$0x1] %v14591_v31  ;;  %v14546_v3 = vsel %vm18850_vm5, %v14530_v27, %v16399_v11 }
 0x858   :  { %16400 = vst [vmem:[%s23295_s4 + $0x34] sm:$0x1] %v14546_v3 }
 0x859   :  { %v14682_v36 = vpop.permute.xlu1 %14681 }
 0x85a   :  { %v14698_v46 = vsel %vm18850_vm5, %v14682_v36, %v16431_v0  ;;  %v14620_v63 = vpop.permute.xlu0 %14619 }
 0x85b   :  { %16432 = vst [vmem:[%s23295_s4 + $0xa4] sm:$0x1] %v14698_v46  ;;  %v14636_v55 = vsel %vm18850_vm5, %v14620_v63, %v16415_v45 }
 0x85c   :  { %16416 = vst [vmem:[%s23295_s4 + $0x6c] sm:$0x1] %v14636_v55 }
 0x85d   :  { %v14772_v33 = vpop.permute.xlu1 %14771 }
 0x85e   :  { %v14788_v19 = vsel %vm18850_vm5, %v14772_v33, %v16447_v28  ;;  %v14727_v17 = vpop.permute.xlu0 %14726 }
 0x85f   :  { %16448 = vst [vmem:[%s23295_s4 + $0xdc] sm:$0x1] %v14788_v19  ;;  %v14743_v62 = vsel %vm18850_vm5, %v14727_v17, %v16439_v13 }
 0x860   :  { %16440 = vst [vmem:[%s23295_s4 + $0xc0] sm:$0x1] %v14743_v62 }
 0x861   :  { %v14770_v47 = vpop.permute.xlu1 %14769 }
 0x862   :  { %16446 = vst.msk [vmem:[%s23295_s4 + $0xd8] sm:$0xf] %vm331_vm2, %v14770_v47  ;;  %v14768_v52 = vpop.permute.xlu0 %14767 }
 0x863   :  { %16445 = vst.msk [vmem:[%s23295_s4 + $0xd4] sm:$0xf] %vm331_vm2, %v14768_v52 }
 0x864   :  { %14794 = vsyncpa [#allocation5], 1 }
 0x865   :  { %14795 = vsyncpa [#allocation7], 1 }

</bundles_post_ra>
